<compile_context>
chip_gen: v5e
topology: v5e:2x2
jax: 0.10.0
libtpu: 0.0.40
codegen_flags: <defaults>
</compile_context>

<pallas_src>
import jax
import jax.numpy as jnp
from jax import lax
from jax.experimental import pallas as pl
from jax.experimental.pallas import tpu as pltpu

HIDDEN = 200          # logical LSTM hidden size
HP = 256              # padded hidden size (lane-tile aligned)
IN_LSTM = 32          # LSTM input size
IN_ACT = 20           # actions feature size
FC0_OUT = 48
MID_OUT = 124
FC1_OUT = 40
LN_EPS = 1e-5
GP = 4 * HP           # padded gate width (1024)


def _sigmoid(x):
    # Single EUP tanh instead of exp + divide.
    return 0.5 * jnp.tanh(0.5 * x) + 0.5


def classifier_lstm_kernel(
    x_ref,        # (T*B, 32)     bf16 tactiles, time-major rows (t*B + b)
    act_ref,      # (B, 20)       f32
    wih_ref,      # (32, 1024)    bf16 padded LSTM W_ih^T
    whh_hbm_ref,  # (256, 1024)   bf16 padded LSTM W_hh^T  (HBM / pl.ANY)
    blstm_ref,    # (1, 1024)     f32 padded b_ih + b_hh
    w0_ref,       # (20, 48)
    b0_ref,       # (1, 48)
    wmid_h_ref,   # (256, 124)    fcmid^T rows for lstm_out[-1] (row-padded)
    wmid_a_ref,   # (48, 124)     fcmid^T rows for fc0(actions)
    bmid_ref,     # (1, 124)
    gamma_ref,    # (1, 124)
    beta_ref,     # (1, 124)
    w1_ref,       # (124, 40)
    b1_ref,       # (1, 40)
    w2_ref,       # (40, 1)
    b2_ref,       # (1, 1)
    out_ref,      # (B, 1)
    xw_scr,       # VMEM (T*B, 1024) f32 : hoisted input projection
    whh_vmem,     # VMEM (256, 1024) bf16 : W_hh staged on-chip
    whh_sem,      # DMA semaphore
):
    TB = x_ref.shape[0]
    B = act_ref.shape[0]
    T = TB // B

    # Start the W_hh HBM->VMEM copy; overlap it with the input projection
    # and fc0(actions) below (grid-free call => no automatic pipelining).
    whh_copy = pltpu.make_async_copy(whh_hbm_ref, whh_vmem, whh_sem)
    whh_copy.start()

    # Hoisted input projection: one batched bf16 matmul for all timesteps,
    # f32 accumulation + f32 bias.
    xw_scr[...] = (
        jnp.dot(x_ref[...], wih_ref[...], preferred_element_type=jnp.float32)
        + blstm_ref[...]
    )

    # fc0(actions) — independent of the recurrence, also runs under the DMA.
    out0 = (
        jnp.dot(act_ref[...], w0_ref[...], preferred_element_type=jnp.float32)
        + b0_ref[...]
    )  # (B, 48)

    whh_copy.wait()

    def step(t, carry):
        h, c = carry
        row = pl.multiple_of(t * B, B)
        xw = xw_scr[pl.ds(row, B), :]            # (B, 1024) f32
        hb = h.astype(jnp.bfloat16)              # round once per step (MXU input)

        def gate_pre(k):
            # Per-gate (256,256) dot so weights stream per gate and the EUP
            # nonlinearity of gate k hides under gate k+1's MXU pushes.
            return xw[:, k * HP:(k + 1) * HP] + jnp.dot(
                hb, whh_vmem[:, k * HP:(k + 1) * HP],
                preferred_element_type=jnp.float32,
            )

        # PyTorch gate order i, f, g, o (each HP-wide, 256-aligned).
        i_g = _sigmoid(gate_pre(0))
        f_g = _sigmoid(gate_pre(1))
        g_g = jnp.tanh(gate_pre(2))
        o_g = _sigmoid(gate_pre(3))

        c = f_g * c + i_g * g_g
        h = o_g * jnp.tanh(c)
        return (h, c)

    h0 = jnp.zeros((B, HP), jnp.float32)
    c0 = jnp.zeros((B, HP), jnp.float32)
    h, _ = lax.fori_loop(0, T, step, (h0, c0), unroll=True)

    # ---- MLP head (runs once, f32) ----
    # fcmid(cat(lstm_out[-1], out0)) as split matmul (avoids lane concat);
    # padded h lanes are exactly 0 and padded wmid_h rows are 0.
    mid = (
        jnp.dot(h, wmid_h_ref[...], preferred_element_type=jnp.float32)
        + jnp.dot(out0, wmid_a_ref[...], preferred_element_type=jnp.float32)
        + bmid_ref[...]
    )  # (B, 124)

    # LayerNorm(124)
    mu = jnp.mean(mid, axis=1, keepdims=True)
    var = jnp.mean((mid - mu) ** 2, axis=1, keepdims=True)
    ln = (mid - mu) * lax.rsqrt(var + LN_EPS) * gamma_ref[...] + beta_ref[...]

    # fc1 + ReLU
    fc1 = jnp.maximum(
        jnp.dot(ln, w1_ref[...], preferred_element_type=jnp.float32) + b1_ref[...],
        0.0,
    )  # (B, 40)

    # dropout(p=0.5) is identity at inference time.
    # fc2 + Tanh
    fc2 = jnp.tanh(
        jnp.dot(fc1, w2_ref[...], preferred_element_type=jnp.float32) + b2_ref[...]
    )  # (B, 1)

    out_ref[...] = fc2.astype(out_ref.dtype)


def prepare_params(p):
    """One-time (off the hot path) padding + bf16 casts of the LSTM weights."""
    pad_n = HP - HIDDEN

    def pad_gate_cols(w):  # (..., 4*HIDDEN) -> (..., 4*HP), per-gate zero pad
        parts = []
        for k in range(4):
            g = w[..., k * HIDDEN:(k + 1) * HIDDEN]
            parts.append(jnp.pad(g, [(0, 0)] * (w.ndim - 1) + [(0, pad_n)]))
        return jnp.concatenate(parts, axis=-1)

    prepared = dict(p)
    prepared["wih_t"] = pad_gate_cols(p["wih_t"]).astype(jnp.bfloat16)          # (32,1024)
    prepared["whh_t"] = pad_gate_cols(
        jnp.pad(p["whh_t"], ((0, pad_n), (0, 0)))
    ).astype(jnp.bfloat16)                                                       # (256,1024)
    prepared["b_lstm"] = pad_gate_cols(p["b_lstm"])                              # (1,1024) f32
    prepared["wmid_h_t"] = jnp.pad(p["wmid_h_t"], ((0, pad_n), (0, 0)))          # (256,124) f32
    return prepared


def classifier_lstm_forward(tactiles, actions, prepared):
    """tactiles: (T, B, 32) f32, actions: (B, 20) f32 -> (B, 1) f32."""
    T, B, _ = tactiles.shape
    Bp = max(8, ((B + 7) // 8) * 8)          # pad batch to full sublane count

    tac_p = jnp.pad(tactiles, ((0, 0), (0, Bp - B), (0, 0)))
    act_p = jnp.pad(actions, ((0, Bp - B), (0, 0)))
    x2d = tac_p.reshape(T * Bp, IN_LSTM).astype(jnp.bfloat16)   # row t*Bp + b

    operands = (
        x2d, act_p,
        prepared["wih_t"], prepared["whh_t"], prepared["b_lstm"],
        prepared["w0_t"], prepared["b0"],
        prepared["wmid_h_t"], prepared["wmid_a_t"], prepared["bmid"],
        prepared["ln_gamma"], prepared["ln_beta"],
        prepared["w1_t"], prepared["b1"],
        prepared["w2_t"], prepared["b2"],
    )

    vmem = pl.BlockSpec(memory_space=pltpu.MemorySpace.VMEM)
    in_specs = [vmem, vmem, vmem, pl.BlockSpec(memory_space=pl.ANY)] + [vmem] * 12

    flops = (
        2 * T * Bp * IN_LSTM * GP                     # hoisted input projection
        + 2 * T * Bp * HP * GP                        # recurrence h @ W_hh
        + 2 * Bp * IN_ACT * FC0_OUT                   # fc0
        + 2 * Bp * (HP + FC0_OUT) * MID_OUT           # fcmid (split)
        + 2 * Bp * MID_OUT * FC1_OUT                  # fc1
        + 2 * Bp * FC1_OUT                            # fc2
    )
    transcendentals = T * Bp * 5 * HP + 2 * Bp
    bytes_accessed = sum(int(a.size) * a.dtype.itemsize for a in operands) + Bp * 4

    out = pl.pallas_call(
        classifier_lstm_kernel,
        out_shape=jax.ShapeDtypeStruct((Bp, 1), jnp.float32),
        in_specs=in_specs,
        out_specs=pl.BlockSpec(memory_space=pltpu.MemorySpace.VMEM),
        scratch_shapes=[
            pltpu.VMEM((T * Bp, GP), jnp.float32),    # xw_scr
            pltpu.VMEM((HP, GP), jnp.bfloat16),       # W_hh staged on-chip
            pltpu.SemaphoreType.DMA(()),
        ],
        compiler_params=pltpu.CompilerParams(vmem_limit_bytes=32 * 1024 * 1024),
        cost_estimate=pl.CostEstimate(
            flops=flops,
            transcendentals=transcendentals,
            bytes_accessed=bytes_accessed,
        ),
    )(*operands)
    return out[:B]


def make_params(key):
    """Deterministic synthetic parameters with the nn.Module's shapes."""
    ks = jax.random.split(key, 14)
    n = lambda k, shape, s=0.1: (s * jax.random.normal(k, shape)).astype(jnp.float32)

    w_ih = n(ks[0], (4 * HIDDEN, IN_LSTM))     # PyTorch layout (4H, in)
    w_hh = n(ks[1], (4 * HIDDEN, HIDDEN))
    b_ih = n(ks[2], (4 * HIDDEN,))
    b_hh = n(ks[3], (4 * HIDDEN,))
    w0 = n(ks[4], (FC0_OUT, IN_ACT))
    b0 = n(ks[5], (FC0_OUT,))
    wmid = n(ks[6], (MID_OUT, HIDDEN + FC0_OUT))
    bmid = n(ks[7], (MID_OUT,))
    w1 = n(ks[8], (FC1_OUT, MID_OUT))
    b1 = n(ks[9], (FC1_OUT,))
    w2 = n(ks[10], (1, FC1_OUT))
    b2 = n(ks[11], (1,))
    gamma = 1.0 + n(ks[12], (MID_OUT,))
    beta = n(ks[13], (MID_OUT,))

    wmid_t = wmid.T  # (248, 124)
    return dict(
        wih_t=w_ih.T,                              # (32, 800)
        whh_t=w_hh.T,                              # (200, 800)
        b_lstm=(b_ih + b_hh).reshape(1, -1),       # (1, 800)
        w0_t=w0.T, b0=b0.reshape(1, -1),
        wmid_h_t=wmid_t[:HIDDEN, :],               # (200, 124)
        wmid_a_t=wmid_t[HIDDEN:, :],               # (48, 124)
        bmid=bmid.reshape(1, -1),
        ln_gamma=gamma.reshape(1, -1),
        ln_beta=beta.reshape(1, -1),
        w1_t=w1.T, b1=b1.reshape(1, -1),
        w2_t=w2.T, b2=b2.reshape(1, -1),
    )


def reference_forward(tactiles, actions, p, lstm_matmul_dtype=jnp.float32):
    """Pure-JAX mirror of the PyTorch forward (eval mode), unpadded.

    lstm_matmul_dtype=jnp.bfloat16 reproduces the kernel's mixed-precision
    LSTM numerics (bf16 MXU operands, f32 accumulation) for a tight check.
    """
    T, B, _ = tactiles.shape
    dt = lstm_matmul_dtype
    wih = p["wih_t"].astype(dt)
    whh = p["whh_t"].astype(dt)
    h = jnp.zeros((B, HIDDEN), jnp.float32)
    c = jnp.zeros((B, HIDDEN), jnp.float32)
    for t in range(T):
        gates = (
            jnp.dot(tactiles[t].astype(dt), wih, preferred_element_type=jnp.float32)
            + jnp.dot(h.astype(dt), whh, preferred_element_type=jnp.float32)
            + p["b_lstm"]
        )
        i = jax.nn.sigmoid(gates[:, :HIDDEN])
        f = jax.nn.sigmoid(gates[:, HIDDEN:2 * HIDDEN])
        g = jnp.tanh(gates[:, 2 * HIDDEN:3 * HIDDEN])
        o = jax.nn.sigmoid(gates[:, 3 * HIDDEN:])
        c = f * c + i * g
        h = o * jnp.tanh(c)
    out0 = actions @ p["w0_t"] + p["b0"]
    mid = h @ p["wmid_h_t"] + out0 @ p["wmid_a_t"] + p["bmid"]
    mu = jnp.mean(mid, axis=1, keepdims=True)
    var = jnp.mean((mid - mu) ** 2, axis=1, keepdims=True)
    ln = (mid - mu) / jnp.sqrt(var + LN_EPS) * p["ln_gamma"] + p["ln_beta"]
    fc1 = jnp.maximum(ln @ p["w1_t"] + p["b1"], 0.0)
    return jnp.tanh(fc1 @ p["w2_t"] + p["b2"])


if __name__ == "__main__":
    key = jax.random.PRNGKey(0)
    k_par, k_tac, k_act = jax.random.split(key, 3)

    T, B = 8, 4  # context_frames (seq len) = 8, batch = 4
    tactiles = jax.random.normal(k_tac, (T, B, IN_LSTM), dtype=jnp.float32)
    actions = jax.random.normal(k_act, (B, IN_ACT), dtype=jnp.float32)
    params = make_params(k_par)

    prepared = prepare_params(params)            # one-time pad + bf16 cast
    forward = jax.jit(classifier_lstm_forward)   # per-call pads/reshape fuse

    out = forward(tactiles, actions, prepared)
    out = jax.block_until_ready(out)

    assert out.shape == (B, 1)
    assert bool(jnp.all(jnp.isfinite(out)))

    # Tight check against a reference that mirrors the kernel's mixed
    # precision (bf16 LSTM matmul operands, f32 accumulation / head).
    ref_mixed = reference_forward(tactiles, actions, params,
                                  lstm_matmul_dtype=jnp.bfloat16)
    assert jnp.allclose(out, ref_mixed, rtol=1e-3, atol=2e-4), (out, ref_mixed)

    # Loose check against the pure-f32 PyTorch-equivalent reference
    # (bf16 MXU operands in the recurrence introduce small deviations).
    ref_f32 = reference_forward(tactiles, actions, params)
    assert jnp.allclose(out, ref_f32, rtol=5e-2, atol=5e-2), (out, ref_f32)

    print("KERNEL_OK")
</pallas_src>

<mosaic_0001>
module attributes {stable_mosaic.version = 11 : i64} {
  func.func @classifier_lstm_kernel(%arg0: memref<64x32xbf16, #tpu.memory_space<vmem>>, %arg1: memref<8x20xf32, #tpu.memory_space<vmem>>, %arg2: memref<32x1024xbf16, #tpu.memory_space<vmem>>, %arg3: memref<256x1024xbf16, #tpu.memory_space<any>>, %arg4: memref<1x1024xf32, #tpu.memory_space<vmem>>, %arg5: memref<20x48xf32, #tpu.memory_space<vmem>>, %arg6: memref<1x48xf32, #tpu.memory_space<vmem>>, %arg7: memref<256x124xf32, #tpu.memory_space<vmem>>, %arg8: memref<48x124xf32, #tpu.memory_space<vmem>>, %arg9: memref<1x124xf32, #tpu.memory_space<vmem>>, %arg10: memref<1x124xf32, #tpu.memory_space<vmem>>, %arg11: memref<1x124xf32, #tpu.memory_space<vmem>>, %arg12: memref<124x40xf32, #tpu.memory_space<vmem>>, %arg13: memref<1x40xf32, #tpu.memory_space<vmem>>, %arg14: memref<40x1xf32, #tpu.memory_space<vmem>>, %arg15: memref<1x1xf32, #tpu.memory_space<vmem>>, %arg16: memref<8x1xf32, #tpu.memory_space<vmem>>, %arg17: memref<64x1024xf32, #tpu.memory_space<vmem>>, %arg18: memref<256x1024xbf16, #tpu.memory_space<vmem>>, %arg19: memref<!tpu.dma_semaphore, #tpu.memory_space<semaphore_mem>>) attributes {dimension_semantics = [], scalar_prefetch = 0 : i64, scratch_operands = 3 : i64, tpu.core_type = #tpu.core_type<tc>} {
    tpu.enqueue_dma source(%arg3 : memref<256x1024xbf16, #tpu.memory_space<any>>) target(%arg18 : memref<256x1024xbf16, #tpu.memory_space<vmem>>) target_semaphore(%arg19 : memref<!tpu.dma_semaphore, #tpu.memory_space<semaphore_mem>>)
    %c0 = arith.constant 0 : index
    %c0_0 = arith.constant 0 : index
    %0 = vector.load %arg0[%c0, %c0_0] : memref<64x32xbf16, #tpu.memory_space<vmem>>, vector<64x32xbf16>
    %c0_1 = arith.constant 0 : index
    %c0_2 = arith.constant 0 : index
    %1 = vector.load %arg2[%c0_1, %c0_2] : memref<32x1024xbf16, #tpu.memory_space<vmem>>, vector<32x1024xbf16>
    %cst = arith.constant dense<0.000000e+00> : vector<64x1024xf32>
    %2 = tpu.matmul %0, %1, %cst {dimension_numbers = #tpu.dot_dimension_numbers<[1], [0], [0], [1], [0, 0, 1, 1], [], []>} : vector<64x32xbf16>, vector<32x1024xbf16>, vector<64x1024xf32> -> vector<64x1024xf32>
    %c0_3 = arith.constant 0 : index
    %c0_4 = arith.constant 0 : index
    %3 = vector.load %arg4[%c0_3, %c0_4] : memref<1x1024xf32, #tpu.memory_space<vmem>>, vector<1x1024xf32>
    %4 = vector.broadcast %3 : vector<1x1024xf32> to vector<64x1024xf32>
    %5 = arith.addf %2, %4 : vector<64x1024xf32>
    %c0_5 = arith.constant 0 : index
    %c0_6 = arith.constant 0 : index
    %6 = vector.load %arg17[%c0_5, %c0_6] : memref<64x1024xf32, #tpu.memory_space<vmem>>, vector<64x1024xf32>
    tpu.vector_store %arg17[%c0_5, %c0_6], %5 {strides = array<i32>} : memref<64x1024xf32, #tpu.memory_space<vmem>>, vector<64x1024xf32>,
    %c0_7 = arith.constant 0 : index
    %c0_8 = arith.constant 0 : index
    %7 = vector.load %arg1[%c0_7, %c0_8] : memref<8x20xf32, #tpu.memory_space<vmem>>, vector<8x20xf32>
    %c0_9 = arith.constant 0 : index
    %c0_10 = arith.constant 0 : index
    %8 = vector.load %arg5[%c0_9, %c0_10] : memref<20x48xf32, #tpu.memory_space<vmem>>, vector<20x48xf32>
    %cst_11 = arith.constant dense<0.000000e+00> : vector<8x48xf32>
    %9 = tpu.matmul %7, %8, %cst_11 {dimension_numbers = #tpu.dot_dimension_numbers<[1], [0], [0], [1], [0, 0, 1, 1], [], []>} : vector<8x20xf32>, vector<20x48xf32>, vector<8x48xf32> -> vector<8x48xf32>
    %c0_12 = arith.constant 0 : index
    %c0_13 = arith.constant 0 : index
    %10 = vector.load %arg6[%c0_12, %c0_13] : memref<1x48xf32, #tpu.memory_space<vmem>>, vector<1x48xf32>
    %11 = vector.broadcast %10 : vector<1x48xf32> to vector<8x48xf32>
    %12 = arith.addf %9, %11 : vector<8x48xf32>
    tpu.wait_dma2 semaphore(%arg19 : memref<!tpu.dma_semaphore, #tpu.memory_space<semaphore_mem>>) src(%arg3 : memref<256x1024xbf16, #tpu.memory_space<any>>) dst(%arg18 : memref<256x1024xbf16, #tpu.memory_space<vmem>>)
    %cst_14 = arith.constant 0.000000e+00 : f32
    %13 = vector.broadcast %cst_14 : f32 to vector<8x256xf32>
    %cst_15 = arith.constant 0.000000e+00 : f32
    %14 = vector.broadcast %cst_15 : f32 to vector<8x256xf32>
    %c0_i32 = arith.constant 0 : i32
    %c8_i32 = arith.constant 8 : i32
    %15 = arith.muli %c0_i32, %c8_i32 : i32
    %16 = tpu.assume_multiple %15, 8 : i32
    %17 = arith.index_cast %16 : i32 to index
    %c0_16 = arith.constant 0 : index
    %18 = vector.load %arg17[%17, %c0_16] : memref<64x1024xf32, #tpu.memory_space<vmem>>, vector<8x1024xf32>
    %19 = arith.truncf %13 : vector<8x256xf32> to vector<8x256xbf16>
    %20 = vector.extract_strided_slice %18 {offsets = [0, 0], sizes = [8, 256], strides = [1, 1]} : vector<8x1024xf32> to vector<8x256xf32>
    %c0_17 = arith.constant 0 : index
    %c0_18 = arith.constant 0 : index
    %21 = vector.load %arg18[%c0_17, %c0_18] : memref<256x1024xbf16, #tpu.memory_space<vmem>>, vector<256x256xbf16>
    %cst_19 = arith.constant dense<0.000000e+00> : vector<8x256xf32>
    %22 = tpu.matmul %19, %21, %cst_19 {dimension_numbers = #tpu.dot_dimension_numbers<[1], [0], [0], [1], [0, 0, 1, 1], [], []>} : vector<8x256xbf16>, vector<256x256xbf16>, vector<8x256xf32> -> vector<8x256xf32>
    %23 = arith.addf %20, %22 : vector<8x256xf32>
    %cst_20 = arith.constant 5.000000e-01 : f32
    %24 = vector.broadcast %cst_20 : f32 to vector<8x256xf32>
    %25 = arith.mulf %24, %23 : vector<8x256xf32>
    %26 = math.tanh %25 : vector<8x256xf32>
    %cst_21 = arith.constant 5.000000e-01 : f32
    %27 = vector.broadcast %cst_21 : f32 to vector<8x256xf32>
    %28 = arith.mulf %27, %26 : vector<8x256xf32>
    %cst_22 = arith.constant 5.000000e-01 : f32
    %29 = vector.broadcast %cst_22 : f32 to vector<8x256xf32>
    %30 = arith.addf %28, %29 : vector<8x256xf32>
    %31 = vector.extract_strided_slice %18 {offsets = [0, 256], sizes = [8, 256], strides = [1, 1]} : vector<8x1024xf32> to vector<8x256xf32>
    %c0_23 = arith.constant 0 : index
    %c256 = arith.constant 256 : index
    %32 = vector.load %arg18[%c0_23, %c256] : memref<256x1024xbf16, #tpu.memory_space<vmem>>, vector<256x256xbf16>
    %cst_24 = arith.constant dense<0.000000e+00> : vector<8x256xf32>
    %33 = tpu.matmul %19, %32, %cst_24 {dimension_numbers = #tpu.dot_dimension_numbers<[1], [0], [0], [1], [0, 0, 1, 1], [], []>} : vector<8x256xbf16>, vector<256x256xbf16>, vector<8x256xf32> -> vector<8x256xf32>
    %34 = arith.addf %31, %33 : vector<8x256xf32>
    %cst_25 = arith.constant 5.000000e-01 : f32
    %35 = vector.broadcast %cst_25 : f32 to vector<8x256xf32>
    %36 = arith.mulf %35, %34 : vector<8x256xf32>
    %37 = math.tanh %36 : vector<8x256xf32>
    %cst_26 = arith.constant 5.000000e-01 : f32
    %38 = vector.broadcast %cst_26 : f32 to vector<8x256xf32>
    %39 = arith.mulf %38, %37 : vector<8x256xf32>
    %cst_27 = arith.constant 5.000000e-01 : f32
    %40 = vector.broadcast %cst_27 : f32 to vector<8x256xf32>
    %41 = arith.addf %39, %40 : vector<8x256xf32>
    %42 = vector.extract_strided_slice %18 {offsets = [0, 512], sizes = [8, 256], strides = [1, 1]} : vector<8x1024xf32> to vector<8x256xf32>
    %c0_28 = arith.constant 0 : index
    %c512 = arith.constant 512 : index
    %43 = vector.load %arg18[%c0_28, %c512] : memref<256x1024xbf16, #tpu.memory_space<vmem>>, vector<256x256xbf16>
    %cst_29 = arith.constant dense<0.000000e+00> : vector<8x256xf32>
    %44 = tpu.matmul %19, %43, %cst_29 {dimension_numbers = #tpu.dot_dimension_numbers<[1], [0], [0], [1], [0, 0, 1, 1], [], []>} : vector<8x256xbf16>, vector<256x256xbf16>, vector<8x256xf32> -> vector<8x256xf32>
    %45 = arith.addf %42, %44 : vector<8x256xf32>
    %46 = math.tanh %45 : vector<8x256xf32>
    %47 = vector.extract_strided_slice %18 {offsets = [0, 768], sizes = [8, 256], strides = [1, 1]} : vector<8x1024xf32> to vector<8x256xf32>
    %c0_30 = arith.constant 0 : index
    %c768 = arith.constant 768 : index
    %48 = vector.load %arg18[%c0_30, %c768] : memref<256x1024xbf16, #tpu.memory_space<vmem>>, vector<256x256xbf16>
    %cst_31 = arith.constant dense<0.000000e+00> : vector<8x256xf32>
    %49 = tpu.matmul %19, %48, %cst_31 {dimension_numbers = #tpu.dot_dimension_numbers<[1], [0], [0], [1], [0, 0, 1, 1], [], []>} : vector<8x256xbf16>, vector<256x256xbf16>, vector<8x256xf32> -> vector<8x256xf32>
    %50 = arith.addf %47, %49 : vector<8x256xf32>
    %cst_32 = arith.constant 5.000000e-01 : f32
    %51 = vector.broadcast %cst_32 : f32 to vector<8x256xf32>
    %52 = arith.mulf %51, %50 : vector<8x256xf32>
    %53 = math.tanh %52 : vector<8x256xf32>
    %cst_33 = arith.constant 5.000000e-01 : f32
    %54 = vector.broadcast %cst_33 : f32 to vector<8x256xf32>
    %55 = arith.mulf %54, %53 : vector<8x256xf32>
    %cst_34 = arith.constant 5.000000e-01 : f32
    %56 = vector.broadcast %cst_34 : f32 to vector<8x256xf32>
    %57 = arith.addf %55, %56 : vector<8x256xf32>
    %58 = arith.mulf %41, %14 : vector<8x256xf32>
    %59 = arith.mulf %30, %46 : vector<8x256xf32>
    %60 = arith.addf %58, %59 : vector<8x256xf32>
    %61 = math.tanh %60 : vector<8x256xf32>
    %62 = arith.mulf %57, %61 : vector<8x256xf32>
    %c1_i32 = arith.constant 1 : i32
    %c8_i32_35 = arith.constant 8 : i32
    %63 = arith.muli %c1_i32, %c8_i32_35 : i32
    %64 = tpu.assume_multiple %63, 8 : i32
    %65 = arith.index_cast %64 : i32 to index
    %c0_36 = arith.constant 0 : index
    %66 = vector.load %arg17[%65, %c0_36] : memref<64x1024xf32, #tpu.memory_space<vmem>>, vector<8x1024xf32>
    %67 = arith.truncf %62 : vector<8x256xf32> to vector<8x256xbf16>
    %68 = vector.extract_strided_slice %66 {offsets = [0, 0], sizes = [8, 256], strides = [1, 1]} : vector<8x1024xf32> to vector<8x256xf32>
    %c0_37 = arith.constant 0 : index
    %c0_38 = arith.constant 0 : index
    %69 = vector.load %arg18[%c0_37, %c0_38] : memref<256x1024xbf16, #tpu.memory_space<vmem>>, vector<256x256xbf16>
    %cst_39 = arith.constant dense<0.000000e+00> : vector<8x256xf32>
    %70 = tpu.matmul %67, %69, %cst_39 {dimension_numbers = #tpu.dot_dimension_numbers<[1], [0], [0], [1], [0, 0, 1, 1], [], []>} : vector<8x256xbf16>, vector<256x256xbf16>, vector<8x256xf32> -> vector<8x256xf32>
    %71 = arith.addf %68, %70 : vector<8x256xf32>
    %cst_40 = arith.constant 5.000000e-01 : f32
    %72 = vector.broadcast %cst_40 : f32 to vector<8x256xf32>
    %73 = arith.mulf %72, %71 : vector<8x256xf32>
    %74 = math.tanh %73 : vector<8x256xf32>
    %cst_41 = arith.constant 5.000000e-01 : f32
    %75 = vector.broadcast %cst_41 : f32 to vector<8x256xf32>
    %76 = arith.mulf %75, %74 : vector<8x256xf32>
    %cst_42 = arith.constant 5.000000e-01 : f32
    %77 = vector.broadcast %cst_42 : f32 to vector<8x256xf32>
    %78 = arith.addf %76, %77 : vector<8x256xf32>
    %79 = vector.extract_strided_slice %66 {offsets = [0, 256], sizes = [8, 256], strides = [1, 1]} : vector<8x1024xf32> to vector<8x256xf32>
    %c0_43 = arith.constant 0 : index
    %c256_44 = arith.constant 256 : index
    %80 = vector.load %arg18[%c0_43, %c256_44] : memref<256x1024xbf16, #tpu.memory_space<vmem>>, vector<256x256xbf16>
    %cst_45 = arith.constant dense<0.000000e+00> : vector<8x256xf32>
    %81 = tpu.matmul %67, %80, %cst_45 {dimension_numbers = #tpu.dot_dimension_numbers<[1], [0], [0], [1], [0, 0, 1, 1], [], []>} : vector<8x256xbf16>, vector<256x256xbf16>, vector<8x256xf32> -> vector<8x256xf32>
    %82 = arith.addf %79, %81 : vector<8x256xf32>
    %cst_46 = arith.constant 5.000000e-01 : f32
    %83 = vector.broadcast %cst_46 : f32 to vector<8x256xf32>
    %84 = arith.mulf %83, %82 : vector<8x256xf32>
    %85 = math.tanh %84 : vector<8x256xf32>
    %cst_47 = arith.constant 5.000000e-01 : f32
    %86 = vector.broadcast %cst_47 : f32 to vector<8x256xf32>
    %87 = arith.mulf %86, %85 : vector<8x256xf32>
    %cst_48 = arith.constant 5.000000e-01 : f32
    %88 = vector.broadcast %cst_48 : f32 to vector<8x256xf32>
    %89 = arith.addf %87, %88 : vector<8x256xf32>
    %90 = vector.extract_strided_slice %66 {offsets = [0, 512], sizes = [8, 256], strides = [1, 1]} : vector<8x1024xf32> to vector<8x256xf32>
    %c0_49 = arith.constant 0 : index
    %c512_50 = arith.constant 512 : index
    %91 = vector.load %arg18[%c0_49, %c512_50] : memref<256x1024xbf16, #tpu.memory_space<vmem>>, vector<256x256xbf16>
    %cst_51 = arith.constant dense<0.000000e+00> : vector<8x256xf32>
    %92 = tpu.matmul %67, %91, %cst_51 {dimension_numbers = #tpu.dot_dimension_numbers<[1], [0], [0], [1], [0, 0, 1, 1], [], []>} : vector<8x256xbf16>, vector<256x256xbf16>, vector<8x256xf32> -> vector<8x256xf32>
    %93 = arith.addf %90, %92 : vector<8x256xf32>
    %94 = math.tanh %93 : vector<8x256xf32>
    %95 = vector.extract_strided_slice %66 {offsets = [0, 768], sizes = [8, 256], strides = [1, 1]} : vector<8x1024xf32> to vector<8x256xf32>
    %c0_52 = arith.constant 0 : index
    %c768_53 = arith.constant 768 : index
    %96 = vector.load %arg18[%c0_52, %c768_53] : memref<256x1024xbf16, #tpu.memory_space<vmem>>, vector<256x256xbf16>
    %cst_54 = arith.constant dense<0.000000e+00> : vector<8x256xf32>
    %97 = tpu.matmul %67, %96, %cst_54 {dimension_numbers = #tpu.dot_dimension_numbers<[1], [0], [0], [1], [0, 0, 1, 1], [], []>} : vector<8x256xbf16>, vector<256x256xbf16>, vector<8x256xf32> -> vector<8x256xf32>
    %98 = arith.addf %95, %97 : vector<8x256xf32>
    %cst_55 = arith.constant 5.000000e-01 : f32
    %99 = vector.broadcast %cst_55 : f32 to vector<8x256xf32>
    %100 = arith.mulf %99, %98 : vector<8x256xf32>
    %101 = math.tanh %100 : vector<8x256xf32>
    %cst_56 = arith.constant 5.000000e-01 : f32
    %102 = vector.broadcast %cst_56 : f32 to vector<8x256xf32>
    %103 = arith.mulf %102, %101 : vector<8x256xf32>
    %cst_57 = arith.constant 5.000000e-01 : f32
    %104 = vector.broadcast %cst_57 : f32 to vector<8x256xf32>
    %105 = arith.addf %103, %104 : vector<8x256xf32>
    %106 = arith.mulf %89, %60 : vector<8x256xf32>
    %107 = arith.mulf %78, %94 : vector<8x256xf32>
    %108 = arith.addf %106, %107 : vector<8x256xf32>
    %109 = math.tanh %108 : vector<8x256xf32>
    %110 = arith.mulf %105, %109 : vector<8x256xf32>
    %c2_i32 = arith.constant 2 : i32
    %c8_i32_58 = arith.constant 8 : i32
    %111 = arith.muli %c2_i32, %c8_i32_58 : i32
    %112 = tpu.assume_multiple %111, 8 : i32
    %113 = arith.index_cast %112 : i32 to index
    %c0_59 = arith.constant 0 : index
    %114 = vector.load %arg17[%113, %c0_59] : memref<64x1024xf32, #tpu.memory_space<vmem>>, vector<8x1024xf32>
    %115 = arith.truncf %110 : vector<8x256xf32> to vector<8x256xbf16>
    %116 = vector.extract_strided_slice %114 {offsets = [0, 0], sizes = [8, 256], strides = [1, 1]} : vector<8x1024xf32> to vector<8x256xf32>
    %c0_60 = arith.constant 0 : index
    %c0_61 = arith.constant 0 : index
    %117 = vector.load %arg18[%c0_60, %c0_61] : memref<256x1024xbf16, #tpu.memory_space<vmem>>, vector<256x256xbf16>
    %cst_62 = arith.constant dense<0.000000e+00> : vector<8x256xf32>
    %118 = tpu.matmul %115, %117, %cst_62 {dimension_numbers = #tpu.dot_dimension_numbers<[1], [0], [0], [1], [0, 0, 1, 1], [], []>} : vector<8x256xbf16>, vector<256x256xbf16>, vector<8x256xf32> -> vector<8x256xf32>
    %119 = arith.addf %116, %118 : vector<8x256xf32>
    %cst_63 = arith.constant 5.000000e-01 : f32
    %120 = vector.broadcast %cst_63 : f32 to vector<8x256xf32>
    %121 = arith.mulf %120, %119 : vector<8x256xf32>
    %122 = math.tanh %121 : vector<8x256xf32>
    %cst_64 = arith.constant 5.000000e-01 : f32
    %123 = vector.broadcast %cst_64 : f32 to vector<8x256xf32>
    %124 = arith.mulf %123, %122 : vector<8x256xf32>
    %cst_65 = arith.constant 5.000000e-01 : f32
    %125 = vector.broadcast %cst_65 : f32 to vector<8x256xf32>
    %126 = arith.addf %124, %125 : vector<8x256xf32>
    %127 = vector.extract_strided_slice %114 {offsets = [0, 256], sizes = [8, 256], strides = [1, 1]} : vector<8x1024xf32> to vector<8x256xf32>
    %c0_66 = arith.constant 0 : index
    %c256_67 = arith.constant 256 : index
    %128 = vector.load %arg18[%c0_66, %c256_67] : memref<256x1024xbf16, #tpu.memory_space<vmem>>, vector<256x256xbf16>
    %cst_68 = arith.constant dense<0.000000e+00> : vector<8x256xf32>
    %129 = tpu.matmul %115, %128, %cst_68 {dimension_numbers = #tpu.dot_dimension_numbers<[1], [0], [0], [1], [0, 0, 1, 1], [], []>} : vector<8x256xbf16>, vector<256x256xbf16>, vector<8x256xf32> -> vector<8x256xf32>
    %130 = arith.addf %127, %129 : vector<8x256xf32>
    %cst_69 = arith.constant 5.000000e-01 : f32
    %131 = vector.broadcast %cst_69 : f32 to vector<8x256xf32>
    %132 = arith.mulf %131, %130 : vector<8x256xf32>
    %133 = math.tanh %132 : vector<8x256xf32>
    %cst_70 = arith.constant 5.000000e-01 : f32
    %134 = vector.broadcast %cst_70 : f32 to vector<8x256xf32>
    %135 = arith.mulf %134, %133 : vector<8x256xf32>
    %cst_71 = arith.constant 5.000000e-01 : f32
    %136 = vector.broadcast %cst_71 : f32 to vector<8x256xf32>
    %137 = arith.addf %135, %136 : vector<8x256xf32>
    %138 = vector.extract_strided_slice %114 {offsets = [0, 512], sizes = [8, 256], strides = [1, 1]} : vector<8x1024xf32> to vector<8x256xf32>
    %c0_72 = arith.constant 0 : index
    %c512_73 = arith.constant 512 : index
    %139 = vector.load %arg18[%c0_72, %c512_73] : memref<256x1024xbf16, #tpu.memory_space<vmem>>, vector<256x256xbf16>
    %cst_74 = arith.constant dense<0.000000e+00> : vector<8x256xf32>
    %140 = tpu.matmul %115, %139, %cst_74 {dimension_numbers = #tpu.dot_dimension_numbers<[1], [0], [0], [1], [0, 0, 1, 1], [], []>} : vector<8x256xbf16>, vector<256x256xbf16>, vector<8x256xf32> -> vector<8x256xf32>
    %141 = arith.addf %138, %140 : vector<8x256xf32>
    %142 = math.tanh %141 : vector<8x256xf32>
    %143 = vector.extract_strided_slice %114 {offsets = [0, 768], sizes = [8, 256], strides = [1, 1]} : vector<8x1024xf32> to vector<8x256xf32>
    %c0_75 = arith.constant 0 : index
    %c768_76 = arith.constant 768 : index
    %144 = vector.load %arg18[%c0_75, %c768_76] : memref<256x1024xbf16, #tpu.memory_space<vmem>>, vector<256x256xbf16>
    %cst_77 = arith.constant dense<0.000000e+00> : vector<8x256xf32>
    %145 = tpu.matmul %115, %144, %cst_77 {dimension_numbers = #tpu.dot_dimension_numbers<[1], [0], [0], [1], [0, 0, 1, 1], [], []>} : vector<8x256xbf16>, vector<256x256xbf16>, vector<8x256xf32> -> vector<8x256xf32>
    %146 = arith.addf %143, %145 : vector<8x256xf32>
    %cst_78 = arith.constant 5.000000e-01 : f32
    %147 = vector.broadcast %cst_78 : f32 to vector<8x256xf32>
    %148 = arith.mulf %147, %146 : vector<8x256xf32>
    %149 = math.tanh %148 : vector<8x256xf32>
    %cst_79 = arith.constant 5.000000e-01 : f32
    %150 = vector.broadcast %cst_79 : f32 to vector<8x256xf32>
    %151 = arith.mulf %150, %149 : vector<8x256xf32>
    %cst_80 = arith.constant 5.000000e-01 : f32
    %152 = vector.broadcast %cst_80 : f32 to vector<8x256xf32>
    %153 = arith.addf %151, %152 : vector<8x256xf32>
    %154 = arith.mulf %137, %108 : vector<8x256xf32>
    %155 = arith.mulf %126, %142 : vector<8x256xf32>
    %156 = arith.addf %154, %155 : vector<8x256xf32>
    %157 = math.tanh %156 : vector<8x256xf32>
    %158 = arith.mulf %153, %157 : vector<8x256xf32>
    %c3_i32 = arith.constant 3 : i32
    %c8_i32_81 = arith.constant 8 : i32
    %159 = arith.muli %c3_i32, %c8_i32_81 : i32
    %160 = tpu.assume_multiple %159, 8 : i32
    %161 = arith.index_cast %160 : i32 to index
    %c0_82 = arith.constant 0 : index
    %162 = vector.load %arg17[%161, %c0_82] : memref<64x1024xf32, #tpu.memory_space<vmem>>, vector<8x1024xf32>
    %163 = arith.truncf %158 : vector<8x256xf32> to vector<8x256xbf16>
    %164 = vector.extract_strided_slice %162 {offsets = [0, 0], sizes = [8, 256], strides = [1, 1]} : vector<8x1024xf32> to vector<8x256xf32>
    %c0_83 = arith.constant 0 : index
    %c0_84 = arith.constant 0 : index
    %165 = vector.load %arg18[%c0_83, %c0_84] : memref<256x1024xbf16, #tpu.memory_space<vmem>>, vector<256x256xbf16>
    %cst_85 = arith.constant dense<0.000000e+00> : vector<8x256xf32>
    %166 = tpu.matmul %163, %165, %cst_85 {dimension_numbers = #tpu.dot_dimension_numbers<[1], [0], [0], [1], [0, 0, 1, 1], [], []>} : vector<8x256xbf16>, vector<256x256xbf16>, vector<8x256xf32> -> vector<8x256xf32>
    %167 = arith.addf %164, %166 : vector<8x256xf32>
    %cst_86 = arith.constant 5.000000e-01 : f32
    %168 = vector.broadcast %cst_86 : f32 to vector<8x256xf32>
    %169 = arith.mulf %168, %167 : vector<8x256xf32>
    %170 = math.tanh %169 : vector<8x256xf32>
    %cst_87 = arith.constant 5.000000e-01 : f32
    %171 = vector.broadcast %cst_87 : f32 to vector<8x256xf32>
    %172 = arith.mulf %171, %170 : vector<8x256xf32>
    %cst_88 = arith.constant 5.000000e-01 : f32
    %173 = vector.broadcast %cst_88 : f32 to vector<8x256xf32>
    %174 = arith.addf %172, %173 : vector<8x256xf32>
    %175 = vector.extract_strided_slice %162 {offsets = [0, 256], sizes = [8, 256], strides = [1, 1]} : vector<8x1024xf32> to vector<8x256xf32>
    %c0_89 = arith.constant 0 : index
    %c256_90 = arith.constant 256 : index
    %176 = vector.load %arg18[%c0_89, %c256_90] : memref<256x1024xbf16, #tpu.memory_space<vmem>>, vector<256x256xbf16>
    %cst_91 = arith.constant dense<0.000000e+00> : vector<8x256xf32>
    %177 = tpu.matmul %163, %176, %cst_91 {dimension_numbers = #tpu.dot_dimension_numbers<[1], [0], [0], [1], [0, 0, 1, 1], [], []>} : vector<8x256xbf16>, vector<256x256xbf16>, vector<8x256xf32> -> vector<8x256xf32>
    %178 = arith.addf %175, %177 : vector<8x256xf32>
    %cst_92 = arith.constant 5.000000e-01 : f32
    %179 = vector.broadcast %cst_92 : f32 to vector<8x256xf32>
    %180 = arith.mulf %179, %178 : vector<8x256xf32>
    %181 = math.tanh %180 : vector<8x256xf32>
    %cst_93 = arith.constant 5.000000e-01 : f32
    %182 = vector.broadcast %cst_93 : f32 to vector<8x256xf32>
    %183 = arith.mulf %182, %181 : vector<8x256xf32>
    %cst_94 = arith.constant 5.000000e-01 : f32
    %184 = vector.broadcast %cst_94 : f32 to vector<8x256xf32>
    %185 = arith.addf %183, %184 : vector<8x256xf32>
    %186 = vector.extract_strided_slice %162 {offsets = [0, 512], sizes = [8, 256], strides = [1, 1]} : vector<8x1024xf32> to vector<8x256xf32>
    %c0_95 = arith.constant 0 : index
    %c512_96 = arith.constant 512 : index
    %187 = vector.load %arg18[%c0_95, %c512_96] : memref<256x1024xbf16, #tpu.memory_space<vmem>>, vector<256x256xbf16>
    %cst_97 = arith.constant dense<0.000000e+00> : vector<8x256xf32>
    %188 = tpu.matmul %163, %187, %cst_97 {dimension_numbers = #tpu.dot_dimension_numbers<[1], [0], [0], [1], [0, 0, 1, 1], [], []>} : vector<8x256xbf16>, vector<256x256xbf16>, vector<8x256xf32> -> vector<8x256xf32>
    %189 = arith.addf %186, %188 : vector<8x256xf32>
    %190 = math.tanh %189 : vector<8x256xf32>
    %191 = vector.extract_strided_slice %162 {offsets = [0, 768], sizes = [8, 256], strides = [1, 1]} : vector<8x1024xf32> to vector<8x256xf32>
    %c0_98 = arith.constant 0 : index
    %c768_99 = arith.constant 768 : index
    %192 = vector.load %arg18[%c0_98, %c768_99] : memref<256x1024xbf16, #tpu.memory_space<vmem>>, vector<256x256xbf16>
    %cst_100 = arith.constant dense<0.000000e+00> : vector<8x256xf32>
    %193 = tpu.matmul %163, %192, %cst_100 {dimension_numbers = #tpu.dot_dimension_numbers<[1], [0], [0], [1], [0, 0, 1, 1], [], []>} : vector<8x256xbf16>, vector<256x256xbf16>, vector<8x256xf32> -> vector<8x256xf32>
    %194 = arith.addf %191, %193 : vector<8x256xf32>
    %cst_101 = arith.constant 5.000000e-01 : f32
    %195 = vector.broadcast %cst_101 : f32 to vector<8x256xf32>
    %196 = arith.mulf %195, %194 : vector<8x256xf32>
    %197 = math.tanh %196 : vector<8x256xf32>
    %cst_102 = arith.constant 5.000000e-01 : f32
    %198 = vector.broadcast %cst_102 : f32 to vector<8x256xf32>
    %199 = arith.mulf %198, %197 : vector<8x256xf32>
    %cst_103 = arith.constant 5.000000e-01 : f32
    %200 = vector.broadcast %cst_103 : f32 to vector<8x256xf32>
    %201 = arith.addf %199, %200 : vector<8x256xf32>
    %202 = arith.mulf %185, %156 : vector<8x256xf32>
    %203 = arith.mulf %174, %190 : vector<8x256xf32>
    %204 = arith.addf %202, %203 : vector<8x256xf32>
    %205 = math.tanh %204 : vector<8x256xf32>
    %206 = arith.mulf %201, %205 : vector<8x256xf32>
    %c4_i32 = arith.constant 4 : i32
    %c8_i32_104 = arith.constant 8 : i32
    %207 = arith.muli %c4_i32, %c8_i32_104 : i32
    %208 = tpu.assume_multiple %207, 8 : i32
    %209 = arith.index_cast %208 : i32 to index
    %c0_105 = arith.constant 0 : index
    %210 = vector.load %arg17[%209, %c0_105] : memref<64x1024xf32, #tpu.memory_space<vmem>>, vector<8x1024xf32>
    %211 = arith.truncf %206 : vector<8x256xf32> to vector<8x256xbf16>
    %212 = vector.extract_strided_slice %210 {offsets = [0, 0], sizes = [8, 256], strides = [1, 1]} : vector<8x1024xf32> to vector<8x256xf32>
    %c0_106 = arith.constant 0 : index
    %c0_107 = arith.constant 0 : index
    %213 = vector.load %arg18[%c0_106, %c0_107] : memref<256x1024xbf16, #tpu.memory_space<vmem>>, vector<256x256xbf16>
    %cst_108 = arith.constant dense<0.000000e+00> : vector<8x256xf32>
    %214 = tpu.matmul %211, %213, %cst_108 {dimension_numbers = #tpu.dot_dimension_numbers<[1], [0], [0], [1], [0, 0, 1, 1], [], []>} : vector<8x256xbf16>, vector<256x256xbf16>, vector<8x256xf32> -> vector<8x256xf32>
    %215 = arith.addf %212, %214 : vector<8x256xf32>
    %cst_109 = arith.constant 5.000000e-01 : f32
    %216 = vector.broadcast %cst_109 : f32 to vector<8x256xf32>
    %217 = arith.mulf %216, %215 : vector<8x256xf32>
    %218 = math.tanh %217 : vector<8x256xf32>
    %cst_110 = arith.constant 5.000000e-01 : f32
    %219 = vector.broadcast %cst_110 : f32 to vector<8x256xf32>
    %220 = arith.mulf %219, %218 : vector<8x256xf32>
    %cst_111 = arith.constant 5.000000e-01 : f32
    %221 = vector.broadcast %cst_111 : f32 to vector<8x256xf32>
    %222 = arith.addf %220, %221 : vector<8x256xf32>
    %223 = vector.extract_strided_slice %210 {offsets = [0, 256], sizes = [8, 256], strides = [1, 1]} : vector<8x1024xf32> to vector<8x256xf32>
    %c0_112 = arith.constant 0 : index
    %c256_113 = arith.constant 256 : index
    %224 = vector.load %arg18[%c0_112, %c256_113] : memref<256x1024xbf16, #tpu.memory_space<vmem>>, vector<256x256xbf16>
    %cst_114 = arith.constant dense<0.000000e+00> : vector<8x256xf32>
    %225 = tpu.matmul %211, %224, %cst_114 {dimension_numbers = #tpu.dot_dimension_numbers<[1], [0], [0], [1], [0, 0, 1, 1], [], []>} : vector<8x256xbf16>, vector<256x256xbf16>, vector<8x256xf32> -> vector<8x256xf32>
    %226 = arith.addf %223, %225 : vector<8x256xf32>
    %cst_115 = arith.constant 5.000000e-01 : f32
    %227 = vector.broadcast %cst_115 : f32 to vector<8x256xf32>
    %228 = arith.mulf %227, %226 : vector<8x256xf32>
    %229 = math.tanh %228 : vector<8x256xf32>
    %cst_116 = arith.constant 5.000000e-01 : f32
    %230 = vector.broadcast %cst_116 : f32 to vector<8x256xf32>
    %231 = arith.mulf %230, %229 : vector<8x256xf32>
    %cst_117 = arith.constant 5.000000e-01 : f32
    %232 = vector.broadcast %cst_117 : f32 to vector<8x256xf32>
    %233 = arith.addf %231, %232 : vector<8x256xf32>
    %234 = vector.extract_strided_slice %210 {offsets = [0, 512], sizes = [8, 256], strides = [1, 1]} : vector<8x1024xf32> to vector<8x256xf32>
    %c0_118 = arith.constant 0 : index
    %c512_119 = arith.constant 512 : index
    %235 = vector.load %arg18[%c0_118, %c512_119] : memref<256x1024xbf16, #tpu.memory_space<vmem>>, vector<256x256xbf16>
    %cst_120 = arith.constant dense<0.000000e+00> : vector<8x256xf32>
    %236 = tpu.matmul %211, %235, %cst_120 {dimension_numbers = #tpu.dot_dimension_numbers<[1], [0], [0], [1], [0, 0, 1, 1], [], []>} : vector<8x256xbf16>, vector<256x256xbf16>, vector<8x256xf32> -> vector<8x256xf32>
    %237 = arith.addf %234, %236 : vector<8x256xf32>
    %238 = math.tanh %237 : vector<8x256xf32>
    %239 = vector.extract_strided_slice %210 {offsets = [0, 768], sizes = [8, 256], strides = [1, 1]} : vector<8x1024xf32> to vector<8x256xf32>
    %c0_121 = arith.constant 0 : index
    %c768_122 = arith.constant 768 : index
    %240 = vector.load %arg18[%c0_121, %c768_122] : memref<256x1024xbf16, #tpu.memory_space<vmem>>, vector<256x256xbf16>
    %cst_123 = arith.constant dense<0.000000e+00> : vector<8x256xf32>
    %241 = tpu.matmul %211, %240, %cst_123 {dimension_numbers = #tpu.dot_dimension_numbers<[1], [0], [0], [1], [0, 0, 1, 1], [], []>} : vector<8x256xbf16>, vector<256x256xbf16>, vector<8x256xf32> -> vector<8x256xf32>
    %242 = arith.addf %239, %241 : vector<8x256xf32>
    %cst_124 = arith.constant 5.000000e-01 : f32
    %243 = vector.broadcast %cst_124 : f32 to vector<8x256xf32>
    %244 = arith.mulf %243, %242 : vector<8x256xf32>
    %245 = math.tanh %244 : vector<8x256xf32>
    %cst_125 = arith.constant 5.000000e-01 : f32
    %246 = vector.broadcast %cst_125 : f32 to vector<8x256xf32>
    %247 = arith.mulf %246, %245 : vector<8x256xf32>
    %cst_126 = arith.constant 5.000000e-01 : f32
    %248 = vector.broadcast %cst_126 : f32 to vector<8x256xf32>
    %249 = arith.addf %247, %248 : vector<8x256xf32>
    %250 = arith.mulf %233, %204 : vector<8x256xf32>
    %251 = arith.mulf %222, %238 : vector<8x256xf32>
    %252 = arith.addf %250, %251 : vector<8x256xf32>
    %253 = math.tanh %252 : vector<8x256xf32>
    %254 = arith.mulf %249, %253 : vector<8x256xf32>
    %c5_i32 = arith.constant 5 : i32
    %c8_i32_127 = arith.constant 8 : i32
    %255 = arith.muli %c5_i32, %c8_i32_127 : i32
    %256 = tpu.assume_multiple %255, 8 : i32
    %257 = arith.index_cast %256 : i32 to index
    %c0_128 = arith.constant 0 : index
    %258 = vector.load %arg17[%257, %c0_128] : memref<64x1024xf32, #tpu.memory_space<vmem>>, vector<8x1024xf32>
    %259 = arith.truncf %254 : vector<8x256xf32> to vector<8x256xbf16>
    %260 = vector.extract_strided_slice %258 {offsets = [0, 0], sizes = [8, 256], strides = [1, 1]} : vector<8x1024xf32> to vector<8x256xf32>
    %c0_129 = arith.constant 0 : index
    %c0_130 = arith.constant 0 : index
    %261 = vector.load %arg18[%c0_129, %c0_130] : memref<256x1024xbf16, #tpu.memory_space<vmem>>, vector<256x256xbf16>
    %cst_131 = arith.constant dense<0.000000e+00> : vector<8x256xf32>
    %262 = tpu.matmul %259, %261, %cst_131 {dimension_numbers = #tpu.dot_dimension_numbers<[1], [0], [0], [1], [0, 0, 1, 1], [], []>} : vector<8x256xbf16>, vector<256x256xbf16>, vector<8x256xf32> -> vector<8x256xf32>
    %263 = arith.addf %260, %262 : vector<8x256xf32>
    %cst_132 = arith.constant 5.000000e-01 : f32
    %264 = vector.broadcast %cst_132 : f32 to vector<8x256xf32>
    %265 = arith.mulf %264, %263 : vector<8x256xf32>
    %266 = math.tanh %265 : vector<8x256xf32>
    %cst_133 = arith.constant 5.000000e-01 : f32
    %267 = vector.broadcast %cst_133 : f32 to vector<8x256xf32>
    %268 = arith.mulf %267, %266 : vector<8x256xf32>
    %cst_134 = arith.constant 5.000000e-01 : f32
    %269 = vector.broadcast %cst_134 : f32 to vector<8x256xf32>
    %270 = arith.addf %268, %269 : vector<8x256xf32>
    %271 = vector.extract_strided_slice %258 {offsets = [0, 256], sizes = [8, 256], strides = [1, 1]} : vector<8x1024xf32> to vector<8x256xf32>
    %c0_135 = arith.constant 0 : index
    %c256_136 = arith.constant 256 : index
    %272 = vector.load %arg18[%c0_135, %c256_136] : memref<256x1024xbf16, #tpu.memory_space<vmem>>, vector<256x256xbf16>
    %cst_137 = arith.constant dense<0.000000e+00> : vector<8x256xf32>
    %273 = tpu.matmul %259, %272, %cst_137 {dimension_numbers = #tpu.dot_dimension_numbers<[1], [0], [0], [1], [0, 0, 1, 1], [], []>} : vector<8x256xbf16>, vector<256x256xbf16>, vector<8x256xf32> -> vector<8x256xf32>
    %274 = arith.addf %271, %273 : vector<8x256xf32>
    %cst_138 = arith.constant 5.000000e-01 : f32
    %275 = vector.broadcast %cst_138 : f32 to vector<8x256xf32>
    %276 = arith.mulf %275, %274 : vector<8x256xf32>
    %277 = math.tanh %276 : vector<8x256xf32>
    %cst_139 = arith.constant 5.000000e-01 : f32
    %278 = vector.broadcast %cst_139 : f32 to vector<8x256xf32>
    %279 = arith.mulf %278, %277 : vector<8x256xf32>
    %cst_140 = arith.constant 5.000000e-01 : f32
    %280 = vector.broadcast %cst_140 : f32 to vector<8x256xf32>
    %281 = arith.addf %279, %280 : vector<8x256xf32>
    %282 = vector.extract_strided_slice %258 {offsets = [0, 512], sizes = [8, 256], strides = [1, 1]} : vector<8x1024xf32> to vector<8x256xf32>
    %c0_141 = arith.constant 0 : index
    %c512_142 = arith.constant 512 : index
    %283 = vector.load %arg18[%c0_141, %c512_142] : memref<256x1024xbf16, #tpu.memory_space<vmem>>, vector<256x256xbf16>
    %cst_143 = arith.constant dense<0.000000e+00> : vector<8x256xf32>
    %284 = tpu.matmul %259, %283, %cst_143 {dimension_numbers = #tpu.dot_dimension_numbers<[1], [0], [0], [1], [0, 0, 1, 1], [], []>} : vector<8x256xbf16>, vector<256x256xbf16>, vector<8x256xf32> -> vector<8x256xf32>
    %285 = arith.addf %282, %284 : vector<8x256xf32>
    %286 = math.tanh %285 : vector<8x256xf32>
    %287 = vector.extract_strided_slice %258 {offsets = [0, 768], sizes = [8, 256], strides = [1, 1]} : vector<8x1024xf32> to vector<8x256xf32>
    %c0_144 = arith.constant 0 : index
    %c768_145 = arith.constant 768 : index
    %288 = vector.load %arg18[%c0_144, %c768_145] : memref<256x1024xbf16, #tpu.memory_space<vmem>>, vector<256x256xbf16>
    %cst_146 = arith.constant dense<0.000000e+00> : vector<8x256xf32>
    %289 = tpu.matmul %259, %288, %cst_146 {dimension_numbers = #tpu.dot_dimension_numbers<[1], [0], [0], [1], [0, 0, 1, 1], [], []>} : vector<8x256xbf16>, vector<256x256xbf16>, vector<8x256xf32> -> vector<8x256xf32>
    %290 = arith.addf %287, %289 : vector<8x256xf32>
    %cst_147 = arith.constant 5.000000e-01 : f32
    %291 = vector.broadcast %cst_147 : f32 to vector<8x256xf32>
    %292 = arith.mulf %291, %290 : vector<8x256xf32>
    %293 = math.tanh %292 : vector<8x256xf32>
    %cst_148 = arith.constant 5.000000e-01 : f32
    %294 = vector.broadcast %cst_148 : f32 to vector<8x256xf32>
    %295 = arith.mulf %294, %293 : vector<8x256xf32>
    %cst_149 = arith.constant 5.000000e-01 : f32
    %296 = vector.broadcast %cst_149 : f32 to vector<8x256xf32>
    %297 = arith.addf %295, %296 : vector<8x256xf32>
    %298 = arith.mulf %281, %252 : vector<8x256xf32>
    %299 = arith.mulf %270, %286 : vector<8x256xf32>
    %300 = arith.addf %298, %299 : vector<8x256xf32>
    %301 = math.tanh %300 : vector<8x256xf32>
    %302 = arith.mulf %297, %301 : vector<8x256xf32>
    %c6_i32 = arith.constant 6 : i32
    %c8_i32_150 = arith.constant 8 : i32
    %303 = arith.muli %c6_i32, %c8_i32_150 : i32
    %304 = tpu.assume_multiple %303, 8 : i32
    %305 = arith.index_cast %304 : i32 to index
    %c0_151 = arith.constant 0 : index
    %306 = vector.load %arg17[%305, %c0_151] : memref<64x1024xf32, #tpu.memory_space<vmem>>, vector<8x1024xf32>
    %307 = arith.truncf %302 : vector<8x256xf32> to vector<8x256xbf16>
    %308 = vector.extract_strided_slice %306 {offsets = [0, 0], sizes = [8, 256], strides = [1, 1]} : vector<8x1024xf32> to vector<8x256xf32>
    %c0_152 = arith.constant 0 : index
    %c0_153 = arith.constant 0 : index
    %309 = vector.load %arg18[%c0_152, %c0_153] : memref<256x1024xbf16, #tpu.memory_space<vmem>>, vector<256x256xbf16>
    %cst_154 = arith.constant dense<0.000000e+00> : vector<8x256xf32>
    %310 = tpu.matmul %307, %309, %cst_154 {dimension_numbers = #tpu.dot_dimension_numbers<[1], [0], [0], [1], [0, 0, 1, 1], [], []>} : vector<8x256xbf16>, vector<256x256xbf16>, vector<8x256xf32> -> vector<8x256xf32>
    %311 = arith.addf %308, %310 : vector<8x256xf32>
    %cst_155 = arith.constant 5.000000e-01 : f32
    %312 = vector.broadcast %cst_155 : f32 to vector<8x256xf32>
    %313 = arith.mulf %312, %311 : vector<8x256xf32>
    %314 = math.tanh %313 : vector<8x256xf32>
    %cst_156 = arith.constant 5.000000e-01 : f32
    %315 = vector.broadcast %cst_156 : f32 to vector<8x256xf32>
    %316 = arith.mulf %315, %314 : vector<8x256xf32>
    %cst_157 = arith.constant 5.000000e-01 : f32
    %317 = vector.broadcast %cst_157 : f32 to vector<8x256xf32>
    %318 = arith.addf %316, %317 : vector<8x256xf32>
    %319 = vector.extract_strided_slice %306 {offsets = [0, 256], sizes = [8, 256], strides = [1, 1]} : vector<8x1024xf32> to vector<8x256xf32>
    %c0_158 = arith.constant 0 : index
    %c256_159 = arith.constant 256 : index
    %320 = vector.load %arg18[%c0_158, %c256_159] : memref<256x1024xbf16, #tpu.memory_space<vmem>>, vector<256x256xbf16>
    %cst_160 = arith.constant dense<0.000000e+00> : vector<8x256xf32>
    %321 = tpu.matmul %307, %320, %cst_160 {dimension_numbers = #tpu.dot_dimension_numbers<[1], [0], [0], [1], [0, 0, 1, 1], [], []>} : vector<8x256xbf16>, vector<256x256xbf16>, vector<8x256xf32> -> vector<8x256xf32>
    %322 = arith.addf %319, %321 : vector<8x256xf32>
    %cst_161 = arith.constant 5.000000e-01 : f32
    %323 = vector.broadcast %cst_161 : f32 to vector<8x256xf32>
    %324 = arith.mulf %323, %322 : vector<8x256xf32>
    %325 = math.tanh %324 : vector<8x256xf32>
    %cst_162 = arith.constant 5.000000e-01 : f32
    %326 = vector.broadcast %cst_162 : f32 to vector<8x256xf32>
    %327 = arith.mulf %326, %325 : vector<8x256xf32>
    %cst_163 = arith.constant 5.000000e-01 : f32
    %328 = vector.broadcast %cst_163 : f32 to vector<8x256xf32>
    %329 = arith.addf %327, %328 : vector<8x256xf32>
    %330 = vector.extract_strided_slice %306 {offsets = [0, 512], sizes = [8, 256], strides = [1, 1]} : vector<8x1024xf32> to vector<8x256xf32>
    %c0_164 = arith.constant 0 : index
    %c512_165 = arith.constant 512 : index
    %331 = vector.load %arg18[%c0_164, %c512_165] : memref<256x1024xbf16, #tpu.memory_space<vmem>>, vector<256x256xbf16>
    %cst_166 = arith.constant dense<0.000000e+00> : vector<8x256xf32>
    %332 = tpu.matmul %307, %331, %cst_166 {dimension_numbers = #tpu.dot_dimension_numbers<[1], [0], [0], [1], [0, 0, 1, 1], [], []>} : vector<8x256xbf16>, vector<256x256xbf16>, vector<8x256xf32> -> vector<8x256xf32>
    %333 = arith.addf %330, %332 : vector<8x256xf32>
    %334 = math.tanh %333 : vector<8x256xf32>
    %335 = vector.extract_strided_slice %306 {offsets = [0, 768], sizes = [8, 256], strides = [1, 1]} : vector<8x1024xf32> to vector<8x256xf32>
    %c0_167 = arith.constant 0 : index
    %c768_168 = arith.constant 768 : index
    %336 = vector.load %arg18[%c0_167, %c768_168] : memref<256x1024xbf16, #tpu.memory_space<vmem>>, vector<256x256xbf16>
    %cst_169 = arith.constant dense<0.000000e+00> : vector<8x256xf32>
    %337 = tpu.matmul %307, %336, %cst_169 {dimension_numbers = #tpu.dot_dimension_numbers<[1], [0], [0], [1], [0, 0, 1, 1], [], []>} : vector<8x256xbf16>, vector<256x256xbf16>, vector<8x256xf32> -> vector<8x256xf32>
    %338 = arith.addf %335, %337 : vector<8x256xf32>
    %cst_170 = arith.constant 5.000000e-01 : f32
    %339 = vector.broadcast %cst_170 : f32 to vector<8x256xf32>
    %340 = arith.mulf %339, %338 : vector<8x256xf32>
    %341 = math.tanh %340 : vector<8x256xf32>
    %cst_171 = arith.constant 5.000000e-01 : f32
    %342 = vector.broadcast %cst_171 : f32 to vector<8x256xf32>
    %343 = arith.mulf %342, %341 : vector<8x256xf32>
    %cst_172 = arith.constant 5.000000e-01 : f32
    %344 = vector.broadcast %cst_172 : f32 to vector<8x256xf32>
    %345 = arith.addf %343, %344 : vector<8x256xf32>
    %346 = arith.mulf %329, %300 : vector<8x256xf32>
    %347 = arith.mulf %318, %334 : vector<8x256xf32>
    %348 = arith.addf %346, %347 : vector<8x256xf32>
    %349 = math.tanh %348 : vector<8x256xf32>
    %350 = arith.mulf %345, %349 : vector<8x256xf32>
    %c7_i32 = arith.constant 7 : i32
    %c8_i32_173 = arith.constant 8 : i32
    %351 = arith.muli %c7_i32, %c8_i32_173 : i32
    %352 = tpu.assume_multiple %351, 8 : i32
    %353 = arith.index_cast %352 : i32 to index
    %c0_174 = arith.constant 0 : index
    %354 = vector.load %arg17[%353, %c0_174] : memref<64x1024xf32, #tpu.memory_space<vmem>>, vector<8x1024xf32>
    %355 = arith.truncf %350 : vector<8x256xf32> to vector<8x256xbf16>
    %356 = vector.extract_strided_slice %354 {offsets = [0, 0], sizes = [8, 256], strides = [1, 1]} : vector<8x1024xf32> to vector<8x256xf32>
    %c0_175 = arith.constant 0 : index
    %c0_176 = arith.constant 0 : index
    %357 = vector.load %arg18[%c0_175, %c0_176] : memref<256x1024xbf16, #tpu.memory_space<vmem>>, vector<256x256xbf16>
    %cst_177 = arith.constant dense<0.000000e+00> : vector<8x256xf32>
    %358 = tpu.matmul %355, %357, %cst_177 {dimension_numbers = #tpu.dot_dimension_numbers<[1], [0], [0], [1], [0, 0, 1, 1], [], []>} : vector<8x256xbf16>, vector<256x256xbf16>, vector<8x256xf32> -> vector<8x256xf32>
    %359 = arith.addf %356, %358 : vector<8x256xf32>
    %cst_178 = arith.constant 5.000000e-01 : f32
    %360 = vector.broadcast %cst_178 : f32 to vector<8x256xf32>
    %361 = arith.mulf %360, %359 : vector<8x256xf32>
    %362 = math.tanh %361 : vector<8x256xf32>
    %cst_179 = arith.constant 5.000000e-01 : f32
    %363 = vector.broadcast %cst_179 : f32 to vector<8x256xf32>
    %364 = arith.mulf %363, %362 : vector<8x256xf32>
    %cst_180 = arith.constant 5.000000e-01 : f32
    %365 = vector.broadcast %cst_180 : f32 to vector<8x256xf32>
    %366 = arith.addf %364, %365 : vector<8x256xf32>
    %367 = vector.extract_strided_slice %354 {offsets = [0, 256], sizes = [8, 256], strides = [1, 1]} : vector<8x1024xf32> to vector<8x256xf32>
    %c0_181 = arith.constant 0 : index
    %c256_182 = arith.constant 256 : index
    %368 = vector.load %arg18[%c0_181, %c256_182] : memref<256x1024xbf16, #tpu.memory_space<vmem>>, vector<256x256xbf16>
    %cst_183 = arith.constant dense<0.000000e+00> : vector<8x256xf32>
    %369 = tpu.matmul %355, %368, %cst_183 {dimension_numbers = #tpu.dot_dimension_numbers<[1], [0], [0], [1], [0, 0, 1, 1], [], []>} : vector<8x256xbf16>, vector<256x256xbf16>, vector<8x256xf32> -> vector<8x256xf32>
    %370 = arith.addf %367, %369 : vector<8x256xf32>
    %cst_184 = arith.constant 5.000000e-01 : f32
    %371 = vector.broadcast %cst_184 : f32 to vector<8x256xf32>
    %372 = arith.mulf %371, %370 : vector<8x256xf32>
    %373 = math.tanh %372 : vector<8x256xf32>
    %cst_185 = arith.constant 5.000000e-01 : f32
    %374 = vector.broadcast %cst_185 : f32 to vector<8x256xf32>
    %375 = arith.mulf %374, %373 : vector<8x256xf32>
    %cst_186 = arith.constant 5.000000e-01 : f32
    %376 = vector.broadcast %cst_186 : f32 to vector<8x256xf32>
    %377 = arith.addf %375, %376 : vector<8x256xf32>
    %378 = vector.extract_strided_slice %354 {offsets = [0, 512], sizes = [8, 256], strides = [1, 1]} : vector<8x1024xf32> to vector<8x256xf32>
    %c0_187 = arith.constant 0 : index
    %c512_188 = arith.constant 512 : index
    %379 = vector.load %arg18[%c0_187, %c512_188] : memref<256x1024xbf16, #tpu.memory_space<vmem>>, vector<256x256xbf16>
    %cst_189 = arith.constant dense<0.000000e+00> : vector<8x256xf32>
    %380 = tpu.matmul %355, %379, %cst_189 {dimension_numbers = #tpu.dot_dimension_numbers<[1], [0], [0], [1], [0, 0, 1, 1], [], []>} : vector<8x256xbf16>, vector<256x256xbf16>, vector<8x256xf32> -> vector<8x256xf32>
    %381 = arith.addf %378, %380 : vector<8x256xf32>
    %382 = math.tanh %381 : vector<8x256xf32>
    %383 = vector.extract_strided_slice %354 {offsets = [0, 768], sizes = [8, 256], strides = [1, 1]} : vector<8x1024xf32> to vector<8x256xf32>
    %c0_190 = arith.constant 0 : index
    %c768_191 = arith.constant 768 : index
    %384 = vector.load %arg18[%c0_190, %c768_191] : memref<256x1024xbf16, #tpu.memory_space<vmem>>, vector<256x256xbf16>
    %cst_192 = arith.constant dense<0.000000e+00> : vector<8x256xf32>
    %385 = tpu.matmul %355, %384, %cst_192 {dimension_numbers = #tpu.dot_dimension_numbers<[1], [0], [0], [1], [0, 0, 1, 1], [], []>} : vector<8x256xbf16>, vector<256x256xbf16>, vector<8x256xf32> -> vector<8x256xf32>
    %386 = arith.addf %383, %385 : vector<8x256xf32>
    %cst_193 = arith.constant 5.000000e-01 : f32
    %387 = vector.broadcast %cst_193 : f32 to vector<8x256xf32>
    %388 = arith.mulf %387, %386 : vector<8x256xf32>
    %389 = math.tanh %388 : vector<8x256xf32>
    %cst_194 = arith.constant 5.000000e-01 : f32
    %390 = vector.broadcast %cst_194 : f32 to vector<8x256xf32>
    %391 = arith.mulf %390, %389 : vector<8x256xf32>
    %cst_195 = arith.constant 5.000000e-01 : f32
    %392 = vector.broadcast %cst_195 : f32 to vector<8x256xf32>
    %393 = arith.addf %391, %392 : vector<8x256xf32>
    %394 = arith.mulf %377, %348 : vector<8x256xf32>
    %395 = arith.mulf %366, %382 : vector<8x256xf32>
    %396 = arith.addf %394, %395 : vector<8x256xf32>
    %397 = math.tanh %396 : vector<8x256xf32>
    %398 = arith.mulf %393, %397 : vector<8x256xf32>
    %c8_i32_196 = arith.constant 8 : i32
    %c0_197 = arith.constant 0 : index
    %c0_198 = arith.constant 0 : index
    %399 = vector.load %arg7[%c0_197, %c0_198] : memref<256x124xf32, #tpu.memory_space<vmem>>, vector<256x124xf32>
    %cst_199 = arith.constant dense<0.000000e+00> : vector<8x124xf32>
    %400 = tpu.matmul %398, %399, %cst_199 {dimension_numbers = #tpu.dot_dimension_numbers<[1], [0], [0], [1], [0, 0, 1, 1], [], []>} : vector<8x256xf32>, vector<256x124xf32>, vector<8x124xf32> -> vector<8x124xf32>
    %c0_200 = arith.constant 0 : index
    %c0_201 = arith.constant 0 : index
    %401 = vector.load %arg8[%c0_200, %c0_201] : memref<48x124xf32, #tpu.memory_space<vmem>>, vector<48x124xf32>
    %cst_202 = arith.constant dense<0.000000e+00> : vector<8x124xf32>
    %402 = tpu.matmul %12, %401, %cst_202 {dimension_numbers = #tpu.dot_dimension_numbers<[1], [0], [0], [1], [0, 0, 1, 1], [], []>} : vector<8x48xf32>, vector<48x124xf32>, vector<8x124xf32> -> vector<8x124xf32>
    %403 = arith.addf %400, %402 : vector<8x124xf32>
    %c0_203 = arith.constant 0 : index
    %c0_204 = arith.constant 0 : index
    %404 = vector.load %arg9[%c0_203, %c0_204] : memref<1x124xf32, #tpu.memory_space<vmem>>, vector<1x124xf32>
    %405 = vector.broadcast %404 : vector<1x124xf32> to vector<8x124xf32>
    %406 = arith.addf %403, %405 : vector<8x124xf32>
    %cst_205 = arith.constant dense<0.000000e+00> : vector<8xf32>
    %407 = vector.multi_reduction <add>, %406, %cst_205 [1] : vector<8x124xf32> to vector<8xf32>
    %408 = vector.shape_cast %407 : vector<8xf32> to vector<8x1xf32>
    %cst_206 = arith.constant 1.240000e+02 : f32
    %409 = vector.broadcast %cst_206 : f32 to vector<8x1xf32>
    %410 = arith.divf %408, %409 : vector<8x1xf32>
    %411 = vector.broadcast %410 : vector<8x1xf32> to vector<8x124xf32>
    %412 = arith.subf %406, %411 : vector<8x124xf32>
    %413 = arith.mulf %412, %412 : vector<8x124xf32>
    %cst_207 = arith.constant dense<0.000000e+00> : vector<8xf32>
    %414 = vector.multi_reduction <add>, %413, %cst_207 [1] : vector<8x124xf32> to vector<8xf32>
    %415 = vector.shape_cast %414 : vector<8xf32> to vector<8x1xf32>
    %cst_208 = arith.constant 1.240000e+02 : f32
    %416 = vector.broadcast %cst_208 : f32 to vector<8x1xf32>
    %417 = arith.divf %415, %416 : vector<8x1xf32>
    %418 = vector.broadcast %410 : vector<8x1xf32> to vector<8x124xf32>
    %419 = arith.subf %406, %418 : vector<8x124xf32>
    %cst_209 = arith.constant 9.99999974E-6 : f32
    %420 = vector.broadcast %cst_209 : f32 to vector<8x1xf32>
    %421 = arith.addf %417, %420 : vector<8x1xf32>
    %422 = math.rsqrt %421 : vector<8x1xf32>
    %423 = vector.broadcast %422 : vector<8x1xf32> to vector<8x124xf32>
    %424 = arith.mulf %419, %423 : vector<8x124xf32>
    %c0_210 = arith.constant 0 : index
    %c0_211 = arith.constant 0 : index
    %425 = vector.load %arg10[%c0_210, %c0_211] : memref<1x124xf32, #tpu.memory_space<vmem>>, vector<1x124xf32>
    %426 = vector.broadcast %425 : vector<1x124xf32> to vector<8x124xf32>
    %427 = arith.mulf %424, %426 : vector<8x124xf32>
    %c0_212 = arith.constant 0 : index
    %c0_213 = arith.constant 0 : index
    %428 = vector.load %arg11[%c0_212, %c0_213] : memref<1x124xf32, #tpu.memory_space<vmem>>, vector<1x124xf32>
    %429 = vector.broadcast %428 : vector<1x124xf32> to vector<8x124xf32>
    %430 = arith.addf %427, %429 : vector<8x124xf32>
    %c0_214 = arith.constant 0 : index
    %c0_215 = arith.constant 0 : index
    %431 = vector.load %arg12[%c0_214, %c0_215] : memref<124x40xf32, #tpu.memory_space<vmem>>, vector<124x40xf32>
    %cst_216 = arith.constant dense<0.000000e+00> : vector<8x40xf32>
    %432 = tpu.matmul %430, %431, %cst_216 {dimension_numbers = #tpu.dot_dimension_numbers<[1], [0], [0], [1], [0, 0, 1, 1], [], []>} : vector<8x124xf32>, vector<124x40xf32>, vector<8x40xf32> -> vector<8x40xf32>
    %c0_217 = arith.constant 0 : index
    %c0_218 = arith.constant 0 : index
    %433 = vector.load %arg13[%c0_217, %c0_218] : memref<1x40xf32, #tpu.memory_space<vmem>>, vector<1x40xf32>
    %434 = vector.broadcast %433 : vector<1x40xf32> to vector<8x40xf32>
    %435 = arith.addf %432, %434 : vector<8x40xf32>
    %cst_219 = arith.constant 0.000000e+00 : f32
    %436 = vector.broadcast %cst_219 : f32 to vector<8x40xf32>
    %437 = arith.maximumf %435, %436 : vector<8x40xf32>
    %c0_220 = arith.constant 0 : index
    %c0_221 = arith.constant 0 : index
    %438 = vector.load %arg14[%c0_220, %c0_221] : memref<40x1xf32, #tpu.memory_space<vmem>>, vector<40x1xf32>
    %cst_222 = arith.constant dense<0.000000e+00> : vector<8x1xf32>
    %439 = tpu.matmul %437, %438, %cst_222 {dimension_numbers = #tpu.dot_dimension_numbers<[1], [0], [0], [1], [0, 0, 1, 1], [], []>} : vector<8x40xf32>, vector<40x1xf32>, vector<8x1xf32> -> vector<8x1xf32>
    %c0_223 = arith.constant 0 : index
    %c0_224 = arith.constant 0 : index
    %440 = vector.load %arg15[%c0_223, %c0_224] : memref<1x1xf32, #tpu.memory_space<vmem>>, vector<1x1xf32>
    %441 = vector.broadcast %440 : vector<1x1xf32> to vector<8x1xf32>
    %442 = arith.addf %439, %441 : vector<8x1xf32>
    %443 = math.tanh %442 : vector<8x1xf32>
    %c0_225 = arith.constant 0 : index
    %c0_226 = arith.constant 0 : index
    %444 = vector.load %arg16[%c0_225, %c0_226] : memref<8x1xf32, #tpu.memory_space<vmem>>, vector<8x1xf32>
    tpu.vector_store %arg16[%c0_225, %c0_226], %443 {strides = array<i32>} : memref<8x1xf32, #tpu.memory_space<vmem>>, vector<8x1xf32>,
    return
  }
}

</mosaic_0001>

<bundles_post_ra>
// kernel: classifier_lstm_forward.1
= control target key start
LH: loop header
LB: loop body
LE: loop exit
PB: predicated region body
PF: predicated region fallthrough
CT: control target
= control target key end

     0   :  { %s6882_s0 = inlined_call_operand.vmem [shape: bf16[64,32], index: 0, kind: input, shape index: {}]   ;;  %s6883_s1 = inlined_call_operand.vmem [shape: f32[8,20], index: 1, kind: input, shape index: {}]   ;;  %s6884_s2 = inlined_call_operand.hbm [shape: bf16[32,1024], index: 2, kind: input, shape index: {}]   ;;  %s6885_s3 = inlined_call_operand.hbm [shape: bf16[256,1024], index: 3, kind: input, shape index: {}]   ;;  %s6886_s4 = inlined_call_operand.hbm [shape: f32[1,1024], index: 4, kind: input, shape index: {}]   ;;  %s6887_s5 = inlined_call_operand.vmem [shape: f32[20,48], index: 5, kind: input, shape index: {}]   ;;  %s6888_s6 = inlined_call_operand.vmem [shape: f32[1,48], index: 6, kind: input, shape index: {}]   ;;  %s6889_s7 = inlined_call_operand.vmem [shape: f32[256,124], index: 7, kind: input, shape index: {}]   ;;  %s6890_s8 = inlined_call_operand.vmem [shape: f32[48,124], index: 8, kind: input, shape index: {}]   ;;  %s6891_s9 = inlined_call_operand.vmem [shape: f32[1,124], index: 9, kind: input, shape index: {}]   ;;  %s6892_s10 = inlined_call_operand.vmem [shape: f32[1,124], index: 10, kind: input, shape index: {}]   ;;  %s6893_s11 = inlined_call_operand.vmem [shape: f32[1,124], index: 11, kind: input, shape index: {}]   ;;  %s6894_s12 = inlined_call_operand.vmem [shape: f32[124,40], index: 12, kind: input, shape index: {}]   ;;  %s6895_s13 = inlined_call_operand.vmem [shape: f32[1,40], index: 13, kind: input, shape index: {}]   ;;  %s6896_s14 = inlined_call_operand.vmem [shape: f32[40,1], index: 14, kind: input, shape index: {}]   ;;  %s6897_s15 = inlined_call_operand.<no memory space> [shape: f32[1,1], index: 15, kind: input, shape index: {}]   ;;  %s6898_s16 = inlined_call_operand.vmem [shape: f32[8,1], index: 16, kind: output, shape index: {}]  }
   0x1   :  { %7169 = sst [smem:[#allocation210_spill]] %s6882_s0  ;;  %v21_v0 = vstv %s6897_s15 }
   0x2   :  { %22 = vst [vmem:[#allocation5] sm:$0x1] %v21_v0 }
   0x3   :  { %23 = vsyncpa [#allocation7], 0  ;;  %s33_s25 = sshll.u32 %s6884_s2, 4  ;;  %s34_s25 = int_to_ptr.hbm [resolvable:$true] %s33_s25 }
   0x4   :  { %24 = vsyncpa [#allocation9], 0  ;;  %s4759_s26 = smov [#allocation6]   ;;  %s47_s30 = sshll.u32 %s6886_s4, 4  ;;  %s48_s30 = int_to_ptr.hbm [resolvable:$true] %s47_s30 }
   0x5   :  { %s35_s27 = sshll.u32 %s4759_s26, 4  ;;  %s4760_s0 = smov 512   ;;  %s36_s27 = int_to_ptr.vmem [resolvable:$true] %s35_s27 }
   0x6   :  { %s4761_s17 = smov 32   ;;  %s4762_s15 = smov [#allocation8]  }
   0x7   :  { %41 = dma.hbm_to_vmem [thread:$0]  %s34_s25, 2048, %s36_s27, [#allocation7], %s4760_s0, %s4760_s0, %s4761_s17  }
   0x8   :  { %s49_s18 = sshll.u32 %s4762_s15, 4  ;;  %s50_s18 = int_to_ptr.vmem [resolvable:$true] %s49_s18 }
   0x9   :  { %52 = dma.hbm_to_vmem [thread:$0]  %s48_s30, 128, %s50_s18, [#allocation9]  }
   0xa   :  { %4753 = dma.done.wait [#allocation7], 2048  }
   0xb   :  { %4754 = vsyncadd [#allocation7], 4294965248 }
   0xc   :  { %4755 = dma.done.wait [#allocation9], 128  }
   0xd   :  { %4756 = vsyncadd [#allocation9], 4294967168  ;;  %v3773_v1 = vld [vmem:[#allocation6 + $0x40] sm:$0xf]  ;;  %v4366_v3 = vld [vmem:[#allocation6 + $0x44] sm:$0xf] }
   0xe   :  { %v4370_v2 = vld [vmem:[#allocation6 + $0x5c] sm:$0xf0]  ;;  %v3775_v5 = vld [vmem:[#allocation6 + $0x60] sm:$0xf0]  ;;  %v3781_v6 = vld [vmem:[#allocation6 + $0x48] sm:$0xf] }
   0xf   :  { %v3774_v4 = vor.u32 %v4370_v2, %v3773_v1  ;;  %v4371_v7 = vld [vmem:[#allocation6 + $0x64] sm:$0xf0]  ;;  %v3778_v8 = vor.u32 %v4366_v3, %v3775_v5  ;;  %v4367_v10 = vld [vmem:[#allocation6 + $0x4c] sm:$0xf]  ;;  %v3741_v12 = vld [vmem:[#allocation6] sm:$0xf] }
  0x10   :  { %v3782_v9 = vor.u32 %v4371_v7, %v3781_v6  ;;  %v3783_v11 = vld [vmem:[#allocation6 + $0x68] sm:$0xf0]  ;;  %v4362_v14 = vld [vmem:[#allocation6 + $0x1c] sm:$0xf0]  ;;  %v4358_v15 = vld [vmem:[#allocation6 + $0x4] sm:$0xf] }
  0x11   :  { %258 = vmatpush.bf16.msra.mxu0 %v3774_v4  ;;  %v3786_v13 = vor.u32 %v4367_v10, %v3783_v11  ;;  %v3743_v16 = vld [vmem:[#allocation6 + $0x20] sm:$0xf0]  ;;  %287 = vmatpush.bf16.msra.mxu1 %v3778_v8  ;;  %v3742_v17 = vor.u32 %v4362_v14, %v3741_v12  ;;  %v3749_v19 = vld [vmem:[#allocation6 + $0x8] sm:$0xf]  ;;  %v4359_v21 = vld [vmem:[#allocation6 + $0xc] sm:$0xf] }
  0x12   :  { %316 = vmatpush.bf16.msra.mxu2 %v3782_v9  ;;  %v3746_v18 = vor.u32 %v4358_v15, %v3743_v16  ;;  %v4363_v20 = vld [vmem:[#allocation6 + $0x24] sm:$0xf0]  ;;  %v3751_v23 = vld [vmem:[#allocation6 + $0x28] sm:$0xf0]  ;;  %s7170_s19 = sld [smem:[#allocation210_spill]]  ;;  %vm239_vm0 = vcmask 261120  }
  0x13   :  { %345 = vmatpush.bf16.msra.mxu3 %v3786_v13  ;;  %v3750_v22 = vor.u32 %v4363_v20, %v3749_v19  ;;  %v3789_v25 = vld [vmem:[#allocation6 + $0x50] sm:$0xf]  ;;  %v3754_v26 = vor.u32 %v4359_v21, %v3751_v23  ;;  %v3797_v28 = vld [vmem:[#allocation6 + $0x58] sm:$0xf]  ;;  %v4369_v32 = vld [vmem:[#allocation6 + $0x5c] sm:$0xf] }
  0x14   :  { %v4372_v27 = vld [vmem:[#allocation6 + $0x6c] sm:$0xf0]  ;;  %v4373_v29 = vld [vmem:[#allocation6 + $0x74] sm:$0xf0]  ;;  %v3799_v33 = vld [vmem:[#allocation6 + $0x78] sm:$0xf0] }
  0x15   :  { %259 = vmatpush.bf16.msra.mxu0 %v3742_v17  ;;  %v3790_v30 = vor.u32 %v4372_v27, %v3789_v25  ;;  %v3798_v31 = vor.u32 %v4373_v29, %v3797_v28  ;;  %v4368_v34 = vld [vmem:[#allocation6 + $0x54] sm:$0xf]  ;;  %288 = vmatpush.bf16.msra.mxu1 %v3746_v18  ;;  %v3802_v36 = vor.u32 %v4369_v32, %v3799_v33  ;;  %v3757_v38 = vld [vmem:[#allocation6 + $0x10] sm:$0xf]  ;;  %v3765_v40 = vld [vmem:[#allocation6 + $0x18] sm:$0xf] }
  0x16   :  { %317 = vmatpush.bf16.msra.mxu2 %v3750_v22  ;;  %v3791_v35 = vld [vmem:[#allocation6 + $0x70] sm:$0xf0]  ;;  %v4364_v39 = vld [vmem:[#allocation6 + $0x2c] sm:$0xf0]  ;;  %v4365_v42 = vld [vmem:[#allocation6 + $0x34] sm:$0xf0] }
  0x17   :  { %346 = vmatpush.bf16.msra.mxu3 %v3754_v26  ;;  %v3794_v37 = vor.u32 %v4368_v34, %v3791_v35  ;;  %v3758_v41 = vor.u32 %v4364_v39, %v3757_v38  ;;  %v4361_v43 = vld [vmem:[#allocation6 + $0x1c] sm:$0xf]  ;;  %v3766_v45 = vor.u32 %v4365_v42, %v3765_v40  ;;  %v4360_v47 = vld [vmem:[#allocation6 + $0x14] sm:$0xf]  ;;  %v551_v52 = vld [vmem:[%s6887_s5 + $0x10] sm:$0xf] }
  0x18   :  { %v4863_v24 = vld [vmem:[%s7170_s19] sm:$0xff]  ;;  %v3759_v48 = vld [vmem:[#allocation6 + $0x30] sm:$0xf0]  ;;  %v4355_v50 = vld [vmem:[%s7170_s19 + $0x8] sm:$0xff]  ;;  %vm560_vm1 = vcmask 1043456   ;;  %vm556_vm2 = vcmask 162816  }
  0x19   :  { %374 = vmatpush.bf16.msrb.mxu0 %v3790_v30  ;;  %3807 = vmatmul.msk.bf16.vlgmr.msra.gmra.mxu1 %vm239_vm0, %v4863_v24  ;;  %v3767_v44 = vld [vmem:[#allocation6 + $0x38] sm:$0xf0]  ;;  %v3762_v49 = vor.u32 %v4360_v47, %v3759_v48  ;;  %v4356_v51 = vld [vmem:[%s7170_s19 + $0x10] sm:$0xff]  ;;  %v550_v54 = vld [vmem:[%s6887_s5 + $0x8] sm:$0xff]  ;;  %s91_s2 = sshll.u32 %s6885_s3, 4  ;;  %s4763_s4 = smov [#allocation3]   ;;  %s92_s2 = int_to_ptr.hbm [resolvable:$true] %s91_s2 }
  0x1a   :  { %3803 = vmatmul.msk.bf16.vlgmr.msra.gmra.mxu0 %vm239_vm0, %v4863_v24  ;;  %432 = vmatpush.bf16.msrb.mxu2 %v3798_v31  ;;  %v3770_v46 = vor.u32 %v4361_v43, %v3767_v44  ;;  %v4357_v53 = vld [vmem:[%s7170_s19 + $0x18] sm:$0xff]  ;;  %v549_v55 = vld [vmem:[%s6887_s5] sm:$0xff]  ;;  %s93_s19 = sshll.u32 %s4763_s4, 4  ;;  %s94_s19 = int_to_ptr.vmem [resolvable:$true] %s93_s19 }
  0x1b   :  { %3811 = vmatmul.msk.bf16.vlgmr.msra.gmra.mxu2 %vm239_vm0, %v4863_v24  ;;  %3815 = vmatmul.msk.bf16.vlgmr.msra.gmra.mxu3 %vm239_vm0, %v4863_v24  ;;  %v4924_v56 = vld [vmem:[#allocation8] sm:$0xff]  ;;  %96 = dma.hbm_to_vmem [thread:$0]  %s92_s2, 16384, %s94_s19, [#allocation4] }
  0x1c   :  { %403 = vmatpush.bf16.msrb.mxu1 %v3794_v37  ;;  %461 = vmatpush.bf16.msrb.mxu3 %v3802_v36  ;;  %v4927_v57 = vperm.slane %v4924_v56, 0  ;;  %v4930_v58 = vperm.slane %v4924_v56, 1  ;;  %v548_v60 = vld [vmem:[%s6883_s1] sm:$0xff]  ;;  %v125_v0 = vperm.slane %v4924_v56, 2  ;;  %v4946_v1 = vperm.slane %v4924_v56, 3 }
  0x1d   :  { %375 = vmatpush.bf16.msrb.mxu0 %v3758_v41 }
  0x1e   :  { %433 = vmatpush.bf16.msrb.mxu2 %v3766_v45 }
  0x20   :  { %462 = vmatpush.bf16.msrb.mxu3 %v3770_v46  ;;  %404 = vmatpush.bf16.msrb.mxu1 %v3762_v49 }
  0x21   :  { %3835 = vmatpush.msk.msra.mxu0 %vm560_vm1, %v551_v52 }
  0x23   :  { %578 = vmatpush.msra.mxu0 %v550_v54 }
  0x25   :  { %579 = vmatpush.msra.mxu0 %v549_v55 }
  0x29   :  { %3808 = vmatmul.msk.bf16.gmra.mxu1 %vm239_vm0, %v4355_v50 }
  0x2a   :  { %3804 = vmatmul.msk.bf16.gmra.mxu0 %vm239_vm0, %v4355_v50 }
  0x2b   :  { %3812 = vmatmul.msk.bf16.gmra.mxu2 %vm239_vm0, %v4355_v50  ;;  %3816 = vmatmul.msk.bf16.gmra.mxu3 %vm239_vm0, %v4355_v50 }
  0x39   :  { %3809 = vmatmul.msk.bf16.gmra.mxu1 %vm239_vm0, %v4356_v51 }
  0x3a   :  { %3805 = vmatmul.msk.bf16.gmra.mxu0 %vm239_vm0, %v4356_v51 }
  0x3b   :  { %3813 = vmatmul.msk.bf16.gmra.mxu2 %vm239_vm0, %v4356_v51  ;;  %3817 = vmatmul.msk.bf16.gmra.mxu3 %vm239_vm0, %v4356_v51 }
  0x49   :  { %3810 = vmatmul.msk.bf16.gmra.mxu1 %vm239_vm0, %v4357_v53 }
  0x4a   :  { %3806 = vmatmul.msk.bf16.gmra.mxu0 %vm239_vm0, %v4357_v53 }
  0x4b   :  { %3814 = vmatmul.msk.bf16.gmra.mxu2 %vm239_vm0, %v4357_v53  ;;  %3818 = vmatmul.msk.bf16.gmra.mxu3 %vm239_vm0, %v4357_v53 }
  0x59   :  { %3823 = vmatmul.msk.bf16.vlgmr.msrb.gmra.mxu1 %vm239_vm0, %v4863_v24 }
  0x5a   :  { %3819 = vmatmul.msk.bf16.vlgmr.msrb.gmra.mxu0 %vm239_vm0, %v4863_v24 }
  0x5b   :  { %3827 = vmatmul.msk.bf16.vlgmr.msrb.gmra.mxu2 %vm239_vm0, %v4863_v24  ;;  %3831 = vmatmul.msk.bf16.vlgmr.msrb.gmra.mxu3 %vm239_vm0, %v4863_v24 }
  0x69   :  { %3824 = vmatmul.msk.bf16.gmra.mxu1 %vm239_vm0, %v4355_v50 }
  0x6a   :  { %3820 = vmatmul.msk.bf16.gmra.mxu0 %vm239_vm0, %v4355_v50 }
  0x6b   :  { %3828 = vmatmul.msk.bf16.gmra.mxu2 %vm239_vm0, %v4355_v50  ;;  %3832 = vmatmul.msk.bf16.gmra.mxu3 %vm239_vm0, %v4355_v50 }
  0x79   :  { %3825 = vmatmul.msk.bf16.gmra.mxu1 %vm239_vm0, %v4356_v51 }
  0x7a   :  { %3821 = vmatmul.msk.bf16.gmra.mxu0 %vm239_vm0, %v4356_v51 }
  0x7b   :  { %3829 = vmatmul.msk.bf16.gmra.mxu2 %vm239_vm0, %v4356_v51  ;;  %3833 = vmatmul.msk.bf16.gmra.mxu3 %vm239_vm0, %v4356_v51 }
  0x89   :  { %3826 = vmatmul.msk.bf16.gmra.mxu1 %vm239_vm0, %v4357_v53 }
  0x8a   :  { %3822 = vmatmul.msk.bf16.gmra.mxu0 %vm239_vm0, %v4357_v53 }
  0x8b   :  { %3830 = vmatmul.msk.bf16.gmra.mxu2 %vm239_vm0, %v4357_v53  ;;  %3834 = vmatmul.msk.bf16.gmra.mxu3 %vm239_vm0, %v4357_v53 }
  0x96   :  { %v290_v62 = vpop.f32.mrf.mxu1 }
  0x97   :  { %v261_v59 = vpop.f32.mrf.mxu0  ;;  %v4942_v63 = vadd.f32 %v290_v62, %v4930_v58  ;;  %v5026_v62 = vperm.slane %v4924_v56, 4 }
  0x98   :  { %v4936_v61 = vadd.f32 %v261_v59, %v4927_v57 }
  0x99   :  { %7172 = vst [vmem:[#allocation18_spill] sm:$0xff] %v4942_v63 }
  0x9a   :  { %7171 = vst [vmem:[#allocation17_spill] sm:$0xff] %v4936_v61  ;;  %3836 = vmatmul.msk.f32.vlgmr.msra.gmra.mxu0 %vm556_vm2, %v548_v60 }
  0x9e   :  { %v319_v2 = vpop.f32.mrf.mxu2  ;;  %v348_v4 = vpop.f32.mrf.mxu3 }
  0x9f   :  { %v4948_v3 = vadd.f32 %v319_v2, %v125_v0  ;;  %v263_v5 = vpop.f32.mrf.mxu0  ;;  %v4951_v6 = vadd.f32 %v348_v4, %v4946_v1  ;;  %v292_v8 = vpop.f32.mrf.mxu1  ;;  %v5029_v2 = vperm.slane %v4924_v56, 5 }
  0xa0   :  { %v4954_v7 = vadd.f32 %v263_v5, %v4927_v57  ;;  %v4957_v9 = vadd.f32 %v292_v8, %v4930_v58 }
  0xa1   :  { %7173 = vst [vmem:[#allocation19_spill] sm:$0xff] %v4948_v3 }
  0xa2   :  { %7174 = vst [vmem:[#allocation20_spill] sm:$0xff] %v4951_v6 }
  0xa3   :  { %7175 = vst [vmem:[#allocation21_spill] sm:$0xff] %v4954_v7 }
  0xa4   :  { %7176 = vst [vmem:[#allocation22_spill] sm:$0xff] %v4957_v9 }
  0xa6   :  { %v321_v10 = vpop.f32.mrf.mxu2  ;;  %v350_v12 = vpop.f32.mrf.mxu3 }
  0xa7   :  { %v4959_v11 = vadd.f32 %v321_v10, %v125_v0  ;;  %v266_v13 = vpop.f32.mrf.mxu0  ;;  %v4962_v14 = vadd.f32 %v350_v12, %v4946_v1  ;;  %v295_v16 = vpop.f32.mrf.mxu1 }
  0xa8   :  { %v4965_v15 = vadd.f32 %v266_v13, %v4927_v57  ;;  %v4968_v17 = vadd.f32 %v295_v16, %v4930_v58  ;;  %v129_v16 = vperm.slane %v4924_v56, 6 }
  0xa9   :  { %7177 = vst [vmem:[#allocation23_spill] sm:$0xff] %v4959_v11 }
  0xaa   :  { %7178 = vst [vmem:[#allocation24_spill] sm:$0xff] %v4962_v14 }
  0xab   :  { %7179 = vst [vmem:[#allocation25_spill] sm:$0xff] %v4965_v15 }
  0xac   :  { %7180 = vst [vmem:[#allocation26_spill] sm:$0xff] %v4968_v17 }
  0xae   :  { %v324_v18 = vpop.f32.mrf.mxu2  ;;  %v353_v20 = vpop.f32.mrf.mxu3 }
  0xaf   :  { %v4970_v19 = vadd.f32 %v324_v18, %v125_v0  ;;  %v268_v21 = vpop.f32.mrf.mxu0  ;;  %v4973_v22 = vadd.f32 %v353_v20, %v4946_v1  ;;  %v297_v24 = vpop.f32.mrf.mxu1  ;;  %v130_v18 = vperm.slane %v4924_v56, 7 }
  0xb0   :  { %v4976_v23 = vadd.f32 %v268_v21, %v4927_v57  ;;  %v4979_v25 = vadd.f32 %v297_v24, %v4930_v58 }
  0xb1   :  { %7181 = vst [vmem:[#allocation27_spill] sm:$0xff] %v4970_v19 }
  0xb2   :  { %7182 = vst [vmem:[#allocation28_spill] sm:$0xff] %v4973_v22 }
  0xb3   :  { %7183 = vst [vmem:[#allocation29_spill] sm:$0xff] %v4976_v23 }
  0xb4   :  { %7184 = vst [vmem:[#allocation30_spill] sm:$0xff] %v4979_v25 }
  0xb6   :  { %v326_v26 = vpop.f32.mrf.mxu2  ;;  %v355_v28 = vpop.f32.mrf.mxu3 }
  0xb7   :  { %v4981_v27 = vadd.f32 %v326_v26, %v125_v0  ;;  %v271_v29 = vpop.f32.mrf.mxu0  ;;  %v4984_v30 = vadd.f32 %v355_v28, %v4946_v1  ;;  %v300_v32 = vpop.f32.mrf.mxu1 }
  0xb8   :  { %v4987_v31 = vadd.f32 %v271_v29, %v4927_v57  ;;  %v4990_v33 = vadd.f32 %v300_v32, %v4930_v58 }
  0xb9   :  { %7185 = vst [vmem:[#allocation31_spill] sm:$0xff] %v4981_v27 }
  0xba   :  { %7186 = vst [vmem:[#allocation32_spill] sm:$0xff] %v4984_v30 }
  0xbb   :  { %7187 = vst [vmem:[#allocation33_spill] sm:$0xff] %v4987_v31 }
  0xbc   :  { %7188 = vst [vmem:[#allocation34_spill] sm:$0xff] %v4990_v33 }
  0xbe   :  { %v329_v34 = vpop.f32.mrf.mxu2  ;;  %v358_v36 = vpop.f32.mrf.mxu3 }
  0xbf   :  { %v4992_v35 = vadd.f32 %v329_v34, %v125_v0  ;;  %v273_v37 = vpop.f32.mrf.mxu0  ;;  %v4995_v38 = vadd.f32 %v358_v36, %v4946_v1  ;;  %v302_v40 = vpop.f32.mrf.mxu1 }
  0xc0   :  { %v4998_v39 = vadd.f32 %v273_v37, %v4927_v57  ;;  %v5001_v41 = vadd.f32 %v302_v40, %v4930_v58 }
  0xc1   :  { %7189 = vst [vmem:[#allocation35_spill] sm:$0xff] %v4992_v35 }
  0xc2   :  { %7190 = vst [vmem:[#allocation36_spill] sm:$0xff] %v4995_v38 }
  0xc3   :  { %7191 = vst [vmem:[#allocation37_spill] sm:$0xff] %v4998_v39 }
  0xc4   :  { %7192 = vst [vmem:[#allocation38_spill] sm:$0xff] %v5001_v41 }
  0xc6   :  { %v331_v42 = vpop.f32.mrf.mxu2  ;;  %v360_v44 = vpop.f32.mrf.mxu3 }
  0xc7   :  { %v5003_v43 = vadd.f32 %v331_v42, %v125_v0  ;;  %v276_v45 = vpop.f32.mrf.mxu0  ;;  %v5006_v46 = vadd.f32 %v360_v44, %v4946_v1  ;;  %v305_v48 = vpop.f32.mrf.mxu1 }
  0xc8   :  { %v5009_v47 = vadd.f32 %v276_v45, %v4927_v57  ;;  %v5012_v49 = vadd.f32 %v305_v48, %v4930_v58 }
  0xc9   :  { %7193 = vst [vmem:[#allocation39_spill] sm:$0xff] %v5003_v43 }
  0xca   :  { %7194 = vst [vmem:[#allocation40_spill] sm:$0xff] %v5006_v46 }
  0xcb   :  { %7195 = vst [vmem:[#allocation41_spill] sm:$0xff] %v5009_v47 }
  0xcc   :  { %7196 = vst [vmem:[#allocation42_spill] sm:$0xff] %v5012_v49 }
  0xce   :  { %v334_v50 = vpop.f32.mrf.mxu2  ;;  %v363_v52 = vpop.f32.mrf.mxu3 }
  0xcf   :  { %v5014_v51 = vadd.f32 %v334_v50, %v125_v0  ;;  %v278_v53 = vpop.f32.mrf.mxu0  ;;  %v5017_v54 = vadd.f32 %v363_v52, %v4946_v1  ;;  %v307_v59 = vpop.f32.mrf.mxu1 }
  0xd0   :  { %v5020_v55 = vadd.f32 %v278_v53, %v4927_v57  ;;  %v5023_v60 = vadd.f32 %v307_v59, %v4930_v58 }
  0xd1   :  { %7197 = vst [vmem:[#allocation43_spill] sm:$0xff] %v5014_v51 }
  0xd2   :  { %7198 = vst [vmem:[#allocation44_spill] sm:$0xff] %v5017_v54 }
  0xd3   :  { %7199 = vst [vmem:[#allocation45_spill] sm:$0xff] %v5020_v55 }
  0xd4   :  { %7200 = vst [vmem:[#allocation46_spill] sm:$0xff] %v5023_v60 }
  0xd6   :  { %v336_v4 = vpop.f32.mrf.mxu2  ;;  %v365_v8 = vpop.f32.mrf.mxu3 }
  0xd7   :  { %v5031_v5 = vadd.f32 %v336_v4, %v125_v0  ;;  %v377_v10 = vpop.f32.mrf.mxu0  ;;  %v5034_v12 = vadd.f32 %v365_v8, %v4946_v1  ;;  %v406_v13 = vpop.f32.mrf.mxu1 }
  0xd8   :  { %v5037_v57 = vadd.f32 %v377_v10, %v5026_v62  ;;  %v5040_v58 = vadd.f32 %v406_v13, %v5029_v2 }
  0xd9   :  { %7201 = vst [vmem:[#allocation47_spill] sm:$0xff] %v5031_v5 }
  0xda   :  { %7202 = vst [vmem:[#allocation48_spill] sm:$0xff] %v5034_v12 }
  0xdb   :  { %7203 = vst [vmem:[#allocation49_spill] sm:$0xff] %v5037_v57 }
  0xdc   :  { %7204 = vst [vmem:[#allocation50_spill] sm:$0xff] %v5040_v58 }
  0xde   :  { %v435_v20 = vpop.f32.mrf.mxu2  ;;  %v464_v0 = vpop.f32.mrf.mxu3 }
  0xdf   :  { %v5044_v21 = vadd.f32 %v435_v20, %v129_v16  ;;  %v379_v24 = vpop.f32.mrf.mxu0  ;;  %v5046_v26 = vadd.f32 %v464_v0, %v130_v18  ;;  %v408_v28 = vpop.f32.mrf.mxu1 }
  0xe0   :  { %v5049_v1 = vadd.f32 %v379_v24, %v5026_v62  ;;  %v5052_v29 = vadd.f32 %v408_v28, %v5029_v2 }
  0xe1   :  { %7205 = vst [vmem:[#allocation51_spill] sm:$0xff] %v5044_v21 }
  0xe2   :  { %7206 = vst [vmem:[#allocation52_spill] sm:$0xff] %v5046_v26 }
  0xe3   :  { %7207 = vst [vmem:[#allocation53_spill] sm:$0xff] %v5049_v1 }
  0xe4   :  { %7208 = vst [vmem:[#allocation54_spill] sm:$0xff] %v5052_v29 }
  0xe6   :  { %v437_v32 = vpop.f32.mrf.mxu2  ;;  %v466_v36 = vpop.f32.mrf.mxu3 }
  0xe7   :  { %v5054_v34 = vadd.f32 %v437_v32, %v129_v16  ;;  %v382_v37 = vpop.f32.mrf.mxu0  ;;  %v5056_v56 = vadd.f32 %v466_v36, %v130_v18  ;;  %v411_v42 = vpop.f32.mrf.mxu1 }
  0xe8   :  { %v5059_v40 = vadd.f32 %v382_v37, %v5026_v62  ;;  %v5062_v44 = vadd.f32 %v411_v42, %v5029_v2 }
  0xe9   :  { %7209 = vst [vmem:[#allocation55_spill] sm:$0xff] %v5054_v34 }
  0xea   :  { %7210 = vst [vmem:[#allocation56_spill] sm:$0xff] %v5056_v56 }
  0xeb   :  { %7211 = vst [vmem:[#allocation57_spill] sm:$0xff] %v5059_v40 }
  0xec   :  { %7212 = vst [vmem:[#allocation58_spill] sm:$0xff] %v5062_v44 }
  0xee   :  { %v440_v45 = vpop.f32.mrf.mxu2  ;;  %v469_v50 = vpop.f32.mrf.mxu3 }
  0xef   :  { %v5064_v48 = vadd.f32 %v440_v45, %v129_v16  ;;  %v384_v52 = vpop.f32.mrf.mxu0  ;;  %v5066_v53 = vadd.f32 %v469_v50, %v130_v18  ;;  %v413_v4 = vpop.f32.mrf.mxu1 }
  0xf0   :  { %v5069_v59 = vadd.f32 %v384_v52, %v5026_v62  ;;  %v5072_v8 = vadd.f32 %v413_v4, %v5029_v2 }
  0xf1   :  { %7213 = vst [vmem:[#allocation59_spill] sm:$0xff] %v5064_v48 }
  0xf2   :  { %7214 = vst [vmem:[#allocation60_spill] sm:$0xff] %v5066_v53 }
  0xf3   :  { %7215 = vst [vmem:[#allocation61_spill] sm:$0xff] %v5069_v59 }
  0xf4   :  { %7216 = vst [vmem:[#allocation62_spill] sm:$0xff] %v5072_v8 }
  0xf6   :  { %v442_v10 = vpop.f32.mrf.mxu2  ;;  %v471_v20 = vpop.f32.mrf.mxu3 }
  0xf7   :  { %v5074_v13 = vadd.f32 %v442_v10, %v129_v16  ;;  %v387_v0 = vpop.f32.mrf.mxu0  ;;  %v5076_v24 = vadd.f32 %v471_v20, %v130_v18  ;;  %v416_v32 = vpop.f32.mrf.mxu1 }
  0xf8   :  { %v5079_v28 = vadd.f32 %v387_v0, %v5026_v62  ;;  %v5082_v36 = vadd.f32 %v416_v32, %v5029_v2 }
  0xf9   :  { %7217 = vst [vmem:[#allocation63_spill] sm:$0xff] %v5074_v13 }
  0xfa   :  { %7218 = vst [vmem:[#allocation64_spill] sm:$0xff] %v5076_v24 }
  0xfb   :  { %7219 = vst [vmem:[#allocation65_spill] sm:$0xff] %v5079_v28 }
  0xfc   :  { %7220 = vst [vmem:[#allocation66_spill] sm:$0xff] %v5082_v36 }
  0xfe   :  { %v445_v37 = vpop.f32.mrf.mxu2  ;;  %v474_v45 = vpop.f32.mrf.mxu3 }
  0xff   :  { %v5084_v42 = vadd.f32 %v445_v37, %v129_v16  ;;  %v389_v50 = vpop.f32.mrf.mxu0  ;;  %v5086_v52 = vadd.f32 %v474_v45, %v130_v18  ;;  %v418_v10 = vpop.f32.mrf.mxu1 }
 0x100   :  { %v5089_v4 = vadd.f32 %v389_v50, %v5026_v62  ;;  %v5092_v20 = vadd.f32 %v418_v10, %v5029_v2 }
 0x101   :  { %7221 = vst [vmem:[#allocation67_spill] sm:$0xff] %v5084_v42 }
 0x102   :  { %7222 = vst [vmem:[#allocation68_spill] sm:$0xff] %v5086_v52 }
 0x103   :  { %7223 = vst [vmem:[#allocation69_spill] sm:$0xff] %v5089_v4 }
 0x104   :  { %7224 = vst [vmem:[#allocation70_spill] sm:$0xff] %v5092_v20 }
 0x106   :  { %v447_v0 = vpop.f32.mrf.mxu2  ;;  %v476_v5 = vpop.f32.mrf.mxu3 }
 0x107   :  { %v5094_v12 = vadd.f32 %v447_v0, %v129_v16  ;;  %v392_v32 = vpop.f32.mrf.mxu0  ;;  %v5096_v55 = vadd.f32 %v476_v5, %v130_v18  ;;  %v421_v60 = vpop.f32.mrf.mxu1 }
 0x108   :  { %v5099_v37 = vadd.f32 %v392_v32, %v5026_v62  ;;  %v5102_v45 = vadd.f32 %v421_v60, %v5029_v2  ;;  %v4509_v32 = vld [vmem:[%s6888_s6] ss:$0 sm:$0xff] }
 0x109   :  { %7225 = vst [vmem:[#allocation71_spill] sm:$0xff] %v5094_v12 }
 0x10a   :  { %7226 = vst [vmem:[#allocation72_spill] sm:$0xff] %v5096_v55 }
 0x10b   :  { %7227 = vst [vmem:[#allocation73_spill] sm:$0xff] %v5099_v37 }
 0x10c   :  { %7228 = vst [vmem:[#allocation74_spill] sm:$0xff] %v5102_v45 }
 0x10e   :  { %v450_v50 = vpop.f32.mrf.mxu2  ;;  %v479_v51 = vpop.f32.mrf.mxu3 }
 0x10f   :  { %v5104_v54 = vadd.f32 %v450_v50, %v129_v16  ;;  %v394_v10 = vpop.f32.mrf.mxu0  ;;  %v5106_v47 = vadd.f32 %v479_v51, %v130_v18  ;;  %v423_v49 = vpop.f32.mrf.mxu1 }
 0x110   :  { %v5109_v0 = vadd.f32 %v394_v10, %v5026_v62  ;;  %v5112_v5 = vadd.f32 %v423_v49, %v5029_v2 }
 0x111   :  { %7229 = vst [vmem:[#allocation75_spill] sm:$0xff] %v5104_v54 }
 0x112   :  { %7230 = vst [vmem:[#allocation76_spill] sm:$0xff] %v5106_v47 }
 0x113   :  { %7231 = vst [vmem:[#allocation77_spill] sm:$0xff] %v5109_v0 }
 0x114   :  { %7232 = vst [vmem:[#allocation78_spill] sm:$0xff] %v5112_v5 }
 0x116   :  { %v452_v60 = vpop.f32.mrf.mxu2  ;;  %v481_v50 = vpop.f32.mrf.mxu3 }
 0x117   :  { %v5117_v45 = vadd.f32 %v452_v60, %v129_v16  ;;  %v581_v54 = vpop.f32.mrf.mxu0  ;;  %v5119_v37 = vadd.f32 %v481_v50, %v130_v18 }
 0x118   :  { %v5121_v51 = vadd.f32 %v4509_v32, %v581_v54 }
 0x119   :  { %7233 = vst [vmem:[#allocation79_spill] sm:$0xff] %v5117_v45 }
 0x11a   :  { %7234 = vst [vmem:[#allocation80_spill] sm:$0xff] %v5119_v37 }
 0x11b   :  { %7235 = vst [vmem:[#allocation81_spill] sm:$0xff] %v5121_v51 }
 0x11c   :  { %4757 = dma.done.wait [#allocation4], 16384 }
 0x11d   :  { %4758 = vsyncadd [#allocation4], 4294950912  ;;  %v3895_v62 = vld [vmem:[#allocation3 + $0x1c0] sm:$0xf]  ;;  %v4388_v5 = vld [vmem:[#allocation3 + $0x1c4] sm:$0xf] }
 0x11e   :  { %v4389_v10 = vld [vmem:[#allocation3 + $0x1dc] sm:$0xf0]  ;;  %v3897_v47 = vld [vmem:[#allocation3 + $0x1e0] sm:$0xf0]  ;;  %v4023_v44 = vld [vmem:[#allocation3 + $0x1c8] sm:$0xf] }
 0x11f   :  { %v3959_v0 = vld [vmem:[#allocation3 + $0x3c0] sm:$0xf]  ;;  %v5123_v49 = vor.u32 %v4389_v10, %v3895_v62  ;;  %v5127_v16 = vor.u32 %v4388_v5, %v3897_v47  ;;  %v4404_v60 = vld [vmem:[#allocation3 + $0x3c4] sm:$0xf]  ;;  %v4421_v40 = vld [vmem:[#allocation3 + $0x1e4] sm:$0xf0] }
 0x120   :  { %v4405_v2 = vld [vmem:[#allocation3 + $0x3dc] sm:$0xf0]  ;;  %v3961_v45 = vld [vmem:[#allocation3 + $0x3e0] sm:$0xf0]  ;;  %v4087_v22 = vld [vmem:[#allocation3 + $0x3c8] sm:$0xf]  ;;  %v5215_v56 = vor.u32 %v4421_v40, %v4023_v44 }
 0x121   :  { %7236 = vst [vmem:[#allocation82_spill] sm:$0xff] %v5123_v49  ;;  %v5125_v55 = vor.u32 %v4405_v2, %v3959_v0  ;;  %v3887_v18 = vld [vmem:[#allocation3 + $0x180] sm:$0xf]  ;;  %791 = vmatpush.bf16.msra.mxu1 %v5123_v49  ;;  %v5130_v54 = vor.u32 %v4404_v60, %v3961_v45  ;;  %817 = vmatpush.bf16.msra.mxu3 %v5127_v16  ;;  %v4386_v47 = vld [vmem:[#allocation3 + $0x184] sm:$0xf]  ;;  %vm3512_vm3 = vcmask 392192  }
 0x122   :  { %7238 = vst [vmem:[#allocation84_spill] sm:$0xff] %v5127_v16  ;;  %v4387_v32 = vld [vmem:[#allocation3 + $0x19c] sm:$0xf0]  ;;  %v3889_v5 = vld [vmem:[#allocation3 + $0x1a0] sm:$0xf0]  ;;  %vm3581_vm4 = vcmask 1014784  }
 0x123   :  { %7237 = vst [vmem:[#allocation83_spill] sm:$0xff] %v5125_v55  ;;  %v3951_v50 = vld [vmem:[#allocation3 + $0x380] sm:$0xf]  ;;  %804 = vmatpush.bf16.msra.mxu2 %v5125_v55  ;;  %v5134_v62 = vor.u32 %v4387_v32, %v3887_v18  ;;  %v4402_v10 = vld [vmem:[#allocation3 + $0x384] sm:$0xf]  ;;  %830 = vmatpush.bf16.msrb.mxu0 %v5130_v54  ;;  %v5139_v2 = vor.u32 %v4386_v47, %v3889_v5  ;;  %vm3677_vm9 = vcmask 326656  }
 0x124   :  { %7239 = vst [vmem:[#allocation85_spill] sm:$0xff] %v5130_v54  ;;  %v4403_v37 = vld [vmem:[#allocation3 + $0x39c] sm:$0xf0]  ;;  %v3953_v45 = vld [vmem:[#allocation3 + $0x3a0] sm:$0xf0]  ;;  %vm3702_vm10 = vcmask 7168  }
 0x125   :  { %7240 = vst [vmem:[#allocation86_spill] sm:$0xff] %v5134_v62  ;;  %v5136_v0 = vor.u32 %v4403_v37, %v3951_v50  ;;  %v3879_v60 = vld [vmem:[#allocation3 + $0x140] sm:$0xf]  ;;  %v5141_v12 = vor.u32 %v4402_v10, %v3953_v45  ;;  %v4384_v46 = vld [vmem:[#allocation3 + $0x144] sm:$0xf]  ;;  %792 = vmatpush.bf16.msra.mxu1 %v5134_v62  ;;  %818 = vmatpush.bf16.msra.mxu3 %v5139_v2 }
 0x126   :  { %7242 = vst [vmem:[#allocation88_spill] sm:$0xff] %v5139_v2  ;;  %v4385_v51 = vld [vmem:[#allocation3 + $0x15c] sm:$0xf0]  ;;  %v3881_v37 = vld [vmem:[#allocation3 + $0x160] sm:$0xf0] }
 0x127   :  { %7241 = vst [vmem:[#allocation87_spill] sm:$0xff] %v5136_v0  ;;  %v3943_v20 = vld [vmem:[#allocation3 + $0x340] sm:$0xf]  ;;  %v5144_v18 = vor.u32 %v4385_v51, %v3879_v60  ;;  %v4400_v32 = vld [vmem:[#allocation3 + $0x344] sm:$0xf]  ;;  %805 = vmatpush.bf16.msra.mxu2 %v5136_v0  ;;  %v5150_v5 = vor.u32 %v4384_v46, %v3881_v37  ;;  %831 = vmatpush.bf16.msrb.mxu0 %v5141_v12 }
 0x128   :  { %7243 = vst [vmem:[#allocation89_spill] sm:$0xff] %v5141_v12  ;;  %v4401_v4 = vld [vmem:[#allocation3 + $0x35c] sm:$0xf0]  ;;  %v3945_v50 = vld [vmem:[#allocation3 + $0x360] sm:$0xf0] }
 0x129   :  { %7244 = vst [vmem:[#allocation90_spill] sm:$0xff] %v5144_v18  ;;  %v5148_v47 = vor.u32 %v4401_v4, %v3943_v20  ;;  %v3871_v10 = vld [vmem:[#allocation3 + $0x100] sm:$0xf]  ;;  %v5153_v39 = vor.u32 %v4400_v32, %v3945_v50  ;;  %v4382_v60 = vld [vmem:[#allocation3 + $0x104] sm:$0xf]  ;;  %793 = vmatpush.bf16.msra.mxu1 %v5144_v18  ;;  %819 = vmatpush.bf16.msra.mxu3 %v5150_v5 }
 0x12a   :  { %7246 = vst [vmem:[#allocation92_spill] sm:$0xff] %v5150_v5  ;;  %v4383_v45 = vld [vmem:[#allocation3 + $0x11c] sm:$0xf0]  ;;  %v3873_v41 = vld [vmem:[#allocation3 + $0x120] sm:$0xf0] }
 0x12b   :  { %7245 = vst [vmem:[#allocation91_spill] sm:$0xff] %v5148_v47  ;;  %v3935_v43 = vld [vmem:[#allocation3 + $0x300] sm:$0xf]  ;;  %v4398_v52 = vld [vmem:[#allocation3 + $0x304] sm:$0xf]  ;;  %v5156_v36 = vor.u32 %v4383_v45, %v3871_v10  ;;  %806 = vmatpush.bf16.msra.mxu2 %v5148_v47  ;;  %v5162_v4 = vor.u32 %v4382_v60, %v3873_v41  ;;  %832 = vmatpush.bf16.msrb.mxu0 %v5153_v39 }
 0x12c   :  { %7247 = vst [vmem:[#allocation93_spill] sm:$0xff] %v5153_v39  ;;  %v4399_v51 = vld [vmem:[#allocation3 + $0x31c] sm:$0xf0]  ;;  %v3937_v42 = vld [vmem:[#allocation3 + $0x320] sm:$0xf0] }
 0x12d   :  { %7248 = vst [vmem:[#allocation94_spill] sm:$0xff] %v5156_v36  ;;  %v5160_v46 = vor.u32 %v4399_v51, %v3935_v43  ;;  %v3863_v20 = vld [vmem:[#allocation3 + $0xc0] sm:$0xf]  ;;  %v5165_v50 = vor.u32 %v4398_v52, %v3937_v42  ;;  %v4380_v38 = vld [vmem:[#allocation3 + $0xc4] sm:$0xf]  ;;  %794 = vmatpush.bf16.msra.mxu1 %v5156_v36  ;;  %820 = vmatpush.bf16.msra.mxu3 %v5162_v4 }
 0x12e   :  { %7250 = vst [vmem:[#allocation96_spill] sm:$0xff] %v5162_v4  ;;  %v4381_v37 = vld [vmem:[#allocation3 + $0xdc] sm:$0xf0]  ;;  %v3865_v35 = vld [vmem:[#allocation3 + $0xe0] sm:$0xf0] }
 0x12f   :  { %7249 = vst [vmem:[#allocation95_spill] sm:$0xff] %v5160_v46  ;;  %v3927_v32 = vld [vmem:[#allocation3 + $0x2c0] sm:$0xf]  ;;  %v4396_v10 = vld [vmem:[#allocation3 + $0x2c4] sm:$0xf]  ;;  %v5168_v31 = vor.u32 %v4381_v37, %v3863_v20  ;;  %807 = vmatpush.bf16.msra.mxu2 %v5160_v46  ;;  %v5174_v43 = vor.u32 %v4380_v38, %v3865_v35  ;;  %833 = vmatpush.bf16.msrb.mxu0 %v5165_v50 }
 0x130   :  { %7251 = vst [vmem:[#allocation97_spill] sm:$0xff] %v5165_v50  ;;  %v4397_v28 = vld [vmem:[#allocation3 + $0x2dc] sm:$0xf0]  ;;  %v3929_v45 = vld [vmem:[#allocation3 + $0x2e0] sm:$0xf0] }
 0x131   :  { %7252 = vst [vmem:[#allocation98_spill] sm:$0xff] %v5168_v31  ;;  %v5172_v41 = vor.u32 %v4397_v28, %v3927_v32  ;;  %v3855_v51 = vld [vmem:[#allocation3 + $0x80] sm:$0xf]  ;;  %v5177_v60 = vor.u32 %v4396_v10, %v3929_v45  ;;  %v4378_v24 = vld [vmem:[#allocation3 + $0x84] sm:$0xf]  ;;  %795 = vmatpush.bf16.msra.mxu1 %v5168_v31  ;;  %821 = vmatpush.bf16.msra.mxu3 %v5174_v43 }
 0x132   :  { %7254 = vst [vmem:[#allocation100_spill] sm:$0xff] %v5174_v43  ;;  %v4379_v42 = vld [vmem:[#allocation3 + $0x9c] sm:$0xf0]  ;;  %v3857_v13 = vld [vmem:[#allocation3 + $0xa0] sm:$0xf0] }
 0x133   :  { %7253 = vst [vmem:[#allocation99_spill] sm:$0xff] %v5172_v41  ;;  %v3919_v52 = vld [vmem:[#allocation3 + $0x280] sm:$0xf]  ;;  %v4394_v20 = vld [vmem:[#allocation3 + $0x284] sm:$0xf]  ;;  %v5180_v8 = vor.u32 %v4379_v42, %v3855_v51  ;;  %808 = vmatpush.bf16.msra.mxu2 %v5172_v41  ;;  %v5186_v38 = vor.u32 %v4378_v24, %v3857_v13  ;;  %834 = vmatpush.bf16.msrb.mxu0 %v5177_v60 }
 0x134   :  { %7255 = vst [vmem:[#allocation101_spill] sm:$0xff] %v5177_v60  ;;  %v4395_v33 = vld [vmem:[#allocation3 + $0x29c] sm:$0xf0]  ;;  %v3921_v37 = vld [vmem:[#allocation3 + $0x2a0] sm:$0xf0] }
 0x135   :  { %7256 = vst [vmem:[#allocation102_spill] sm:$0xff] %v5180_v8  ;;  %v5184_v35 = vor.u32 %v4395_v33, %v3919_v52  ;;  %v3847_v28 = vld [vmem:[#allocation3 + $0x40] sm:$0xf]  ;;  %v5189_v45 = vor.u32 %v4394_v20, %v3921_v37  ;;  %v4376_v30 = vld [vmem:[#allocation3 + $0x44] sm:$0xf]  ;;  %796 = vmatpush.bf16.msra.mxu1 %v5180_v8  ;;  %822 = vmatpush.bf16.msra.mxu3 %v5186_v38 }
 0x136   :  { %7258 = vst [vmem:[#allocation104_spill] sm:$0xff] %v5186_v38  ;;  %v4377_v32 = vld [vmem:[#allocation3 + $0x5c] sm:$0xf0]  ;;  %v3849_v27 = vld [vmem:[#allocation3 + $0x60] sm:$0xf0] }
 0x137   :  { %7257 = vst [vmem:[#allocation103_spill] sm:$0xff] %v5184_v35  ;;  %v3911_v10 = vld [vmem:[#allocation3 + $0x240] sm:$0xf]  ;;  %v4392_v51 = vld [vmem:[#allocation3 + $0x244] sm:$0xf]  ;;  %v5192_v23 = vor.u32 %v4377_v32, %v3847_v28  ;;  %809 = vmatpush.bf16.msra.mxu2 %v5184_v35  ;;  %v5198_v24 = vor.u32 %v4376_v30, %v3849_v27  ;;  %835 = vmatpush.bf16.msrb.mxu0 %v5189_v45 }
 0x138   :  { %7259 = vst [vmem:[#allocation105_spill] sm:$0xff] %v5189_v45  ;;  %v4393_v59 = vld [vmem:[#allocation3 + $0x25c] sm:$0xf0]  ;;  %v3913_v42 = vld [vmem:[#allocation3 + $0x260] sm:$0xf0] }
 0x139   :  { %7260 = vst [vmem:[#allocation106_spill] sm:$0xff] %v5192_v23  ;;  %v3839_v33 = vld [vmem:[#allocation3] sm:$0xf]  ;;  %v5196_v13 = vor.u32 %v4393_v59, %v3911_v10  ;;  %v4374_v25 = vld [vmem:[#allocation3 + $0x4] sm:$0xf]  ;;  %v5201_v53 = vor.u32 %v4392_v51, %v3913_v42  ;;  %797 = vmatpush.bf16.msra.mxu1 %v5192_v23  ;;  %823 = vmatpush.bf16.msra.mxu3 %v5198_v24 }
 0x13a   :  { %v4375_v52 = vld [vmem:[#allocation3 + $0x1c] sm:$0xf0]  ;;  %7262 = vst [vmem:[#allocation108_spill] sm:$0xff] %v5198_v24  ;;  %v3841_v48 = vld [vmem:[#allocation3 + $0x20] sm:$0xf0] }
 0x13b   :  { %7261 = vst [vmem:[#allocation107_spill] sm:$0xff] %v5196_v13  ;;  %v3903_v20 = vld [vmem:[#allocation3 + $0x200] sm:$0xf]  ;;  %v4390_v28 = vld [vmem:[#allocation3 + $0x204] sm:$0xf]  ;;  %v5204_v19 = vor.u32 %v4375_v52, %v3839_v33  ;;  %810 = vmatpush.bf16.msra.mxu2 %v5196_v13  ;;  %v5210_v51 = vor.u32 %v4374_v25, %v3841_v48  ;;  %836 = vmatpush.bf16.msrb.mxu0 %v5201_v53 }
 0x13c   :  { %v4391_v37 = vld [vmem:[#allocation3 + $0x21c] sm:$0xf0]  ;;  %7263 = vst [vmem:[#allocation109_spill] sm:$0xff] %v5201_v53  ;;  %v3905_v32 = vld [vmem:[#allocation3 + $0x220] sm:$0xf0] }
 0x13d   :  { %7264 = vst [vmem:[#allocation110_spill] sm:$0xff] %v5204_v19  ;;  %v4437_v59 = vld [vmem:[#allocation3 + $0x3e4] sm:$0xf0]  ;;  %v4420_v27 = vld [vmem:[#allocation3 + $0x1cc] sm:$0xf]  ;;  %v5208_v10 = vor.u32 %v4391_v37, %v3903_v20  ;;  %v5213_v17 = vor.u32 %v4390_v28, %v3905_v32  ;;  %798 = vmatpush.bf16.msra.mxu1 %v5204_v19  ;;  %824 = vmatpush.bf16.msra.mxu3 %v5210_v51 }
 0x13e   :  { %v4025_v30 = vld [vmem:[#allocation3 + $0x1e8] sm:$0xf0]  ;;  %7266 = vst [vmem:[#allocation112_spill] sm:$0xff] %v5210_v51  ;;  %v5217_v33 = vor.u32 %v4437_v59, %v4087_v22  ;;  %v4015_v34 = vld [vmem:[#allocation3 + $0x188] sm:$0xf] }
 0x13f   :  { %7265 = vst [vmem:[#allocation111_spill] sm:$0xff] %v5208_v10  ;;  %v4436_v42 = vld [vmem:[#allocation3 + $0x3cc] sm:$0xf]  ;;  %v5219_v52 = vor.u32 %v4420_v27, %v4025_v30  ;;  %v4419_v29 = vld [vmem:[#allocation3 + $0x1a4] sm:$0xf0]  ;;  %811 = vmatpush.bf16.msra.mxu2 %v5208_v10  ;;  %837 = vmatpush.bf16.msrb.mxu0 %v5213_v17 }
 0x140   :  { %v4089_v15 = vld [vmem:[#allocation3 + $0x3e8] sm:$0xf0]  ;;  %7267 = vst [vmem:[#allocation113_spill] sm:$0xff] %v5213_v17  ;;  %v4079_v1 = vld [vmem:[#allocation3 + $0x388] sm:$0xf]  ;;  %v5228_v22 = vor.u32 %v4419_v29, %v4015_v34 }
 0x141   :  { %7268 = vst [vmem:[#allocation114_spill] sm:$0xff] %v5215_v56  ;;  %v5222_v20 = vor.u32 %v4436_v42, %v4089_v15  ;;  %v4435_v25 = vld [vmem:[#allocation3 + $0x3a4] sm:$0xf0]  ;;  %v4418_v48 = vld [vmem:[#allocation3 + $0x18c] sm:$0xf]  ;;  %1045 = vmatpush.bf16.msrb.mxu1 %v5215_v56  ;;  %1071 = vmatpush.bf16.msrb.mxu3 %v5219_v52 }
 0x142   :  { %7269 = vst [vmem:[#allocation115_spill] sm:$0xff] %v5217_v33  ;;  %v4017_v37 = vld [vmem:[#allocation3 + $0x1a8] sm:$0xf0]  ;;  %v5232_v15 = vor.u32 %v4435_v25, %v4079_v1  ;;  %v4007_v32 = vld [vmem:[#allocation3 + $0x148] sm:$0xf] }
 0x143   :  { %7270 = vst [vmem:[#allocation116_spill] sm:$0xff] %v5219_v52  ;;  %v4434_v40 = vld [vmem:[#allocation3 + $0x38c] sm:$0xf]  ;;  %1058 = vmatpush.bf16.msrb.mxu2 %v5217_v33  ;;  %v5234_v28 = vor.u32 %v4418_v48, %v4017_v37  ;;  %v4417_v59 = vld [vmem:[#allocation3 + $0x164] sm:$0xf0]  ;;  %1084 = vmatpush.bf16.msra.mxu0 %v5222_v20 }
 0x144   :  { %7271 = vst [vmem:[#allocation117_spill] sm:$0xff] %v5222_v20  ;;  %v4081_v44 = vld [vmem:[#allocation3 + $0x3a8] sm:$0xf0]  ;;  %v4071_v27 = vld [vmem:[#allocation3 + $0x348] sm:$0xf]  ;;  %v5240_v7 = vor.u32 %v4417_v59, %v4007_v32  ;;  %v6900_v32 = vmov 0  }
 0x145   :  { %7272 = vst [vmem:[#allocation118_spill] sm:$0xff] %v5228_v22  ;;  %v5237_v30 = vor.u32 %v4434_v40, %v4081_v44  ;;  %v4433_v42 = vld [vmem:[#allocation3 + $0x364] sm:$0xf0]  ;;  %v4416_v14 = vld [vmem:[#allocation3 + $0x14c] sm:$0xf]  ;;  %1046 = vmatpush.bf16.msrb.mxu1 %v5228_v22  ;;  %1072 = vmatpush.bf16.msrb.mxu3 %v5234_v28 }
 0x146   :  { %7273 = vst [vmem:[#allocation119_spill] sm:$0xff] %v5232_v15  ;;  %v4009_v11 = vld [vmem:[#allocation3 + $0x168] sm:$0xf0]  ;;  %v5244_v1 = vor.u32 %v4433_v42, %v4071_v27  ;;  %v3999_v48 = vld [vmem:[#allocation3 + $0x108] sm:$0xf]  ;;  %825 = vmatmul.bf16.vlgmr.msra.gmra.mxu3 %v6900_v32  ;;  %812 = vmatmul.bf16.vlgmr.msra.gmra.mxu2 %v6900_v32 }
 0x147   :  { %7274 = vst [vmem:[#allocation120_spill] sm:$0xff] %v5234_v28  ;;  %v4432_v29 = vld [vmem:[#allocation3 + $0x34c] sm:$0xf]  ;;  %1059 = vmatpush.bf16.msrb.mxu2 %v5232_v15  ;;  %v5246_v25 = vor.u32 %v4416_v14, %v4009_v11  ;;  %v4415_v37 = vld [vmem:[#allocation3 + $0x124] sm:$0xf0]  ;;  %1085 = vmatpush.bf16.msra.mxu0 %v5237_v30 }
 0x148   :  { %7275 = vst [vmem:[#allocation121_spill] sm:$0xff] %v5237_v30  ;;  %v4073_v34 = vld [vmem:[#allocation3 + $0x368] sm:$0xf0]  ;;  %v4063_v40 = vld [vmem:[#allocation3 + $0x308] sm:$0xf]  ;;  %838 = vmatmul.bf16.vlgmr.msrb.gmra.mxu0 %v6900_v32  ;;  %v5255_v11 = vor.u32 %v4415_v37, %v3999_v48  ;;  %v7284_v48 = vmov 0  }
 0x149   :  { %7276 = vst [vmem:[#allocation122_spill] sm:$0xff] %v5240_v7  ;;  %v5249_v44 = vor.u32 %v4432_v29, %v4073_v34  ;;  %v4431_v9 = vld [vmem:[#allocation3 + $0x324] sm:$0xf0]  ;;  %v4414_v26 = vld [vmem:[#allocation3 + $0x10c] sm:$0xf]  ;;  %1047 = vmatpush.bf16.msrb.mxu1 %v5240_v7  ;;  %1073 = vmatpush.bf16.msrb.mxu3 %v5246_v25 }
 0x14a   :  { %7277 = vst [vmem:[#allocation123_spill] sm:$0xff] %v5244_v1  ;;  %v4001_v21 = vld [vmem:[#allocation3 + $0x128] sm:$0xf0]  ;;  %v5259_v14 = vor.u32 %v4431_v9, %v4063_v40  ;;  %v3991_v42 = vld [vmem:[#allocation3 + $0xc8] sm:$0xf]  ;;  %799 = vmatmul.bf16.vlgmr.msra.gmra.mxu1 %v7284_v48 }
 0x14b   :  { %7278 = vst [vmem:[#allocation124_spill] sm:$0xff] %v5246_v25  ;;  %v4430_v59 = vld [vmem:[#allocation3 + $0x30c] sm:$0xf]  ;;  %1060 = vmatpush.bf16.msrb.mxu2 %v5244_v1  ;;  %v5261_v27 = vor.u32 %v4414_v26, %v4001_v21  ;;  %v4413_v29 = vld [vmem:[#allocation3 + $0xe4] sm:$0xf0]  ;;  %1086 = vmatpush.bf16.msra.mxu0 %v5249_v44 }
 0x14c   :  { %7279 = vst [vmem:[#allocation125_spill] sm:$0xff] %v5249_v44  ;;  %v4065_v58 = vld [vmem:[#allocation3 + $0x328] sm:$0xf0]  ;;  %v4055_v34 = vld [vmem:[#allocation3 + $0x2c8] sm:$0xf]  ;;  %v5268_v9 = vor.u32 %v4413_v29, %v3991_v42 }
 0x14d   :  { %7280 = vst [vmem:[#allocation126_spill] sm:$0xff] %v5255_v11  ;;  %v5264_v57 = vor.u32 %v4430_v59, %v4065_v58  ;;  %v4429_v32 = vld [vmem:[#allocation3 + $0x2e4] sm:$0xf0]  ;;  %v4412_v63 = vld [vmem:[#allocation3 + $0xcc] sm:$0xf]  ;;  %1048 = vmatpush.bf16.msrb.mxu1 %v5255_v11  ;;  %1074 = vmatpush.bf16.msrb.mxu3 %v5261_v27 }
 0x14e   :  { %7281 = vst [vmem:[#allocation127_spill] sm:$0xff] %v5259_v14  ;;  %v3993_v61 = vld [vmem:[#allocation3 + $0xe8] sm:$0xf0]  ;;  %v5272_v21 = vor.u32 %v4429_v32, %v4055_v34  ;;  %v3983_v58 = vld [vmem:[#allocation3 + $0x88] sm:$0xf] }
 0x14f   :  { %7282 = vst [vmem:[#allocation128_spill] sm:$0xff] %v5261_v27  ;;  %v4428_v37 = vld [vmem:[#allocation3 + $0x2cc] sm:$0xf]  ;;  %1061 = vmatpush.bf16.msrb.mxu2 %v5259_v14  ;;  %v5274_v26 = vor.u32 %v4412_v63, %v3993_v61  ;;  %v4411_v40 = vld [vmem:[#allocation3 + $0xa4] sm:$0xf0]  ;;  %1087 = vmatpush.bf16.msra.mxu0 %v5264_v57 }
 0x150   :  { %7283 = vst [vmem:[#allocation129_spill] sm:$0xff] %v5264_v57  ;;  %v4057_v6 = vld [vmem:[#allocation3 + $0x2e8] sm:$0xf0]  ;;  %v4047_v59 = vld [vmem:[#allocation3 + $0x288] sm:$0xf]  ;;  %v5280_v14 = vor.u32 %v4411_v40, %v3983_v58 }
 0x151   :  { %7285 = vst [vmem:[#allocation130_spill] sm:$0xff] %v5268_v9  ;;  %v5277_v3 = vor.u32 %v4428_v37, %v4057_v6  ;;  %v4427_v44 = vld [vmem:[#allocation3 + $0x2a4] sm:$0xf0]  ;;  %v4410_v25 = vld [vmem:[#allocation3 + $0x8c] sm:$0xf]  ;;  %1049 = vmatpush.bf16.msrb.mxu1 %v5268_v9  ;;  %1075 = vmatpush.bf16.msrb.mxu3 %v5274_v26 }
 0x152   :  { %7286 = vst [vmem:[#allocation131_spill] sm:$0xff] %v5272_v21  ;;  %v3985_v11 = vld [vmem:[#allocation3 + $0xa8] sm:$0xf0]  ;;  %v5284_v61 = vor.u32 %v4427_v44, %v4047_v59  ;;  %v3975_v32 = vld [vmem:[#allocation3 + $0x48] sm:$0xf] }
 0x153   :  { %7287 = vst [vmem:[#allocation132_spill] sm:$0xff] %v5274_v26  ;;  %v4426_v42 = vld [vmem:[#allocation3 + $0x28c] sm:$0xf]  ;;  %1062 = vmatpush.bf16.msrb.mxu2 %v5272_v21  ;;  %v5286_v63 = vor.u32 %v4410_v25, %v3985_v11  ;;  %v4409_v6 = vld [vmem:[#allocation3 + $0x64] sm:$0xf0]  ;;  %1088 = vmatpush.bf16.msra.mxu0 %v5277_v3 }
 0x154   :  { %7288 = vst [vmem:[#allocation133_spill] sm:$0xff] %v5277_v3  ;;  %v4049_v29 = vld [vmem:[#allocation3 + $0x2a8] sm:$0xf0]  ;;  %v4039_v34 = vld [vmem:[#allocation3 + $0x248] sm:$0xf]  ;;  %v5292_v21 = vor.u32 %v4409_v6, %v3975_v32 }
 0x155   :  { %7289 = vst [vmem:[#allocation134_spill] sm:$0xff] %v5280_v14  ;;  %v5289_v37 = vor.u32 %v4426_v42, %v4049_v29  ;;  %v4425_v57 = vld [vmem:[#allocation3 + $0x264] sm:$0xf0]  ;;  %v4408_v27 = vld [vmem:[#allocation3 + $0x4c] sm:$0xf]  ;;  %1050 = vmatpush.bf16.msrb.mxu1 %v5280_v14  ;;  %1076 = vmatpush.bf16.msrb.mxu3 %v5286_v63 }
 0x156   :  { %7290 = vst [vmem:[#allocation135_spill] sm:$0xff] %v5284_v61  ;;  %v3977_v9 = vld [vmem:[#allocation3 + $0x68] sm:$0xf0]  ;;  %v3967_v44 = vld [vmem:[#allocation3 + $0x8] sm:$0xf]  ;;  %v5296_v25 = vor.u32 %v4425_v57, %v4039_v34 }
 0x157   :  { %7291 = vst [vmem:[#allocation136_spill] sm:$0xff] %v5286_v63  ;;  %v4424_v58 = vld [vmem:[#allocation3 + $0x24c] sm:$0xf]  ;;  %v4407_v59 = vld [vmem:[#allocation3 + $0x24] sm:$0xf0]  ;;  %1063 = vmatpush.bf16.msrb.mxu2 %v5284_v61  ;;  %v5298_v11 = vor.u32 %v4408_v27, %v3977_v9  ;;  %1089 = vmatpush.bf16.msra.mxu0 %v5289_v37 }
 0x158   :  { %7292 = vst [vmem:[#allocation137_spill] sm:$0xff] %v5289_v37  ;;  %v4041_v40 = vld [vmem:[#allocation3 + $0x268] sm:$0xf0]  ;;  %v4031_v42 = vld [vmem:[#allocation3 + $0x208] sm:$0xf]  ;;  %v5304_v63 = vor.u32 %v4407_v59, %v3967_v44 }
 0x159   :  { %7293 = vst [vmem:[#allocation138_spill] sm:$0xff] %v5292_v21  ;;  %v4423_v29 = vld [vmem:[#allocation3 + $0x224] sm:$0xf0]  ;;  %v4406_v3 = vld [vmem:[#allocation3 + $0xc] sm:$0xf]  ;;  %v5301_v26 = vor.u32 %v4424_v58, %v4041_v40  ;;  %1051 = vmatpush.bf16.msrb.mxu1 %v5292_v21  ;;  %1077 = vmatpush.bf16.msrb.mxu3 %v5298_v11 }
 0x15a   :  { %7294 = vst [vmem:[#allocation139_spill] sm:$0xff] %v5296_v25  ;;  %v3969_v14 = vld [vmem:[#allocation3 + $0x28] sm:$0xf0]  ;;  %v4151_v1 = vld [vmem:[#allocation3 + $0x1d0] sm:$0xf]  ;;  %v5308_v34 = vor.u32 %v4423_v29, %v4031_v42 }
 0x15b   :  { %7295 = vst [vmem:[#allocation140_spill] sm:$0xff] %v5298_v11  ;;  %v4422_v32 = vld [vmem:[#allocation3 + $0x20c] sm:$0xf]  ;;  %v4453_v7 = vld [vmem:[#allocation3 + $0x1ec] sm:$0xf0]  ;;  %1064 = vmatpush.bf16.msrb.mxu2 %v5296_v25  ;;  %v5310_v58 = vor.u32 %v4406_v3, %v3969_v14  ;;  %1090 = vmatpush.bf16.msra.mxu0 %v5301_v26 }
 0x15c   :  { %7296 = vst [vmem:[#allocation141_spill] sm:$0xff] %v5301_v26  ;;  %v4033_v6 = vld [vmem:[#allocation3 + $0x228] sm:$0xf0]  ;;  %v4215_v30 = vld [vmem:[#allocation3 + $0x3d0] sm:$0xf]  ;;  %v5315_v21 = vor.u32 %v4453_v7, %v4151_v1 }
 0x15d   :  { %7297 = vst [vmem:[#allocation142_spill] sm:$0xff] %v5304_v63  ;;  %v4469_v57 = vld [vmem:[#allocation3 + $0x3ec] sm:$0xf0]  ;;  %v4452_v27 = vld [vmem:[#allocation3 + $0x1d4] sm:$0xf]  ;;  %v5313_v61 = vor.u32 %v4422_v32, %v4033_v6  ;;  %1052 = vmatpush.bf16.msrb.mxu1 %v5304_v63  ;;  %1078 = vmatpush.bf16.msrb.mxu3 %v5310_v58 }
 0x15e   :  { %v4153_v9 = vld [vmem:[#allocation3 + $0x1f0] sm:$0xf0]  ;;  %7298 = vst [vmem:[#allocation143_spill] sm:$0xff] %v5308_v34  ;;  %v5317_v44 = vor.u32 %v4469_v57, %v4215_v30  ;;  %v4143_v28 = vld [vmem:[#allocation3 + $0x190] sm:$0xf] }
 0x15f   :  { %7299 = vst [vmem:[#allocation144_spill] sm:$0xff] %v5310_v58  ;;  %v4468_v40 = vld [vmem:[#allocation3 + $0x3d4] sm:$0xf]  ;;  %v5319_v59 = vor.u32 %v4452_v27, %v4153_v9  ;;  %v4451_v25 = vld [vmem:[#allocation3 + $0x1ac] sm:$0xf0]  ;;  %1065 = vmatpush.bf16.msrb.mxu2 %v5308_v34  ;;  %1091 = vmatpush.bf16.msra.mxu0 %v5313_v61 }
 0x160   :  { %v4217_v37 = vld [vmem:[#allocation3 + $0x3f0] sm:$0xf0]  ;;  %7300 = vst [vmem:[#allocation145_spill] sm:$0xff] %v5313_v61  ;;  %v4207_v15 = vld [vmem:[#allocation3 + $0x390] sm:$0xf]  ;;  %v5328_v30 = vor.u32 %v4451_v25, %v4143_v28  ;;  %1079 = vmatmul.bf16.vlgmr.msrb.gmra.mxu3 %v7284_v48  ;;  %1053 = vmatmul.bf16.vlgmr.msrb.gmra.mxu1 %v7284_v48 }
 0x161   :  { %7301 = vst [vmem:[#allocation146_spill] sm:$0xff] %v5315_v21  ;;  %v5322_v42 = vor.u32 %v4468_v40, %v4217_v37  ;;  %v4467_v3 = vld [vmem:[#allocation3 + $0x3ac] sm:$0xf0]  ;;  %v4450_v14 = vld [vmem:[#allocation3 + $0x194] sm:$0xf]  ;;  %1299 = vmatpush.bf16.msra.mxu1 %v5315_v21  ;;  %1325 = vmatpush.bf16.msra.mxu3 %v5319_v59 }
 0x162   :  { %7302 = vst [vmem:[#allocation147_spill] sm:$0xff] %v5317_v44  ;;  %v4145_v29 = vld [vmem:[#allocation3 + $0x1b0] sm:$0xf0]  ;;  %v5332_v37 = vor.u32 %v4467_v3, %v4207_v15  ;;  %v4135_v6 = vld [vmem:[#allocation3 + $0x150] sm:$0xf]  ;;  %1066 = vmatmul.bf16.vlgmr.msrb.gmra.mxu2 %v7284_v48  ;;  %1092 = vmatmul.bf16.vlgmr.msra.gmra.mxu0 %v7284_v48 }
 0x163   :  { %7303 = vst [vmem:[#allocation148_spill] sm:$0xff] %v5319_v59  ;;  %v4466_v7 = vld [vmem:[#allocation3 + $0x394] sm:$0xf]  ;;  %1312 = vmatpush.bf16.msra.mxu2 %v5317_v44  ;;  %v5334_v32 = vor.u32 %v4450_v14, %v4145_v29  ;;  %v4449_v57 = vld [vmem:[#allocation3 + $0x16c] sm:$0xf0]  ;;  %1338 = vmatpush.bf16.msrb.mxu0 %v5322_v42 }
 0x164   :  { %7304 = vst [vmem:[#allocation149_spill] sm:$0xff] %v5322_v42  ;;  %v4209_v1 = vld [vmem:[#allocation3 + $0x3b0] sm:$0xf0]  ;;  %v4199_v27 = vld [vmem:[#allocation3 + $0x350] sm:$0xf]  ;;  %v5343_v15 = vor.u32 %v4449_v57, %v4135_v6 }
 0x165   :  { %7305 = vst [vmem:[#allocation150_spill] sm:$0xff] %v5328_v30  ;;  %v5337_v9 = vor.u32 %v4466_v7, %v4209_v1  ;;  %v4465_v40 = vld [vmem:[#allocation3 + $0x36c] sm:$0xf0]  ;;  %v4448_v61 = vld [vmem:[#allocation3 + $0x154] sm:$0xf]  ;;  %1300 = vmatpush.bf16.msra.mxu1 %v5328_v30  ;;  %1326 = vmatpush.bf16.msra.mxu3 %v5334_v32 }
 0x166   :  { %7306 = vst [vmem:[#allocation151_spill] sm:$0xff] %v5332_v37  ;;  %v4137_v21 = vld [vmem:[#allocation3 + $0x170] sm:$0xf0]  ;;  %v5348_v3 = vor.u32 %v4465_v40, %v4199_v27  ;;  %v4127_v29 = vld [vmem:[#allocation3 + $0x110] sm:$0xf] }
 0x167   :  { %7307 = vst [vmem:[#allocation152_spill] sm:$0xff] %v5334_v32  ;;  %v4464_v28 = vld [vmem:[#allocation3 + $0x354] sm:$0xf]  ;;  %1313 = vmatpush.bf16.msra.mxu2 %v5332_v37  ;;  %v5350_v14 = vor.u32 %v4448_v61, %v4137_v21  ;;  %v4447_v7 = vld [vmem:[#allocation3 + $0x12c] sm:$0xf0]  ;;  %1339 = vmatpush.bf16.msrb.mxu0 %v5337_v9 }
 0x168   :  { %7308 = vst [vmem:[#allocation153_spill] sm:$0xff] %v5337_v9  ;;  %v4201_v25 = vld [vmem:[#allocation3 + $0x370] sm:$0xf0]  ;;  %v4191_v1 = vld [vmem:[#allocation3 + $0x310] sm:$0xf]  ;;  %v5356_v37 = vor.u32 %v4447_v7, %v4127_v29 }
 0x169   :  { %7309 = vst [vmem:[#allocation154_spill] sm:$0xff] %v5343_v15  ;;  %v5353_v42 = vor.u32 %v4464_v28, %v4201_v25  ;;  %v4463_v30 = vld [vmem:[#allocation3 + $0x32c] sm:$0xf0]  ;;  %v4446_v6 = vld [vmem:[#allocation3 + $0x114] sm:$0xf]  ;;  %1301 = vmatpush.bf16.msra.mxu1 %v5343_v15  ;;  %1327 = vmatpush.bf16.msra.mxu3 %v5350_v14 }
 0x16a   :  { %7310 = vst [vmem:[#allocation155_spill] sm:$0xff] %v5348_v3  ;;  %v4129_v57 = vld [vmem:[#allocation3 + $0x130] sm:$0xf0]  ;;  %v5360_v21 = vor.u32 %v4463_v30, %v4191_v1  ;;  %v4119_v27 = vld [vmem:[#allocation3 + $0xd0] sm:$0xf] }
 0x16b   :  { %7311 = vst [vmem:[#allocation156_spill] sm:$0xff] %v5350_v14  ;;  %v4462_v59 = vld [vmem:[#allocation3 + $0x314] sm:$0xf]  ;;  %1314 = vmatpush.bf16.msra.mxu2 %v5348_v3  ;;  %v5362_v61 = vor.u32 %v4446_v6, %v4129_v57  ;;  %v4445_v40 = vld [vmem:[#allocation3 + $0xec] sm:$0xf0]  ;;  %1340 = vmatpush.bf16.msrb.mxu0 %v5353_v42 }
 0x16c   :  { %7312 = vst [vmem:[#allocation157_spill] sm:$0xff] %v5353_v42  ;;  %v4193_v44 = vld [vmem:[#allocation3 + $0x330] sm:$0xf0]  ;;  %v4183_v28 = vld [vmem:[#allocation3 + $0x2d0] sm:$0xf]  ;;  %v5368_v3 = vor.u32 %v4445_v40, %v4119_v27 }
 0x16d   :  { %7313 = vst [vmem:[#allocation158_spill] sm:$0xff] %v5356_v37  ;;  %v5365_v25 = vor.u32 %v4462_v59, %v4193_v44  ;;  %v4461_v9 = vld [vmem:[#allocation3 + $0x2ec] sm:$0xf0]  ;;  %v4444_v32 = vld [vmem:[#allocation3 + $0xd4] sm:$0xf]  ;;  %1302 = vmatpush.bf16.msra.mxu1 %v5356_v37  ;;  %1328 = vmatpush.bf16.msra.mxu3 %v5362_v61 }
 0x16e   :  { %7314 = vst [vmem:[#allocation159_spill] sm:$0xff] %v5360_v21  ;;  %v4121_v15 = vld [vmem:[#allocation3 + $0xf0] sm:$0xf0]  ;;  %v4111_v30 = vld [vmem:[#allocation3 + $0x90] sm:$0xf]  ;;  %v5372_v6 = vor.u32 %v4461_v9, %v4183_v28 }
 0x16f   :  { %7315 = vst [vmem:[#allocation160_spill] sm:$0xff] %v5362_v61  ;;  %v4460_v29 = vld [vmem:[#allocation3 + $0x2d4] sm:$0xf]  ;;  %v4443_v1 = vld [vmem:[#allocation3 + $0xac] sm:$0xf0]  ;;  %1315 = vmatpush.bf16.msra.mxu2 %v5360_v21  ;;  %v5374_v57 = vor.u32 %v4444_v32, %v4121_v15  ;;  %1341 = vmatpush.bf16.msrb.mxu0 %v5365_v25 }
 0x170   :  { %7316 = vst [vmem:[#allocation161_spill] sm:$0xff] %v5365_v25  ;;  %v4185_v7 = vld [vmem:[#allocation3 + $0x2f0] sm:$0xf0]  ;;  %v4175_v44 = vld [vmem:[#allocation3 + $0x290] sm:$0xf]  ;;  %v5380_v58 = vor.u32 %v4443_v1, %v4111_v30 }
 0x171   :  { %7317 = vst [vmem:[#allocation162_spill] sm:$0xff] %v5368_v3  ;;  %v4459_v59 = vld [vmem:[#allocation3 + $0x2ac] sm:$0xf0]  ;;  %v4442_v42 = vld [vmem:[#allocation3 + $0x94] sm:$0xf]  ;;  %v5377_v14 = vor.u32 %v4460_v29, %v4185_v7  ;;  %1303 = vmatpush.bf16.msra.mxu1 %v5368_v3  ;;  %1329 = vmatpush.bf16.msra.mxu3 %v5374_v57 }
 0x172   :  { %7318 = vst [vmem:[#allocation163_spill] sm:$0xff] %v5372_v6  ;;  %v4113_v37 = vld [vmem:[#allocation3 + $0xb0] sm:$0xf0]  ;;  %v5384_v32 = vor.u32 %v4459_v59, %v4175_v44  ;;  %v4103_v15 = vld [vmem:[#allocation3 + $0x50] sm:$0xf] }
 0x173   :  { %7319 = vst [vmem:[#allocation164_spill] sm:$0xff] %v5374_v57  ;;  %v4458_v27 = vld [vmem:[#allocation3 + $0x294] sm:$0xf]  ;;  %1316 = vmatpush.bf16.msra.mxu2 %v5372_v6  ;;  %v5386_v9 = vor.u32 %v4442_v42, %v4113_v37  ;;  %v4441_v28 = vld [vmem:[#allocation3 + $0x6c] sm:$0xf0]  ;;  %1342 = vmatpush.bf16.msrb.mxu0 %v5377_v14 }
 0x174   :  { %7320 = vst [vmem:[#allocation165_spill] sm:$0xff] %v5377_v14  ;;  %v4177_v40 = vld [vmem:[#allocation3 + $0x2b0] sm:$0xf0]  ;;  %v4167_v25 = vld [vmem:[#allocation3 + $0x250] sm:$0xf]  ;;  %v5392_v6 = vor.u32 %v4441_v28, %v4103_v15 }
 0x175   :  { %7321 = vst [vmem:[#allocation166_spill] sm:$0xff] %v5380_v58  ;;  %v5389_v29 = vor.u32 %v4458_v27, %v4177_v40  ;;  %v4457_v7 = vld [vmem:[#allocation3 + $0x26c] sm:$0xf0]  ;;  %v4440_v61 = vld [vmem:[#allocation3 + $0x54] sm:$0xf]  ;;  %1304 = vmatpush.bf16.msra.mxu1 %v5380_v58  ;;  %1330 = vmatpush.bf16.msra.mxu3 %v5386_v9 }
 0x176   :  { %7322 = vst [vmem:[#allocation167_spill] sm:$0xff] %v5384_v32  ;;  %v4105_v3 = vld [vmem:[#allocation3 + $0x70] sm:$0xf0]  ;;  %v4095_v44 = vld [vmem:[#allocation3 + $0x10] sm:$0xf]  ;;  %v5396_v42 = vor.u32 %v4457_v7, %v4167_v25 }
 0x177   :  { %7323 = vst [vmem:[#allocation168_spill] sm:$0xff] %v5386_v9  ;;  %v4456_v30 = vld [vmem:[#allocation3 + $0x254] sm:$0xf]  ;;  %v4439_v59 = vld [vmem:[#allocation3 + $0x2c] sm:$0xf0]  ;;  %1317 = vmatpush.bf16.msra.mxu2 %v5384_v32  ;;  %v5398_v37 = vor.u32 %v4440_v61, %v4105_v3  ;;  %1343 = vmatpush.bf16.msrb.mxu0 %v5389_v29 }
 0x178   :  { %7324 = vst [vmem:[#allocation169_spill] sm:$0xff] %v5389_v29  ;;  %v4169_v1 = vld [vmem:[#allocation3 + $0x270] sm:$0xf0]  ;;  %v4159_v27 = vld [vmem:[#allocation3 + $0x210] sm:$0xf]  ;;  %v5404_v9 = vor.u32 %v4439_v59, %v4095_v44 }
 0x179   :  { %7325 = vst [vmem:[#allocation170_spill] sm:$0xff] %v5392_v6  ;;  %v4455_v40 = vld [vmem:[#allocation3 + $0x22c] sm:$0xf0]  ;;  %v4438_v14 = vld [vmem:[#allocation3 + $0x14] sm:$0xf]  ;;  %v5401_v57 = vor.u32 %v4456_v30, %v4169_v1  ;;  %1305 = vmatpush.bf16.msra.mxu1 %v5392_v6  ;;  %1331 = vmatpush.bf16.msra.mxu3 %v5398_v37 }
 0x17a   :  { %7326 = vst [vmem:[#allocation171_spill] sm:$0xff] %v5396_v42  ;;  %v4097_v58 = vld [vmem:[#allocation3 + $0x30] sm:$0xf0]  ;;  %v4279_v21 = vld [vmem:[#allocation3 + $0x1d8] sm:$0xf]  ;;  %v5408_v7 = vor.u32 %v4455_v40, %v4159_v27 }
 0x17b   :  { %7327 = vst [vmem:[#allocation172_spill] sm:$0xff] %v5398_v37  ;;  %v4454_v15 = vld [vmem:[#allocation3 + $0x214] sm:$0xf]  ;;  %v4485_v34 = vld [vmem:[#allocation3 + $0x1f4] sm:$0xf0]  ;;  %1318 = vmatpush.bf16.msra.mxu2 %v5396_v42  ;;  %v5410_v30 = vor.u32 %v4438_v14, %v4097_v58  ;;  %1344 = vmatpush.bf16.msrb.mxu0 %v5401_v57 }
 0x17c   :  { %7328 = vst [vmem:[#allocation173_spill] sm:$0xff] %v5401_v57  ;;  %v4161_v28 = vld [vmem:[#allocation3 + $0x230] sm:$0xf0]  ;;  %v4343_v63 = vld [vmem:[#allocation3 + $0x3d8] sm:$0xf]  ;;  %v5415_v6 = vor.u32 %v4485_v34, %v4279_v21 }
 0x17d   :  { %7329 = vst [vmem:[#allocation174_spill] sm:$0xff] %v5404_v9  ;;  %v4501_v25 = vld [vmem:[#allocation3 + $0x3f4] sm:$0xf0]  ;;  %v4484_v3 = vld [vmem:[#allocation3 + $0x1dc] sm:$0xf]  ;;  %v5413_v32 = vor.u32 %v4454_v15, %v4161_v28  ;;  %1306 = vmatpush.bf16.msra.mxu1 %v5404_v9  ;;  %1332 = vmatpush.bf16.msra.mxu3 %v5410_v30 }
 0x17e   :  { %v4281_v61 = vld [vmem:[#allocation3 + $0x1f8] sm:$0xf0]  ;;  %7330 = vst [vmem:[#allocation175_spill] sm:$0xff] %v5408_v7  ;;  %v5417_v44 = vor.u32 %v4501_v25, %v4343_v63  ;;  %v4271_v26 = vld [vmem:[#allocation3 + $0x198] sm:$0xf] }
 0x17f   :  { %7331 = vst [vmem:[#allocation176_spill] sm:$0xff] %v5410_v30  ;;  %v4500_v1 = vld [vmem:[#allocation3 + $0x3dc] sm:$0xf]  ;;  %v5419_v59 = vor.u32 %v4484_v3, %v4281_v61  ;;  %v4483_v42 = vld [vmem:[#allocation3 + $0x1b4] sm:$0xf0]  ;;  %1319 = vmatpush.bf16.msra.mxu2 %v5408_v7  ;;  %1345 = vmatpush.bf16.msrb.mxu0 %v5413_v32 }
 0x180   :  { %v4345_v29 = vld [vmem:[#allocation3 + $0x3f8] sm:$0xf0]  ;;  %7332 = vst [vmem:[#allocation177_spill] sm:$0xff] %v5413_v32  ;;  %v4335_v11 = vld [vmem:[#allocation3 + $0x398] sm:$0xf]  ;;  %v5428_v63 = vor.u32 %v4483_v42, %v4271_v26  ;;  %1333 = vmatmul.bf16.vlgmr.msra.gmra.mxu3 %v7284_v48  ;;  %1307 = vmatmul.bf16.vlgmr.msra.gmra.mxu1 %v7284_v48 }
 0x181   :  { %7333 = vst [vmem:[#allocation178_spill] sm:$0xff] %v5415_v6  ;;  %v5422_v27 = vor.u32 %v4500_v1, %v4345_v29  ;;  %v4499_v58 = vld [vmem:[#allocation3 + $0x3b4] sm:$0xf0]  ;;  %v4482_v14 = vld [vmem:[#allocation3 + $0x19c] sm:$0xf]  ;;  %1547 = vmatpush.bf16.msrb.mxu1 %v5415_v6  ;;  %1573 = vmatpush.bf16.msrb.mxu3 %v5419_v59 }
 0x182   :  { %7334 = vst [vmem:[#allocation179_spill] sm:$0xff] %v5417_v44  ;;  %v4273_v40 = vld [vmem:[#allocation3 + $0x1b8] sm:$0xf0]  ;;  %v5432_v29 = vor.u32 %v4499_v58, %v4335_v11  ;;  %v4263_v28 = vld [vmem:[#allocation3 + $0x158] sm:$0xf]  ;;  %1320 = vmatmul.bf16.vlgmr.msra.gmra.mxu2 %v7284_v48  ;;  %1346 = vmatmul.bf16.vlgmr.msrb.gmra.mxu0 %v7284_v48 }
 0x183   :  { %7335 = vst [vmem:[#allocation180_spill] sm:$0xff] %v5419_v59  ;;  %v4498_v34 = vld [vmem:[#allocation3 + $0x39c] sm:$0xf]  ;;  %1560 = vmatpush.bf16.msrb.mxu2 %v5417_v44  ;;  %v5434_v15 = vor.u32 %v4482_v14, %v4273_v40  ;;  %v4481_v25 = vld [vmem:[#allocation3 + $0x174] sm:$0xf0]  ;;  %1586 = vmatpush.bf16.msra.mxu0 %v5422_v27 }
 0x184   :  { %7336 = vst [vmem:[#allocation181_spill] sm:$0xff] %v5422_v27  ;;  %v4337_v21 = vld [vmem:[#allocation3 + $0x3b8] sm:$0xf0]  ;;  %v4327_v3 = vld [vmem:[#allocation3 + $0x358] sm:$0xf]  ;;  %v5444_v14 = vor.u32 %v4481_v25, %v4263_v28 }
 0x185   :  { %7337 = vst [vmem:[#allocation182_spill] sm:$0xff] %v5428_v63  ;;  %v5438_v61 = vor.u32 %v4498_v34, %v4337_v21  ;;  %v4497_v1 = vld [vmem:[#allocation3 + $0x374] sm:$0xf0]  ;;  %v4480_v26 = vld [vmem:[#allocation3 + $0x15c] sm:$0xf]  ;;  %1548 = vmatpush.bf16.msrb.mxu1 %v5428_v63  ;;  %1574 = vmatpush.bf16.msrb.mxu3 %v5434_v15 }
 0x186   :  { %7338 = vst [vmem:[#allocation183_spill] sm:$0xff] %v5432_v29  ;;  %v4265_v42 = vld [vmem:[#allocation3 + $0x178] sm:$0xf0]  ;;  %v5448_v40 = vor.u32 %v4497_v1, %v4327_v3  ;;  %v4255_v21 = vld [vmem:[#allocation3 + $0x118] sm:$0xf] }
 0x187   :  { %7339 = vst [vmem:[#allocation184_spill] sm:$0xff] %v5434_v15  ;;  %v4496_v11 = vld [vmem:[#allocation3 + $0x35c] sm:$0xf]  ;;  %1561 = vmatpush.bf16.msrb.mxu2 %v5432_v29  ;;  %v5450_v34 = vor.u32 %v4480_v26, %v4265_v42  ;;  %v4479_v27 = vld [vmem:[#allocation3 + $0x134] sm:$0xf0]  ;;  %1587 = vmatpush.bf16.msra.mxu0 %v5438_v61 }
 0x188   :  { %7340 = vst [vmem:[#allocation185_spill] sm:$0xff] %v5438_v61  ;;  %v4329_v58 = vld [vmem:[#allocation3 + $0x378] sm:$0xf0]  ;;  %v4319_v59 = vld [vmem:[#allocation3 + $0x318] sm:$0xf]  ;;  %v5456_v29 = vor.u32 %v4479_v27, %v4255_v21 }
 0x189   :  { %7341 = vst [vmem:[#allocation186_spill] sm:$0xff] %v5444_v14  ;;  %v5453_v44 = vor.u32 %v4496_v11, %v4329_v58  ;;  %v4495_v63 = vld [vmem:[#allocation3 + $0x334] sm:$0xf0]  ;;  %v4478_v6 = vld [vmem:[#allocation3 + $0x11c] sm:$0xf]  ;;  %1549 = vmatpush.bf16.msrb.mxu1 %v5444_v14  ;;  %1575 = vmatpush.bf16.msrb.mxu3 %v5450_v34 }
 0x18a   :  { %7342 = vst [vmem:[#allocation187_spill] sm:$0xff] %v5448_v40  ;;  %v4257_v32 = vld [vmem:[#allocation3 + $0x138] sm:$0xf0]  ;;  %v5460_v3 = vor.u32 %v4495_v63, %v4319_v59  ;;  %v4247_v26 = vld [vmem:[#allocation3 + $0xd8] sm:$0xf] }
 0x18b   :  { %7343 = vst [vmem:[#allocation188_spill] sm:$0xff] %v5450_v34  ;;  %v4494_v28 = vld [vmem:[#allocation3 + $0x31c] sm:$0xf]  ;;  %1562 = vmatpush.bf16.msrb.mxu2 %v5448_v40  ;;  %v5462_v1 = vor.u32 %v4478_v6, %v4257_v32  ;;  %v4477_v42 = vld [vmem:[#allocation3 + $0xf4] sm:$0xf0]  ;;  %1588 = vmatpush.bf16.msra.mxu0 %v5453_v44 }
 0x18c   :  { %7344 = vst [vmem:[#allocation189_spill] sm:$0xff] %v5453_v44  ;;  %v4321_v25 = vld [vmem:[#allocation3 + $0x338] sm:$0xf0]  ;;  %v4311_v11 = vld [vmem:[#allocation3 + $0x2d8] sm:$0xf]  ;;  %v5468_v40 = vor.u32 %v4477_v42, %v4247_v26 }
 0x18d   :  { %7345 = vst [vmem:[#allocation190_spill] sm:$0xff] %v5456_v29  ;;  %v5465_v58 = vor.u32 %v4494_v28, %v4321_v25  ;;  %v4493_v61 = vld [vmem:[#allocation3 + $0x2f4] sm:$0xf0]  ;;  %v4476_v15 = vld [vmem:[#allocation3 + $0xdc] sm:$0xf]  ;;  %1550 = vmatpush.bf16.msrb.mxu1 %v5456_v29  ;;  %1576 = vmatpush.bf16.msrb.mxu3 %v5462_v1 }
 0x18e   :  { %7346 = vst [vmem:[#allocation191_spill] sm:$0xff] %v5460_v3  ;;  %v4249_v14 = vld [vmem:[#allocation3 + $0xf8] sm:$0xf0]  ;;  %v5472_v6 = vor.u32 %v4493_v61, %v4311_v11  ;;  %v4239_v59 = vld [vmem:[#allocation3 + $0x98] sm:$0xf] }
 0x18f   :  { %7347 = vst [vmem:[#allocation192_spill] sm:$0xff] %v5462_v1  ;;  %v4492_v27 = vld [vmem:[#allocation3 + $0x2dc] sm:$0xf]  ;;  %1563 = vmatpush.bf16.msrb.mxu2 %v5460_v3  ;;  %v5474_v32 = vor.u32 %v4476_v15, %v4249_v14  ;;  %v4475_v63 = vld [vmem:[#allocation3 + $0xb4] sm:$0xf0]  ;;  %1589 = vmatpush.bf16.msra.mxu0 %v5465_v58 }
 0x190   :  { %7348 = vst [vmem:[#allocation193_spill] sm:$0xff] %v5465_v58  ;;  %v4313_v21 = vld [vmem:[#allocation3 + $0x2f8] sm:$0xf0]  ;;  %v4303_v28 = vld [vmem:[#allocation3 + $0x298] sm:$0xf]  ;;  %v5480_v3 = vor.u32 %v4475_v63, %v4239_v59 }
 0x191   :  { %7349 = vst [vmem:[#allocation194_spill] sm:$0xff] %v5468_v40  ;;  %v5477_v25 = vor.u32 %v4492_v27, %v4313_v21  ;;  %v4491_v44 = vld [vmem:[#allocation3 + $0x2b4] sm:$0xf0]  ;;  %v4474_v34 = vld [vmem:[#allocation3 + $0x9c] sm:$0xf]  ;;  %1551 = vmatpush.bf16.msrb.mxu1 %v5468_v40  ;;  %1577 = vmatpush.bf16.msrb.mxu3 %v5474_v32 }
 0x192   :  { %7350 = vst [vmem:[#allocation195_spill] sm:$0xff] %v5472_v6  ;;  %v4241_v29 = vld [vmem:[#allocation3 + $0xb8] sm:$0xf0]  ;;  %v5484_v15 = vor.u32 %v4491_v44, %v4303_v28  ;;  %v4231_v14 = vld [vmem:[#allocation3 + $0x58] sm:$0xf] }
 0x193   :  { %7351 = vst [vmem:[#allocation196_spill] sm:$0xff] %v5474_v32  ;;  %v4490_v26 = vld [vmem:[#allocation3 + $0x29c] sm:$0xf]  ;;  %1564 = vmatpush.bf16.msrb.mxu2 %v5472_v6  ;;  %v5486_v61 = vor.u32 %v4474_v34, %v4241_v29  ;;  %v4473_v11 = vld [vmem:[#allocation3 + $0x74] sm:$0xf0]  ;;  %1590 = vmatpush.bf16.msra.mxu0 %v5477_v25 }
 0x194   :  { %7352 = vst [vmem:[#allocation197_spill] sm:$0xff] %v5477_v25  ;;  %v4305_v42 = vld [vmem:[#allocation3 + $0x2b8] sm:$0xf0]  ;;  %v4295_v27 = vld [vmem:[#allocation3 + $0x258] sm:$0xf]  ;;  %v5492_v6 = vor.u32 %v4473_v11, %v4231_v14 }
 0x195   :  { %7353 = vst [vmem:[#allocation198_spill] sm:$0xff] %v5480_v3  ;;  %v5489_v21 = vor.u32 %v4490_v26, %v4305_v42  ;;  %v4489_v58 = vld [vmem:[#allocation3 + $0x274] sm:$0xf0]  ;;  %v4472_v1 = vld [vmem:[#allocation3 + $0x5c] sm:$0xf]  ;;  %1552 = vmatpush.bf16.msrb.mxu1 %v5480_v3  ;;  %1578 = vmatpush.bf16.msrb.mxu3 %v5486_v61 }
 0x196   :  { %7354 = vst [vmem:[#allocation199_spill] sm:$0xff] %v5484_v15  ;;  %v4233_v40 = vld [vmem:[#allocation3 + $0x78] sm:$0xf0]  ;;  %v5496_v44 = vor.u32 %v4489_v58, %v4295_v27  ;;  %v4223_v34 = vld [vmem:[#allocation3 + $0x18] sm:$0xf] }
 0x197   :  { %7355 = vst [vmem:[#allocation200_spill] sm:$0xff] %v5486_v61  ;;  %v4488_v59 = vld [vmem:[#allocation3 + $0x25c] sm:$0xf]  ;;  %1565 = vmatpush.bf16.msrb.mxu2 %v5484_v15  ;;  %v5498_v29 = vor.u32 %v4472_v1, %v4233_v40  ;;  %v4471_v28 = vld [vmem:[#allocation3 + $0x34] sm:$0xf0]  ;;  %1591 = vmatpush.bf16.msra.mxu0 %v5489_v21 }
 0x198   :  { %7356 = vst [vmem:[#allocation201_spill] sm:$0xff] %v5489_v21  ;;  %v4297_v63 = vld [vmem:[#allocation3 + $0x278] sm:$0xf0]  ;;  %v4287_v26 = vld [vmem:[#allocation3 + $0x218] sm:$0xf]  ;;  %v5504_v15 = vor.u32 %v4471_v28, %v4223_v34 }
 0x199   :  { %7357 = vst [vmem:[#allocation202_spill] sm:$0xff] %v5492_v6  ;;  %v5501_v42 = vor.u32 %v4488_v59, %v4297_v63  ;;  %v4487_v25 = vld [vmem:[#allocation3 + $0x234] sm:$0xf0]  ;;  %v4470_v32 = vld [vmem:[#allocation3 + $0x1c] sm:$0xf]  ;;  %1553 = vmatpush.bf16.msrb.mxu1 %v5492_v6  ;;  %1579 = vmatpush.bf16.msrb.mxu3 %v5498_v29  ;;  %v7370_v59 = vld [vmem:[#allocation124_spill] sm:$0xff] }
 0x19a   :  { %7358 = vst [vmem:[#allocation203_spill] sm:$0xff] %v5496_v44  ;;  %v4225_v3 = vld [vmem:[#allocation3 + $0x38] sm:$0xf0]  ;;  %v5508_v40 = vor.u32 %v4487_v25, %v4287_v26  ;;  %v7368_v25 = vld [vmem:[#allocation122_spill] sm:$0xff]  ;;  %v7371_v63 = vld [vmem:[#allocation125_spill] sm:$0xff] }
 0x19b   :  { %7359 = vst [vmem:[#allocation204_spill] sm:$0xff] %v5498_v29  ;;  %v4486_v14 = vld [vmem:[#allocation3 + $0x21c] sm:$0xf]  ;;  %1566 = vmatpush.bf16.msrb.mxu2 %v5496_v44  ;;  %v5510_v1 = vor.u32 %v4470_v32, %v4225_v3  ;;  %1592 = vmatpush.bf16.msra.mxu0 %v5501_v42  ;;  %v7366_v3 = vld [vmem:[#allocation120_spill] sm:$0xff]  ;;  %v7367_v32 = vld [vmem:[#allocation121_spill] sm:$0xff] }
 0x19c   :  { %7360 = vst [vmem:[#allocation205_spill] sm:$0xff] %v5501_v42  ;;  %v4289_v11 = vld [vmem:[#allocation3 + $0x238] sm:$0xf0]  ;;  %v7372_v34 = vld [vmem:[#allocation126_spill] sm:$0xff] }
 0x19d   :  { %7361 = vst [vmem:[#allocation206_spill] sm:$0xff] %v5504_v15  ;;  %v5513_v58 = vor.u32 %v4486_v14, %v4289_v11  ;;  %1554 = vmatpush.bf16.msrb.mxu1 %v5504_v15  ;;  %1580 = vmatpush.bf16.msrb.mxu3 %v5510_v1  ;;  %v7369_v27 = vld [vmem:[#allocation123_spill] sm:$0xff]  ;;  %v7374_v14 = vld [vmem:[#allocation128_spill] sm:$0xff] }
 0x19e   :  { %7362 = vst [vmem:[#allocation207_spill] sm:$0xff] %v5508_v40  ;;  %v7373_v26 = vld [vmem:[#allocation127_spill] sm:$0xff] }
 0x19f   :  { %7363 = vst [vmem:[#allocation208_spill] sm:$0xff] %v5510_v1  ;;  %1567 = vmatpush.bf16.msrb.mxu2 %v5508_v40  ;;  %1593 = vmatpush.bf16.msra.mxu0 %v5513_v58 }
 0x1a0   :  { %7364 = vst [vmem:[#allocation209_spill] sm:$0xff] %v5513_v58  ;;  %1555 = vmatmul.bf16.vlgmr.msrb.gmra.mxu1 %v7284_v48  ;;  %1581 = vmatmul.bf16.vlgmr.msrb.gmra.mxu3 %v7284_v48 }
 0x1a1   :  { %1632 = vmatpush.bf16.msra.mxu1 %v5123_v49  ;;  %1658 = vmatpush.bf16.msra.mxu3 %v5127_v16 }
 0x1a2   :  { %1568 = vmatmul.bf16.vlgmr.msrb.gmra.mxu2 %v7284_v48  ;;  %1594 = vmatmul.bf16.vlgmr.msra.gmra.mxu0 %v7284_v48  ;;  %v7365_v48 = vld [vmem:[#allocation119_spill] sm:$0xff] }
 0x1a3   :  { %1645 = vmatpush.bf16.msra.mxu2 %v5125_v55  ;;  %1671 = vmatpush.bf16.msrb.mxu0 %v5130_v54 }
 0x1a5   :  { %1633 = vmatpush.bf16.msra.mxu1 %v5134_v62  ;;  %1659 = vmatpush.bf16.msra.mxu3 %v5139_v2 }
 0x1a7   :  { %1646 = vmatpush.bf16.msra.mxu2 %v5136_v0  ;;  %1672 = vmatpush.bf16.msrb.mxu0 %v5141_v12 }
 0x1a9   :  { %1634 = vmatpush.bf16.msra.mxu1 %v5144_v18  ;;  %1660 = vmatpush.bf16.msra.mxu3 %v5150_v5 }
 0x1ab   :  { %1647 = vmatpush.bf16.msra.mxu2 %v5148_v47  ;;  %1673 = vmatpush.bf16.msrb.mxu0 %v5153_v39 }
 0x1ad   :  { %1635 = vmatpush.bf16.msra.mxu1 %v5156_v36  ;;  %1661 = vmatpush.bf16.msra.mxu3 %v5162_v4 }
 0x1af   :  { %1648 = vmatpush.bf16.msra.mxu2 %v5160_v46  ;;  %1674 = vmatpush.bf16.msrb.mxu0 %v5165_v50 }
 0x1b1   :  { %1636 = vmatpush.bf16.msra.mxu1 %v5168_v31  ;;  %1662 = vmatpush.bf16.msra.mxu3 %v5174_v43 }
 0x1b3   :  { %1649 = vmatpush.bf16.msra.mxu2 %v5172_v41  ;;  %1675 = vmatpush.bf16.msrb.mxu0 %v5177_v60 }
 0x1b5   :  { %1637 = vmatpush.bf16.msra.mxu1 %v5180_v8  ;;  %1663 = vmatpush.bf16.msra.mxu3 %v5186_v38 }
 0x1b7   :  { %1650 = vmatpush.bf16.msra.mxu2 %v5184_v35  ;;  %1676 = vmatpush.bf16.msrb.mxu0 %v5189_v45 }
 0x1b9   :  { %1638 = vmatpush.bf16.msra.mxu1 %v5192_v23  ;;  %1664 = vmatpush.bf16.msra.mxu3 %v5198_v24  ;;  %v7394_v23 = vld [vmem:[#allocation17_spill] sm:$0xff] }
 0x1bb   :  { %1651 = vmatpush.bf16.msra.mxu2 %v5196_v13  ;;  %1677 = vmatpush.bf16.msrb.mxu0 %v5201_v53 }
 0x1bd   :  { %1639 = vmatpush.bf16.msra.mxu1 %v5204_v19  ;;  %1665 = vmatpush.bf16.msra.mxu3 %v5210_v51  ;;  %v7392_v19 = vld [vmem:[#allocation19_spill] sm:$0xff] }
 0x1bf   :  { %1652 = vmatpush.bf16.msra.mxu2 %v5208_v10  ;;  %1678 = vmatpush.bf16.msrb.mxu0 %v5213_v17  ;;  %v7383_v17 = vld [vmem:[#allocation137_spill] sm:$0xff] }
 0x1c1   :  { %1694 = vmatpush.bf16.msrb.mxu1 %v5215_v56  ;;  %1720 = vmatpush.bf16.msrb.mxu3 %v5219_v52  ;;  %v7381_v52 = vld [vmem:[#allocation135_spill] sm:$0xff] }
 0x1c3   :  { %1707 = vmatpush.bf16.msrb.mxu2 %v5217_v33  ;;  %1733 = vmatpush.bf16.msra.mxu0 %v5222_v20  ;;  %v7379_v20 = vld [vmem:[#allocation133_spill] sm:$0xff] }
 0x1c5   :  { %1695 = vmatpush.bf16.msrb.mxu1 %v5228_v22  ;;  %1721 = vmatpush.bf16.msrb.mxu3 %v7366_v3  ;;  %v839_v28 = vpop.f32.mrf.mxu0  ;;  %v7376_v3 = vld [vmem:[#allocation130_spill] sm:$0xff] }
 0x1c7   :  { %1708 = vmatpush.bf16.msrb.mxu2 %v7365_v48  ;;  %1734 = vmatpush.bf16.msra.mxu0 %v7367_v32  ;;  %v800_v11 = vpop.f32.mrf.mxu1  ;;  %v7375_v48 = vld [vmem:[#allocation129_spill] sm:$0xff]  ;;  %v7377_v32 = vld [vmem:[#allocation131_spill] sm:$0xff] }
 0x1c9   :  { %1696 = vmatpush.bf16.msrb.mxu1 %v7368_v25  ;;  %1722 = vmatpush.bf16.msrb.mxu3 %v7370_v59  ;;  %v826_v25 = vpop.f32.mrf.mxu3  ;;  %v813_v22 = vpop.f32.mrf.mxu2  ;;  %v7378_v59 = vld [vmem:[#allocation132_spill] sm:$0xff] }
 0x1cb   :  { %1709 = vmatpush.bf16.msrb.mxu2 %v7369_v27  ;;  %1735 = vmatpush.bf16.msra.mxu0 %v7371_v63  ;;  %v840_v27 = vadd.f32 %v839_v28, %v826_v25  ;;  %v814_v63 = vadd.f32 %v813_v22, %v800_v11  ;;  %v7387_v22 = vld [vmem:[#allocation141_spill] sm:$0xff]  ;;  %v7388_v11 = vld [vmem:[#allocation142_spill] sm:$0xff] }
 0x1cd   :  { %1697 = vmatpush.bf16.msrb.mxu1 %v7372_v34  ;;  %1723 = vmatpush.bf16.msrb.mxu3 %v7374_v14  ;;  %v7380_v34 = vld [vmem:[#allocation134_spill] sm:$0xff]  ;;  %v7382_v14 = vld [vmem:[#allocation136_spill] sm:$0xff]  ;;  %v843_v45 = vadd.f32 %v814_v63, %v7394_v23 }
 0x1cf   :  { %1710 = vmatpush.bf16.msrb.mxu2 %v7373_v26  ;;  %1736 = vmatpush.bf16.msra.mxu0 %v7375_v48  ;;  %v841_v26 = vpop.f32.mrf.mxu0  ;;  %v802_v48 = vpop.f32.mrf.mxu1  ;;  %v845_v38 = vmul.f32 0.5, %v843_v45 }
 0x1d0   :  { %v7389_v26 = vld [vmem:[#allocation143_spill] sm:$0xff] }
 0x1d1   :  { %1698 = vmatpush.bf16.msrb.mxu1 %v7376_v3  ;;  %1724 = vmatpush.bf16.msrb.mxu3 %v7378_v59  ;;  %v7384_v3 = vld [vmem:[#allocation138_spill] sm:$0xff]  ;;  %v828_v25 = vpop.f32.mrf.mxu3  ;;  %v815_v28 = vpop.f32.mrf.mxu2  ;;  %v7386_v59 = vld [vmem:[#allocation140_spill] sm:$0xff] }
 0x1d3   :  { %1711 = vmatpush.bf16.msrb.mxu2 %v7377_v32  ;;  %1737 = vmatpush.bf16.msra.mxu0 %v7379_v20  ;;  %v7385_v32 = vld [vmem:[#allocation139_spill] sm:$0xff] }
 0x1d5   :  { %1699 = vmatpush.bf16.msrb.mxu1 %v7380_v34  ;;  %1725 = vmatpush.bf16.msrb.mxu3 %v7382_v14  ;;  %v7391_v14 = vld [vmem:[#allocation145_spill] sm:$0xff] }
 0x1d7   :  { %1712 = vmatpush.bf16.msrb.mxu2 %v7381_v52  ;;  %1738 = vmatpush.bf16.msra.mxu0 %v7383_v17  ;;  %v7390_v52 = vld [vmem:[#allocation144_spill] sm:$0xff] }
 0x1d9   :  { %1700 = vmatpush.bf16.msrb.mxu1 %v7384_v3  ;;  %1726 = vmatpush.bf16.msrb.mxu3 %v7386_v59 }
 0x1db   :  { %1713 = vmatpush.bf16.msrb.mxu2 %v7385_v32  ;;  %1739 = vmatpush.bf16.msra.mxu0 %v7387_v22 }
 0x1dd   :  { %1701 = vmatpush.bf16.msrb.mxu1 %v7388_v11  ;;  %1727 = vmatpush.bf16.msrb.mxu3 %v7390_v52  ;;  %v1054_v48 = vpop.f32.mrf.mxu1 }
 0x1df   :  { %1714 = vmatpush.bf16.msrb.mxu2 %v7389_v26  ;;  %1740 = vmatpush.bf16.msra.mxu0 %v7391_v14  ;;  %v1093_v17 = vpop.f32.mrf.mxu0  ;;  %v7393_v14 = vld [vmem:[#allocation20_spill] sm:$0xff] }
 0x1e3   :  { %v1080_v3 = vpop.f32.mrf.mxu3 }
 0x1e4   :  { %v1094_v26 = vadd.f32 %v1093_v17, %v1080_v3  ;;  %v7396_v17 = vld [vmem:[#allocation49_spill] sm:$0xff] }
 0x1e5   :  { %v1067_v34 = vpop.f32.mrf.mxu2  ;;  %v1056_v20 = vpop.f32.mrf.mxu1 }
 0x1e6   :  { %v1068_v11 = vadd.f32 %v1067_v34, %v1054_v48  ;;  %v1098_v24 = vadd.f32 %v1094_v26, %v7393_v14  ;;  %v7395_v20 = vld [vmem:[#allocation18_spill] sm:$0xff] }
 0x1e7   :  { %v1095_v32 = vpop.f32.mrf.mxu0 }
 0x1e8   :  { %v1097_v52 = vadd.f32 %v1068_v11, %v7392_v19  ;;  %v844_v32 = vadd.f32 %v840_v27, %v7395_v20 }
 0x1ea   :  { %v846_v35 = vmul.f32 0.5, %v844_v32 }
 0x1eb   :  { %v1082_v28 = vpop.f32.mrf.mxu3 }
 0x1ec   :  { %v1100_v28 = vmul.f32 0.5, %v1098_v24 }
 0x1ed   :  { %v1069_v25 = vpop.f32.mrf.mxu2 }
 0x1ee   :  { %v1099_v25 = vmul.f32 0.5, %v1097_v52 }
 0x1f0   :  { %4515 = vtanh.f32 %v1099_v25 }
 0x1f1   :  { %4517 = vtanh.f32 %v1100_v28  ;;  %v7398_v28 = vld [vmem:[#allocation51_spill] sm:$0xff] }
 0x1f2   :  { %4519 = vtanh.f32 %v845_v38 }
 0x1f3   :  { %4521 = vtanh.f32 %v846_v35 }
 0x1f6   :  { %v4516_v3 = vpop.eup %4515 }
 0x1f7   :  { %v1103_v52 = vmul.f32 0.5, %v4516_v3 }
 0x1fd   :  { %v1308_v51 = vpop.f32.mrf.mxu1 }
 0x1ff   :  { %v1347_v59 = vpop.f32.mrf.mxu0 }
 0x203   :  { %v1334_v22 = vpop.f32.mrf.mxu3 }
 0x205   :  { %v1321_v33 = vpop.f32.mrf.mxu2  ;;  %v1310_v56 = vpop.f32.mrf.mxu1 }
 0x206   :  { %v1322_v8 = vadd.f32 %v1321_v33, %v1308_v51  ;;  %v1348_v56 = vadd.f32 %v1347_v59, %v1334_v22  ;;  %v1105_v33 = vadd.f32 0.5, %v1103_v52 }
 0x207   :  { %v1349_v10 = vpop.f32.mrf.mxu0 }
 0x208   :  { %v1351_v19 = vadd.f32 %v1322_v8, %v7396_v17  ;;  %v1609_v32 = vmul.f32 0.0, %v1105_v33  ;;  %v7399_v17 = vld [vmem:[#allocation52_spill] sm:$0xff] }
 0x20a   :  { %4523 = vtanh.f32 %v1351_v19 }
 0x20b   :  { %v1336_v13 = vpop.f32.mrf.mxu3 }
 0x20c   :  { %v4518_v13 = vpop.eup %4517 }
 0x20d   :  { %v1323_v53 = vpop.f32.mrf.mxu2  ;;  %v4520_v23 = vpop.eup %4519  ;;  %v1104_v24 = vmul.f32 0.5, %v4518_v13 }
 0x20e   :  { %v7397_v53 = vld [vmem:[#allocation50_spill] sm:$0xff]  ;;  %v4522_v27 = vpop.eup %4521  ;;  %v849_v63 = vmul.f32 0.5, %v4520_v23 }
 0x20f   :  { %v1352_v10 = vadd.f32 %v1348_v56, %v7397_v53  ;;  %v850_v51 = vmul.f32 0.5, %v4522_v27  ;;  %v1106_v38 = vadd.f32 0.5, %v1104_v24 }
 0x210   :  { %v4524_v59 = vpop.eup %4523  ;;  %v851_v22 = vadd.f32 0.5, %v849_v63 }
 0x211   :  { %4525 = vtanh.f32 %v1352_v10  ;;  %v852_v20 = vadd.f32 0.5, %v850_v51  ;;  %v1610_v10 = vmul.f32 0.0, %v1106_v38 }
 0x212   :  { %v1611_v25 = vmul.f32 %v4524_v59, %v851_v22 }
 0x214   :  { %v5595_v27 = vadd.f32 %v1611_v25, %v1609_v32  ;;  %v7402_v32 = vld [vmem:[#allocation148_spill] sm:$0xff]  ;;  %v7403_v25 = vld [vmem:[#allocation149_spill] sm:$0xff] }
 0x217   :  { %v4526_v8 = vpop.eup %4525 }
 0x218   :  { %v1612_v3 = vmul.f32 %v4526_v8, %v852_v20  ;;  %v7401_v20 = vld [vmem:[#allocation147_spill] sm:$0xff] }
 0x21a   :  { %v5597_v52 = vadd.f32 %v1612_v3, %v1610_v10  ;;  %v7409_v10 = vld [vmem:[#allocation155_spill] sm:$0xff]  ;;  %v7410_v3 = vld [vmem:[#allocation156_spill] sm:$0xff] }
 0x21d   :  { %v1556_v34 = vpop.f32.mrf.mxu1 }
 0x21f   :  { %v1595_v45 = vpop.f32.mrf.mxu0 }
 0x223   :  { %v1582_v14 = vpop.f32.mrf.mxu3 }
 0x224   :  { %v1596_v26 = vadd.f32 %v1595_v45, %v1582_v14 }
 0x225   :  { %v1569_v35 = vpop.f32.mrf.mxu2  ;;  %v1558_v48 = vpop.f32.mrf.mxu1 }
 0x226   :  { %v1570_v11 = vadd.f32 %v1569_v35, %v1556_v34  ;;  %v1600_v19 = vadd.f32 %v1596_v26, %v7399_v17  ;;  %v7400_v48 = vld [vmem:[#allocation146_spill] sm:$0xff]  ;;  %v7406_v17 = vld [vmem:[#allocation152_spill] sm:$0xff] }
 0x227   :  { %v1597_v53 = vpop.f32.mrf.mxu0 }
 0x228   :  { %v1599_v56 = vadd.f32 %v1570_v11, %v7398_v28  ;;  %v1602_v23 = vmul.f32 0.5, %v1600_v19  ;;  %v7404_v28 = vld [vmem:[#allocation150_spill] sm:$0xff]  ;;  %v7407_v19 = vld [vmem:[#allocation153_spill] sm:$0xff] }
 0x229   :  { %v7408_v53 = vld [vmem:[#allocation154_spill] sm:$0xff] }
 0x22a   :  { %v1601_v13 = vmul.f32 0.5, %v1599_v56  ;;  %v7405_v56 = vld [vmem:[#allocation151_spill] sm:$0xff] }
 0x22b   :  { %v1584_v45 = vpop.f32.mrf.mxu3 }
 0x22c   :  { %4527 = vtanh.f32 %v1601_v13  ;;  %v7411_v13 = vld [vmem:[#allocation157_spill] sm:$0xff]  ;;  %v7414_v45 = vld [vmem:[#allocation160_spill] sm:$0xff] }
 0x22d   :  { %4529 = vtanh.f32 %v1602_v23  ;;  %v1571_v34 = vpop.f32.mrf.mxu2  ;;  %v7412_v23 = vld [vmem:[#allocation158_spill] sm:$0xff] }
 0x22e   :  { %4531 = vtanh.f32 %v5595_v27  ;;  %v7413_v34 = vld [vmem:[#allocation159_spill] sm:$0xff] }
 0x22f   :  { %4533 = vtanh.f32 %v5597_v52 }
 0x232   :  { %v4528_v24 = vpop.eup %4527 }
 0x233   :  { %v4530_v63 = vpop.eup %4529  ;;  %v1605_v51 = vmul.f32 0.5, %v4528_v24  ;;  %v7415_v24 = vld [vmem:[#allocation161_spill] sm:$0xff] }
 0x234   :  { %v1606_v33 = vmul.f32 0.5, %v4530_v63  ;;  %v4532_v38 = vpop.eup %4531  ;;  %v7416_v63 = vld [vmem:[#allocation162_spill] sm:$0xff] }
 0x235   :  { %v1607_v59 = vadd.f32 0.5, %v1605_v51  ;;  %v4534_v14 = vpop.eup %4533  ;;  %v7417_v51 = vld [vmem:[#allocation163_spill] sm:$0xff] }
 0x236   :  { %v1608_v35 = vadd.f32 0.5, %v1606_v33  ;;  %v7418_v33 = vld [vmem:[#allocation164_spill] sm:$0xff] }
 0x237   :  { %v1617_v8 = vmul.f32 %v4532_v38, %v1607_v59  ;;  %v7419_v59 = vld [vmem:[#allocation165_spill] sm:$0xff]  ;;  %v7420_v38 = vld [vmem:[#allocation166_spill] sm:$0xff] }
 0x238   :  { %v1618_v22 = vmul.f32 %v4534_v14, %v1608_v35  ;;  %v7421_v35 = vld [vmem:[#allocation167_spill] sm:$0xff]  ;;  %v7422_v14 = vld [vmem:[#allocation168_spill] sm:$0xff] }
 0x239   :  { %v5601_v11 = vpack.c.bf16 %v1617_v8, %v1617_v8  ;;  %v7423_v8 = vld [vmem:[#allocation169_spill] sm:$0xff] }
 0x23a   :  { %v5603_v26 = vpack.c.bf16 %v1618_v22, %v1618_v22  ;;  %v7424_v22 = vld [vmem:[#allocation170_spill] sm:$0xff] }
 0x23b   :  { %1640 = vmatmul.bf16.vlgmr.msra.gmra.mxu1 %v5601_v11  ;;  %1666 = vmatmul.bf16.vlgmr.msra.gmra.mxu3 %v5601_v11 }
 0x23c   :  { %1653 = vmatmul.bf16.vlgmr.msra.gmra.mxu2 %v5603_v26  ;;  %1679 = vmatmul.bf16.vlgmr.msrb.gmra.mxu0 %v5603_v26 }
 0x23d   :  { %1756 = vmatpush.bf16.msra.mxu1 %v7400_v48  ;;  %1769 = vmatpush.bf16.msra.mxu2 %v7401_v20 }
 0x23e   :  { %1782 = vmatpush.bf16.msra.mxu3 %v7402_v32  ;;  %1795 = vmatpush.bf16.msrb.mxu0 %v7403_v25 }
 0x241   :  { %1757 = vmatpush.bf16.msra.mxu1 %v7404_v28  ;;  %1770 = vmatpush.bf16.msra.mxu2 %v7405_v56 }
 0x242   :  { %1783 = vmatpush.bf16.msra.mxu3 %v7406_v17  ;;  %1796 = vmatpush.bf16.msrb.mxu0 %v7407_v19 }
 0x245   :  { %1758 = vmatpush.bf16.msra.mxu1 %v7408_v53  ;;  %1771 = vmatpush.bf16.msra.mxu2 %v7409_v10 }
 0x246   :  { %1784 = vmatpush.bf16.msra.mxu3 %v7410_v3  ;;  %1797 = vmatpush.bf16.msrb.mxu0 %v7411_v13 }
 0x249   :  { %1759 = vmatpush.bf16.msra.mxu1 %v7412_v23  ;;  %1772 = vmatpush.bf16.msra.mxu2 %v7413_v34 }
 0x24a   :  { %1785 = vmatpush.bf16.msra.mxu3 %v7414_v45  ;;  %1798 = vmatpush.bf16.msrb.mxu0 %v7415_v24  ;;  %v7425_v24 = vld [vmem:[#allocation171_spill] sm:$0xff] }
 0x24b   :  { %1702 = vmatmul.bf16.vlgmr.msrb.gmra.mxu1 %v5601_v11  ;;  %1728 = vmatmul.bf16.vlgmr.msrb.gmra.mxu3 %v5601_v11 }
 0x24c   :  { %1715 = vmatmul.bf16.vlgmr.msrb.gmra.mxu2 %v5603_v26  ;;  %1741 = vmatmul.bf16.vlgmr.msra.gmra.mxu0 %v5603_v26 }
 0x24d   :  { %1760 = vmatpush.bf16.msra.mxu1 %v7416_v63  ;;  %1773 = vmatpush.bf16.msra.mxu2 %v7417_v51 }
 0x24e   :  { %1786 = vmatpush.bf16.msra.mxu3 %v7418_v33  ;;  %1799 = vmatpush.bf16.msrb.mxu0 %v7419_v59 }
 0x251   :  { %1761 = vmatpush.bf16.msra.mxu1 %v7420_v38  ;;  %1774 = vmatpush.bf16.msra.mxu2 %v7421_v35  ;;  %v7426_v38 = vld [vmem:[#allocation177_spill] sm:$0xff]  ;;  %v7427_v35 = vld [vmem:[#allocation178_spill] sm:$0xff] }
 0x252   :  { %1787 = vmatpush.bf16.msra.mxu3 %v7422_v14  ;;  %1800 = vmatpush.bf16.msrb.mxu0 %v7423_v8  ;;  %v7428_v14 = vld [vmem:[#allocation179_spill] sm:$0xff]  ;;  %v7429_v8 = vld [vmem:[#allocation180_spill] sm:$0xff] }
 0x255   :  { %1762 = vmatpush.bf16.msra.mxu1 %v7424_v22  ;;  %1775 = vmatpush.bf16.msra.mxu2 %v7425_v24  ;;  %v7430_v22 = vld [vmem:[#allocation181_spill] sm:$0xff]  ;;  %v7441_v24 = vld [vmem:[#allocation192_spill] sm:$0xff] }
 0x256   :  { %1788 = vmatpush.bf16.msra.mxu3 %v5398_v37  ;;  %1801 = vmatpush.bf16.msrb.mxu0 %v5401_v57  ;;  %v7439_v57 = vld [vmem:[#allocation190_spill] sm:$0xff]  ;;  %v7440_v37 = vld [vmem:[#allocation191_spill] sm:$0xff] }
 0x259   :  { %1763 = vmatpush.bf16.msra.mxu1 %v5404_v9  ;;  %1776 = vmatpush.bf16.msra.mxu2 %v5408_v7  ;;  %v7431_v7 = vld [vmem:[#allocation182_spill] sm:$0xff]  ;;  %v7438_v9 = vld [vmem:[#allocation189_spill] sm:$0xff] }
 0x25a   :  { %1789 = vmatpush.bf16.msra.mxu3 %v5410_v30  ;;  %1802 = vmatpush.bf16.msrb.mxu0 %v7426_v38  ;;  %v7432_v30 = vld [vmem:[#allocation183_spill] sm:$0xff]  ;;  %v7433_v38 = vld [vmem:[#allocation184_spill] sm:$0xff] }
 0x25c   :  { %1764 = vmatmul.bf16.vlgmr.msra.gmra.mxu1 %v5601_v11  ;;  %1777 = vmatmul.bf16.vlgmr.msra.gmra.mxu2 %v5603_v26 }
 0x25d   :  { %1812 = vmatpush.bf16.msrb.mxu1 %v7427_v35  ;;  %1825 = vmatpush.bf16.msrb.mxu2 %v7428_v14  ;;  %v7434_v35 = vld [vmem:[#allocation185_spill] sm:$0xff]  ;;  %v7435_v14 = vld [vmem:[#allocation186_spill] sm:$0xff] }
 0x25e   :  { %1838 = vmatpush.bf16.msrb.mxu3 %v7429_v8  ;;  %1851 = vmatpush.bf16.msra.mxu0 %v7430_v22  ;;  %v7436_v8 = vld [vmem:[#allocation187_spill] sm:$0xff]  ;;  %v7437_v22 = vld [vmem:[#allocation188_spill] sm:$0xff] }
 0x25f   :  { %1790 = vmatmul.bf16.vlgmr.msra.gmra.mxu3 %v5601_v11  ;;  %1803 = vmatmul.bf16.vlgmr.msrb.gmra.mxu0 %v5603_v26 }
 0x261   :  { %1813 = vmatpush.bf16.msrb.mxu1 %v7431_v7  ;;  %1826 = vmatpush.bf16.msrb.mxu2 %v7432_v30  ;;  %v7442_v7 = vld [vmem:[#allocation193_spill] sm:$0xff]  ;;  %v7443_v30 = vld [vmem:[#allocation194_spill] sm:$0xff] }
 0x262   :  { %1839 = vmatpush.bf16.msrb.mxu3 %v7433_v38  ;;  %1852 = vmatpush.bf16.msra.mxu0 %v7434_v35  ;;  %v7444_v38 = vld [vmem:[#allocation195_spill] sm:$0xff]  ;;  %v7445_v35 = vld [vmem:[#allocation196_spill] sm:$0xff] }
 0x265   :  { %1814 = vmatpush.bf16.msrb.mxu1 %v7435_v14  ;;  %1827 = vmatpush.bf16.msrb.mxu2 %v7436_v8  ;;  %v7446_v14 = vld [vmem:[#allocation197_spill] sm:$0xff]  ;;  %v7447_v8 = vld [vmem:[#allocation198_spill] sm:$0xff] }
 0x266   :  { %1840 = vmatpush.bf16.msrb.mxu3 %v7437_v22  ;;  %1853 = vmatpush.bf16.msra.mxu0 %v7438_v9  ;;  %v7448_v22 = vld [vmem:[#allocation199_spill] sm:$0xff] }
 0x269   :  { %1815 = vmatpush.bf16.msrb.mxu1 %v7439_v57  ;;  %1828 = vmatpush.bf16.msrb.mxu2 %v7440_v37 }
 0x26a   :  { %1841 = vmatpush.bf16.msrb.mxu3 %v7441_v24  ;;  %1854 = vmatpush.bf16.msra.mxu0 %v7442_v7 }
 0x26d   :  { %1816 = vmatpush.bf16.msrb.mxu1 %v7443_v30  ;;  %1829 = vmatpush.bf16.msrb.mxu2 %v7444_v38 }
 0x26e   :  { %1842 = vmatpush.bf16.msrb.mxu3 %v7445_v35  ;;  %1855 = vmatpush.bf16.msra.mxu0 %v7446_v14 }
 0x271   :  { %1817 = vmatpush.bf16.msrb.mxu1 %v7447_v8  ;;  %1830 = vmatpush.bf16.msrb.mxu2 %v7448_v22 }
 0x272   :  { %1843 = vmatpush.bf16.msrb.mxu3 %v5486_v61  ;;  %1856 = vmatpush.bf16.msra.mxu0 %v5489_v21 }
 0x275   :  { %1818 = vmatpush.bf16.msrb.mxu1 %v5492_v6  ;;  %1831 = vmatpush.bf16.msrb.mxu2 %v5496_v44 }
 0x276   :  { %1844 = vmatpush.bf16.msrb.mxu3 %v5498_v29  ;;  %1857 = vmatpush.bf16.msra.mxu0 %v5501_v42  ;;  %v7495_v29 = vld [vmem:[#allocation23_spill] sm:$0xff] }
 0x279   :  { %1819 = vmatpush.bf16.msrb.mxu1 %v5504_v15  ;;  %1832 = vmatpush.bf16.msrb.mxu2 %v5508_v40  ;;  %v7494_v40 = vld [vmem:[#allocation21_spill] sm:$0xff] }
 0x27a   :  { %1845 = vmatpush.bf16.msrb.mxu3 %v5510_v1  ;;  %1858 = vmatpush.bf16.msra.mxu0 %v5513_v58 }
 0x27c   :  { %1820 = vmatmul.bf16.vlgmr.msrb.gmra.mxu1 %v5601_v11  ;;  %1833 = vmatmul.bf16.vlgmr.msrb.gmra.mxu2 %v5603_v26 }
 0x27d   :  { %1897 = vmatpush.bf16.msra.mxu1 %v5123_v49  ;;  %1910 = vmatpush.bf16.msra.mxu2 %v5125_v55 }
 0x27e   :  { %1846 = vmatmul.bf16.vlgmr.msrb.gmra.mxu3 %v5601_v11  ;;  %1859 = vmatmul.bf16.vlgmr.msra.gmra.mxu0 %v5603_v26  ;;  %v7449_v11 = vld [vmem:[#allocation102_spill] sm:$0xff]  ;;  %v7450_v26 = vld [vmem:[#allocation103_spill] sm:$0xff] }
 0x27f   :  { %1923 = vmatpush.bf16.msra.mxu3 %v5127_v16  ;;  %1936 = vmatpush.bf16.msrb.mxu0 %v5130_v54 }
 0x281   :  { %1898 = vmatpush.bf16.msra.mxu1 %v5134_v62  ;;  %1911 = vmatpush.bf16.msra.mxu2 %v5136_v0 }
 0x283   :  { %1924 = vmatpush.bf16.msra.mxu3 %v5139_v2  ;;  %1937 = vmatpush.bf16.msrb.mxu0 %v5141_v12 }
 0x285   :  { %1899 = vmatpush.bf16.msra.mxu1 %v5144_v18  ;;  %1912 = vmatpush.bf16.msra.mxu2 %v5148_v47 }
 0x287   :  { %1925 = vmatpush.bf16.msra.mxu3 %v5150_v5  ;;  %1938 = vmatpush.bf16.msrb.mxu0 %v5153_v39  ;;  %v7451_v39 = vld [vmem:[#allocation104_spill] sm:$0xff] }
 0x289   :  { %1900 = vmatpush.bf16.msra.mxu1 %v5156_v36  ;;  %1913 = vmatpush.bf16.msra.mxu2 %v5160_v46  ;;  %v7452_v36 = vld [vmem:[#allocation105_spill] sm:$0xff]  ;;  %v7453_v46 = vld [vmem:[#allocation106_spill] sm:$0xff] }
 0x28b   :  { %1926 = vmatpush.bf16.msra.mxu3 %v5162_v4  ;;  %1939 = vmatpush.bf16.msrb.mxu0 %v5165_v50  ;;  %v7454_v4 = vld [vmem:[#allocation107_spill] sm:$0xff]  ;;  %v7455_v50 = vld [vmem:[#allocation108_spill] sm:$0xff] }
 0x28d   :  { %1901 = vmatpush.bf16.msra.mxu1 %v5168_v31  ;;  %1914 = vmatpush.bf16.msra.mxu2 %v5172_v41  ;;  %v7456_v31 = vld [vmem:[#allocation109_spill] sm:$0xff]  ;;  %v7457_v41 = vld [vmem:[#allocation110_spill] sm:$0xff] }
 0x28f   :  { %1927 = vmatpush.bf16.msra.mxu3 %v5174_v43  ;;  %1940 = vmatpush.bf16.msrb.mxu0 %v5177_v60  ;;  %v7458_v43 = vld [vmem:[#allocation111_spill] sm:$0xff]  ;;  %v7459_v60 = vld [vmem:[#allocation114_spill] sm:$0xff] }
 0x291   :  { %1902 = vmatpush.bf16.msra.mxu1 %v7449_v11  ;;  %1915 = vmatpush.bf16.msra.mxu2 %v7450_v26  ;;  %v7460_v11 = vld [vmem:[#allocation115_spill] sm:$0xff]  ;;  %v7461_v26 = vld [vmem:[#allocation112_spill] sm:$0xff] }
 0x293   :  { %1928 = vmatpush.bf16.msra.mxu3 %v7451_v39  ;;  %1941 = vmatpush.bf16.msrb.mxu0 %v7452_v36  ;;  %v7462_v39 = vld [vmem:[#allocation113_spill] sm:$0xff]  ;;  %v7463_v36 = vld [vmem:[#allocation116_spill] sm:$0xff] }
 0x295   :  { %1903 = vmatpush.bf16.msra.mxu1 %v7453_v46  ;;  %1916 = vmatpush.bf16.msra.mxu2 %v7454_v4  ;;  %v7464_v46 = vld [vmem:[#allocation117_spill] sm:$0xff]  ;;  %v7465_v4 = vld [vmem:[#allocation118_spill] sm:$0xff] }
 0x297   :  { %1929 = vmatpush.bf16.msra.mxu3 %v7455_v50  ;;  %1942 = vmatpush.bf16.msrb.mxu0 %v7456_v31  ;;  %v7466_v50 = vld [vmem:[#allocation119_spill] sm:$0xff]  ;;  %v7467_v31 = vld [vmem:[#allocation120_spill] sm:$0xff] }
 0x299   :  { %1904 = vmatpush.bf16.msra.mxu1 %v7457_v41  ;;  %1917 = vmatpush.bf16.msra.mxu2 %v7458_v43  ;;  %v7468_v41 = vld [vmem:[#allocation121_spill] sm:$0xff]  ;;  %v7469_v43 = vld [vmem:[#allocation122_spill] sm:$0xff] }
 0x29b   :  { %1930 = vmatpush.bf16.msra.mxu3 %v7461_v26  ;;  %1943 = vmatpush.bf16.msrb.mxu0 %v7462_v39  ;;  %v7472_v26 = vld [vmem:[#allocation125_spill] sm:$0xff]  ;;  %v7473_v39 = vld [vmem:[#allocation126_spill] sm:$0xff] }
 0x29d   :  { %1959 = vmatpush.bf16.msrb.mxu1 %v7459_v60  ;;  %1972 = vmatpush.bf16.msrb.mxu2 %v7460_v11  ;;  %v7470_v60 = vld [vmem:[#allocation123_spill] sm:$0xff]  ;;  %v7471_v11 = vld [vmem:[#allocation124_spill] sm:$0xff] }
 0x29f   :  { %1985 = vmatpush.bf16.msrb.mxu3 %v7463_v36  ;;  %1998 = vmatpush.bf16.msra.mxu0 %v7464_v46  ;;  %v7474_v36 = vld [vmem:[#allocation127_spill] sm:$0xff]  ;;  %v7475_v46 = vld [vmem:[#allocation128_spill] sm:$0xff] }
 0x2a1   :  { %1960 = vmatpush.bf16.msrb.mxu1 %v7465_v4  ;;  %1973 = vmatpush.bf16.msrb.mxu2 %v7466_v50  ;;  %v7476_v4 = vld [vmem:[#allocation129_spill] sm:$0xff]  ;;  %v7477_v50 = vld [vmem:[#allocation130_spill] sm:$0xff] }
 0x2a3   :  { %1986 = vmatpush.bf16.msrb.mxu3 %v7467_v31  ;;  %1999 = vmatpush.bf16.msra.mxu0 %v7468_v41  ;;  %v7478_v31 = vld [vmem:[#allocation131_spill] sm:$0xff]  ;;  %v7479_v41 = vld [vmem:[#allocation132_spill] sm:$0xff] }
 0x2a5   :  { %1961 = vmatpush.bf16.msrb.mxu1 %v7469_v43  ;;  %1974 = vmatpush.bf16.msrb.mxu2 %v7470_v60  ;;  %v7480_v43 = vld [vmem:[#allocation133_spill] sm:$0xff]  ;;  %v7481_v60 = vld [vmem:[#allocation134_spill] sm:$0xff] }
 0x2a7   :  { %1987 = vmatpush.bf16.msrb.mxu3 %v7471_v11  ;;  %2000 = vmatpush.bf16.msra.mxu0 %v7472_v26  ;;  %v7482_v11 = vld [vmem:[#allocation135_spill] sm:$0xff]  ;;  %v7483_v26 = vld [vmem:[#allocation136_spill] sm:$0xff] }
 0x2a9   :  { %1962 = vmatpush.bf16.msrb.mxu1 %v7473_v39  ;;  %1975 = vmatpush.bf16.msrb.mxu2 %v7474_v36  ;;  %v7484_v39 = vld [vmem:[#allocation137_spill] sm:$0xff]  ;;  %v7485_v36 = vld [vmem:[#allocation138_spill] sm:$0xff] }
 0x2ab   :  { %1988 = vmatpush.bf16.msrb.mxu3 %v7475_v46  ;;  %2001 = vmatpush.bf16.msra.mxu0 %v7476_v4  ;;  %v7486_v46 = vld [vmem:[#allocation139_spill] sm:$0xff]  ;;  %v7487_v4 = vld [vmem:[#allocation140_spill] sm:$0xff] }
 0x2ad   :  { %1963 = vmatpush.bf16.msrb.mxu1 %v7477_v50  ;;  %1976 = vmatpush.bf16.msrb.mxu2 %v7478_v31  ;;  %v7488_v50 = vld [vmem:[#allocation141_spill] sm:$0xff]  ;;  %v7489_v31 = vld [vmem:[#allocation142_spill] sm:$0xff] }
 0x2af   :  { %1989 = vmatpush.bf16.msrb.mxu3 %v7479_v41  ;;  %2002 = vmatpush.bf16.msra.mxu0 %v7480_v43  ;;  %v7490_v41 = vld [vmem:[#allocation143_spill] sm:$0xff]  ;;  %v7491_v43 = vld [vmem:[#allocation144_spill] sm:$0xff] }
 0x2b1   :  { %1964 = vmatpush.bf16.msrb.mxu1 %v7481_v60  ;;  %1977 = vmatpush.bf16.msrb.mxu2 %v7482_v11  ;;  %v7492_v60 = vld [vmem:[#allocation145_spill] sm:$0xff] }
 0x2b3   :  { %1990 = vmatpush.bf16.msrb.mxu3 %v7483_v26  ;;  %2003 = vmatpush.bf16.msra.mxu0 %v7484_v39 }
 0x2b5   :  { %1965 = vmatpush.bf16.msrb.mxu1 %v7485_v36  ;;  %1978 = vmatpush.bf16.msrb.mxu2 %v7486_v46 }
 0x2b7   :  { %1991 = vmatpush.bf16.msrb.mxu3 %v7487_v4  ;;  %2004 = vmatpush.bf16.msra.mxu0 %v7488_v50 }
 0x2b8   :  { %v1641_v11 = vpop.f32.mrf.mxu1 }
 0x2b9   :  { %1966 = vmatpush.bf16.msrb.mxu1 %v7489_v31  ;;  %1979 = vmatpush.bf16.msrb.mxu2 %v7490_v41  ;;  %v1680_v26 = vpop.f32.mrf.mxu0 }
 0x2bb   :  { %1992 = vmatpush.bf16.msrb.mxu3 %v7491_v43  ;;  %2005 = vmatpush.bf16.msra.mxu0 %v7492_v60 }
 0x2be   :  { %v1667_v5 = vpop.f32.mrf.mxu3 }
 0x2bf   :  { %v1654_v39 = vpop.f32.mrf.mxu2  ;;  %v1681_v49 = vadd.f32 %v1680_v26, %v1667_v5 }
 0x2c0   :  { %v1643_v47 = vpop.f32.mrf.mxu1  ;;  %v1655_v1 = vadd.f32 %v1654_v39, %v1641_v11 }
 0x2c1   :  { %v1682_v36 = vpop.f32.mrf.mxu0 }
 0x2c2   :  { %v1684_v15 = vadd.f32 %v1655_v1, %v7494_v40 }
 0x2c4   :  { %v1686_v6 = vmul.f32 0.5, %v1684_v15 }
 0x2c6   :  { %v1669_v18 = vpop.f32.mrf.mxu3 }
 0x2c7   :  { %v1656_v46 = vpop.f32.mrf.mxu2  ;;  %v7493_v18 = vld [vmem:[#allocation22_spill] sm:$0xff] }
 0x2c8   :  { %v1703_v12 = vpop.f32.mrf.mxu1  ;;  %v1685_v46 = vadd.f32 %v1681_v49, %v7493_v18 }
 0x2c9   :  { %v1742_v4 = vpop.f32.mrf.mxu0 }
 0x2ca   :  { %v1687_v44 = vmul.f32 0.5, %v1685_v46 }
 0x2cc   :  { %4535 = vtanh.f32 %v1687_v44 }
 0x2cd   :  { %4537 = vtanh.f32 %v1686_v6 }
 0x2ce   :  { %v1729_v2 = vpop.f32.mrf.mxu3 }
 0x2cf   :  { %v1716_v50 = vpop.f32.mrf.mxu2  ;;  %v1743_v36 = vadd.f32 %v1742_v4, %v1729_v2  ;;  %v7498_v2 = vld [vmem:[#allocation54_spill] sm:$0xff] }
 0x2d0   :  { %v1705_v0 = vpop.f32.mrf.mxu1  ;;  %v1717_v47 = vadd.f32 %v1716_v50, %v1703_v12  ;;  %v7497_v12 = vld [vmem:[#allocation53_spill] sm:$0xff] }
 0x2d1   :  { %v1744_v31 = vpop.f32.mrf.mxu0 }
 0x2d2   :  { %v1746_v0 = vadd.f32 %v1717_v47, %v7495_v29  ;;  %v4536_v4 = vpop.eup %4535 }
 0x2d3   :  { %v4538_v50 = vpop.eup %4537  ;;  %v1691_v44 = vmul.f32 0.5, %v4536_v4 }
 0x2d4   :  { %v1748_v21 = vmul.f32 0.5, %v1746_v0  ;;  %v1690_v1 = vmul.f32 0.5, %v4538_v50  ;;  %v7499_v0 = vld [vmem:[#allocation55_spill] sm:$0xff] }
 0x2d5   :  { %v1693_v26 = vadd.f32 0.5, %v1691_v44 }
 0x2d6   :  { %v1731_v62 = vpop.f32.mrf.mxu3  ;;  %4539 = vtanh.f32 %v1748_v21  ;;  %v1692_v6 = vadd.f32 0.5, %v1690_v1 }
 0x2d7   :  { %v1718_v41 = vpop.f32.mrf.mxu2  ;;  %v7496_v62 = vld [vmem:[#allocation24_spill] sm:$0xff] }
 0x2d8   :  { %v1747_v41 = vadd.f32 %v1743_v36, %v7496_v62 }
 0x2d9   :  { %v1765_v54 = vpop.f32.mrf.mxu1 }
 0x2da   :  { %v1749_v61 = vmul.f32 0.5, %v1747_v41 }
 0x2dc   :  { %v1804_v43 = vpop.f32.mrf.mxu0  ;;  %4541 = vtanh.f32 %v1749_v61  ;;  %v4540_v29 = vpop.eup %4539 }
 0x2df   :  { %v1778_v16 = vpop.f32.mrf.mxu2 }
 0x2e1   :  { %v1767_v55 = vpop.f32.mrf.mxu1 }
 0x2e2   :  { %v1791_v60 = vpop.f32.mrf.mxu3  ;;  %v1779_v55 = vadd.f32 %v1778_v16, %v1765_v54  ;;  %v4542_v40 = vpop.eup %4541 }
 0x2e3   :  { %v1805_v39 = vadd.f32 %v1804_v43, %v1791_v60  ;;  %v1753_v16 = vmul.f32 0.5, %v4542_v40 }
 0x2e4   :  { %v1806_v58 = vpop.f32.mrf.mxu0  ;;  %v1808_v49 = vadd.f32 %v1779_v55, %v7497_v12  ;;  %v7500_v55 = vld [vmem:[#allocation56_spill] sm:$0xff] }
 0x2e5   :  { %v1809_v5 = vadd.f32 %v1805_v39, %v7498_v2  ;;  %v1752_v58 = vmul.f32 0.5, %v4540_v29  ;;  %v1755_v47 = vadd.f32 0.5, %v1753_v16 }
 0x2e6   :  { %4543 = vtanh.f32 %v1808_v49 }
 0x2e7   :  { %v1780_v42 = vpop.f32.mrf.mxu2  ;;  %4545 = vtanh.f32 %v1809_v5  ;;  %v1754_v61 = vadd.f32 0.5, %v1752_v58  ;;  %v1875_v2 = vmul.f32 %v1755_v47, %v5597_v52  ;;  %v7505_v47 = vld [vmem:[#allocation169_spill] sm:$0xff] }
 0x2e9   :  { %v1874_v12 = vmul.f32 %v1754_v61, %v5595_v27  ;;  %v7501_v61 = vld [vmem:[#allocation161_spill] sm:$0xff] }
 0x2ea   :  { %v1793_v31 = vpop.f32.mrf.mxu3 }
 0x2ec   :  { %v4544_v54 = vpop.eup %4543 }
 0x2ed   :  { %v4546_v60 = vpop.eup %4545  ;;  %v1876_v46 = vmul.f32 %v4544_v54, %v1692_v6 }
 0x2ee   :  { %v1877_v41 = vmul.f32 %v4546_v60, %v1693_v26  ;;  %v7504_v26 = vld [vmem:[#allocation168_spill] sm:$0xff] }
 0x2ef   :  { %v5759_v4 = vadd.f32 %v1876_v46, %v1874_v12  ;;  %v7508_v46 = vld [vmem:[#allocation172_spill] sm:$0xff]  ;;  %v7515_v12 = vld [vmem:[#allocation179_spill] sm:$0xff] }
 0x2f0   :  { %v5761_v50 = vadd.f32 %v1877_v41, %v1875_v2  ;;  %v7512_v41 = vld [vmem:[#allocation176_spill] sm:$0xff]  ;;  %v7517_v2 = vld [vmem:[#allocation181_spill] sm:$0xff] }
 0x2f9   :  { %v1821_v42 = vpop.f32.mrf.mxu1 }
 0x2fb   :  { %v1860_v15 = vpop.f32.mrf.mxu0 }
 0x2ff   :  { %v1834_v43 = vpop.f32.mrf.mxu2 }
 0x300   :  { %v1835_v21 = vadd.f32 %v1834_v43, %v1821_v42 }
 0x301   :  { %v1847_v11 = vpop.f32.mrf.mxu3  ;;  %v1823_v18 = vpop.f32.mrf.mxu1 }
 0x302   :  { %v1861_v36 = vadd.f32 %v1860_v15, %v1847_v11  ;;  %v1864_v31 = vadd.f32 %v1835_v21, %v7499_v0  ;;  %v7502_v21 = vld [vmem:[#allocation166_spill] sm:$0xff]  ;;  %v7503_v11 = vld [vmem:[#allocation167_spill] sm:$0xff]  ;;  %v7509_v0 = vld [vmem:[#allocation173_spill] sm:$0xff] }
 0x303   :  { %v1862_v62 = vpop.f32.mrf.mxu0  ;;  %v7507_v18 = vld [vmem:[#allocation171_spill] sm:$0xff] }
 0x304   :  { %v1865_v39 = vadd.f32 %v1861_v36, %v7500_v55  ;;  %v1866_v49 = vmul.f32 0.5, %v1864_v31  ;;  %v7506_v36 = vld [vmem:[#allocation170_spill] sm:$0xff]  ;;  %v7511_v62 = vld [vmem:[#allocation175_spill] sm:$0xff]  ;;  %v7513_v55 = vld [vmem:[#allocation177_spill] sm:$0xff] }
 0x305   :  { %v7510_v31 = vld [vmem:[#allocation174_spill] sm:$0xff] }
 0x306   :  { %v1867_v5 = vmul.f32 0.5, %v1865_v39  ;;  %4547 = vtanh.f32 %v1866_v49  ;;  %v7514_v39 = vld [vmem:[#allocation178_spill] sm:$0xff]  ;;  %v7516_v49 = vld [vmem:[#allocation180_spill] sm:$0xff] }
 0x307   :  { %v1836_v29 = vpop.f32.mrf.mxu2 }
 0x308   :  { %4549 = vtanh.f32 %v1867_v5  ;;  %v7518_v5 = vld [vmem:[#allocation182_spill] sm:$0xff]  ;;  %v7519_v29 = vld [vmem:[#allocation183_spill] sm:$0xff] }
 0x309   :  { %v1849_v42 = vpop.f32.mrf.mxu3  ;;  %4551 = vtanh.f32 %v5759_v4 }
 0x30a   :  { %4553 = vtanh.f32 %v5761_v50  ;;  %v7520_v42 = vld [vmem:[#allocation184_spill] sm:$0xff] }
 0x30c   :  { %v4548_v40 = vpop.eup %4547 }
 0x30d   :  { %v1870_v1 = vmul.f32 0.5, %v4548_v40  ;;  %v7521_v40 = vld [vmem:[#allocation185_spill] sm:$0xff] }
 0x30e   :  { %v4550_v15 = vpop.eup %4549 }
 0x30f   :  { %v1871_v27 = vmul.f32 0.5, %v4550_v15  ;;  %v1872_v58 = vadd.f32 0.5, %v1870_v1  ;;  %v4552_v44 = vpop.eup %4551  ;;  %v7522_v15 = vld [vmem:[#allocation186_spill] sm:$0xff]  ;;  %v7523_v1 = vld [vmem:[#allocation187_spill] sm:$0xff] }
 0x310   :  { %v4554_v16 = vpop.eup %4553 }
 0x311   :  { %v1873_v52 = vadd.f32 0.5, %v1871_v27  ;;  %v1882_v54 = vmul.f32 %v4552_v44, %v1872_v58  ;;  %v7524_v27 = vld [vmem:[#allocation188_spill] sm:$0xff]  ;;  %v7526_v44 = vld [vmem:[#allocation201_spill] sm:$0xff] }
 0x312   :  { %v7525_v58 = vld [vmem:[#allocation200_spill] sm:$0xff] }
 0x313   :  { %v1883_v43 = vmul.f32 %v4554_v16, %v1873_v52  ;;  %v5765_v60 = vpack.c.bf16 %v1882_v54, %v1882_v54  ;;  %v7527_v52 = vld [vmem:[#allocation202_spill] sm:$0xff]  ;;  %v7528_v16 = vld [vmem:[#allocation203_spill] sm:$0xff]  ;;  %v7529_v54 = vld [vmem:[#allocation204_spill] sm:$0xff] }
 0x315   :  { %v5767_v6 = vpack.c.bf16 %v1883_v43, %v1883_v43  ;;  %1905 = vmatmul.bf16.vlgmr.msra.gmra.mxu1 %v5765_v60  ;;  %1931 = vmatmul.bf16.vlgmr.msra.gmra.mxu3 %v5765_v60  ;;  %v7530_v43 = vld [vmem:[#allocation205_spill] sm:$0xff] }
 0x316   :  { %2021 = vmatpush.bf16.msra.mxu1 %v7400_v48  ;;  %2047 = vmatpush.bf16.msra.mxu3 %v7402_v32 }
 0x317   :  { %1918 = vmatmul.bf16.vlgmr.msra.gmra.mxu2 %v5767_v6  ;;  %1944 = vmatmul.bf16.vlgmr.msrb.gmra.mxu0 %v5767_v6 }
 0x318   :  { %2034 = vmatpush.bf16.msra.mxu2 %v7401_v20  ;;  %2060 = vmatpush.bf16.msrb.mxu0 %v7403_v25 }
 0x31a   :  { %2022 = vmatpush.bf16.msra.mxu1 %v7404_v28  ;;  %2048 = vmatpush.bf16.msra.mxu3 %v7406_v17 }
 0x31c   :  { %2035 = vmatpush.bf16.msra.mxu2 %v7405_v56  ;;  %2061 = vmatpush.bf16.msrb.mxu0 %v7407_v19 }
 0x31e   :  { %2023 = vmatpush.bf16.msra.mxu1 %v7408_v53  ;;  %2049 = vmatpush.bf16.msra.mxu3 %v7410_v3 }
 0x320   :  { %2036 = vmatpush.bf16.msra.mxu2 %v7409_v10  ;;  %2062 = vmatpush.bf16.msrb.mxu0 %v7411_v13 }
 0x322   :  { %2024 = vmatpush.bf16.msra.mxu1 %v7412_v23  ;;  %2050 = vmatpush.bf16.msra.mxu3 %v7414_v45 }
 0x324   :  { %2037 = vmatpush.bf16.msra.mxu2 %v7413_v34  ;;  %2063 = vmatpush.bf16.msrb.mxu0 %v7501_v61 }
 0x325   :  { %1967 = vmatmul.bf16.vlgmr.msrb.gmra.mxu1 %v5765_v60  ;;  %1993 = vmatmul.bf16.vlgmr.msrb.gmra.mxu3 %v5765_v60 }
 0x326   :  { %2025 = vmatpush.bf16.msra.mxu1 %v7416_v63  ;;  %2051 = vmatpush.bf16.msra.mxu3 %v7418_v33 }
 0x327   :  { %1980 = vmatmul.bf16.vlgmr.msrb.gmra.mxu2 %v5767_v6  ;;  %2006 = vmatmul.bf16.vlgmr.msra.gmra.mxu0 %v5767_v6 }
 0x328   :  { %2038 = vmatpush.bf16.msra.mxu2 %v7417_v51  ;;  %2064 = vmatpush.bf16.msrb.mxu0 %v7419_v59 }
 0x32a   :  { %2026 = vmatpush.bf16.msra.mxu1 %v7502_v21  ;;  %2052 = vmatpush.bf16.msra.mxu3 %v7504_v26 }
 0x32c   :  { %2039 = vmatpush.bf16.msra.mxu2 %v7503_v11  ;;  %2065 = vmatpush.bf16.msrb.mxu0 %v7505_v47 }
 0x32e   :  { %2027 = vmatpush.bf16.msra.mxu1 %v7506_v36  ;;  %2053 = vmatpush.bf16.msra.mxu3 %v7508_v46 }
 0x330   :  { %2040 = vmatpush.bf16.msra.mxu2 %v7507_v18  ;;  %2066 = vmatpush.bf16.msrb.mxu0 %v7509_v0 }
 0x332   :  { %2028 = vmatpush.bf16.msra.mxu1 %v7510_v31  ;;  %2054 = vmatpush.bf16.msra.mxu3 %v7512_v41 }
 0x334   :  { %2041 = vmatpush.bf16.msra.mxu2 %v7511_v62  ;;  %2067 = vmatpush.bf16.msrb.mxu0 %v7513_v55 }
 0x335   :  { %2029 = vmatmul.bf16.vlgmr.msra.gmra.mxu1 %v5765_v60  ;;  %2055 = vmatmul.bf16.vlgmr.msra.gmra.mxu3 %v5765_v60 }
 0x336   :  { %2077 = vmatpush.bf16.msrb.mxu1 %v7514_v39  ;;  %2103 = vmatpush.bf16.msrb.mxu3 %v7516_v49  ;;  %v7601_v49 = vld [vmem:[#allocation27_spill] sm:$0xff] }
 0x337   :  { %2042 = vmatmul.bf16.vlgmr.msra.gmra.mxu2 %v5767_v6  ;;  %2068 = vmatmul.bf16.vlgmr.msrb.gmra.mxu0 %v5767_v6 }
 0x338   :  { %2090 = vmatpush.bf16.msrb.mxu2 %v7515_v12  ;;  %2116 = vmatpush.bf16.msra.mxu0 %v7517_v2 }
 0x33a   :  { %2078 = vmatpush.bf16.msrb.mxu1 %v7518_v5  ;;  %2104 = vmatpush.bf16.msrb.mxu3 %v7520_v42 }
 0x33c   :  { %2091 = vmatpush.bf16.msrb.mxu2 %v7519_v29  ;;  %2117 = vmatpush.bf16.msra.mxu0 %v7521_v40  ;;  %v7600_v29 = vld [vmem:[#allocation25_spill] sm:$0xff] }
 0x33e   :  { %2079 = vmatpush.bf16.msrb.mxu1 %v7522_v15  ;;  %2105 = vmatpush.bf16.msrb.mxu3 %v7524_v27 }
 0x340   :  { %2092 = vmatpush.bf16.msrb.mxu2 %v7523_v1  ;;  %2118 = vmatpush.bf16.msra.mxu0 %v7438_v9 }
 0x342   :  { %2080 = vmatpush.bf16.msrb.mxu1 %v7439_v57  ;;  %2106 = vmatpush.bf16.msrb.mxu3 %v7441_v24 }
 0x344   :  { %2093 = vmatpush.bf16.msrb.mxu2 %v7440_v37  ;;  %2119 = vmatpush.bf16.msra.mxu0 %v7442_v7 }
 0x346   :  { %2081 = vmatpush.bf16.msrb.mxu1 %v7443_v30  ;;  %2107 = vmatpush.bf16.msrb.mxu3 %v7445_v35  ;;  %v7532_v35 = vld [vmem:[#allocation207_spill] sm:$0xff] }
 0x348   :  { %2094 = vmatpush.bf16.msrb.mxu2 %v7444_v38  ;;  %2120 = vmatpush.bf16.msra.mxu0 %v7446_v14  ;;  %v7531_v38 = vld [vmem:[#allocation206_spill] sm:$0xff]  ;;  %v7533_v14 = vld [vmem:[#allocation208_spill] sm:$0xff] }
 0x34a   :  { %2082 = vmatpush.bf16.msrb.mxu1 %v7447_v8  ;;  %2108 = vmatpush.bf16.msrb.mxu3 %v7525_v58  ;;  %v7534_v8 = vld [vmem:[#allocation209_spill] sm:$0xff]  ;;  %v7536_v58 = vld [vmem:[#allocation83_spill] sm:$0xff] }
 0x34c   :  { %2095 = vmatpush.bf16.msrb.mxu2 %v7448_v22  ;;  %2121 = vmatpush.bf16.msra.mxu0 %v7526_v44  ;;  %v7535_v22 = vld [vmem:[#allocation82_spill] sm:$0xff] }
 0x34e   :  { %2083 = vmatpush.bf16.msrb.mxu1 %v7527_v52  ;;  %2109 = vmatpush.bf16.msrb.mxu3 %v7529_v54  ;;  %v7544_v54 = vld [vmem:[#allocation91_spill] sm:$0xff] }
 0x350   :  { %2096 = vmatpush.bf16.msrb.mxu2 %v7528_v16  ;;  %2122 = vmatpush.bf16.msra.mxu0 %v7530_v43  ;;  %v7537_v43 = vld [vmem:[#allocation84_spill] sm:$0xff] }
 0x351   :  { %v7545_v16 = vld [vmem:[#allocation92_spill] sm:$0xff] }
 0x352   :  { %2084 = vmatpush.bf16.msrb.mxu1 %v7531_v38  ;;  %2110 = vmatpush.bf16.msrb.mxu3 %v7533_v14  ;;  %v7538_v38 = vld [vmem:[#allocation85_spill] sm:$0xff]  ;;  %v7540_v14 = vld [vmem:[#allocation87_spill] sm:$0xff] }
 0x354   :  { %2097 = vmatpush.bf16.msrb.mxu2 %v7532_v35  ;;  %2123 = vmatpush.bf16.msra.mxu0 %v7534_v8  ;;  %v7539_v35 = vld [vmem:[#allocation86_spill] sm:$0xff]  ;;  %v7541_v8 = vld [vmem:[#allocation88_spill] sm:$0xff] }
 0x355   :  { %2085 = vmatmul.bf16.vlgmr.msrb.gmra.mxu1 %v5765_v60  ;;  %2111 = vmatmul.bf16.vlgmr.msrb.gmra.mxu3 %v5765_v60  ;;  %v7546_v60 = vld [vmem:[#allocation93_spill] sm:$0xff] }
 0x356   :  { %2162 = vmatpush.bf16.msra.mxu1 %v7535_v22  ;;  %2188 = vmatpush.bf16.msra.mxu3 %v7537_v43  ;;  %v7542_v22 = vld [vmem:[#allocation89_spill] sm:$0xff]  ;;  %v7548_v43 = vld [vmem:[#allocation95_spill] sm:$0xff] }
 0x357   :  { %2098 = vmatmul.bf16.vlgmr.msrb.gmra.mxu2 %v5767_v6  ;;  %2124 = vmatmul.bf16.vlgmr.msra.gmra.mxu0 %v5767_v6  ;;  %v7547_v6 = vld [vmem:[#allocation94_spill] sm:$0xff] }
 0x358   :  { %2175 = vmatpush.bf16.msra.mxu2 %v7536_v58  ;;  %2201 = vmatpush.bf16.msrb.mxu0 %v7538_v38  ;;  %v7543_v58 = vld [vmem:[#allocation90_spill] sm:$0xff]  ;;  %v7549_v38 = vld [vmem:[#allocation96_spill] sm:$0xff] }
 0x35a   :  { %2163 = vmatpush.bf16.msra.mxu1 %v7539_v35  ;;  %2189 = vmatpush.bf16.msra.mxu3 %v7541_v8  ;;  %v7550_v35 = vld [vmem:[#allocation97_spill] sm:$0xff]  ;;  %v7552_v8 = vld [vmem:[#allocation99_spill] sm:$0xff] }
 0x35c   :  { %2176 = vmatpush.bf16.msra.mxu2 %v7540_v14  ;;  %2202 = vmatpush.bf16.msrb.mxu0 %v7542_v22  ;;  %v7551_v14 = vld [vmem:[#allocation98_spill] sm:$0xff]  ;;  %v7553_v22 = vld [vmem:[#allocation100_spill] sm:$0xff] }
 0x35e   :  { %2164 = vmatpush.bf16.msra.mxu1 %v7543_v58  ;;  %2190 = vmatpush.bf16.msra.mxu3 %v7545_v16  ;;  %v7554_v58 = vld [vmem:[#allocation101_spill] sm:$0xff]  ;;  %v7556_v16 = vld [vmem:[#allocation103_spill] sm:$0xff] }
 0x360   :  { %2177 = vmatpush.bf16.msra.mxu2 %v7544_v54  ;;  %2203 = vmatpush.bf16.msrb.mxu0 %v7546_v60  ;;  %v7555_v54 = vld [vmem:[#allocation102_spill] sm:$0xff]  ;;  %v7557_v60 = vld [vmem:[#allocation104_spill] sm:$0xff] }
 0x362   :  { %2165 = vmatpush.bf16.msra.mxu1 %v7547_v6  ;;  %2191 = vmatpush.bf16.msra.mxu3 %v7549_v38  ;;  %v7558_v6 = vld [vmem:[#allocation105_spill] sm:$0xff]  ;;  %v7560_v38 = vld [vmem:[#allocation107_spill] sm:$0xff] }
 0x364   :  { %2178 = vmatpush.bf16.msra.mxu2 %v7548_v43  ;;  %2204 = vmatpush.bf16.msrb.mxu0 %v7550_v35  ;;  %v7559_v43 = vld [vmem:[#allocation106_spill] sm:$0xff]  ;;  %v7561_v35 = vld [vmem:[#allocation108_spill] sm:$0xff] }
 0x366   :  { %2166 = vmatpush.bf16.msra.mxu1 %v7551_v14  ;;  %2192 = vmatpush.bf16.msra.mxu3 %v7553_v22  ;;  %v7562_v14 = vld [vmem:[#allocation109_spill] sm:$0xff]  ;;  %v7564_v22 = vld [vmem:[#allocation111_spill] sm:$0xff] }
 0x368   :  { %2179 = vmatpush.bf16.msra.mxu2 %v7552_v8  ;;  %2205 = vmatpush.bf16.msrb.mxu0 %v7554_v58  ;;  %v7563_v8 = vld [vmem:[#allocation110_spill] sm:$0xff] }
 0x369   :  { %v7565_v58 = vld [vmem:[#allocation114_spill] sm:$0xff] }
 0x36a   :  { %2167 = vmatpush.bf16.msra.mxu1 %v7555_v54  ;;  %2193 = vmatpush.bf16.msra.mxu3 %v7557_v60  ;;  %v7566_v54 = vld [vmem:[#allocation115_spill] sm:$0xff]  ;;  %v7568_v60 = vld [vmem:[#allocation113_spill] sm:$0xff] }
 0x36c   :  { %2180 = vmatpush.bf16.msra.mxu2 %v7556_v16  ;;  %2206 = vmatpush.bf16.msrb.mxu0 %v7558_v6  ;;  %v7567_v16 = vld [vmem:[#allocation112_spill] sm:$0xff] }
 0x36d   :  { %v7569_v6 = vld [vmem:[#allocation116_spill] sm:$0xff] }
 0x36e   :  { %2168 = vmatpush.bf16.msra.mxu1 %v7559_v43  ;;  %2194 = vmatpush.bf16.msra.mxu3 %v7561_v35  ;;  %v7570_v43 = vld [vmem:[#allocation117_spill] sm:$0xff]  ;;  %v7572_v35 = vld [vmem:[#allocation119_spill] sm:$0xff] }
 0x370   :  { %2181 = vmatpush.bf16.msra.mxu2 %v7560_v38  ;;  %2207 = vmatpush.bf16.msrb.mxu0 %v7562_v14  ;;  %v7571_v38 = vld [vmem:[#allocation118_spill] sm:$0xff]  ;;  %v7573_v14 = vld [vmem:[#allocation120_spill] sm:$0xff] }
 0x372   :  { %2169 = vmatpush.bf16.msra.mxu1 %v7563_v8  ;;  %2195 = vmatpush.bf16.msra.mxu3 %v7567_v16  ;;  %v7574_v8 = vld [vmem:[#allocation121_spill] sm:$0xff] }
 0x373   :  { %v7578_v16 = vld [vmem:[#allocation125_spill] sm:$0xff] }
 0x374   :  { %2182 = vmatpush.bf16.msra.mxu2 %v7564_v22  ;;  %2208 = vmatpush.bf16.msrb.mxu0 %v7568_v60  ;;  %v7575_v22 = vld [vmem:[#allocation122_spill] sm:$0xff] }
 0x375   :  { %v7579_v60 = vld [vmem:[#allocation126_spill] sm:$0xff] }
 0x376   :  { %2224 = vmatpush.bf16.msrb.mxu1 %v7565_v58  ;;  %2250 = vmatpush.bf16.msrb.mxu3 %v7569_v6  ;;  %v7576_v58 = vld [vmem:[#allocation123_spill] sm:$0xff] }
 0x377   :  { %v7580_v6 = vld [vmem:[#allocation127_spill] sm:$0xff] }
 0x378   :  { %2237 = vmatpush.bf16.msrb.mxu2 %v7566_v54  ;;  %2263 = vmatpush.bf16.msra.mxu0 %v7570_v43  ;;  %v7577_v54 = vld [vmem:[#allocation124_spill] sm:$0xff] }
 0x379   :  { %v7581_v43 = vld [vmem:[#allocation128_spill] sm:$0xff] }
 0x37a   :  { %2225 = vmatpush.bf16.msrb.mxu1 %v7571_v38  ;;  %2251 = vmatpush.bf16.msrb.mxu3 %v7573_v14  ;;  %v7582_v38 = vld [vmem:[#allocation129_spill] sm:$0xff]  ;;  %v7584_v14 = vld [vmem:[#allocation131_spill] sm:$0xff] }
 0x37c   :  { %2238 = vmatpush.bf16.msrb.mxu2 %v7572_v35  ;;  %2264 = vmatpush.bf16.msra.mxu0 %v7574_v8  ;;  %v7583_v35 = vld [vmem:[#allocation130_spill] sm:$0xff]  ;;  %v7585_v8 = vld [vmem:[#allocation132_spill] sm:$0xff] }
 0x37e   :  { %2226 = vmatpush.bf16.msrb.mxu1 %v7575_v22  ;;  %2252 = vmatpush.bf16.msrb.mxu3 %v7577_v54  ;;  %v7586_v22 = vld [vmem:[#allocation133_spill] sm:$0xff]  ;;  %v7588_v54 = vld [vmem:[#allocation135_spill] sm:$0xff] }
 0x380   :  { %2239 = vmatpush.bf16.msrb.mxu2 %v7576_v58  ;;  %2265 = vmatpush.bf16.msra.mxu0 %v7578_v16  ;;  %v7587_v58 = vld [vmem:[#allocation134_spill] sm:$0xff]  ;;  %v7589_v16 = vld [vmem:[#allocation136_spill] sm:$0xff] }
 0x382   :  { %2227 = vmatpush.bf16.msrb.mxu1 %v7579_v60  ;;  %2253 = vmatpush.bf16.msrb.mxu3 %v7581_v43  ;;  %v7590_v60 = vld [vmem:[#allocation137_spill] sm:$0xff]  ;;  %v7592_v43 = vld [vmem:[#allocation139_spill] sm:$0xff] }
 0x384   :  { %2240 = vmatpush.bf16.msrb.mxu2 %v7580_v6  ;;  %2266 = vmatpush.bf16.msra.mxu0 %v7582_v38  ;;  %v7591_v6 = vld [vmem:[#allocation138_spill] sm:$0xff]  ;;  %v7593_v38 = vld [vmem:[#allocation140_spill] sm:$0xff] }
 0x386   :  { %2228 = vmatpush.bf16.msrb.mxu1 %v7583_v35  ;;  %2254 = vmatpush.bf16.msrb.mxu3 %v7585_v8  ;;  %v7594_v35 = vld [vmem:[#allocation141_spill] sm:$0xff]  ;;  %v7596_v8 = vld [vmem:[#allocation143_spill] sm:$0xff] }
 0x388   :  { %2241 = vmatpush.bf16.msrb.mxu2 %v7584_v14  ;;  %2267 = vmatpush.bf16.msra.mxu0 %v7586_v22  ;;  %v7595_v14 = vld [vmem:[#allocation142_spill] sm:$0xff]  ;;  %v7597_v22 = vld [vmem:[#allocation144_spill] sm:$0xff] }
 0x38a   :  { %2229 = vmatpush.bf16.msrb.mxu1 %v7587_v58  ;;  %2255 = vmatpush.bf16.msrb.mxu3 %v7589_v16  ;;  %v7598_v58 = vld [vmem:[#allocation145_spill] sm:$0xff] }
 0x38c   :  { %2242 = vmatpush.bf16.msrb.mxu2 %v7588_v54  ;;  %2268 = vmatpush.bf16.msra.mxu0 %v7590_v60 }
 0x38e   :  { %2230 = vmatpush.bf16.msrb.mxu1 %v7591_v6  ;;  %2256 = vmatpush.bf16.msrb.mxu3 %v7593_v38 }
 0x390   :  { %2243 = vmatpush.bf16.msrb.mxu2 %v7592_v43  ;;  %2269 = vmatpush.bf16.msra.mxu0 %v7594_v35 }
 0x392   :  { %2231 = vmatpush.bf16.msrb.mxu1 %v7595_v14  ;;  %2257 = vmatpush.bf16.msrb.mxu3 %v7597_v22  ;;  %v1906_v54 = vpop.f32.mrf.mxu1 }
 0x394   :  { %2244 = vmatpush.bf16.msrb.mxu2 %v7596_v8  ;;  %2270 = vmatpush.bf16.msra.mxu0 %v7598_v58  ;;  %v1945_v16 = vpop.f32.mrf.mxu0 }
 0x398   :  { %v1932_v52 = vpop.f32.mrf.mxu3 }
 0x399   :  { %v1946_v15 = vadd.f32 %v1945_v16, %v1932_v52 }
 0x39a   :  { %v1919_v60 = vpop.f32.mrf.mxu2  ;;  %v1908_v44 = vpop.f32.mrf.mxu1 }
 0x39b   :  { %v1920_v42 = vadd.f32 %v1919_v60, %v1906_v54 }
 0x39c   :  { %v1947_v6 = vpop.f32.mrf.mxu0 }
 0x39d   :  { %v1949_v5 = vadd.f32 %v1920_v42, %v7600_v29 }
 0x39f   :  { %v1951_v39 = vmul.f32 0.5, %v1949_v5 }
 0x3a0   :  { %v1934_v30 = vpop.f32.mrf.mxu3 }
 0x3a1   :  { %v7599_v30 = vld [vmem:[#allocation26_spill] sm:$0xff] }
 0x3a2   :  { %v1921_v43 = vpop.f32.mrf.mxu2  ;;  %v1968_v7 = vpop.f32.mrf.mxu1 }
 0x3a3   :  { %v1950_v43 = vadd.f32 %v1946_v15, %v7599_v30 }
 0x3a4   :  { %v2007_v38 = vpop.f32.mrf.mxu0 }
 0x3a5   :  { %v1952_v12 = vmul.f32 0.5, %v1950_v43 }
 0x3a7   :  { %4555 = vtanh.f32 %v1952_v12 }
 0x3a8   :  { %v1994_v24 = vpop.f32.mrf.mxu3  ;;  %4557 = vtanh.f32 %v1951_v39 }
 0x3a9   :  { %v2008_v6 = vadd.f32 %v2007_v38, %v1994_v24  ;;  %v7604_v38 = vld [vmem:[#allocation58_spill] sm:$0xff] }
 0x3aa   :  { %v1981_v35 = vpop.f32.mrf.mxu2  ;;  %v1970_v37 = vpop.f32.mrf.mxu1 }
 0x3ab   :  { %v1982_v44 = vadd.f32 %v1981_v35, %v1968_v7  ;;  %v7603_v7 = vld [vmem:[#allocation57_spill] sm:$0xff] }
 0x3ac   :  { %v2009_v14 = vpop.f32.mrf.mxu0 }
 0x3ad   :  { %v2011_v37 = vadd.f32 %v1982_v44, %v7601_v49 }
 0x3af   :  { %v2013_v55 = vmul.f32 0.5, %v2011_v37  ;;  %v7605_v37 = vld [vmem:[#allocation59_spill] sm:$0xff] }
 0x3b0   :  { %v1996_v57 = vpop.f32.mrf.mxu3 }
 0x3b1   :  { %v7602_v57 = vld [vmem:[#allocation28_spill] sm:$0xff]  ;;  %4559 = vtanh.f32 %v2013_v55 }
 0x3b2   :  { %v1983_v8 = vpop.f32.mrf.mxu2  ;;  %v2030_v9 = vpop.f32.mrf.mxu1 }
 0x3b3   :  { %v2012_v8 = vadd.f32 %v2008_v6, %v7602_v57 }
 0x3b4   :  { %v2069_v22 = vpop.f32.mrf.mxu0 }
 0x3b5   :  { %v2014_v41 = vmul.f32 0.5, %v2012_v8 }
 0x3b7   :  { %4561 = vtanh.f32 %v2014_v41 }
 0x3b8   :  { %v2056_v58 = vpop.f32.mrf.mxu3 }
 0x3ba   :  { %v2043_v27 = vpop.f32.mrf.mxu2  ;;  %v2032_v1 = vpop.f32.mrf.mxu1 }
 0x3bb   :  { %v2044_v1 = vadd.f32 %v2043_v27, %v2030_v9 }
 0x3bc   :  { %v2071_v40 = vpop.f32.mrf.mxu0 }
 0x3bd   :  { %v2070_v40 = vadd.f32 %v2069_v22, %v2056_v58  ;;  %v2073_v24 = vadd.f32 %v2044_v1, %v7603_v7  ;;  %v7606_v1 = vld [vmem:[#allocation60_spill] sm:$0xff] }
 0x3bf   :  { %v2074_v35 = vadd.f32 %v2070_v40, %v7604_v38  ;;  %4563 = vtanh.f32 %v2073_v24 }
 0x3c0   :  { %v2058_v14 = vpop.f32.mrf.mxu3 }
 0x3c1   :  { %4565 = vtanh.f32 %v2074_v35 }
 0x3c2   :  { %v2045_v2 = vpop.f32.mrf.mxu2 }
 0x3c3   :  { %v4556_v2 = vpop.eup %4555 }
 0x3c4   :  { %v4558_v29 = vpop.eup %4557  ;;  %v1956_v12 = vmul.f32 0.5, %v4556_v2 }
 0x3c5   :  { %v4560_v49 = vpop.eup %4559  ;;  %v1955_v52 = vmul.f32 0.5, %v4558_v29 }
 0x3c6   :  { %v4562_v15 = vpop.eup %4561  ;;  %v2017_v16 = vmul.f32 0.5, %v4560_v49  ;;  %v1958_v60 = vadd.f32 0.5, %v1956_v12 }
 0x3c7   :  { %v2018_v9 = vmul.f32 0.5, %v4562_v15  ;;  %v4564_v39 = vpop.eup %4563  ;;  %v1957_v41 = vadd.f32 0.5, %v1955_v52 }
 0x3c8   :  { %v4566_v55 = vpop.eup %4565  ;;  %v2019_v27 = vadd.f32 0.5, %v2017_v16 }
 0x3c9   :  { %v2020_v44 = vadd.f32 0.5, %v2018_v9  ;;  %v2141_v43 = vmul.f32 %v4564_v39, %v1957_v41  ;;  %v2142_v8 = vmul.f32 %v4566_v55, %v1958_v60  ;;  %v7610_v60 = vld [vmem:[#allocation179_spill] sm:$0xff] }
 0x3ca   :  { %v2139_v7 = vmul.f32 %v2019_v27, %v5759_v4  ;;  %v7607_v27 = vld [vmem:[#allocation176_spill] sm:$0xff] }
 0x3cb   :  { %v2140_v38 = vmul.f32 %v2020_v44, %v5761_v50  ;;  %v7611_v44 = vld [vmem:[#allocation180_spill] sm:$0xff] }
 0x3cc   :  { %v5923_v2 = vadd.f32 %v2141_v43, %v2139_v7  ;;  %v7614_v43 = vld [vmem:[#allocation183_spill] sm:$0xff]  ;;  %v7621_v7 = vld [vmem:[#allocation190_spill] sm:$0xff] }
 0x3cd   :  { %v5925_v29 = vadd.f32 %v2142_v8, %v2140_v38  ;;  %v7618_v8 = vld [vmem:[#allocation187_spill] sm:$0xff]  ;;  %v7623_v38 = vld [vmem:[#allocation192_spill] sm:$0xff] }
 0x3d2   :  { %v2086_v42 = vpop.f32.mrf.mxu1 }
 0x3d4   :  { %v2125_v5 = vpop.f32.mrf.mxu0 }
 0x3d8   :  { %v2112_v54 = vpop.f32.mrf.mxu3 }
 0x3d9   :  { %v2126_v6 = vadd.f32 %v2125_v5, %v2112_v54  ;;  %v7609_v54 = vld [vmem:[#allocation178_spill] sm:$0xff] }
 0x3da   :  { %v2099_v22 = vpop.f32.mrf.mxu2  ;;  %v2088_v30 = vpop.f32.mrf.mxu1 }
 0x3db   :  { %v2100_v58 = vadd.f32 %v2099_v22, %v2086_v42  ;;  %v2130_v40 = vadd.f32 %v2126_v6, %v7606_v1  ;;  %v7612_v6 = vld [vmem:[#allocation181_spill] sm:$0xff]  ;;  %v7613_v30 = vld [vmem:[#allocation182_spill] sm:$0xff]  ;;  %v7619_v1 = vld [vmem:[#allocation188_spill] sm:$0xff] }
 0x3dc   :  { %v2127_v57 = vpop.f32.mrf.mxu0 }
 0x3dd   :  { %v2129_v14 = vadd.f32 %v2100_v58, %v7605_v37  ;;  %v2132_v35 = vmul.f32 0.5, %v2130_v40  ;;  %v7608_v58 = vld [vmem:[#allocation177_spill] sm:$0xff]  ;;  %v7615_v37 = vld [vmem:[#allocation184_spill] sm:$0xff]  ;;  %v7617_v57 = vld [vmem:[#allocation186_spill] sm:$0xff] }
 0x3de   :  { %v7620_v40 = vld [vmem:[#allocation189_spill] sm:$0xff] }
 0x3df   :  { %v2131_v24 = vmul.f32 0.5, %v2129_v14  ;;  %v7616_v14 = vld [vmem:[#allocation185_spill] sm:$0xff] }
 0x3e0   :  { %v2114_v42 = vpop.f32.mrf.mxu3 }
 0x3e1   :  { %4567 = vtanh.f32 %v2131_v24  ;;  %v7622_v24 = vld [vmem:[#allocation191_spill] sm:$0xff] }
 0x3e2   :  { %4569 = vtanh.f32 %v2132_v35  ;;  %v2101_v49 = vpop.f32.mrf.mxu2  ;;  %v7624_v35 = vld [vmem:[#allocation193_spill] sm:$0xff]  ;;  %v7626_v42 = vld [vmem:[#allocation195_spill] sm:$0xff] }
 0x3e3   :  { %4571 = vtanh.f32 %v5923_v2  ;;  %v7625_v49 = vld [vmem:[#allocation194_spill] sm:$0xff] }
 0x3e4   :  { %4573 = vtanh.f32 %v5925_v29 }
 0x3e7   :  { %v4568_v15 = vpop.eup %4567 }
 0x3e8   :  { %v4570_v5 = vpop.eup %4569  ;;  %v2135_v52 = vmul.f32 0.5, %v4568_v15  ;;  %v7627_v15 = vld [vmem:[#allocation196_spill] sm:$0xff] }
 0x3e9   :  { %v2136_v4 = vmul.f32 0.5, %v4570_v5  ;;  %v4572_v12 = vpop.eup %4571  ;;  %v7628_v5 = vld [vmem:[#allocation197_spill] sm:$0xff] }
 0x3ea   :  { %v2137_v16 = vadd.f32 0.5, %v2135_v52  ;;  %v4574_v9 = vpop.eup %4573  ;;  %v7629_v52 = vld [vmem:[#allocation198_spill] sm:$0xff] }
 0x3eb   :  { %v2138_v50 = vadd.f32 0.5, %v2136_v4  ;;  %v7630_v4 = vld [vmem:[#allocation199_spill] sm:$0xff] }
 0x3ec   :  { %v2147_v39 = vmul.f32 %v4572_v12, %v2137_v16  ;;  %v7631_v16 = vld [vmem:[#allocation200_spill] sm:$0xff]  ;;  %v7632_v12 = vld [vmem:[#allocation201_spill] sm:$0xff] }
 0x3ed   :  { %v2148_v22 = vmul.f32 %v4574_v9, %v2138_v50  ;;  %v7633_v50 = vld [vmem:[#allocation202_spill] sm:$0xff]  ;;  %v7634_v9 = vld [vmem:[#allocation203_spill] sm:$0xff] }
 0x3ee   :  { %v5929_v55 = vpack.c.bf16 %v2147_v39, %v2147_v39  ;;  %v7635_v39 = vld [vmem:[#allocation204_spill] sm:$0xff] }
 0x3ef   :  { %v5931_v41 = vpack.c.bf16 %v2148_v22, %v2148_v22  ;;  %v7636_v22 = vld [vmem:[#allocation205_spill] sm:$0xff] }
 0x3f0   :  { %2170 = vmatmul.bf16.vlgmr.msra.gmra.mxu1 %v5929_v55  ;;  %2196 = vmatmul.bf16.vlgmr.msra.gmra.mxu3 %v5929_v55 }
 0x3f1   :  { %2183 = vmatmul.bf16.vlgmr.msra.gmra.mxu2 %v5931_v41  ;;  %2209 = vmatmul.bf16.vlgmr.msrb.gmra.mxu0 %v5931_v41 }
 0x3f2   :  { %2286 = vmatpush.bf16.msra.mxu1 %v7400_v48  ;;  %2299 = vmatpush.bf16.msra.mxu2 %v7401_v20 }
 0x3f3   :  { %2312 = vmatpush.bf16.msra.mxu3 %v7402_v32  ;;  %2325 = vmatpush.bf16.msrb.mxu0 %v7403_v25 }
 0x3f6   :  { %2287 = vmatpush.bf16.msra.mxu1 %v7404_v28  ;;  %2300 = vmatpush.bf16.msra.mxu2 %v7405_v56 }
 0x3f7   :  { %2313 = vmatpush.bf16.msra.mxu3 %v7406_v17  ;;  %2326 = vmatpush.bf16.msrb.mxu0 %v7407_v19 }
 0x3fa   :  { %2288 = vmatpush.bf16.msra.mxu1 %v7408_v53  ;;  %2301 = vmatpush.bf16.msra.mxu2 %v7409_v10 }
 0x3fb   :  { %2314 = vmatpush.bf16.msra.mxu3 %v7410_v3  ;;  %2327 = vmatpush.bf16.msrb.mxu0 %v7411_v13 }
 0x3fe   :  { %2289 = vmatpush.bf16.msra.mxu1 %v7412_v23  ;;  %2302 = vmatpush.bf16.msra.mxu2 %v7413_v34 }
 0x3ff   :  { %2315 = vmatpush.bf16.msra.mxu3 %v7414_v45  ;;  %2328 = vmatpush.bf16.msrb.mxu0 %v7501_v61 }
 0x400   :  { %2232 = vmatmul.bf16.vlgmr.msrb.gmra.mxu1 %v5929_v55  ;;  %2258 = vmatmul.bf16.vlgmr.msrb.gmra.mxu3 %v5929_v55 }
 0x401   :  { %2245 = vmatmul.bf16.vlgmr.msrb.gmra.mxu2 %v5931_v41  ;;  %2271 = vmatmul.bf16.vlgmr.msra.gmra.mxu0 %v5931_v41 }
 0x402   :  { %2290 = vmatpush.bf16.msra.mxu1 %v7416_v63  ;;  %2303 = vmatpush.bf16.msra.mxu2 %v7417_v51 }
 0x403   :  { %2316 = vmatpush.bf16.msra.mxu3 %v7418_v33  ;;  %2329 = vmatpush.bf16.msrb.mxu0 %v7419_v59 }
 0x406   :  { %2291 = vmatpush.bf16.msra.mxu1 %v7502_v21  ;;  %2304 = vmatpush.bf16.msra.mxu2 %v7503_v11 }
 0x407   :  { %2317 = vmatpush.bf16.msra.mxu3 %v7504_v26  ;;  %2330 = vmatpush.bf16.msrb.mxu0 %v7505_v47 }
 0x40a   :  { %2292 = vmatpush.bf16.msra.mxu1 %v7506_v36  ;;  %2305 = vmatpush.bf16.msra.mxu2 %v7507_v18 }
 0x40b   :  { %2318 = vmatpush.bf16.msra.mxu3 %v7508_v46  ;;  %2331 = vmatpush.bf16.msrb.mxu0 %v7509_v0 }
 0x40e   :  { %2293 = vmatpush.bf16.msra.mxu1 %v7510_v31  ;;  %2306 = vmatpush.bf16.msra.mxu2 %v7511_v62 }
 0x40f   :  { %2319 = vmatpush.bf16.msra.mxu3 %v7607_v27  ;;  %2332 = vmatpush.bf16.msrb.mxu0 %v7608_v58 }
 0x411   :  { %2294 = vmatmul.bf16.vlgmr.msra.gmra.mxu1 %v5929_v55  ;;  %2307 = vmatmul.bf16.vlgmr.msra.gmra.mxu2 %v5931_v41 }
 0x412   :  { %2342 = vmatpush.bf16.msrb.mxu1 %v7609_v54  ;;  %2355 = vmatpush.bf16.msrb.mxu2 %v7610_v60 }
 0x413   :  { %2368 = vmatpush.bf16.msrb.mxu3 %v7611_v44  ;;  %2381 = vmatpush.bf16.msra.mxu0 %v7612_v6  ;;  %v7707_v44 = vld [vmem:[#allocation31_spill] sm:$0xff] }
 0x414   :  { %2320 = vmatmul.bf16.vlgmr.msra.gmra.mxu3 %v5929_v55  ;;  %2333 = vmatmul.bf16.vlgmr.msrb.gmra.mxu0 %v5931_v41 }
 0x416   :  { %2343 = vmatpush.bf16.msrb.mxu1 %v7613_v30  ;;  %2356 = vmatpush.bf16.msrb.mxu2 %v7614_v43  ;;  %v7706_v43 = vld [vmem:[#allocation29_spill] sm:$0xff] }
 0x417   :  { %2369 = vmatpush.bf16.msrb.mxu3 %v7615_v37  ;;  %2382 = vmatpush.bf16.msra.mxu0 %v7616_v14 }
 0x41a   :  { %2344 = vmatpush.bf16.msrb.mxu1 %v7617_v57  ;;  %2357 = vmatpush.bf16.msrb.mxu2 %v7618_v8 }
 0x41b   :  { %2370 = vmatpush.bf16.msrb.mxu3 %v7619_v1  ;;  %2383 = vmatpush.bf16.msra.mxu0 %v7620_v40 }
 0x41e   :  { %2345 = vmatpush.bf16.msrb.mxu1 %v7621_v7  ;;  %2358 = vmatpush.bf16.msrb.mxu2 %v7622_v24 }
 0x41f   :  { %2371 = vmatpush.bf16.msrb.mxu3 %v7623_v38  ;;  %2384 = vmatpush.bf16.msra.mxu0 %v7624_v35 }
 0x422   :  { %2346 = vmatpush.bf16.msrb.mxu1 %v7625_v49  ;;  %2359 = vmatpush.bf16.msrb.mxu2 %v7626_v42  ;;  %v7637_v42 = vld [vmem:[#allocation206_spill] sm:$0xff] }
 0x423   :  { %2372 = vmatpush.bf16.msrb.mxu3 %v7627_v15  ;;  %2385 = vmatpush.bf16.msra.mxu0 %v7628_v5  ;;  %v7638_v15 = vld [vmem:[#allocation207_spill] sm:$0xff]  ;;  %v7639_v5 = vld [vmem:[#allocation208_spill] sm:$0xff] }
 0x426   :  { %2347 = vmatpush.bf16.msrb.mxu1 %v7629_v52  ;;  %2360 = vmatpush.bf16.msrb.mxu2 %v7630_v4  ;;  %v7640_v52 = vld [vmem:[#allocation209_spill] sm:$0xff]  ;;  %v7641_v4 = vld [vmem:[#allocation82_spill] sm:$0xff] }
 0x427   :  { %2373 = vmatpush.bf16.msrb.mxu3 %v7631_v16  ;;  %2386 = vmatpush.bf16.msra.mxu0 %v7632_v12  ;;  %v7642_v16 = vld [vmem:[#allocation83_spill] sm:$0xff] }
 0x42a   :  { %2348 = vmatpush.bf16.msrb.mxu1 %v7633_v50  ;;  %2361 = vmatpush.bf16.msrb.mxu2 %v7634_v9  ;;  %v7651_v9 = vld [vmem:[#allocation92_spill] sm:$0xff] }
 0x42b   :  { %2374 = vmatpush.bf16.msrb.mxu3 %v7635_v39  ;;  %2387 = vmatpush.bf16.msra.mxu0 %v7636_v22  ;;  %v7643_v22 = vld [vmem:[#allocation84_spill] sm:$0xff]  ;;  %v7650_v39 = vld [vmem:[#allocation91_spill] sm:$0xff] }
 0x42e   :  { %2349 = vmatpush.bf16.msrb.mxu1 %v7637_v42  ;;  %2362 = vmatpush.bf16.msrb.mxu2 %v7638_v15  ;;  %v7644_v42 = vld [vmem:[#allocation85_spill] sm:$0xff]  ;;  %v7645_v15 = vld [vmem:[#allocation86_spill] sm:$0xff] }
 0x42f   :  { %2375 = vmatpush.bf16.msrb.mxu3 %v7639_v5  ;;  %2388 = vmatpush.bf16.msra.mxu0 %v7640_v52  ;;  %v7646_v5 = vld [vmem:[#allocation87_spill] sm:$0xff]  ;;  %v7647_v52 = vld [vmem:[#allocation88_spill] sm:$0xff] }
 0x431   :  { %2350 = vmatmul.bf16.vlgmr.msrb.gmra.mxu1 %v5929_v55  ;;  %2363 = vmatmul.bf16.vlgmr.msrb.gmra.mxu2 %v5931_v41 }
 0x432   :  { %2427 = vmatpush.bf16.msra.mxu1 %v7641_v4  ;;  %2440 = vmatpush.bf16.msra.mxu2 %v7642_v16  ;;  %v7648_v4 = vld [vmem:[#allocation89_spill] sm:$0xff]  ;;  %v7649_v16 = vld [vmem:[#allocation90_spill] sm:$0xff] }
 0x433   :  { %2376 = vmatmul.bf16.vlgmr.msrb.gmra.mxu3 %v5929_v55  ;;  %2389 = vmatmul.bf16.vlgmr.msra.gmra.mxu0 %v5931_v41  ;;  %v7652_v55 = vld [vmem:[#allocation93_spill] sm:$0xff]  ;;  %v7653_v41 = vld [vmem:[#allocation94_spill] sm:$0xff] }
 0x434   :  { %2453 = vmatpush.bf16.msra.mxu3 %v7643_v22  ;;  %2466 = vmatpush.bf16.msrb.mxu0 %v7644_v42  ;;  %v7654_v22 = vld [vmem:[#allocation95_spill] sm:$0xff]  ;;  %v7655_v42 = vld [vmem:[#allocation96_spill] sm:$0xff] }
 0x436   :  { %2428 = vmatpush.bf16.msra.mxu1 %v7645_v15  ;;  %2441 = vmatpush.bf16.msra.mxu2 %v7646_v5  ;;  %v7656_v15 = vld [vmem:[#allocation97_spill] sm:$0xff]  ;;  %v7657_v5 = vld [vmem:[#allocation98_spill] sm:$0xff] }
 0x438   :  { %2454 = vmatpush.bf16.msra.mxu3 %v7647_v52  ;;  %2467 = vmatpush.bf16.msrb.mxu0 %v7648_v4  ;;  %v7658_v52 = vld [vmem:[#allocation99_spill] sm:$0xff]  ;;  %v7659_v4 = vld [vmem:[#allocation100_spill] sm:$0xff] }
 0x43a   :  { %2429 = vmatpush.bf16.msra.mxu1 %v7649_v16  ;;  %2442 = vmatpush.bf16.msra.mxu2 %v7650_v39  ;;  %v7660_v16 = vld [vmem:[#allocation101_spill] sm:$0xff]  ;;  %v7661_v39 = vld [vmem:[#allocation102_spill] sm:$0xff] }
 0x43c   :  { %2455 = vmatpush.bf16.msra.mxu3 %v7651_v9  ;;  %2468 = vmatpush.bf16.msrb.mxu0 %v7652_v55  ;;  %v7662_v9 = vld [vmem:[#allocation103_spill] sm:$0xff]  ;;  %v7663_v55 = vld [vmem:[#allocation104_spill] sm:$0xff] }
 0x43e   :  { %2430 = vmatpush.bf16.msra.mxu1 %v7653_v41  ;;  %2443 = vmatpush.bf16.msra.mxu2 %v7654_v22  ;;  %v7664_v41 = vld [vmem:[#allocation105_spill] sm:$0xff]  ;;  %v7665_v22 = vld [vmem:[#allocation106_spill] sm:$0xff] }
 0x440   :  { %2456 = vmatpush.bf16.msra.mxu3 %v7655_v42  ;;  %2469 = vmatpush.bf16.msrb.mxu0 %v7656_v15  ;;  %v7666_v42 = vld [vmem:[#allocation107_spill] sm:$0xff]  ;;  %v7667_v15 = vld [vmem:[#allocation108_spill] sm:$0xff] }
 0x442   :  { %2431 = vmatpush.bf16.msra.mxu1 %v7657_v5  ;;  %2444 = vmatpush.bf16.msra.mxu2 %v7658_v52  ;;  %v7668_v5 = vld [vmem:[#allocation109_spill] sm:$0xff]  ;;  %v7669_v52 = vld [vmem:[#allocation110_spill] sm:$0xff] }
 0x444   :  { %2457 = vmatpush.bf16.msra.mxu3 %v7659_v4  ;;  %2470 = vmatpush.bf16.msrb.mxu0 %v7660_v16  ;;  %v7670_v4 = vld [vmem:[#allocation111_spill] sm:$0xff]  ;;  %v7671_v16 = vld [vmem:[#allocation114_spill] sm:$0xff] }
 0x446   :  { %2432 = vmatpush.bf16.msra.mxu1 %v7661_v39  ;;  %2445 = vmatpush.bf16.msra.mxu2 %v7662_v9  ;;  %v7672_v39 = vld [vmem:[#allocation115_spill] sm:$0xff]  ;;  %v7673_v9 = vld [vmem:[#allocation112_spill] sm:$0xff] }
 0x448   :  { %2458 = vmatpush.bf16.msra.mxu3 %v7663_v55  ;;  %2471 = vmatpush.bf16.msrb.mxu0 %v7664_v41  ;;  %v7674_v55 = vld [vmem:[#allocation113_spill] sm:$0xff]  ;;  %v7675_v41 = vld [vmem:[#allocation116_spill] sm:$0xff] }
 0x44a   :  { %2433 = vmatpush.bf16.msra.mxu1 %v7665_v22  ;;  %2446 = vmatpush.bf16.msra.mxu2 %v7666_v42  ;;  %v7676_v22 = vld [vmem:[#allocation117_spill] sm:$0xff]  ;;  %v7677_v42 = vld [vmem:[#allocation118_spill] sm:$0xff] }
 0x44c   :  { %2459 = vmatpush.bf16.msra.mxu3 %v7667_v15  ;;  %2472 = vmatpush.bf16.msrb.mxu0 %v7668_v5  ;;  %v7678_v15 = vld [vmem:[#allocation119_spill] sm:$0xff]  ;;  %v7679_v5 = vld [vmem:[#allocation120_spill] sm:$0xff] }
 0x44e   :  { %2434 = vmatpush.bf16.msra.mxu1 %v7669_v52  ;;  %2447 = vmatpush.bf16.msra.mxu2 %v7670_v4  ;;  %v7680_v52 = vld [vmem:[#allocation121_spill] sm:$0xff]  ;;  %v7681_v4 = vld [vmem:[#allocation122_spill] sm:$0xff] }
 0x450   :  { %2460 = vmatpush.bf16.msra.mxu3 %v7673_v9  ;;  %2473 = vmatpush.bf16.msrb.mxu0 %v7674_v55  ;;  %v7684_v9 = vld [vmem:[#allocation125_spill] sm:$0xff]  ;;  %v7685_v55 = vld [vmem:[#allocation126_spill] sm:$0xff] }
 0x452   :  { %2489 = vmatpush.bf16.msrb.mxu1 %v7671_v16  ;;  %2502 = vmatpush.bf16.msrb.mxu2 %v7672_v39  ;;  %v7682_v16 = vld [vmem:[#allocation123_spill] sm:$0xff]  ;;  %v7683_v39 = vld [vmem:[#allocation124_spill] sm:$0xff] }
 0x454   :  { %2515 = vmatpush.bf16.msrb.mxu3 %v7675_v41  ;;  %2528 = vmatpush.bf16.msra.mxu0 %v7676_v22  ;;  %v7686_v41 = vld [vmem:[#allocation127_spill] sm:$0xff]  ;;  %v7687_v22 = vld [vmem:[#allocation128_spill] sm:$0xff] }
 0x456   :  { %2490 = vmatpush.bf16.msrb.mxu1 %v7677_v42  ;;  %2503 = vmatpush.bf16.msrb.mxu2 %v7678_v15  ;;  %v7688_v42 = vld [vmem:[#allocation129_spill] sm:$0xff]  ;;  %v7689_v15 = vld [vmem:[#allocation130_spill] sm:$0xff] }
 0x458   :  { %2516 = vmatpush.bf16.msrb.mxu3 %v7679_v5  ;;  %2529 = vmatpush.bf16.msra.mxu0 %v7680_v52  ;;  %v7690_v5 = vld [vmem:[#allocation131_spill] sm:$0xff]  ;;  %v7691_v52 = vld [vmem:[#allocation132_spill] sm:$0xff] }
 0x45a   :  { %2491 = vmatpush.bf16.msrb.mxu1 %v7681_v4  ;;  %2504 = vmatpush.bf16.msrb.mxu2 %v7682_v16  ;;  %v7692_v4 = vld [vmem:[#allocation133_spill] sm:$0xff]  ;;  %v7693_v16 = vld [vmem:[#allocation134_spill] sm:$0xff] }
 0x45c   :  { %2517 = vmatpush.bf16.msrb.mxu3 %v7683_v39  ;;  %2530 = vmatpush.bf16.msra.mxu0 %v7684_v9  ;;  %v7694_v39 = vld [vmem:[#allocation135_spill] sm:$0xff]  ;;  %v7695_v9 = vld [vmem:[#allocation136_spill] sm:$0xff] }
 0x45e   :  { %2492 = vmatpush.bf16.msrb.mxu1 %v7685_v55  ;;  %2505 = vmatpush.bf16.msrb.mxu2 %v7686_v41  ;;  %v7696_v55 = vld [vmem:[#allocation137_spill] sm:$0xff]  ;;  %v7697_v41 = vld [vmem:[#allocation138_spill] sm:$0xff] }
 0x460   :  { %2518 = vmatpush.bf16.msrb.mxu3 %v7687_v22  ;;  %2531 = vmatpush.bf16.msra.mxu0 %v7688_v42  ;;  %v7698_v22 = vld [vmem:[#allocation139_spill] sm:$0xff]  ;;  %v7699_v42 = vld [vmem:[#allocation140_spill] sm:$0xff] }
 0x462   :  { %2493 = vmatpush.bf16.msrb.mxu1 %v7689_v15  ;;  %2506 = vmatpush.bf16.msrb.mxu2 %v7690_v5  ;;  %v7700_v15 = vld [vmem:[#allocation141_spill] sm:$0xff]  ;;  %v7701_v5 = vld [vmem:[#allocation142_spill] sm:$0xff] }
 0x464   :  { %2519 = vmatpush.bf16.msrb.mxu3 %v7691_v52  ;;  %2532 = vmatpush.bf16.msra.mxu0 %v7692_v4  ;;  %v7702_v52 = vld [vmem:[#allocation143_spill] sm:$0xff]  ;;  %v7703_v4 = vld [vmem:[#allocation144_spill] sm:$0xff] }
 0x466   :  { %2494 = vmatpush.bf16.msrb.mxu1 %v7693_v16  ;;  %2507 = vmatpush.bf16.msrb.mxu2 %v7694_v39  ;;  %v7704_v16 = vld [vmem:[#allocation145_spill] sm:$0xff] }
 0x468   :  { %2520 = vmatpush.bf16.msrb.mxu3 %v7695_v9  ;;  %2533 = vmatpush.bf16.msra.mxu0 %v7696_v55 }
 0x46a   :  { %2495 = vmatpush.bf16.msrb.mxu1 %v7697_v41  ;;  %2508 = vmatpush.bf16.msrb.mxu2 %v7698_v22 }
 0x46c   :  { %2521 = vmatpush.bf16.msrb.mxu3 %v7699_v42  ;;  %2534 = vmatpush.bf16.msra.mxu0 %v7700_v15 }
 0x46d   :  { %v2171_v39 = vpop.f32.mrf.mxu1 }
 0x46e   :  { %2496 = vmatpush.bf16.msrb.mxu1 %v7701_v5  ;;  %2509 = vmatpush.bf16.msrb.mxu2 %v7702_v52  ;;  %v2210_v9 = vpop.f32.mrf.mxu0 }
 0x470   :  { %2522 = vmatpush.bf16.msrb.mxu3 %v7703_v4  ;;  %2535 = vmatpush.bf16.msra.mxu0 %v7704_v16 }
 0x473   :  { %v2197_v50 = vpop.f32.mrf.mxu3 }
 0x474   :  { %v2184_v55 = vpop.f32.mrf.mxu2  ;;  %v2211_v57 = vadd.f32 %v2210_v9, %v2197_v50 }
 0x475   :  { %v2173_v12 = vpop.f32.mrf.mxu1  ;;  %v2185_v37 = vadd.f32 %v2184_v55, %v2171_v39 }
 0x476   :  { %v2212_v41 = vpop.f32.mrf.mxu0 }
 0x477   :  { %v2214_v30 = vadd.f32 %v2185_v37, %v7706_v43 }
 0x479   :  { %v2216_v54 = vmul.f32 0.5, %v2214_v30 }
 0x47b   :  { %v2199_v49 = vpop.f32.mrf.mxu3 }
 0x47c   :  { %v2186_v22 = vpop.f32.mrf.mxu2  ;;  %v7705_v49 = vld [vmem:[#allocation30_spill] sm:$0xff] }
 0x47d   :  { %v2233_v35 = vpop.f32.mrf.mxu1  ;;  %v2215_v22 = vadd.f32 %v2211_v57, %v7705_v49 }
 0x47e   :  { %v2272_v42 = vpop.f32.mrf.mxu0 }
 0x47f   :  { %v2217_v60 = vmul.f32 0.5, %v2215_v22 }
 0x481   :  { %4575 = vtanh.f32 %v2217_v60 }
 0x482   :  { %4577 = vtanh.f32 %v2216_v54 }
 0x483   :  { %v2259_v38 = vpop.f32.mrf.mxu3 }
 0x484   :  { %v2246_v15 = vpop.f32.mrf.mxu2  ;;  %v2273_v41 = vadd.f32 %v2272_v42, %v2259_v38  ;;  %v7709_v38 = vld [vmem:[#allocation61_spill] sm:$0xff] }
 0x485   :  { %v2235_v24 = vpop.f32.mrf.mxu1  ;;  %v2247_v12 = vadd.f32 %v2246_v15, %v2233_v35  ;;  %v7710_v35 = vld [vmem:[#allocation62_spill] sm:$0xff] }
 0x486   :  { %v2274_v5 = vpop.f32.mrf.mxu0 }
 0x487   :  { %v2276_v24 = vadd.f32 %v2247_v12, %v7707_v44 }
 0x489   :  { %v2278_v58 = vmul.f32 0.5, %v2276_v24  ;;  %v7711_v24 = vld [vmem:[#allocation63_spill] sm:$0xff] }
 0x48b   :  { %v2261_v7 = vpop.f32.mrf.mxu3  ;;  %4579 = vtanh.f32 %v2278_v58 }
 0x48c   :  { %v2248_v52 = vpop.f32.mrf.mxu2  ;;  %v7708_v7 = vld [vmem:[#allocation32_spill] sm:$0xff] }
 0x48d   :  { %v2277_v52 = vadd.f32 %v2273_v41, %v7708_v7 }
 0x48e   :  { %v2295_v40 = vpop.f32.mrf.mxu1 }
 0x48f   :  { %v2279_v27 = vmul.f32 0.5, %v2277_v52 }
 0x491   :  { %v2334_v4 = vpop.f32.mrf.mxu0  ;;  %4581 = vtanh.f32 %v2279_v27 }
 0x494   :  { %v2308_v1 = vpop.f32.mrf.mxu2 }
 0x496   :  { %v2297_v8 = vpop.f32.mrf.mxu1 }
 0x497   :  { %v2321_v16 = vpop.f32.mrf.mxu3  ;;  %v2309_v8 = vadd.f32 %v2308_v1, %v2295_v40 }
 0x499   :  { %v2336_v14 = vpop.f32.mrf.mxu0  ;;  %v2338_v57 = vadd.f32 %v2309_v8, %v7709_v38  ;;  %v7712_v8 = vld [vmem:[#allocation64_spill] sm:$0xff] }
 0x49a   :  { %v2335_v14 = vadd.f32 %v2334_v4, %v2321_v16 }
 0x49b   :  { %4583 = vtanh.f32 %v2338_v57 }
 0x49c   :  { %v2310_v6 = vpop.f32.mrf.mxu2  ;;  %v2339_v43 = vadd.f32 %v2335_v14, %v7710_v35 }
 0x49d   :  { %v4576_v6 = vpop.eup %4575 }
 0x49e   :  { %v4578_v37 = vpop.eup %4577  ;;  %4585 = vtanh.f32 %v2339_v43  ;;  %v2221_v60 = vmul.f32 0.5, %v4576_v6 }
 0x49f   :  { %v2323_v5 = vpop.f32.mrf.mxu3  ;;  %v4580_v44 = vpop.eup %4579  ;;  %v2220_v50 = vmul.f32 0.5, %v4578_v37 }
 0x4a0   :  { %v4582_v15 = vpop.eup %4581  ;;  %v2282_v9 = vmul.f32 0.5, %v4580_v44  ;;  %v2223_v55 = vadd.f32 0.5, %v2221_v60 }
 0x4a1   :  { %v2283_v1 = vmul.f32 0.5, %v4582_v15  ;;  %v4584_v54 = vpop.eup %4583  ;;  %v2222_v27 = vadd.f32 0.5, %v2220_v50 }
 0x4a2   :  { %v2284_v4 = vadd.f32 0.5, %v2282_v9 }
 0x4a3   :  { %v2285_v12 = vadd.f32 0.5, %v2283_v1  ;;  %v2406_v22 = vmul.f32 %v4584_v54, %v2222_v27 }
 0x4a4   :  { %v4586_v58 = vpop.eup %4585  ;;  %v2404_v38 = vmul.f32 %v2284_v4, %v5923_v2  ;;  %v7713_v4 = vld [vmem:[#allocation176_spill] sm:$0xff] }
 0x4a5   :  { %v2407_v52 = vmul.f32 %v4586_v58, %v2223_v55  ;;  %v2405_v35 = vmul.f32 %v2285_v12, %v5925_v29  ;;  %v7716_v55 = vld [vmem:[#allocation179_spill] sm:$0xff]  ;;  %v7717_v12 = vld [vmem:[#allocation180_spill] sm:$0xff] }
 0x4a6   :  { %v6087_v6 = vadd.f32 %v2406_v22, %v2404_v38  ;;  %v7720_v22 = vld [vmem:[#allocation183_spill] sm:$0xff]  ;;  %v7727_v38 = vld [vmem:[#allocation190_spill] sm:$0xff] }
 0x4a7   :  { %v6089_v37 = vadd.f32 %v2407_v52, %v2405_v35  ;;  %v7724_v52 = vld [vmem:[#allocation187_spill] sm:$0xff]  ;;  %v7729_v35 = vld [vmem:[#allocation192_spill] sm:$0xff] }
 0x4ae   :  { %v2351_v42 = vpop.f32.mrf.mxu1 }
 0x4b0   :  { %v2390_v30 = vpop.f32.mrf.mxu0 }
 0x4b4   :  { %v2364_v40 = vpop.f32.mrf.mxu2 }
 0x4b5   :  { %v2365_v16 = vadd.f32 %v2364_v40, %v2351_v42 }
 0x4b6   :  { %v2377_v39 = vpop.f32.mrf.mxu3  ;;  %v2353_v49 = vpop.f32.mrf.mxu1 }
 0x4b7   :  { %v2391_v41 = vadd.f32 %v2390_v30, %v2377_v39  ;;  %v2394_v5 = vadd.f32 %v2365_v16, %v7711_v24  ;;  %v7714_v16 = vld [vmem:[#allocation177_spill] sm:$0xff]  ;;  %v7715_v39 = vld [vmem:[#allocation178_spill] sm:$0xff]  ;;  %v7721_v24 = vld [vmem:[#allocation184_spill] sm:$0xff] }
 0x4b8   :  { %v2392_v7 = vpop.f32.mrf.mxu0  ;;  %v7719_v49 = vld [vmem:[#allocation182_spill] sm:$0xff] }
 0x4b9   :  { %v2395_v14 = vadd.f32 %v2391_v41, %v7712_v8  ;;  %v2396_v57 = vmul.f32 0.5, %v2394_v5  ;;  %v7718_v41 = vld [vmem:[#allocation181_spill] sm:$0xff]  ;;  %v7723_v7 = vld [vmem:[#allocation186_spill] sm:$0xff]  ;;  %v7725_v8 = vld [vmem:[#allocation188_spill] sm:$0xff] }
 0x4ba   :  { %v7722_v5 = vld [vmem:[#allocation185_spill] sm:$0xff] }
 0x4bb   :  { %v2397_v43 = vmul.f32 0.5, %v2395_v14  ;;  %4587 = vtanh.f32 %v2396_v57  ;;  %v7726_v14 = vld [vmem:[#allocation189_spill] sm:$0xff]  ;;  %v7728_v57 = vld [vmem:[#allocation191_spill] sm:$0xff] }
 0x4bc   :  { %v2366_v44 = vpop.f32.mrf.mxu2 }
 0x4bd   :  { %4589 = vtanh.f32 %v2397_v43  ;;  %v7730_v43 = vld [vmem:[#allocation193_spill] sm:$0xff]  ;;  %v7731_v44 = vld [vmem:[#allocation194_spill] sm:$0xff] }
 0x4be   :  { %v2379_v42 = vpop.f32.mrf.mxu3  ;;  %4591 = vtanh.f32 %v6087_v6 }
 0x4bf   :  { %4593 = vtanh.f32 %v6089_v37  ;;  %v7732_v42 = vld [vmem:[#allocation195_spill] sm:$0xff] }
 0x4c1   :  { %v4588_v15 = vpop.eup %4587 }
 0x4c2   :  { %v2400_v50 = vmul.f32 0.5, %v4588_v15  ;;  %v7733_v15 = vld [vmem:[#allocation196_spill] sm:$0xff] }
 0x4c3   :  { %v4590_v30 = vpop.eup %4589 }
 0x4c4   :  { %v2401_v2 = vmul.f32 0.5, %v4590_v30  ;;  %v2402_v9 = vadd.f32 0.5, %v2400_v50  ;;  %v4592_v60 = vpop.eup %4591  ;;  %v7734_v30 = vld [vmem:[#allocation197_spill] sm:$0xff]  ;;  %v7735_v50 = vld [vmem:[#allocation198_spill] sm:$0xff] }
 0x4c5   :  { %v4594_v1 = vpop.eup %4593 }
 0x4c6   :  { %v2403_v29 = vadd.f32 0.5, %v2401_v2  ;;  %v2412_v54 = vmul.f32 %v4592_v60, %v2402_v9  ;;  %v7736_v2 = vld [vmem:[#allocation199_spill] sm:$0xff]  ;;  %v7737_v9 = vld [vmem:[#allocation200_spill] sm:$0xff]  ;;  %v7738_v60 = vld [vmem:[#allocation201_spill] sm:$0xff] }
 0x4c8   :  { %v2413_v40 = vmul.f32 %v4594_v1, %v2403_v29  ;;  %v6093_v58 = vpack.c.bf16 %v2412_v54, %v2412_v54  ;;  %v7739_v29 = vld [vmem:[#allocation202_spill] sm:$0xff]  ;;  %v7740_v1 = vld [vmem:[#allocation203_spill] sm:$0xff]  ;;  %v7741_v54 = vld [vmem:[#allocation204_spill] sm:$0xff] }
 0x4ca   :  { %v6095_v27 = vpack.c.bf16 %v2413_v40, %v2413_v40  ;;  %2435 = vmatmul.bf16.vlgmr.msra.gmra.mxu1 %v6093_v58  ;;  %2461 = vmatmul.bf16.vlgmr.msra.gmra.mxu3 %v6093_v58  ;;  %v7742_v40 = vld [vmem:[#allocation205_spill] sm:$0xff] }
 0x4cb   :  { %2551 = vmatpush.bf16.msra.mxu1 %v7400_v48  ;;  %2577 = vmatpush.bf16.msra.mxu3 %v7402_v32 }
 0x4cc   :  { %2448 = vmatmul.bf16.vlgmr.msra.gmra.mxu2 %v6095_v27  ;;  %2474 = vmatmul.bf16.vlgmr.msrb.gmra.mxu0 %v6095_v27 }
 0x4cd   :  { %2564 = vmatpush.bf16.msra.mxu2 %v7401_v20  ;;  %2590 = vmatpush.bf16.msrb.mxu0 %v7403_v25 }
 0x4cf   :  { %2552 = vmatpush.bf16.msra.mxu1 %v7404_v28  ;;  %2578 = vmatpush.bf16.msra.mxu3 %v7406_v17 }
 0x4d1   :  { %2565 = vmatpush.bf16.msra.mxu2 %v7405_v56  ;;  %2591 = vmatpush.bf16.msrb.mxu0 %v7407_v19 }
 0x4d3   :  { %2553 = vmatpush.bf16.msra.mxu1 %v7408_v53  ;;  %2579 = vmatpush.bf16.msra.mxu3 %v7410_v3 }
 0x4d5   :  { %2566 = vmatpush.bf16.msra.mxu2 %v7409_v10  ;;  %2592 = vmatpush.bf16.msrb.mxu0 %v7411_v13 }
 0x4d7   :  { %2554 = vmatpush.bf16.msra.mxu1 %v7412_v23  ;;  %2580 = vmatpush.bf16.msra.mxu3 %v7414_v45 }
 0x4d9   :  { %2567 = vmatpush.bf16.msra.mxu2 %v7413_v34  ;;  %2593 = vmatpush.bf16.msrb.mxu0 %v7501_v61 }
 0x4da   :  { %2497 = vmatmul.bf16.vlgmr.msrb.gmra.mxu1 %v6093_v58  ;;  %2523 = vmatmul.bf16.vlgmr.msrb.gmra.mxu3 %v6093_v58 }
 0x4db   :  { %2555 = vmatpush.bf16.msra.mxu1 %v7416_v63  ;;  %2581 = vmatpush.bf16.msra.mxu3 %v7418_v33 }
 0x4dc   :  { %2510 = vmatmul.bf16.vlgmr.msrb.gmra.mxu2 %v6095_v27  ;;  %2536 = vmatmul.bf16.vlgmr.msra.gmra.mxu0 %v6095_v27 }
 0x4dd   :  { %2568 = vmatpush.bf16.msra.mxu2 %v7417_v51  ;;  %2594 = vmatpush.bf16.msrb.mxu0 %v7419_v59 }
 0x4df   :  { %2556 = vmatpush.bf16.msra.mxu1 %v7502_v21  ;;  %2582 = vmatpush.bf16.msra.mxu3 %v7504_v26 }
 0x4e1   :  { %2569 = vmatpush.bf16.msra.mxu2 %v7503_v11  ;;  %2595 = vmatpush.bf16.msrb.mxu0 %v7505_v47 }
 0x4e3   :  { %2557 = vmatpush.bf16.msra.mxu1 %v7506_v36  ;;  %2583 = vmatpush.bf16.msra.mxu3 %v7508_v46 }
 0x4e5   :  { %2570 = vmatpush.bf16.msra.mxu2 %v7507_v18  ;;  %2596 = vmatpush.bf16.msrb.mxu0 %v7509_v0 }
 0x4e7   :  { %2558 = vmatpush.bf16.msra.mxu1 %v7510_v31  ;;  %2584 = vmatpush.bf16.msra.mxu3 %v7713_v4 }
 0x4e9   :  { %2571 = vmatpush.bf16.msra.mxu2 %v7511_v62  ;;  %2597 = vmatpush.bf16.msrb.mxu0 %v7714_v16 }
 0x4ea   :  { %2559 = vmatmul.bf16.vlgmr.msra.gmra.mxu1 %v6093_v58  ;;  %2585 = vmatmul.bf16.vlgmr.msra.gmra.mxu3 %v6093_v58 }
 0x4eb   :  { %2607 = vmatpush.bf16.msrb.mxu1 %v7715_v39  ;;  %2633 = vmatpush.bf16.msrb.mxu3 %v7717_v12  ;;  %v7813_v12 = vld [vmem:[#allocation35_spill] sm:$0xff] }
 0x4ec   :  { %2572 = vmatmul.bf16.vlgmr.msra.gmra.mxu2 %v6095_v27  ;;  %2598 = vmatmul.bf16.vlgmr.msrb.gmra.mxu0 %v6095_v27 }
 0x4ed   :  { %2620 = vmatpush.bf16.msrb.mxu2 %v7716_v55  ;;  %2646 = vmatpush.bf16.msra.mxu0 %v7718_v41 }
 0x4ef   :  { %2608 = vmatpush.bf16.msrb.mxu1 %v7719_v49  ;;  %2634 = vmatpush.bf16.msrb.mxu3 %v7721_v24 }
 0x4f1   :  { %2621 = vmatpush.bf16.msrb.mxu2 %v7720_v22  ;;  %2647 = vmatpush.bf16.msra.mxu0 %v7722_v5  ;;  %v7812_v22 = vld [vmem:[#allocation33_spill] sm:$0xff] }
 0x4f3   :  { %2609 = vmatpush.bf16.msrb.mxu1 %v7723_v7  ;;  %2635 = vmatpush.bf16.msrb.mxu3 %v7725_v8 }
 0x4f5   :  { %2622 = vmatpush.bf16.msrb.mxu2 %v7724_v52  ;;  %2648 = vmatpush.bf16.msra.mxu0 %v7726_v14 }
 0x4f7   :  { %2610 = vmatpush.bf16.msrb.mxu1 %v7727_v38  ;;  %2636 = vmatpush.bf16.msrb.mxu3 %v7729_v35 }
 0x4f9   :  { %2623 = vmatpush.bf16.msrb.mxu2 %v7728_v57  ;;  %2649 = vmatpush.bf16.msra.mxu0 %v7730_v43 }
 0x4fb   :  { %2611 = vmatpush.bf16.msrb.mxu1 %v7731_v44  ;;  %2637 = vmatpush.bf16.msrb.mxu3 %v7733_v15  ;;  %v7744_v15 = vld [vmem:[#allocation207_spill] sm:$0xff] }
 0x4fd   :  { %2624 = vmatpush.bf16.msrb.mxu2 %v7732_v42  ;;  %2650 = vmatpush.bf16.msra.mxu0 %v7734_v30  ;;  %v7743_v42 = vld [vmem:[#allocation206_spill] sm:$0xff]  ;;  %v7745_v30 = vld [vmem:[#allocation208_spill] sm:$0xff] }
 0x4ff   :  { %2612 = vmatpush.bf16.msrb.mxu1 %v7735_v50  ;;  %2638 = vmatpush.bf16.msrb.mxu3 %v7737_v9  ;;  %v7746_v50 = vld [vmem:[#allocation209_spill] sm:$0xff]  ;;  %v7748_v9 = vld [vmem:[#allocation83_spill] sm:$0xff] }
 0x501   :  { %2625 = vmatpush.bf16.msrb.mxu2 %v7736_v2  ;;  %2651 = vmatpush.bf16.msra.mxu0 %v7738_v60  ;;  %v7747_v2 = vld [vmem:[#allocation82_spill] sm:$0xff] }
 0x503   :  { %2613 = vmatpush.bf16.msrb.mxu1 %v7739_v29  ;;  %2639 = vmatpush.bf16.msrb.mxu3 %v7741_v54  ;;  %v7756_v54 = vld [vmem:[#allocation91_spill] sm:$0xff] }
 0x505   :  { %2626 = vmatpush.bf16.msrb.mxu2 %v7740_v1  ;;  %2652 = vmatpush.bf16.msra.mxu0 %v7742_v40  ;;  %v7749_v40 = vld [vmem:[#allocation84_spill] sm:$0xff] }
 0x506   :  { %v7757_v1 = vld [vmem:[#allocation92_spill] sm:$0xff] }
 0x507   :  { %2614 = vmatpush.bf16.msrb.mxu1 %v7743_v42  ;;  %2640 = vmatpush.bf16.msrb.mxu3 %v7745_v30  ;;  %v7750_v42 = vld [vmem:[#allocation85_spill] sm:$0xff]  ;;  %v7752_v30 = vld [vmem:[#allocation87_spill] sm:$0xff] }
 0x509   :  { %2627 = vmatpush.bf16.msrb.mxu2 %v7744_v15  ;;  %2653 = vmatpush.bf16.msra.mxu0 %v7746_v50  ;;  %v7751_v15 = vld [vmem:[#allocation86_spill] sm:$0xff]  ;;  %v7753_v50 = vld [vmem:[#allocation88_spill] sm:$0xff] }
 0x50a   :  { %2615 = vmatmul.bf16.vlgmr.msrb.gmra.mxu1 %v6093_v58  ;;  %2641 = vmatmul.bf16.vlgmr.msrb.gmra.mxu3 %v6093_v58  ;;  %v7758_v58 = vld [vmem:[#allocation93_spill] sm:$0xff] }
 0x50b   :  { %2692 = vmatpush.bf16.msra.mxu1 %v7747_v2  ;;  %2718 = vmatpush.bf16.msra.mxu3 %v7749_v40  ;;  %v7754_v2 = vld [vmem:[#allocation89_spill] sm:$0xff]  ;;  %v7760_v40 = vld [vmem:[#allocation95_spill] sm:$0xff] }
 0x50c   :  { %2628 = vmatmul.bf16.vlgmr.msrb.gmra.mxu2 %v6095_v27  ;;  %2654 = vmatmul.bf16.vlgmr.msra.gmra.mxu0 %v6095_v27  ;;  %v7759_v27 = vld [vmem:[#allocation94_spill] sm:$0xff] }
 0x50d   :  { %2705 = vmatpush.bf16.msra.mxu2 %v7748_v9  ;;  %2731 = vmatpush.bf16.msrb.mxu0 %v7750_v42  ;;  %v7755_v9 = vld [vmem:[#allocation90_spill] sm:$0xff]  ;;  %v7761_v42 = vld [vmem:[#allocation96_spill] sm:$0xff] }
 0x50f   :  { %2693 = vmatpush.bf16.msra.mxu1 %v7751_v15  ;;  %2719 = vmatpush.bf16.msra.mxu3 %v7753_v50  ;;  %v7762_v15 = vld [vmem:[#allocation97_spill] sm:$0xff]  ;;  %v7764_v50 = vld [vmem:[#allocation99_spill] sm:$0xff] }
 0x511   :  { %2706 = vmatpush.bf16.msra.mxu2 %v7752_v30  ;;  %2732 = vmatpush.bf16.msrb.mxu0 %v7754_v2  ;;  %v7763_v30 = vld [vmem:[#allocation98_spill] sm:$0xff]  ;;  %v7765_v2 = vld [vmem:[#allocation100_spill] sm:$0xff] }
 0x513   :  { %2694 = vmatpush.bf16.msra.mxu1 %v7755_v9  ;;  %2720 = vmatpush.bf16.msra.mxu3 %v7757_v1  ;;  %v7766_v9 = vld [vmem:[#allocation101_spill] sm:$0xff]  ;;  %v7768_v1 = vld [vmem:[#allocation103_spill] sm:$0xff] }
 0x515   :  { %2707 = vmatpush.bf16.msra.mxu2 %v7756_v54  ;;  %2733 = vmatpush.bf16.msrb.mxu0 %v7758_v58  ;;  %v7767_v54 = vld [vmem:[#allocation102_spill] sm:$0xff]  ;;  %v7769_v58 = vld [vmem:[#allocation104_spill] sm:$0xff] }
 0x517   :  { %2695 = vmatpush.bf16.msra.mxu1 %v7759_v27  ;;  %2721 = vmatpush.bf16.msra.mxu3 %v7761_v42  ;;  %v7770_v27 = vld [vmem:[#allocation105_spill] sm:$0xff]  ;;  %v7772_v42 = vld [vmem:[#allocation107_spill] sm:$0xff] }
 0x519   :  { %2708 = vmatpush.bf16.msra.mxu2 %v7760_v40  ;;  %2734 = vmatpush.bf16.msrb.mxu0 %v7762_v15  ;;  %v7771_v40 = vld [vmem:[#allocation106_spill] sm:$0xff]  ;;  %v7773_v15 = vld [vmem:[#allocation108_spill] sm:$0xff] }
 0x51b   :  { %2696 = vmatpush.bf16.msra.mxu1 %v7763_v30  ;;  %2722 = vmatpush.bf16.msra.mxu3 %v7765_v2  ;;  %v7774_v30 = vld [vmem:[#allocation109_spill] sm:$0xff]  ;;  %v7776_v2 = vld [vmem:[#allocation111_spill] sm:$0xff] }
 0x51d   :  { %2709 = vmatpush.bf16.msra.mxu2 %v7764_v50  ;;  %2735 = vmatpush.bf16.msrb.mxu0 %v7766_v9  ;;  %v7775_v50 = vld [vmem:[#allocation110_spill] sm:$0xff] }
 0x51e   :  { %v7777_v9 = vld [vmem:[#allocation114_spill] sm:$0xff] }
 0x51f   :  { %2697 = vmatpush.bf16.msra.mxu1 %v7767_v54  ;;  %2723 = vmatpush.bf16.msra.mxu3 %v7769_v58  ;;  %v7778_v54 = vld [vmem:[#allocation115_spill] sm:$0xff]  ;;  %v7780_v58 = vld [vmem:[#allocation113_spill] sm:$0xff] }
 0x521   :  { %2710 = vmatpush.bf16.msra.mxu2 %v7768_v1  ;;  %2736 = vmatpush.bf16.msrb.mxu0 %v7770_v27  ;;  %v7779_v1 = vld [vmem:[#allocation112_spill] sm:$0xff] }
 0x522   :  { %v7781_v27 = vld [vmem:[#allocation116_spill] sm:$0xff] }
 0x523   :  { %2698 = vmatpush.bf16.msra.mxu1 %v7771_v40  ;;  %2724 = vmatpush.bf16.msra.mxu3 %v7773_v15  ;;  %v7782_v40 = vld [vmem:[#allocation117_spill] sm:$0xff]  ;;  %v7784_v15 = vld [vmem:[#allocation119_spill] sm:$0xff] }
 0x525   :  { %2711 = vmatpush.bf16.msra.mxu2 %v7772_v42  ;;  %2737 = vmatpush.bf16.msrb.mxu0 %v7774_v30  ;;  %v7783_v42 = vld [vmem:[#allocation118_spill] sm:$0xff]  ;;  %v7785_v30 = vld [vmem:[#allocation120_spill] sm:$0xff] }
 0x527   :  { %2699 = vmatpush.bf16.msra.mxu1 %v7775_v50  ;;  %2725 = vmatpush.bf16.msra.mxu3 %v7779_v1  ;;  %v7786_v50 = vld [vmem:[#allocation121_spill] sm:$0xff] }
 0x528   :  { %v7790_v1 = vld [vmem:[#allocation125_spill] sm:$0xff] }
 0x529   :  { %2712 = vmatpush.bf16.msra.mxu2 %v7776_v2  ;;  %2738 = vmatpush.bf16.msrb.mxu0 %v7780_v58  ;;  %v7787_v2 = vld [vmem:[#allocation122_spill] sm:$0xff] }
 0x52a   :  { %v7791_v58 = vld [vmem:[#allocation126_spill] sm:$0xff] }
 0x52b   :  { %2754 = vmatpush.bf16.msrb.mxu1 %v7777_v9  ;;  %2780 = vmatpush.bf16.msrb.mxu3 %v7781_v27  ;;  %v7788_v9 = vld [vmem:[#allocation123_spill] sm:$0xff] }
 0x52c   :  { %v7792_v27 = vld [vmem:[#allocation127_spill] sm:$0xff] }
 0x52d   :  { %2767 = vmatpush.bf16.msrb.mxu2 %v7778_v54  ;;  %2793 = vmatpush.bf16.msra.mxu0 %v7782_v40  ;;  %v7789_v54 = vld [vmem:[#allocation124_spill] sm:$0xff] }
 0x52e   :  { %v7793_v40 = vld [vmem:[#allocation128_spill] sm:$0xff] }
 0x52f   :  { %2755 = vmatpush.bf16.msrb.mxu1 %v7783_v42  ;;  %2781 = vmatpush.bf16.msrb.mxu3 %v7785_v30  ;;  %v7794_v42 = vld [vmem:[#allocation129_spill] sm:$0xff]  ;;  %v7796_v30 = vld [vmem:[#allocation131_spill] sm:$0xff] }
 0x531   :  { %2768 = vmatpush.bf16.msrb.mxu2 %v7784_v15  ;;  %2794 = vmatpush.bf16.msra.mxu0 %v7786_v50  ;;  %v7795_v15 = vld [vmem:[#allocation130_spill] sm:$0xff]  ;;  %v7797_v50 = vld [vmem:[#allocation132_spill] sm:$0xff] }
 0x533   :  { %2756 = vmatpush.bf16.msrb.mxu1 %v7787_v2  ;;  %2782 = vmatpush.bf16.msrb.mxu3 %v7789_v54  ;;  %v7798_v2 = vld [vmem:[#allocation133_spill] sm:$0xff]  ;;  %v7800_v54 = vld [vmem:[#allocation135_spill] sm:$0xff] }
 0x535   :  { %2769 = vmatpush.bf16.msrb.mxu2 %v7788_v9  ;;  %2795 = vmatpush.bf16.msra.mxu0 %v7790_v1  ;;  %v7799_v9 = vld [vmem:[#allocation134_spill] sm:$0xff]  ;;  %v7801_v1 = vld [vmem:[#allocation136_spill] sm:$0xff] }
 0x537   :  { %2757 = vmatpush.bf16.msrb.mxu1 %v7791_v58  ;;  %2783 = vmatpush.bf16.msrb.mxu3 %v7793_v40  ;;  %v7802_v58 = vld [vmem:[#allocation137_spill] sm:$0xff]  ;;  %v7804_v40 = vld [vmem:[#allocation139_spill] sm:$0xff] }
 0x539   :  { %2770 = vmatpush.bf16.msrb.mxu2 %v7792_v27  ;;  %2796 = vmatpush.bf16.msra.mxu0 %v7794_v42  ;;  %v7803_v27 = vld [vmem:[#allocation138_spill] sm:$0xff]  ;;  %v7805_v42 = vld [vmem:[#allocation140_spill] sm:$0xff] }
 0x53b   :  { %2758 = vmatpush.bf16.msrb.mxu1 %v7795_v15  ;;  %2784 = vmatpush.bf16.msrb.mxu3 %v7797_v50  ;;  %v7806_v15 = vld [vmem:[#allocation141_spill] sm:$0xff]  ;;  %v7808_v50 = vld [vmem:[#allocation143_spill] sm:$0xff] }
 0x53d   :  { %2771 = vmatpush.bf16.msrb.mxu2 %v7796_v30  ;;  %2797 = vmatpush.bf16.msra.mxu0 %v7798_v2  ;;  %v7807_v30 = vld [vmem:[#allocation142_spill] sm:$0xff]  ;;  %v7809_v2 = vld [vmem:[#allocation144_spill] sm:$0xff] }
 0x53f   :  { %2759 = vmatpush.bf16.msrb.mxu1 %v7799_v9  ;;  %2785 = vmatpush.bf16.msrb.mxu3 %v7801_v1  ;;  %v7810_v9 = vld [vmem:[#allocation145_spill] sm:$0xff] }
 0x541   :  { %2772 = vmatpush.bf16.msrb.mxu2 %v7800_v54  ;;  %2798 = vmatpush.bf16.msra.mxu0 %v7802_v58 }
 0x543   :  { %2760 = vmatpush.bf16.msrb.mxu1 %v7803_v27  ;;  %2786 = vmatpush.bf16.msrb.mxu3 %v7805_v42 }
 0x545   :  { %2773 = vmatpush.bf16.msrb.mxu2 %v7804_v40  ;;  %2799 = vmatpush.bf16.msra.mxu0 %v7806_v15 }
 0x547   :  { %2761 = vmatpush.bf16.msrb.mxu1 %v7807_v30  ;;  %2787 = vmatpush.bf16.msrb.mxu3 %v7809_v2  ;;  %v2436_v54 = vpop.f32.mrf.mxu1 }
 0x549   :  { %2774 = vmatpush.bf16.msrb.mxu2 %v7808_v50  ;;  %2800 = vmatpush.bf16.msra.mxu0 %v7810_v9  ;;  %v2475_v1 = vpop.f32.mrf.mxu0 }
 0x54d   :  { %v2462_v29 = vpop.f32.mrf.mxu3 }
 0x54e   :  { %v2476_v7 = vadd.f32 %v2475_v1, %v2462_v29 }
 0x54f   :  { %v2449_v58 = vpop.f32.mrf.mxu2  ;;  %v2438_v60 = vpop.f32.mrf.mxu1 }
 0x550   :  { %v2450_v24 = vadd.f32 %v2449_v58, %v2436_v54 }
 0x551   :  { %v2477_v27 = vpop.f32.mrf.mxu0 }
 0x552   :  { %v2479_v49 = vadd.f32 %v2450_v24, %v7812_v22 }
 0x554   :  { %v2481_v39 = vmul.f32 0.5, %v2479_v49 }
 0x555   :  { %v2464_v44 = vpop.f32.mrf.mxu3 }
 0x556   :  { %v7811_v44 = vld [vmem:[#allocation34_spill] sm:$0xff] }
 0x557   :  { %v2451_v40 = vpop.f32.mrf.mxu2  ;;  %v2498_v43 = vpop.f32.mrf.mxu1 }
 0x558   :  { %v2480_v40 = vadd.f32 %v2476_v7, %v7811_v44 }
 0x559   :  { %v2537_v42 = vpop.f32.mrf.mxu0 }
 0x55a   :  { %v2482_v55 = vmul.f32 0.5, %v2480_v40 }
 0x55c   :  { %4595 = vtanh.f32 %v2482_v55 }
 0x55d   :  { %v2524_v35 = vpop.f32.mrf.mxu3  ;;  %4597 = vtanh.f32 %v2481_v39 }
 0x55e   :  { %v2538_v27 = vadd.f32 %v2537_v42, %v2524_v35  ;;  %v7815_v35 = vld [vmem:[#allocation65_spill] sm:$0xff] }
 0x55f   :  { %v2511_v15 = vpop.f32.mrf.mxu2  ;;  %v2500_v57 = vpop.f32.mrf.mxu1 }
 0x560   :  { %v2512_v60 = vadd.f32 %v2511_v15, %v2498_v43  ;;  %v7816_v43 = vld [vmem:[#allocation66_spill] sm:$0xff] }
 0x561   :  { %v2539_v30 = vpop.f32.mrf.mxu0 }
 0x562   :  { %v2541_v57 = vadd.f32 %v2512_v60, %v7813_v12 }
 0x564   :  { %v2543_v16 = vmul.f32 0.5, %v2541_v57  ;;  %v7817_v57 = vld [vmem:[#allocation67_spill] sm:$0xff] }
 0x565   :  { %v2526_v38 = vpop.f32.mrf.mxu3 }
 0x566   :  { %v7814_v38 = vld [vmem:[#allocation36_spill] sm:$0xff]  ;;  %4599 = vtanh.f32 %v2543_v16 }
 0x567   :  { %v2513_v50 = vpop.f32.mrf.mxu2  ;;  %v2560_v14 = vpop.f32.mrf.mxu1 }
 0x568   :  { %v2542_v50 = vadd.f32 %v2538_v27, %v7814_v38 }
 0x569   :  { %v2599_v2 = vpop.f32.mrf.mxu0 }
 0x56a   :  { %v2544_v4 = vmul.f32 0.5, %v2542_v50 }
 0x56c   :  { %4601 = vtanh.f32 %v2544_v4 }
 0x56d   :  { %v2586_v9 = vpop.f32.mrf.mxu3 }
 0x56f   :  { %v2573_v8 = vpop.f32.mrf.mxu2  ;;  %v2562_v52 = vpop.f32.mrf.mxu1 }
 0x570   :  { %v2574_v52 = vadd.f32 %v2573_v8, %v2560_v14 }
 0x571   :  { %v2601_v5 = vpop.f32.mrf.mxu0 }
 0x572   :  { %v2600_v5 = vadd.f32 %v2599_v2, %v2586_v9  ;;  %v2603_v7 = vadd.f32 %v2574_v52, %v7815_v35  ;;  %v7818_v52 = vld [vmem:[#allocation68_spill] sm:$0xff] }
 0x574   :  { %v2604_v22 = vadd.f32 %v2600_v5, %v7816_v43  ;;  %4603 = vtanh.f32 %v2603_v7 }
 0x575   :  { %v2588_v30 = vpop.f32.mrf.mxu3 }
 0x576   :  { %4605 = vtanh.f32 %v2604_v22 }
 0x577   :  { %v2575_v41 = vpop.f32.mrf.mxu2 }
 0x578   :  { %v4596_v41 = vpop.eup %4595 }
 0x579   :  { %v4598_v24 = vpop.eup %4597  ;;  %v2486_v55 = vmul.f32 0.5, %v4596_v41 }
 0x57a   :  { %v4600_v12 = vpop.eup %4599  ;;  %v2485_v29 = vmul.f32 0.5, %v4598_v24 }
 0x57b   :  { %v4602_v15 = vpop.eup %4601  ;;  %v2547_v1 = vmul.f32 0.5, %v4600_v12  ;;  %v2488_v58 = vadd.f32 0.5, %v2486_v55 }
 0x57c   :  { %v2548_v8 = vmul.f32 0.5, %v4602_v15  ;;  %v4604_v39 = vpop.eup %4603  ;;  %v2487_v4 = vadd.f32 0.5, %v2485_v29 }
 0x57d   :  { %v4606_v16 = vpop.eup %4605  ;;  %v2549_v2 = vadd.f32 0.5, %v2547_v1 }
 0x57e   :  { %v2550_v60 = vadd.f32 0.5, %v2548_v8  ;;  %v2671_v40 = vmul.f32 %v4604_v39, %v2487_v4  ;;  %v2672_v50 = vmul.f32 %v4606_v16, %v2488_v58  ;;  %v7822_v58 = vld [vmem:[#allocation179_spill] sm:$0xff] }
 0x57f   :  { %v2669_v35 = vmul.f32 %v2549_v2, %v6087_v6  ;;  %v7819_v2 = vld [vmem:[#allocation176_spill] sm:$0xff] }
 0x580   :  { %v2670_v43 = vmul.f32 %v2550_v60, %v6089_v37  ;;  %v7823_v60 = vld [vmem:[#allocation180_spill] sm:$0xff] }
 0x581   :  { %v6251_v41 = vadd.f32 %v2671_v40, %v2669_v35  ;;  %v7826_v40 = vld [vmem:[#allocation183_spill] sm:$0xff]  ;;  %v7833_v35 = vld [vmem:[#allocation190_spill] sm:$0xff] }
 0x582   :  { %v6253_v24 = vadd.f32 %v2672_v50, %v2670_v43  ;;  %v7830_v50 = vld [vmem:[#allocation187_spill] sm:$0xff]  ;;  %v7835_v43 = vld [vmem:[#allocation192_spill] sm:$0xff] }
 0x587   :  { %v2616_v42 = vpop.f32.mrf.mxu1 }
 0x589   :  { %v2655_v49 = vpop.f32.mrf.mxu0 }
 0x58d   :  { %v2642_v54 = vpop.f32.mrf.mxu3 }
 0x58e   :  { %v2656_v27 = vadd.f32 %v2655_v49, %v2642_v54  ;;  %v7821_v54 = vld [vmem:[#allocation178_spill] sm:$0xff] }
 0x58f   :  { %v2629_v14 = vpop.f32.mrf.mxu2  ;;  %v2618_v44 = vpop.f32.mrf.mxu1 }
 0x590   :  { %v2630_v9 = vadd.f32 %v2629_v14, %v2616_v42  ;;  %v2660_v5 = vadd.f32 %v2656_v27, %v7818_v52  ;;  %v7824_v27 = vld [vmem:[#allocation181_spill] sm:$0xff]  ;;  %v7825_v44 = vld [vmem:[#allocation182_spill] sm:$0xff]  ;;  %v7831_v52 = vld [vmem:[#allocation188_spill] sm:$0xff] }
 0x591   :  { %v2657_v38 = vpop.f32.mrf.mxu0 }
 0x592   :  { %v2659_v30 = vadd.f32 %v2630_v9, %v7817_v57  ;;  %v2662_v22 = vmul.f32 0.5, %v2660_v5  ;;  %v7820_v9 = vld [vmem:[#allocation177_spill] sm:$0xff]  ;;  %v7827_v57 = vld [vmem:[#allocation184_spill] sm:$0xff]  ;;  %v7829_v38 = vld [vmem:[#allocation186_spill] sm:$0xff] }
 0x593   :  { %v7832_v5 = vld [vmem:[#allocation189_spill] sm:$0xff] }
 0x594   :  { %v2661_v7 = vmul.f32 0.5, %v2659_v30  ;;  %v7828_v30 = vld [vmem:[#allocation185_spill] sm:$0xff] }
 0x595   :  { %v2644_v42 = vpop.f32.mrf.mxu3 }
 0x596   :  { %4607 = vtanh.f32 %v2661_v7  ;;  %v7834_v7 = vld [vmem:[#allocation191_spill] sm:$0xff] }
 0x597   :  { %4609 = vtanh.f32 %v2662_v22  ;;  %v2631_v12 = vpop.f32.mrf.mxu2  ;;  %v7836_v22 = vld [vmem:[#allocation193_spill] sm:$0xff]  ;;  %v7838_v42 = vld [vmem:[#allocation195_spill] sm:$0xff] }
 0x598   :  { %4611 = vtanh.f32 %v6251_v41  ;;  %v7837_v12 = vld [vmem:[#allocation194_spill] sm:$0xff] }
 0x599   :  { %4613 = vtanh.f32 %v6253_v24 }
 0x59c   :  { %v4608_v15 = vpop.eup %4607 }
 0x59d   :  { %v4610_v49 = vpop.eup %4609  ;;  %v2665_v29 = vmul.f32 0.5, %v4608_v15  ;;  %v7839_v15 = vld [vmem:[#allocation196_spill] sm:$0xff] }
 0x59e   :  { %v2666_v6 = vmul.f32 0.5, %v4610_v49  ;;  %v4612_v55 = vpop.eup %4611  ;;  %v7840_v49 = vld [vmem:[#allocation197_spill] sm:$0xff] }
 0x59f   :  { %v2667_v1 = vadd.f32 0.5, %v2665_v29  ;;  %v4614_v8 = vpop.eup %4613  ;;  %v7841_v29 = vld [vmem:[#allocation198_spill] sm:$0xff] }
 0x5a0   :  { %v2668_v37 = vadd.f32 0.5, %v2666_v6  ;;  %v7842_v6 = vld [vmem:[#allocation199_spill] sm:$0xff] }
 0x5a1   :  { %v2677_v39 = vmul.f32 %v4612_v55, %v2667_v1  ;;  %v7843_v1 = vld [vmem:[#allocation200_spill] sm:$0xff]  ;;  %v7844_v55 = vld [vmem:[#allocation201_spill] sm:$0xff] }
 0x5a2   :  { %v2678_v14 = vmul.f32 %v4614_v8, %v2668_v37  ;;  %v7845_v37 = vld [vmem:[#allocation202_spill] sm:$0xff]  ;;  %v7846_v8 = vld [vmem:[#allocation203_spill] sm:$0xff] }
 0x5a3   :  { %v6257_v16 = vpack.c.bf16 %v2677_v39, %v2677_v39  ;;  %v7847_v39 = vld [vmem:[#allocation204_spill] sm:$0xff] }
 0x5a4   :  { %v6259_v4 = vpack.c.bf16 %v2678_v14, %v2678_v14  ;;  %v7848_v14 = vld [vmem:[#allocation205_spill] sm:$0xff] }
 0x5a5   :  { %2700 = vmatmul.bf16.vlgmr.msra.gmra.mxu1 %v6257_v16  ;;  %2726 = vmatmul.bf16.vlgmr.msra.gmra.mxu3 %v6257_v16 }
 0x5a6   :  { %2713 = vmatmul.bf16.vlgmr.msra.gmra.mxu2 %v6259_v4  ;;  %2739 = vmatmul.bf16.vlgmr.msrb.gmra.mxu0 %v6259_v4 }
 0x5a7   :  { %2816 = vmatpush.bf16.msra.mxu1 %v7400_v48  ;;  %2829 = vmatpush.bf16.msra.mxu2 %v7401_v20 }
 0x5a8   :  { %2842 = vmatpush.bf16.msra.mxu3 %v7402_v32  ;;  %2855 = vmatpush.bf16.msrb.mxu0 %v7403_v25 }
 0x5ab   :  { %2817 = vmatpush.bf16.msra.mxu1 %v7404_v28  ;;  %2830 = vmatpush.bf16.msra.mxu2 %v7405_v56 }
 0x5ac   :  { %2843 = vmatpush.bf16.msra.mxu3 %v7406_v17  ;;  %2856 = vmatpush.bf16.msrb.mxu0 %v7407_v19 }
 0x5af   :  { %2818 = vmatpush.bf16.msra.mxu1 %v7408_v53  ;;  %2831 = vmatpush.bf16.msra.mxu2 %v7409_v10 }
 0x5b0   :  { %2844 = vmatpush.bf16.msra.mxu3 %v7410_v3  ;;  %2857 = vmatpush.bf16.msrb.mxu0 %v7411_v13 }
 0x5b3   :  { %2819 = vmatpush.bf16.msra.mxu1 %v7412_v23  ;;  %2832 = vmatpush.bf16.msra.mxu2 %v7413_v34 }
 0x5b4   :  { %2845 = vmatpush.bf16.msra.mxu3 %v7414_v45  ;;  %2858 = vmatpush.bf16.msrb.mxu0 %v7501_v61 }
 0x5b5   :  { %2762 = vmatmul.bf16.vlgmr.msrb.gmra.mxu1 %v6257_v16  ;;  %2788 = vmatmul.bf16.vlgmr.msrb.gmra.mxu3 %v6257_v16 }
 0x5b6   :  { %2775 = vmatmul.bf16.vlgmr.msrb.gmra.mxu2 %v6259_v4  ;;  %2801 = vmatmul.bf16.vlgmr.msra.gmra.mxu0 %v6259_v4 }
 0x5b7   :  { %2820 = vmatpush.bf16.msra.mxu1 %v7416_v63  ;;  %2833 = vmatpush.bf16.msra.mxu2 %v7417_v51 }
 0x5b8   :  { %2846 = vmatpush.bf16.msra.mxu3 %v7418_v33  ;;  %2859 = vmatpush.bf16.msrb.mxu0 %v7419_v59 }
 0x5bb   :  { %2821 = vmatpush.bf16.msra.mxu1 %v7502_v21  ;;  %2834 = vmatpush.bf16.msra.mxu2 %v7503_v11 }
 0x5bc   :  { %2847 = vmatpush.bf16.msra.mxu3 %v7504_v26  ;;  %2860 = vmatpush.bf16.msrb.mxu0 %v7505_v47 }
 0x5bf   :  { %2822 = vmatpush.bf16.msra.mxu1 %v7506_v36  ;;  %2835 = vmatpush.bf16.msra.mxu2 %v7507_v18 }
 0x5c0   :  { %2848 = vmatpush.bf16.msra.mxu3 %v7508_v46  ;;  %2861 = vmatpush.bf16.msrb.mxu0 %v7509_v0 }
 0x5c3   :  { %2823 = vmatpush.bf16.msra.mxu1 %v7510_v31  ;;  %2836 = vmatpush.bf16.msra.mxu2 %v7511_v62 }
 0x5c4   :  { %2849 = vmatpush.bf16.msra.mxu3 %v7819_v2  ;;  %2862 = vmatpush.bf16.msrb.mxu0 %v7820_v9 }
 0x5c6   :  { %2824 = vmatmul.bf16.vlgmr.msra.gmra.mxu1 %v6257_v16  ;;  %2837 = vmatmul.bf16.vlgmr.msra.gmra.mxu2 %v6259_v4 }
 0x5c7   :  { %2872 = vmatpush.bf16.msrb.mxu1 %v7821_v54  ;;  %2885 = vmatpush.bf16.msrb.mxu2 %v7822_v58 }
 0x5c8   :  { %2898 = vmatpush.bf16.msrb.mxu3 %v7823_v60  ;;  %2911 = vmatpush.bf16.msra.mxu0 %v7824_v27  ;;  %v7919_v60 = vld [vmem:[#allocation39_spill] sm:$0xff] }
 0x5c9   :  { %2850 = vmatmul.bf16.vlgmr.msra.gmra.mxu3 %v6257_v16  ;;  %2863 = vmatmul.bf16.vlgmr.msrb.gmra.mxu0 %v6259_v4 }
 0x5cb   :  { %2873 = vmatpush.bf16.msrb.mxu1 %v7825_v44  ;;  %2886 = vmatpush.bf16.msrb.mxu2 %v7826_v40  ;;  %v7918_v40 = vld [vmem:[#allocation37_spill] sm:$0xff] }
 0x5cc   :  { %2899 = vmatpush.bf16.msrb.mxu3 %v7827_v57  ;;  %2912 = vmatpush.bf16.msra.mxu0 %v7828_v30 }
 0x5cf   :  { %2874 = vmatpush.bf16.msrb.mxu1 %v7829_v38  ;;  %2887 = vmatpush.bf16.msrb.mxu2 %v7830_v50 }
 0x5d0   :  { %2900 = vmatpush.bf16.msrb.mxu3 %v7831_v52  ;;  %2913 = vmatpush.bf16.msra.mxu0 %v7832_v5 }
 0x5d3   :  { %2875 = vmatpush.bf16.msrb.mxu1 %v7833_v35  ;;  %2888 = vmatpush.bf16.msrb.mxu2 %v7834_v7 }
 0x5d4   :  { %2901 = vmatpush.bf16.msrb.mxu3 %v7835_v43  ;;  %2914 = vmatpush.bf16.msra.mxu0 %v7836_v22 }
 0x5d7   :  { %2876 = vmatpush.bf16.msrb.mxu1 %v7837_v12  ;;  %2889 = vmatpush.bf16.msrb.mxu2 %v7838_v42  ;;  %v7849_v42 = vld [vmem:[#allocation206_spill] sm:$0xff] }
 0x5d8   :  { %2902 = vmatpush.bf16.msrb.mxu3 %v7839_v15  ;;  %2915 = vmatpush.bf16.msra.mxu0 %v7840_v49  ;;  %v7850_v15 = vld [vmem:[#allocation207_spill] sm:$0xff]  ;;  %v7851_v49 = vld [vmem:[#allocation208_spill] sm:$0xff] }
 0x5db   :  { %2877 = vmatpush.bf16.msrb.mxu1 %v7841_v29  ;;  %2890 = vmatpush.bf16.msrb.mxu2 %v7842_v6  ;;  %v7852_v29 = vld [vmem:[#allocation209_spill] sm:$0xff]  ;;  %v7853_v6 = vld [vmem:[#allocation82_spill] sm:$0xff] }
 0x5dc   :  { %2903 = vmatpush.bf16.msrb.mxu3 %v7843_v1  ;;  %2916 = vmatpush.bf16.msra.mxu0 %v7844_v55  ;;  %v7854_v1 = vld [vmem:[#allocation83_spill] sm:$0xff] }
 0x5df   :  { %2878 = vmatpush.bf16.msrb.mxu1 %v7845_v37  ;;  %2891 = vmatpush.bf16.msrb.mxu2 %v7846_v8  ;;  %v7863_v8 = vld [vmem:[#allocation92_spill] sm:$0xff] }
 0x5e0   :  { %2904 = vmatpush.bf16.msrb.mxu3 %v7847_v39  ;;  %2917 = vmatpush.bf16.msra.mxu0 %v7848_v14  ;;  %v7855_v14 = vld [vmem:[#allocation84_spill] sm:$0xff]  ;;  %v7862_v39 = vld [vmem:[#allocation91_spill] sm:$0xff] }
 0x5e3   :  { %2879 = vmatpush.bf16.msrb.mxu1 %v7849_v42  ;;  %2892 = vmatpush.bf16.msrb.mxu2 %v7850_v15  ;;  %v7856_v42 = vld [vmem:[#allocation85_spill] sm:$0xff]  ;;  %v7857_v15 = vld [vmem:[#allocation86_spill] sm:$0xff] }
 0x5e4   :  { %2905 = vmatpush.bf16.msrb.mxu3 %v7851_v49  ;;  %2918 = vmatpush.bf16.msra.mxu0 %v7852_v29  ;;  %v7858_v49 = vld [vmem:[#allocation87_spill] sm:$0xff]  ;;  %v7859_v29 = vld [vmem:[#allocation88_spill] sm:$0xff] }
 0x5e6   :  { %2880 = vmatmul.bf16.vlgmr.msrb.gmra.mxu1 %v6257_v16  ;;  %2893 = vmatmul.bf16.vlgmr.msrb.gmra.mxu2 %v6259_v4 }
 0x5e7   :  { %2957 = vmatpush.bf16.msra.mxu1 %v7853_v6  ;;  %2970 = vmatpush.bf16.msra.mxu2 %v7854_v1  ;;  %v7860_v6 = vld [vmem:[#allocation89_spill] sm:$0xff]  ;;  %v7861_v1 = vld [vmem:[#allocation90_spill] sm:$0xff] }
 0x5e8   :  { %2906 = vmatmul.bf16.vlgmr.msrb.gmra.mxu3 %v6257_v16  ;;  %2919 = vmatmul.bf16.vlgmr.msra.gmra.mxu0 %v6259_v4  ;;  %v7864_v16 = vld [vmem:[#allocation93_spill] sm:$0xff]  ;;  %v7865_v4 = vld [vmem:[#allocation94_spill] sm:$0xff] }
 0x5e9   :  { %2983 = vmatpush.bf16.msra.mxu3 %v7855_v14  ;;  %2996 = vmatpush.bf16.msrb.mxu0 %v7856_v42  ;;  %v7866_v14 = vld [vmem:[#allocation95_spill] sm:$0xff]  ;;  %v7867_v42 = vld [vmem:[#allocation96_spill] sm:$0xff] }
 0x5eb   :  { %2958 = vmatpush.bf16.msra.mxu1 %v7857_v15  ;;  %2971 = vmatpush.bf16.msra.mxu2 %v7858_v49  ;;  %v7868_v15 = vld [vmem:[#allocation97_spill] sm:$0xff]  ;;  %v7869_v49 = vld [vmem:[#allocation98_spill] sm:$0xff] }
 0x5ed   :  { %2984 = vmatpush.bf16.msra.mxu3 %v7859_v29  ;;  %2997 = vmatpush.bf16.msrb.mxu0 %v7860_v6  ;;  %v7870_v29 = vld [vmem:[#allocation99_spill] sm:$0xff]  ;;  %v7871_v6 = vld [vmem:[#allocation100_spill] sm:$0xff] }
 0x5ef   :  { %2959 = vmatpush.bf16.msra.mxu1 %v7861_v1  ;;  %2972 = vmatpush.bf16.msra.mxu2 %v7862_v39  ;;  %v7872_v1 = vld [vmem:[#allocation101_spill] sm:$0xff]  ;;  %v7873_v39 = vld [vmem:[#allocation102_spill] sm:$0xff] }
 0x5f1   :  { %2985 = vmatpush.bf16.msra.mxu3 %v7863_v8  ;;  %2998 = vmatpush.bf16.msrb.mxu0 %v7864_v16  ;;  %v7874_v8 = vld [vmem:[#allocation103_spill] sm:$0xff]  ;;  %v7875_v16 = vld [vmem:[#allocation104_spill] sm:$0xff] }
 0x5f3   :  { %2960 = vmatpush.bf16.msra.mxu1 %v7865_v4  ;;  %2973 = vmatpush.bf16.msra.mxu2 %v7866_v14  ;;  %v7876_v4 = vld [vmem:[#allocation105_spill] sm:$0xff]  ;;  %v7877_v14 = vld [vmem:[#allocation106_spill] sm:$0xff] }
 0x5f5   :  { %2986 = vmatpush.bf16.msra.mxu3 %v7867_v42  ;;  %2999 = vmatpush.bf16.msrb.mxu0 %v7868_v15  ;;  %v7878_v42 = vld [vmem:[#allocation107_spill] sm:$0xff]  ;;  %v7879_v15 = vld [vmem:[#allocation108_spill] sm:$0xff] }
 0x5f7   :  { %2961 = vmatpush.bf16.msra.mxu1 %v7869_v49  ;;  %2974 = vmatpush.bf16.msra.mxu2 %v7870_v29  ;;  %v7880_v49 = vld [vmem:[#allocation109_spill] sm:$0xff]  ;;  %v7881_v29 = vld [vmem:[#allocation110_spill] sm:$0xff] }
 0x5f9   :  { %2987 = vmatpush.bf16.msra.mxu3 %v7871_v6  ;;  %3000 = vmatpush.bf16.msrb.mxu0 %v7872_v1  ;;  %v7882_v6 = vld [vmem:[#allocation111_spill] sm:$0xff]  ;;  %v7883_v1 = vld [vmem:[#allocation114_spill] sm:$0xff] }
 0x5fb   :  { %2962 = vmatpush.bf16.msra.mxu1 %v7873_v39  ;;  %2975 = vmatpush.bf16.msra.mxu2 %v7874_v8  ;;  %v7884_v39 = vld [vmem:[#allocation115_spill] sm:$0xff]  ;;  %v7885_v8 = vld [vmem:[#allocation112_spill] sm:$0xff] }
 0x5fd   :  { %2988 = vmatpush.bf16.msra.mxu3 %v7875_v16  ;;  %3001 = vmatpush.bf16.msrb.mxu0 %v7876_v4  ;;  %v7886_v16 = vld [vmem:[#allocation113_spill] sm:$0xff]  ;;  %v7887_v4 = vld [vmem:[#allocation116_spill] sm:$0xff] }
 0x5ff   :  { %2963 = vmatpush.bf16.msra.mxu1 %v7877_v14  ;;  %2976 = vmatpush.bf16.msra.mxu2 %v7878_v42  ;;  %v7888_v14 = vld [vmem:[#allocation117_spill] sm:$0xff]  ;;  %v7889_v42 = vld [vmem:[#allocation118_spill] sm:$0xff] }
 0x601   :  { %2989 = vmatpush.bf16.msra.mxu3 %v7879_v15  ;;  %3002 = vmatpush.bf16.msrb.mxu0 %v7880_v49  ;;  %v7890_v15 = vld [vmem:[#allocation119_spill] sm:$0xff]  ;;  %v7891_v49 = vld [vmem:[#allocation120_spill] sm:$0xff] }
 0x603   :  { %2964 = vmatpush.bf16.msra.mxu1 %v7881_v29  ;;  %2977 = vmatpush.bf16.msra.mxu2 %v7882_v6  ;;  %v7892_v29 = vld [vmem:[#allocation121_spill] sm:$0xff]  ;;  %v7893_v6 = vld [vmem:[#allocation122_spill] sm:$0xff] }
 0x605   :  { %2990 = vmatpush.bf16.msra.mxu3 %v7885_v8  ;;  %3003 = vmatpush.bf16.msrb.mxu0 %v7886_v16  ;;  %v7896_v8 = vld [vmem:[#allocation125_spill] sm:$0xff]  ;;  %v7897_v16 = vld [vmem:[#allocation126_spill] sm:$0xff] }
 0x607   :  { %3019 = vmatpush.bf16.msrb.mxu1 %v7883_v1  ;;  %3032 = vmatpush.bf16.msrb.mxu2 %v7884_v39  ;;  %v7894_v1 = vld [vmem:[#allocation123_spill] sm:$0xff]  ;;  %v7895_v39 = vld [vmem:[#allocation124_spill] sm:$0xff] }
 0x609   :  { %3045 = vmatpush.bf16.msrb.mxu3 %v7887_v4  ;;  %3058 = vmatpush.bf16.msra.mxu0 %v7888_v14  ;;  %v7898_v4 = vld [vmem:[#allocation127_spill] sm:$0xff]  ;;  %v7899_v14 = vld [vmem:[#allocation128_spill] sm:$0xff] }
 0x60b   :  { %3020 = vmatpush.bf16.msrb.mxu1 %v7889_v42  ;;  %3033 = vmatpush.bf16.msrb.mxu2 %v7890_v15  ;;  %v7900_v42 = vld [vmem:[#allocation129_spill] sm:$0xff]  ;;  %v7901_v15 = vld [vmem:[#allocation130_spill] sm:$0xff] }
 0x60d   :  { %3046 = vmatpush.bf16.msrb.mxu3 %v7891_v49  ;;  %3059 = vmatpush.bf16.msra.mxu0 %v7892_v29  ;;  %v7902_v49 = vld [vmem:[#allocation131_spill] sm:$0xff]  ;;  %v7903_v29 = vld [vmem:[#allocation132_spill] sm:$0xff] }
 0x60f   :  { %3021 = vmatpush.bf16.msrb.mxu1 %v7893_v6  ;;  %3034 = vmatpush.bf16.msrb.mxu2 %v7894_v1  ;;  %v7904_v6 = vld [vmem:[#allocation133_spill] sm:$0xff]  ;;  %v7905_v1 = vld [vmem:[#allocation134_spill] sm:$0xff] }
 0x611   :  { %3047 = vmatpush.bf16.msrb.mxu3 %v7895_v39  ;;  %3060 = vmatpush.bf16.msra.mxu0 %v7896_v8  ;;  %v7906_v39 = vld [vmem:[#allocation135_spill] sm:$0xff]  ;;  %v7907_v8 = vld [vmem:[#allocation136_spill] sm:$0xff] }
 0x613   :  { %3022 = vmatpush.bf16.msrb.mxu1 %v7897_v16  ;;  %3035 = vmatpush.bf16.msrb.mxu2 %v7898_v4  ;;  %v7908_v16 = vld [vmem:[#allocation137_spill] sm:$0xff]  ;;  %v7909_v4 = vld [vmem:[#allocation138_spill] sm:$0xff] }
 0x615   :  { %3048 = vmatpush.bf16.msrb.mxu3 %v7899_v14  ;;  %3061 = vmatpush.bf16.msra.mxu0 %v7900_v42  ;;  %v7910_v14 = vld [vmem:[#allocation139_spill] sm:$0xff]  ;;  %v7911_v42 = vld [vmem:[#allocation140_spill] sm:$0xff] }
 0x617   :  { %3023 = vmatpush.bf16.msrb.mxu1 %v7901_v15  ;;  %3036 = vmatpush.bf16.msrb.mxu2 %v7902_v49  ;;  %v7912_v15 = vld [vmem:[#allocation141_spill] sm:$0xff]  ;;  %v7913_v49 = vld [vmem:[#allocation142_spill] sm:$0xff] }
 0x619   :  { %3049 = vmatpush.bf16.msrb.mxu3 %v7903_v29  ;;  %3062 = vmatpush.bf16.msra.mxu0 %v7904_v6  ;;  %v7914_v29 = vld [vmem:[#allocation143_spill] sm:$0xff]  ;;  %v7915_v6 = vld [vmem:[#allocation144_spill] sm:$0xff] }
 0x61b   :  { %3024 = vmatpush.bf16.msrb.mxu1 %v7905_v1  ;;  %3037 = vmatpush.bf16.msrb.mxu2 %v7906_v39  ;;  %v7916_v1 = vld [vmem:[#allocation145_spill] sm:$0xff] }
 0x61d   :  { %3050 = vmatpush.bf16.msrb.mxu3 %v7907_v8  ;;  %3063 = vmatpush.bf16.msra.mxu0 %v7908_v16 }
 0x61f   :  { %3025 = vmatpush.bf16.msrb.mxu1 %v7909_v4  ;;  %3038 = vmatpush.bf16.msrb.mxu2 %v7910_v14 }
 0x621   :  { %3051 = vmatpush.bf16.msrb.mxu3 %v7911_v42  ;;  %3064 = vmatpush.bf16.msra.mxu0 %v7912_v15 }
 0x622   :  { %v2701_v39 = vpop.f32.mrf.mxu1 }
 0x623   :  { %3026 = vmatpush.bf16.msrb.mxu1 %v7913_v49  ;;  %3039 = vmatpush.bf16.msrb.mxu2 %v7914_v29  ;;  %v2740_v8 = vpop.f32.mrf.mxu0 }
 0x625   :  { %3052 = vmatpush.bf16.msrb.mxu3 %v7915_v6  ;;  %3065 = vmatpush.bf16.msra.mxu0 %v7916_v1 }
 0x628   :  { %v2727_v37 = vpop.f32.mrf.mxu3 }
 0x629   :  { %v2714_v16 = vpop.f32.mrf.mxu2  ;;  %v2741_v38 = vadd.f32 %v2740_v8, %v2727_v37 }
 0x62a   :  { %v2703_v55 = vpop.f32.mrf.mxu1  ;;  %v2715_v57 = vadd.f32 %v2714_v16, %v2701_v39 }
 0x62b   :  { %v2742_v4 = vpop.f32.mrf.mxu0 }
 0x62c   :  { %v2744_v44 = vadd.f32 %v2715_v57, %v7918_v40 }
 0x62e   :  { %v2746_v54 = vmul.f32 0.5, %v2744_v44 }
 0x630   :  { %v2729_v12 = vpop.f32.mrf.mxu3 }
 0x631   :  { %v2716_v14 = vpop.f32.mrf.mxu2  ;;  %v7917_v12 = vld [vmem:[#allocation38_spill] sm:$0xff] }
 0x632   :  { %v2763_v22 = vpop.f32.mrf.mxu1  ;;  %v2745_v14 = vadd.f32 %v2741_v38, %v7917_v12 }
 0x633   :  { %v2802_v42 = vpop.f32.mrf.mxu0 }
 0x634   :  { %v2747_v58 = vmul.f32 0.5, %v2745_v14 }
 0x636   :  { %4615 = vtanh.f32 %v2747_v58 }
 0x637   :  { %4617 = vtanh.f32 %v2746_v54 }
 0x638   :  { %v2789_v43 = vpop.f32.mrf.mxu3 }
 0x639   :  { %v2776_v15 = vpop.f32.mrf.mxu2  ;;  %v2803_v4 = vadd.f32 %v2802_v42, %v2789_v43  ;;  %v7921_v43 = vld [vmem:[#allocation69_spill] sm:$0xff] }
 0x63a   :  { %v2765_v7 = vpop.f32.mrf.mxu1  ;;  %v2777_v55 = vadd.f32 %v2776_v15, %v2763_v22  ;;  %v7922_v22 = vld [vmem:[#allocation70_spill] sm:$0xff] }
 0x63b   :  { %v2804_v49 = vpop.f32.mrf.mxu0 }
 0x63c   :  { %v2806_v7 = vadd.f32 %v2777_v55, %v7919_v60 }
 0x63e   :  { %v2808_v9 = vmul.f32 0.5, %v2806_v7  ;;  %v7923_v7 = vld [vmem:[#allocation71_spill] sm:$0xff] }
 0x640   :  { %v2791_v35 = vpop.f32.mrf.mxu3  ;;  %4619 = vtanh.f32 %v2808_v9 }
 0x641   :  { %v2778_v29 = vpop.f32.mrf.mxu2  ;;  %v7920_v35 = vld [vmem:[#allocation40_spill] sm:$0xff] }
 0x642   :  { %v2807_v29 = vadd.f32 %v2803_v4, %v7920_v35 }
 0x643   :  { %v2825_v5 = vpop.f32.mrf.mxu1 }
 0x644   :  { %v2809_v2 = vmul.f32 0.5, %v2807_v29 }
 0x646   :  { %v2864_v6 = vpop.f32.mrf.mxu0  ;;  %4621 = vtanh.f32 %v2809_v2 }
 0x649   :  { %v2838_v52 = vpop.f32.mrf.mxu2 }
 0x64b   :  { %v2827_v50 = vpop.f32.mrf.mxu1 }
 0x64c   :  { %v2851_v1 = vpop.f32.mrf.mxu3  ;;  %v2839_v50 = vadd.f32 %v2838_v52, %v2825_v5 }
 0x64e   :  { %v2866_v30 = vpop.f32.mrf.mxu0  ;;  %v2868_v38 = vadd.f32 %v2839_v50, %v7921_v43  ;;  %v7924_v50 = vld [vmem:[#allocation72_spill] sm:$0xff] }
 0x64f   :  { %v2865_v30 = vadd.f32 %v2864_v6, %v2851_v1 }
 0x650   :  { %4623 = vtanh.f32 %v2868_v38 }
 0x651   :  { %v2840_v27 = vpop.f32.mrf.mxu2  ;;  %v2869_v40 = vadd.f32 %v2865_v30, %v7922_v22 }
 0x652   :  { %v4616_v27 = vpop.eup %4615 }
 0x653   :  { %v4618_v57 = vpop.eup %4617  ;;  %4625 = vtanh.f32 %v2869_v40  ;;  %v2751_v58 = vmul.f32 0.5, %v4616_v27 }
 0x654   :  { %v2853_v49 = vpop.f32.mrf.mxu3  ;;  %v4620_v60 = vpop.eup %4619  ;;  %v2750_v37 = vmul.f32 0.5, %v4618_v57 }
 0x655   :  { %v4622_v15 = vpop.eup %4621  ;;  %v2812_v8 = vmul.f32 0.5, %v4620_v60  ;;  %v2753_v16 = vadd.f32 0.5, %v2751_v58 }
 0x656   :  { %v2813_v52 = vmul.f32 0.5, %v4622_v15  ;;  %v4624_v54 = vpop.eup %4623  ;;  %v2752_v2 = vadd.f32 0.5, %v2750_v37 }
 0x657   :  { %v2814_v6 = vadd.f32 0.5, %v2812_v8 }
 0x658   :  { %v2815_v55 = vadd.f32 0.5, %v2813_v52  ;;  %v2936_v14 = vmul.f32 %v4624_v54, %v2752_v2 }
 0x659   :  { %v4626_v9 = vpop.eup %4625  ;;  %v2934_v43 = vmul.f32 %v2814_v6, %v6251_v41  ;;  %v7925_v6 = vld [vmem:[#allocation176_spill] sm:$0xff] }
 0x65a   :  { %v2937_v29 = vmul.f32 %v4626_v9, %v2753_v16  ;;  %v2935_v22 = vmul.f32 %v2815_v55, %v6253_v24  ;;  %v7928_v16 = vld [vmem:[#allocation179_spill] sm:$0xff]  ;;  %v7929_v55 = vld [vmem:[#allocation180_spill] sm:$0xff] }
 0x65b   :  { %v6415_v27 = vadd.f32 %v2936_v14, %v2934_v43  ;;  %v7932_v14 = vld [vmem:[#allocation183_spill] sm:$0xff]  ;;  %v7939_v43 = vld [vmem:[#allocation190_spill] sm:$0xff] }
 0x65c   :  { %v6417_v57 = vadd.f32 %v2937_v29, %v2935_v22  ;;  %v7936_v29 = vld [vmem:[#allocation187_spill] sm:$0xff]  ;;  %v7941_v22 = vld [vmem:[#allocation192_spill] sm:$0xff] }
 0x663   :  { %v2881_v42 = vpop.f32.mrf.mxu1 }
 0x665   :  { %v2920_v44 = vpop.f32.mrf.mxu0 }
 0x669   :  { %v2894_v5 = vpop.f32.mrf.mxu2 }
 0x66a   :  { %v2895_v1 = vadd.f32 %v2894_v5, %v2881_v42 }
 0x66b   :  { %v2907_v39 = vpop.f32.mrf.mxu3  ;;  %v2883_v12 = vpop.f32.mrf.mxu1 }
 0x66c   :  { %v2921_v4 = vadd.f32 %v2920_v44, %v2907_v39  ;;  %v2924_v49 = vadd.f32 %v2895_v1, %v7923_v7  ;;  %v7926_v1 = vld [vmem:[#allocation177_spill] sm:$0xff]  ;;  %v7927_v39 = vld [vmem:[#allocation178_spill] sm:$0xff]  ;;  %v7933_v7 = vld [vmem:[#allocation184_spill] sm:$0xff] }
 0x66d   :  { %v2922_v35 = vpop.f32.mrf.mxu0  ;;  %v7931_v12 = vld [vmem:[#allocation182_spill] sm:$0xff] }
 0x66e   :  { %v2925_v30 = vadd.f32 %v2921_v4, %v7924_v50  ;;  %v2926_v38 = vmul.f32 0.5, %v2924_v49  ;;  %v7930_v4 = vld [vmem:[#allocation181_spill] sm:$0xff]  ;;  %v7935_v35 = vld [vmem:[#allocation186_spill] sm:$0xff]  ;;  %v7937_v50 = vld [vmem:[#allocation188_spill] sm:$0xff] }
 0x66f   :  { %v7934_v49 = vld [vmem:[#allocation185_spill] sm:$0xff] }
 0x670   :  { %v2927_v40 = vmul.f32 0.5, %v2925_v30  ;;  %4627 = vtanh.f32 %v2926_v38  ;;  %v7938_v30 = vld [vmem:[#allocation189_spill] sm:$0xff]  ;;  %v7940_v38 = vld [vmem:[#allocation191_spill] sm:$0xff] }
 0x671   :  { %v2896_v60 = vpop.f32.mrf.mxu2 }
 0x672   :  { %4629 = vtanh.f32 %v2927_v40  ;;  %v7942_v40 = vld [vmem:[#allocation193_spill] sm:$0xff]  ;;  %v7943_v60 = vld [vmem:[#allocation194_spill] sm:$0xff] }
 0x673   :  { %v2909_v42 = vpop.f32.mrf.mxu3  ;;  %4631 = vtanh.f32 %v6415_v27 }
 0x674   :  { %4633 = vtanh.f32 %v6417_v57  ;;  %v7944_v42 = vld [vmem:[#allocation195_spill] sm:$0xff] }
 0x676   :  { %v4628_v15 = vpop.eup %4627 }
 0x677   :  { %v2930_v37 = vmul.f32 0.5, %v4628_v15  ;;  %v7945_v15 = vld [vmem:[#allocation196_spill] sm:$0xff] }
 0x678   :  { %v4630_v44 = vpop.eup %4629 }
 0x679   :  { %v2931_v41 = vmul.f32 0.5, %v4630_v44  ;;  %v2932_v8 = vadd.f32 0.5, %v2930_v37  ;;  %v4632_v58 = vpop.eup %4631  ;;  %v7946_v44 = vld [vmem:[#allocation197_spill] sm:$0xff]  ;;  %v7947_v37 = vld [vmem:[#allocation198_spill] sm:$0xff] }
 0x67a   :  { %v4634_v52 = vpop.eup %4633 }
 0x67b   :  { %v2933_v24 = vadd.f32 0.5, %v2931_v41  ;;  %v2942_v54 = vmul.f32 %v4632_v58, %v2932_v8  ;;  %v7948_v41 = vld [vmem:[#allocation199_spill] sm:$0xff]  ;;  %v7949_v8 = vld [vmem:[#allocation200_spill] sm:$0xff]  ;;  %v7950_v58 = vld [vmem:[#allocation201_spill] sm:$0xff] }
 0x67d   :  { %v2943_v5 = vmul.f32 %v4634_v52, %v2933_v24  ;;  %v6421_v9 = vpack.c.bf16 %v2942_v54, %v2942_v54  ;;  %v7951_v24 = vld [vmem:[#allocation202_spill] sm:$0xff]  ;;  %v7952_v52 = vld [vmem:[#allocation203_spill] sm:$0xff]  ;;  %v7953_v54 = vld [vmem:[#allocation204_spill] sm:$0xff] }
 0x67f   :  { %v6423_v2 = vpack.c.bf16 %v2943_v5, %v2943_v5  ;;  %2965 = vmatmul.bf16.vlgmr.msra.gmra.mxu1 %v6421_v9  ;;  %2991 = vmatmul.bf16.vlgmr.msra.gmra.mxu3 %v6421_v9  ;;  %v7954_v5 = vld [vmem:[#allocation205_spill] sm:$0xff] }
 0x680   :  { %3081 = vmatpush.bf16.msra.mxu1 %v7400_v48  ;;  %3107 = vmatpush.bf16.msra.mxu3 %v7402_v32 }
 0x681   :  { %2978 = vmatmul.bf16.vlgmr.msra.gmra.mxu2 %v6423_v2  ;;  %3004 = vmatmul.bf16.vlgmr.msrb.gmra.mxu0 %v6423_v2 }
 0x682   :  { %3094 = vmatpush.bf16.msra.mxu2 %v7401_v20  ;;  %3120 = vmatpush.bf16.msrb.mxu0 %v7403_v25 }
 0x684   :  { %3082 = vmatpush.bf16.msra.mxu1 %v7404_v28  ;;  %3108 = vmatpush.bf16.msra.mxu3 %v7406_v17 }
 0x686   :  { %3095 = vmatpush.bf16.msra.mxu2 %v7405_v56  ;;  %3121 = vmatpush.bf16.msrb.mxu0 %v7407_v19 }
 0x688   :  { %3083 = vmatpush.bf16.msra.mxu1 %v7408_v53  ;;  %3109 = vmatpush.bf16.msra.mxu3 %v7410_v3 }
 0x68a   :  { %3096 = vmatpush.bf16.msra.mxu2 %v7409_v10  ;;  %3122 = vmatpush.bf16.msrb.mxu0 %v7411_v13 }
 0x68c   :  { %3084 = vmatpush.bf16.msra.mxu1 %v7412_v23  ;;  %3110 = vmatpush.bf16.msra.mxu3 %v7414_v45 }
 0x68e   :  { %3097 = vmatpush.bf16.msra.mxu2 %v7413_v34  ;;  %3123 = vmatpush.bf16.msrb.mxu0 %v7501_v61 }
 0x68f   :  { %3027 = vmatmul.bf16.vlgmr.msrb.gmra.mxu1 %v6421_v9  ;;  %3053 = vmatmul.bf16.vlgmr.msrb.gmra.mxu3 %v6421_v9 }
 0x690   :  { %3085 = vmatpush.bf16.msra.mxu1 %v7416_v63  ;;  %3111 = vmatpush.bf16.msra.mxu3 %v7418_v33 }
 0x691   :  { %3040 = vmatmul.bf16.vlgmr.msrb.gmra.mxu2 %v6423_v2  ;;  %3066 = vmatmul.bf16.vlgmr.msra.gmra.mxu0 %v6423_v2 }
 0x692   :  { %3098 = vmatpush.bf16.msra.mxu2 %v7417_v51  ;;  %3124 = vmatpush.bf16.msrb.mxu0 %v7419_v59 }
 0x694   :  { %3086 = vmatpush.bf16.msra.mxu1 %v7502_v21  ;;  %3112 = vmatpush.bf16.msra.mxu3 %v7504_v26 }
 0x696   :  { %3099 = vmatpush.bf16.msra.mxu2 %v7503_v11  ;;  %3125 = vmatpush.bf16.msrb.mxu0 %v7505_v47 }
 0x698   :  { %3087 = vmatpush.bf16.msra.mxu1 %v7506_v36  ;;  %3113 = vmatpush.bf16.msra.mxu3 %v7508_v46 }
 0x69a   :  { %3100 = vmatpush.bf16.msra.mxu2 %v7507_v18  ;;  %3126 = vmatpush.bf16.msrb.mxu0 %v7509_v0 }
 0x69c   :  { %3088 = vmatpush.bf16.msra.mxu1 %v7510_v31  ;;  %3114 = vmatpush.bf16.msra.mxu3 %v7925_v6 }
 0x69e   :  { %3101 = vmatpush.bf16.msra.mxu2 %v7511_v62  ;;  %3127 = vmatpush.bf16.msrb.mxu0 %v7926_v1 }
 0x69f   :  { %3089 = vmatmul.bf16.vlgmr.msra.gmra.mxu1 %v6421_v9  ;;  %3115 = vmatmul.bf16.vlgmr.msra.gmra.mxu3 %v6421_v9 }
 0x6a0   :  { %3137 = vmatpush.bf16.msrb.mxu1 %v7927_v39  ;;  %3163 = vmatpush.bf16.msrb.mxu3 %v7929_v55  ;;  %v8025_v55 = vld [vmem:[#allocation43_spill] sm:$0xff] }
 0x6a1   :  { %3102 = vmatmul.bf16.vlgmr.msra.gmra.mxu2 %v6423_v2  ;;  %3128 = vmatmul.bf16.vlgmr.msrb.gmra.mxu0 %v6423_v2 }
 0x6a2   :  { %3150 = vmatpush.bf16.msrb.mxu2 %v7928_v16  ;;  %3176 = vmatpush.bf16.msra.mxu0 %v7930_v4 }
 0x6a4   :  { %3138 = vmatpush.bf16.msrb.mxu1 %v7931_v12  ;;  %3164 = vmatpush.bf16.msrb.mxu3 %v7933_v7 }
 0x6a6   :  { %3151 = vmatpush.bf16.msrb.mxu2 %v7932_v14  ;;  %3177 = vmatpush.bf16.msra.mxu0 %v7934_v49  ;;  %v8024_v14 = vld [vmem:[#allocation41_spill] sm:$0xff] }
 0x6a8   :  { %3139 = vmatpush.bf16.msrb.mxu1 %v7935_v35  ;;  %3165 = vmatpush.bf16.msrb.mxu3 %v7937_v50 }
 0x6aa   :  { %3152 = vmatpush.bf16.msrb.mxu2 %v7936_v29  ;;  %3178 = vmatpush.bf16.msra.mxu0 %v7938_v30 }
 0x6ac   :  { %3140 = vmatpush.bf16.msrb.mxu1 %v7939_v43  ;;  %3166 = vmatpush.bf16.msrb.mxu3 %v7941_v22 }
 0x6ae   :  { %3153 = vmatpush.bf16.msrb.mxu2 %v7940_v38  ;;  %3179 = vmatpush.bf16.msra.mxu0 %v7942_v40 }
 0x6b0   :  { %3141 = vmatpush.bf16.msrb.mxu1 %v7943_v60  ;;  %3167 = vmatpush.bf16.msrb.mxu3 %v7945_v15  ;;  %v7956_v15 = vld [vmem:[#allocation207_spill] sm:$0xff] }
 0x6b2   :  { %3154 = vmatpush.bf16.msrb.mxu2 %v7944_v42  ;;  %3180 = vmatpush.bf16.msra.mxu0 %v7946_v44  ;;  %v7955_v42 = vld [vmem:[#allocation206_spill] sm:$0xff]  ;;  %v7957_v44 = vld [vmem:[#allocation208_spill] sm:$0xff] }
 0x6b4   :  { %3142 = vmatpush.bf16.msrb.mxu1 %v7947_v37  ;;  %3168 = vmatpush.bf16.msrb.mxu3 %v7949_v8  ;;  %v7958_v37 = vld [vmem:[#allocation209_spill] sm:$0xff]  ;;  %v7960_v8 = vld [vmem:[#allocation83_spill] sm:$0xff] }
 0x6b6   :  { %3155 = vmatpush.bf16.msrb.mxu2 %v7948_v41  ;;  %3181 = vmatpush.bf16.msra.mxu0 %v7950_v58  ;;  %v7959_v41 = vld [vmem:[#allocation82_spill] sm:$0xff] }
 0x6b8   :  { %3143 = vmatpush.bf16.msrb.mxu1 %v7951_v24  ;;  %3169 = vmatpush.bf16.msrb.mxu3 %v7953_v54  ;;  %v7968_v54 = vld [vmem:[#allocation91_spill] sm:$0xff] }
 0x6ba   :  { %3156 = vmatpush.bf16.msrb.mxu2 %v7952_v52  ;;  %3182 = vmatpush.bf16.msra.mxu0 %v7954_v5  ;;  %v7961_v5 = vld [vmem:[#allocation84_spill] sm:$0xff] }
 0x6bb   :  { %v7969_v52 = vld [vmem:[#allocation92_spill] sm:$0xff] }
 0x6bc   :  { %3144 = vmatpush.bf16.msrb.mxu1 %v7955_v42  ;;  %3170 = vmatpush.bf16.msrb.mxu3 %v7957_v44  ;;  %v7962_v42 = vld [vmem:[#allocation85_spill] sm:$0xff]  ;;  %v7964_v44 = vld [vmem:[#allocation87_spill] sm:$0xff] }
 0x6be   :  { %3157 = vmatpush.bf16.msrb.mxu2 %v7956_v15  ;;  %3183 = vmatpush.bf16.msra.mxu0 %v7958_v37  ;;  %v7963_v15 = vld [vmem:[#allocation86_spill] sm:$0xff]  ;;  %v7965_v37 = vld [vmem:[#allocation88_spill] sm:$0xff] }
 0x6bf   :  { %3145 = vmatmul.bf16.vlgmr.msrb.gmra.mxu1 %v6421_v9  ;;  %3171 = vmatmul.bf16.vlgmr.msrb.gmra.mxu3 %v6421_v9  ;;  %v7970_v9 = vld [vmem:[#allocation93_spill] sm:$0xff] }
 0x6c0   :  { %3222 = vmatpush.bf16.msra.mxu1 %v7959_v41  ;;  %3248 = vmatpush.bf16.msra.mxu3 %v7961_v5  ;;  %v7966_v41 = vld [vmem:[#allocation89_spill] sm:$0xff]  ;;  %v7972_v5 = vld [vmem:[#allocation95_spill] sm:$0xff] }
 0x6c1   :  { %3158 = vmatmul.bf16.vlgmr.msrb.gmra.mxu2 %v6423_v2  ;;  %3184 = vmatmul.bf16.vlgmr.msra.gmra.mxu0 %v6423_v2  ;;  %v7971_v2 = vld [vmem:[#allocation94_spill] sm:$0xff] }
 0x6c2   :  { %3235 = vmatpush.bf16.msra.mxu2 %v7960_v8  ;;  %3261 = vmatpush.bf16.msrb.mxu0 %v7962_v42  ;;  %v7967_v8 = vld [vmem:[#allocation90_spill] sm:$0xff]  ;;  %v7973_v42 = vld [vmem:[#allocation96_spill] sm:$0xff] }
 0x6c4   :  { %3223 = vmatpush.bf16.msra.mxu1 %v7963_v15  ;;  %3249 = vmatpush.bf16.msra.mxu3 %v7965_v37  ;;  %v7974_v15 = vld [vmem:[#allocation97_spill] sm:$0xff]  ;;  %v7976_v37 = vld [vmem:[#allocation99_spill] sm:$0xff] }
 0x6c6   :  { %3236 = vmatpush.bf16.msra.mxu2 %v7964_v44  ;;  %3262 = vmatpush.bf16.msrb.mxu0 %v7966_v41  ;;  %v7975_v44 = vld [vmem:[#allocation98_spill] sm:$0xff]  ;;  %v7977_v41 = vld [vmem:[#allocation100_spill] sm:$0xff] }
 0x6c8   :  { %3224 = vmatpush.bf16.msra.mxu1 %v7967_v8  ;;  %3250 = vmatpush.bf16.msra.mxu3 %v7969_v52  ;;  %v7978_v8 = vld [vmem:[#allocation101_spill] sm:$0xff]  ;;  %v7980_v52 = vld [vmem:[#allocation103_spill] sm:$0xff] }
 0x6ca   :  { %3237 = vmatpush.bf16.msra.mxu2 %v7968_v54  ;;  %3263 = vmatpush.bf16.msrb.mxu0 %v7970_v9  ;;  %v7979_v54 = vld [vmem:[#allocation102_spill] sm:$0xff]  ;;  %v7981_v9 = vld [vmem:[#allocation104_spill] sm:$0xff] }
 0x6cc   :  { %3225 = vmatpush.bf16.msra.mxu1 %v7971_v2  ;;  %3251 = vmatpush.bf16.msra.mxu3 %v7973_v42  ;;  %v7982_v2 = vld [vmem:[#allocation105_spill] sm:$0xff]  ;;  %v7984_v42 = vld [vmem:[#allocation107_spill] sm:$0xff] }
 0x6ce   :  { %3238 = vmatpush.bf16.msra.mxu2 %v7972_v5  ;;  %3264 = vmatpush.bf16.msrb.mxu0 %v7974_v15  ;;  %v7983_v5 = vld [vmem:[#allocation106_spill] sm:$0xff]  ;;  %v7985_v15 = vld [vmem:[#allocation108_spill] sm:$0xff] }
 0x6d0   :  { %3226 = vmatpush.bf16.msra.mxu1 %v7975_v44  ;;  %3252 = vmatpush.bf16.msra.mxu3 %v7977_v41  ;;  %v7986_v44 = vld [vmem:[#allocation109_spill] sm:$0xff]  ;;  %v7988_v41 = vld [vmem:[#allocation111_spill] sm:$0xff] }
 0x6d2   :  { %3239 = vmatpush.bf16.msra.mxu2 %v7976_v37  ;;  %3265 = vmatpush.bf16.msrb.mxu0 %v7978_v8  ;;  %v7987_v37 = vld [vmem:[#allocation110_spill] sm:$0xff] }
 0x6d3   :  { %v7989_v8 = vld [vmem:[#allocation114_spill] sm:$0xff] }
 0x6d4   :  { %3227 = vmatpush.bf16.msra.mxu1 %v7979_v54  ;;  %3253 = vmatpush.bf16.msra.mxu3 %v7981_v9  ;;  %v7990_v54 = vld [vmem:[#allocation115_spill] sm:$0xff]  ;;  %v7992_v9 = vld [vmem:[#allocation113_spill] sm:$0xff] }
 0x6d6   :  { %3240 = vmatpush.bf16.msra.mxu2 %v7980_v52  ;;  %3266 = vmatpush.bf16.msrb.mxu0 %v7982_v2  ;;  %v7991_v52 = vld [vmem:[#allocation112_spill] sm:$0xff] }
 0x6d7   :  { %v7993_v2 = vld [vmem:[#allocation116_spill] sm:$0xff] }
 0x6d8   :  { %3228 = vmatpush.bf16.msra.mxu1 %v7983_v5  ;;  %3254 = vmatpush.bf16.msra.mxu3 %v7985_v15  ;;  %v7994_v5 = vld [vmem:[#allocation117_spill] sm:$0xff]  ;;  %v7996_v15 = vld [vmem:[#allocation119_spill] sm:$0xff] }
 0x6da   :  { %3241 = vmatpush.bf16.msra.mxu2 %v7984_v42  ;;  %3267 = vmatpush.bf16.msrb.mxu0 %v7986_v44  ;;  %v7995_v42 = vld [vmem:[#allocation118_spill] sm:$0xff]  ;;  %v7997_v44 = vld [vmem:[#allocation120_spill] sm:$0xff] }
 0x6dc   :  { %3229 = vmatpush.bf16.msra.mxu1 %v7987_v37  ;;  %3255 = vmatpush.bf16.msra.mxu3 %v7991_v52  ;;  %v7998_v37 = vld [vmem:[#allocation121_spill] sm:$0xff] }
 0x6dd   :  { %v8002_v52 = vld [vmem:[#allocation125_spill] sm:$0xff] }
 0x6de   :  { %3242 = vmatpush.bf16.msra.mxu2 %v7988_v41  ;;  %3268 = vmatpush.bf16.msrb.mxu0 %v7992_v9  ;;  %v7999_v41 = vld [vmem:[#allocation122_spill] sm:$0xff] }
 0x6df   :  { %v8003_v9 = vld [vmem:[#allocation126_spill] sm:$0xff] }
 0x6e0   :  { %3284 = vmatpush.bf16.msrb.mxu1 %v7989_v8  ;;  %3310 = vmatpush.bf16.msrb.mxu3 %v7993_v2  ;;  %v8000_v8 = vld [vmem:[#allocation123_spill] sm:$0xff] }
 0x6e1   :  { %v8004_v2 = vld [vmem:[#allocation127_spill] sm:$0xff] }
 0x6e2   :  { %3297 = vmatpush.bf16.msrb.mxu2 %v7990_v54  ;;  %3323 = vmatpush.bf16.msra.mxu0 %v7994_v5  ;;  %v8001_v54 = vld [vmem:[#allocation124_spill] sm:$0xff] }
 0x6e3   :  { %v8005_v5 = vld [vmem:[#allocation128_spill] sm:$0xff] }
 0x6e4   :  { %3285 = vmatpush.bf16.msrb.mxu1 %v7995_v42  ;;  %3311 = vmatpush.bf16.msrb.mxu3 %v7997_v44  ;;  %v8006_v42 = vld [vmem:[#allocation129_spill] sm:$0xff]  ;;  %v8008_v44 = vld [vmem:[#allocation131_spill] sm:$0xff] }
 0x6e6   :  { %3298 = vmatpush.bf16.msrb.mxu2 %v7996_v15  ;;  %3324 = vmatpush.bf16.msra.mxu0 %v7998_v37  ;;  %v8007_v15 = vld [vmem:[#allocation130_spill] sm:$0xff]  ;;  %v8009_v37 = vld [vmem:[#allocation132_spill] sm:$0xff] }
 0x6e8   :  { %3286 = vmatpush.bf16.msrb.mxu1 %v7999_v41  ;;  %3312 = vmatpush.bf16.msrb.mxu3 %v8001_v54  ;;  %v8010_v41 = vld [vmem:[#allocation133_spill] sm:$0xff]  ;;  %v8012_v54 = vld [vmem:[#allocation135_spill] sm:$0xff] }
 0x6ea   :  { %3299 = vmatpush.bf16.msrb.mxu2 %v8000_v8  ;;  %3325 = vmatpush.bf16.msra.mxu0 %v8002_v52  ;;  %v8011_v8 = vld [vmem:[#allocation134_spill] sm:$0xff]  ;;  %v8013_v52 = vld [vmem:[#allocation136_spill] sm:$0xff] }
 0x6ec   :  { %3287 = vmatpush.bf16.msrb.mxu1 %v8003_v9  ;;  %3313 = vmatpush.bf16.msrb.mxu3 %v8005_v5  ;;  %v8014_v9 = vld [vmem:[#allocation137_spill] sm:$0xff]  ;;  %v8016_v5 = vld [vmem:[#allocation139_spill] sm:$0xff] }
 0x6ee   :  { %3300 = vmatpush.bf16.msrb.mxu2 %v8004_v2  ;;  %3326 = vmatpush.bf16.msra.mxu0 %v8006_v42  ;;  %v8015_v2 = vld [vmem:[#allocation138_spill] sm:$0xff]  ;;  %v8017_v42 = vld [vmem:[#allocation140_spill] sm:$0xff] }
 0x6f0   :  { %3288 = vmatpush.bf16.msrb.mxu1 %v8007_v15  ;;  %3314 = vmatpush.bf16.msrb.mxu3 %v8009_v37  ;;  %v8018_v15 = vld [vmem:[#allocation141_spill] sm:$0xff]  ;;  %v8020_v37 = vld [vmem:[#allocation143_spill] sm:$0xff] }
 0x6f2   :  { %3301 = vmatpush.bf16.msrb.mxu2 %v8008_v44  ;;  %3327 = vmatpush.bf16.msra.mxu0 %v8010_v41  ;;  %v8019_v44 = vld [vmem:[#allocation142_spill] sm:$0xff]  ;;  %v8021_v41 = vld [vmem:[#allocation144_spill] sm:$0xff] }
 0x6f4   :  { %3289 = vmatpush.bf16.msrb.mxu1 %v8011_v8  ;;  %3315 = vmatpush.bf16.msrb.mxu3 %v8013_v52  ;;  %v8022_v8 = vld [vmem:[#allocation145_spill] sm:$0xff] }
 0x6f6   :  { %3302 = vmatpush.bf16.msrb.mxu2 %v8012_v54  ;;  %3328 = vmatpush.bf16.msra.mxu0 %v8014_v9 }
 0x6f8   :  { %3290 = vmatpush.bf16.msrb.mxu1 %v8015_v2  ;;  %3316 = vmatpush.bf16.msrb.mxu3 %v8017_v42 }
 0x6fa   :  { %3303 = vmatpush.bf16.msrb.mxu2 %v8016_v5  ;;  %3329 = vmatpush.bf16.msra.mxu0 %v8018_v15 }
 0x6fc   :  { %3291 = vmatpush.bf16.msrb.mxu1 %v8019_v44  ;;  %3317 = vmatpush.bf16.msrb.mxu3 %v8021_v41  ;;  %v2966_v54 = vpop.f32.mrf.mxu1 }
 0x6fe   :  { %3304 = vmatpush.bf16.msrb.mxu2 %v8020_v37  ;;  %3330 = vmatpush.bf16.msra.mxu0 %v8022_v8  ;;  %v3005_v52 = vpop.f32.mrf.mxu0 }
 0x702   :  { %v2992_v24 = vpop.f32.mrf.mxu3 }
 0x703   :  { %v3006_v35 = vadd.f32 %v3005_v52, %v2992_v24 }
 0x704   :  { %v2979_v9 = vpop.f32.mrf.mxu2  ;;  %v2968_v58 = vpop.f32.mrf.mxu1 }
 0x705   :  { %v2980_v7 = vadd.f32 %v2979_v9, %v2966_v54 }
 0x706   :  { %v3007_v2 = vpop.f32.mrf.mxu0 }
 0x707   :  { %v3009_v12 = vadd.f32 %v2980_v7, %v8024_v14 }
 0x709   :  { %v3011_v39 = vmul.f32 0.5, %v3009_v12 }
 0x70a   :  { %v2994_v60 = vpop.f32.mrf.mxu3 }
 0x70b   :  { %v8023_v60 = vld [vmem:[#allocation42_spill] sm:$0xff] }
 0x70c   :  { %v2981_v5 = vpop.f32.mrf.mxu2  ;;  %v3028_v40 = vpop.f32.mrf.mxu1 }
 0x70d   :  { %v3010_v5 = vadd.f32 %v3006_v35, %v8023_v60 }
 0x70e   :  { %v3067_v42 = vpop.f32.mrf.mxu0 }
 0x70f   :  { %v3012_v16 = vmul.f32 0.5, %v3010_v5 }
 0x711   :  { %4635 = vtanh.f32 %v3012_v16 }
 0x712   :  { %v3054_v22 = vpop.f32.mrf.mxu3  ;;  %4637 = vtanh.f32 %v3011_v39 }
 0x713   :  { %v3068_v2 = vadd.f32 %v3067_v42, %v3054_v22  ;;  %v8027_v22 = vld [vmem:[#allocation73_spill] sm:$0xff] }
 0x714   :  { %v3041_v15 = vpop.f32.mrf.mxu2  ;;  %v3030_v38 = vpop.f32.mrf.mxu1 }
 0x715   :  { %v3042_v58 = vadd.f32 %v3041_v15, %v3028_v40  ;;  %v8028_v40 = vld [vmem:[#allocation74_spill] sm:$0xff] }
 0x716   :  { %v3069_v44 = vpop.f32.mrf.mxu0 }
 0x717   :  { %v3071_v38 = vadd.f32 %v3042_v58, %v8025_v55 }
 0x719   :  { %v3073_v1 = vmul.f32 0.5, %v3071_v38  ;;  %v8029_v38 = vld [vmem:[#allocation75_spill] sm:$0xff] }
 0x71a   :  { %v3056_v43 = vpop.f32.mrf.mxu3 }
 0x71b   :  { %v8026_v43 = vld [vmem:[#allocation44_spill] sm:$0xff]  ;;  %4639 = vtanh.f32 %v3073_v1 }
 0x71c   :  { %v3043_v37 = vpop.f32.mrf.mxu2  ;;  %v3090_v30 = vpop.f32.mrf.mxu1 }
 0x71d   :  { %v3072_v37 = vadd.f32 %v3068_v2, %v8026_v43 }
 0x71e   :  { %v3129_v41 = vpop.f32.mrf.mxu0 }
 0x71f   :  { %v3074_v6 = vmul.f32 0.5, %v3072_v37 }
 0x721   :  { %4641 = vtanh.f32 %v3074_v6 }
 0x722   :  { %v3116_v8 = vpop.f32.mrf.mxu3 }
 0x724   :  { %v3103_v50 = vpop.f32.mrf.mxu2  ;;  %v3092_v29 = vpop.f32.mrf.mxu1 }
 0x725   :  { %v3104_v29 = vadd.f32 %v3103_v50, %v3090_v30 }
 0x726   :  { %v3131_v49 = vpop.f32.mrf.mxu0 }
 0x727   :  { %v3130_v49 = vadd.f32 %v3129_v41, %v3116_v8  ;;  %v3133_v35 = vadd.f32 %v3104_v29, %v8027_v22  ;;  %v8030_v29 = vld [vmem:[#allocation76_spill] sm:$0xff] }
 0x729   :  { %v3134_v14 = vadd.f32 %v3130_v49, %v8028_v40  ;;  %4643 = vtanh.f32 %v3133_v35 }
 0x72a   :  { %v3118_v44 = vpop.f32.mrf.mxu3 }
 0x72b   :  { %4645 = vtanh.f32 %v3134_v14 }
 0x72c   :  { %v3105_v4 = vpop.f32.mrf.mxu2 }
 0x72d   :  { %v4636_v4 = vpop.eup %4635 }
 0x72e   :  { %v4638_v7 = vpop.eup %4637  ;;  %v3016_v16 = vmul.f32 0.5, %v4636_v4 }
 0x72f   :  { %v4640_v55 = vpop.eup %4639  ;;  %v3015_v52 = vmul.f32 0.5, %v4638_v7 }
 0x730   :  { %v4642_v54 = vpop.eup %4641  ;;  %v3077_v9 = vmul.f32 0.5, %v4640_v55  ;;  %v3018_v8 = vadd.f32 0.5, %v3016_v16 }
 0x731   :  { %v3078_v50 = vmul.f32 0.5, %v4642_v54  ;;  %v4644_v39 = vpop.eup %4643  ;;  %v3017_v6 = vadd.f32 0.5, %v3015_v52 }
 0x732   :  { %v4646_v1 = vpop.eup %4645  ;;  %v3079_v42 = vadd.f32 0.5, %v3077_v9 }
 0x733   :  { %v3080_v58 = vadd.f32 0.5, %v3078_v50  ;;  %v3201_v5 = vmul.f32 %v4644_v39, %v3017_v6  ;;  %v3202_v37 = vmul.f32 %v4646_v1, %v3018_v8  ;;  %v8064_v8 = vld [vmem:[#allocation209_spill] sm:$0xff] }
 0x734   :  { %v3199_v22 = vmul.f32 %v3079_v42, %v6415_v27  ;;  %v8061_v42 = vld [vmem:[#allocation206_spill] sm:$0xff] }
 0x735   :  { %v3200_v40 = vmul.f32 %v3080_v58, %v6417_v57 }
 0x736   :  { %v6579_v4 = vadd.f32 %v3201_v5, %v3199_v22 }
 0x737   :  { %v6581_v7 = vadd.f32 %v3202_v37, %v3200_v40 }
 0x73c   :  { %v3146_v24 = vpop.f32.mrf.mxu1 }
 0x73e   :  { %v3185_v12 = vpop.f32.mrf.mxu0 }
 0x742   :  { %v3172_v41 = vpop.f32.mrf.mxu3 }
 0x743   :  { %v3186_v2 = vadd.f32 %v3185_v12, %v3172_v41  ;;  %v8063_v41 = vld [vmem:[#allocation208_spill] sm:$0xff] }
 0x744   :  { %v3159_v30 = vpop.f32.mrf.mxu2  ;;  %v3148_v60 = vpop.f32.mrf.mxu1 }
 0x745   :  { %v3160_v15 = vadd.f32 %v3159_v30, %v3146_v24  ;;  %v3190_v49 = vadd.f32 %v3186_v2, %v8030_v29 }
 0x746   :  { %v3187_v43 = vpop.f32.mrf.mxu0 }
 0x747   :  { %v3189_v44 = vadd.f32 %v3160_v15, %v8029_v38  ;;  %v3192_v14 = vmul.f32 0.5, %v3190_v49  ;;  %v8062_v15 = vld [vmem:[#allocation207_spill] sm:$0xff] }
 0x749   :  { %v3191_v35 = vmul.f32 0.5, %v3189_v44 }
 0x74a   :  { %v3174_v24 = vpop.f32.mrf.mxu3 }
 0x74b   :  { %4647 = vtanh.f32 %v3191_v35  ;;  %v3505_v24 = vld [vmem:[%s6889_s7 + $0xf8] sm:$0xff] }
 0x74c   :  { %4649 = vtanh.f32 %v3192_v14  ;;  %v3161_v55 = vpop.f32.mrf.mxu2 }
 0x74d   :  { %4651 = vtanh.f32 %v6579_v4  ;;  %v3489_v55 = vld [vmem:[%s6889_s7 + $0x78] sm:$0xff] }
 0x74e   :  { %4653 = vtanh.f32 %v6581_v7 }
 0x751   :  { %v4648_v54 = vpop.eup %4647 }
 0x752   :  { %v4650_v12 = vpop.eup %4649  ;;  %v3195_v52 = vmul.f32 0.5, %v4648_v54  ;;  %v3488_v54 = vld [vmem:[%s6889_s7 + $0x70] sm:$0xff] }
 0x753   :  { %v3196_v27 = vmul.f32 0.5, %v4650_v12  ;;  %v4652_v16 = vpop.eup %4651  ;;  %v3504_v12 = vld [vmem:[%s6889_s7 + $0xf0] sm:$0xff] }
 0x754   :  { %v3197_v9 = vadd.f32 0.5, %v3195_v52  ;;  %v4654_v50 = vpop.eup %4653  ;;  %v3487_v52 = vld [vmem:[%s6889_s7 + $0x68] sm:$0xff] }
 0x755   :  { %v3198_v57 = vadd.f32 0.5, %v3196_v27  ;;  %v3503_v27 = vld [vmem:[%s6889_s7 + $0xe8] sm:$0xff] }
 0x756   :  { %v3207_v39 = vmul.f32 %v4652_v16, %v3197_v9 }
 0x757   :  { %v3208_v30 = vmul.f32 %v4654_v50, %v3198_v57  ;;  %v3486_v57 = vld [vmem:[%s6889_s7 + $0x60] sm:$0xff] }
 0x758   :  { %v6585_v1 = vpack.c.bf16 %v3207_v39, %v3207_v39  ;;  %v3502_v50 = vld [vmem:[%s6889_s7 + $0xe0] sm:$0xff]  ;;  %v3485_v39 = vld [vmem:[%s6889_s7 + $0x58] sm:$0xff] }
 0x759   :  { %v6587_v6 = vpack.c.bf16 %v3208_v30, %v3208_v30  ;;  %v3501_v30 = vld [vmem:[%s6889_s7 + $0xd8] sm:$0xff] }
 0x75a   :  { %3230 = vmatmul.bf16.vlgmr.msra.gmra.mxu1 %v6585_v1  ;;  %3256 = vmatmul.bf16.vlgmr.msra.gmra.mxu3 %v6585_v1 }
 0x75b   :  { %3243 = vmatmul.bf16.vlgmr.msra.gmra.mxu2 %v6587_v6  ;;  %3269 = vmatmul.bf16.vlgmr.msrb.gmra.mxu0 %v6587_v6 }
 0x75c   :  { %3346 = vmatpush.bf16.msra.mxu1 %v7400_v48  ;;  %3359 = vmatpush.bf16.msra.mxu2 %v7401_v20  ;;  %v8031_v48 = vld [vmem:[#allocation176_spill] sm:$0xff]  ;;  %v8032_v20 = vld [vmem:[#allocation177_spill] sm:$0xff] }
 0x75d   :  { %3372 = vmatpush.bf16.msra.mxu3 %v7402_v32  ;;  %3385 = vmatpush.bf16.msrb.mxu0 %v7403_v25  ;;  %v8033_v32 = vld [vmem:[#allocation178_spill] sm:$0xff]  ;;  %v8034_v25 = vld [vmem:[#allocation179_spill] sm:$0xff] }
 0x760   :  { %3347 = vmatpush.bf16.msra.mxu1 %v7404_v28  ;;  %3360 = vmatpush.bf16.msra.mxu2 %v7405_v56  ;;  %v8035_v28 = vld [vmem:[#allocation180_spill] sm:$0xff]  ;;  %v8036_v56 = vld [vmem:[#allocation181_spill] sm:$0xff] }
 0x761   :  { %3373 = vmatpush.bf16.msra.mxu3 %v7406_v17  ;;  %3386 = vmatpush.bf16.msrb.mxu0 %v7407_v19  ;;  %v8037_v17 = vld [vmem:[#allocation182_spill] sm:$0xff]  ;;  %v8038_v19 = vld [vmem:[#allocation183_spill] sm:$0xff] }
 0x764   :  { %3348 = vmatpush.bf16.msra.mxu1 %v7408_v53  ;;  %3361 = vmatpush.bf16.msra.mxu2 %v7409_v10  ;;  %v8039_v53 = vld [vmem:[#allocation184_spill] sm:$0xff]  ;;  %v8040_v10 = vld [vmem:[#allocation185_spill] sm:$0xff] }
 0x765   :  { %3374 = vmatpush.bf16.msra.mxu3 %v7410_v3  ;;  %3387 = vmatpush.bf16.msrb.mxu0 %v7411_v13  ;;  %v8041_v3 = vld [vmem:[#allocation186_spill] sm:$0xff]  ;;  %v8042_v13 = vld [vmem:[#allocation187_spill] sm:$0xff] }
 0x768   :  { %3349 = vmatpush.bf16.msra.mxu1 %v7412_v23  ;;  %3362 = vmatpush.bf16.msra.mxu2 %v7413_v34  ;;  %v8043_v23 = vld [vmem:[#allocation188_spill] sm:$0xff]  ;;  %v8044_v34 = vld [vmem:[#allocation189_spill] sm:$0xff] }
 0x769   :  { %3375 = vmatpush.bf16.msra.mxu3 %v7414_v45  ;;  %3388 = vmatpush.bf16.msrb.mxu0 %v7501_v61  ;;  %v8045_v45 = vld [vmem:[#allocation190_spill] sm:$0xff]  ;;  %v8050_v61 = vld [vmem:[#allocation195_spill] sm:$0xff] }
 0x76a   :  { %3292 = vmatmul.bf16.vlgmr.msrb.gmra.mxu1 %v6585_v1  ;;  %3318 = vmatmul.bf16.vlgmr.msrb.gmra.mxu3 %v6585_v1 }
 0x76b   :  { %3305 = vmatmul.bf16.vlgmr.msrb.gmra.mxu2 %v6587_v6  ;;  %3331 = vmatmul.bf16.vlgmr.msra.gmra.mxu0 %v6587_v6 }
 0x76c   :  { %3350 = vmatpush.bf16.msra.mxu1 %v7416_v63  ;;  %3363 = vmatpush.bf16.msra.mxu2 %v7417_v51  ;;  %v8046_v63 = vld [vmem:[#allocation191_spill] sm:$0xff]  ;;  %v8047_v51 = vld [vmem:[#allocation192_spill] sm:$0xff] }
 0x76d   :  { %3376 = vmatpush.bf16.msra.mxu3 %v7418_v33  ;;  %3389 = vmatpush.bf16.msrb.mxu0 %v7419_v59  ;;  %v8048_v33 = vld [vmem:[#allocation193_spill] sm:$0xff]  ;;  %v8049_v59 = vld [vmem:[#allocation194_spill] sm:$0xff] }
 0x770   :  { %3351 = vmatpush.bf16.msra.mxu1 %v7502_v21  ;;  %3364 = vmatpush.bf16.msra.mxu2 %v7503_v11  ;;  %v8051_v21 = vld [vmem:[#allocation196_spill] sm:$0xff]  ;;  %v8052_v11 = vld [vmem:[#allocation197_spill] sm:$0xff] }
 0x771   :  { %3377 = vmatpush.bf16.msra.mxu3 %v7504_v26  ;;  %3390 = vmatpush.bf16.msrb.mxu0 %v7505_v47  ;;  %v8053_v26 = vld [vmem:[#allocation198_spill] sm:$0xff]  ;;  %v8054_v47 = vld [vmem:[#allocation199_spill] sm:$0xff] }
 0x774   :  { %3352 = vmatpush.bf16.msra.mxu1 %v7506_v36  ;;  %3365 = vmatpush.bf16.msra.mxu2 %v7507_v18  ;;  %v8055_v36 = vld [vmem:[#allocation200_spill] sm:$0xff]  ;;  %v8056_v18 = vld [vmem:[#allocation201_spill] sm:$0xff] }
 0x775   :  { %3378 = vmatpush.bf16.msra.mxu3 %v7508_v46  ;;  %3391 = vmatpush.bf16.msrb.mxu0 %v7509_v0  ;;  %v8057_v46 = vld [vmem:[#allocation202_spill] sm:$0xff]  ;;  %v8058_v0 = vld [vmem:[#allocation203_spill] sm:$0xff] }
 0x778   :  { %3353 = vmatpush.bf16.msra.mxu1 %v7510_v31  ;;  %3366 = vmatpush.bf16.msra.mxu2 %v7511_v62  ;;  %v8059_v31 = vld [vmem:[#allocation204_spill] sm:$0xff]  ;;  %v8060_v62 = vld [vmem:[#allocation205_spill] sm:$0xff] }
 0x779   :  { %3379 = vmatpush.bf16.msra.mxu3 %v8031_v48  ;;  %3392 = vmatpush.bf16.msrb.mxu0 %v8032_v20  ;;  %v3500_v48 = vld [vmem:[%s6889_s7 + $0xd0] sm:$0xff] }
 0x77b   :  { %3354 = vmatmul.bf16.vlgmr.msra.gmra.mxu1 %v6585_v1  ;;  %3367 = vmatmul.bf16.vlgmr.msra.gmra.mxu2 %v6587_v6 }
 0x77c   :  { %3402 = vmatpush.bf16.msrb.mxu1 %v8033_v32  ;;  %3415 = vmatpush.bf16.msrb.mxu2 %v8034_v25  ;;  %v3483_v32 = vld [vmem:[%s6889_s7 + $0x48] sm:$0xff] }
 0x77d   :  { %3428 = vmatpush.bf16.msrb.mxu3 %v8035_v28  ;;  %3441 = vmatpush.bf16.msra.mxu0 %v8036_v56  ;;  %v3499_v25 = vld [vmem:[%s6889_s7 + $0xc8] sm:$0xff]  ;;  %v3482_v56 = vld [vmem:[%s6889_s7 + $0x40] sm:$0xff] }
 0x77e   :  { %3380 = vmatmul.bf16.vlgmr.msra.gmra.mxu3 %v6585_v1  ;;  %3393 = vmatmul.bf16.vlgmr.msrb.gmra.mxu0 %v6587_v6 }
 0x780   :  { %3403 = vmatpush.bf16.msrb.mxu1 %v8037_v17  ;;  %3416 = vmatpush.bf16.msrb.mxu2 %v8038_v19  ;;  %v3498_v17 = vld [vmem:[%s6889_s7 + $0xc0] sm:$0xff] }
 0x781   :  { %3429 = vmatpush.bf16.msrb.mxu3 %v8039_v53  ;;  %3442 = vmatpush.bf16.msra.mxu0 %v8040_v10  ;;  %v3481_v10 = vld [vmem:[%s6889_s7 + $0x38] sm:$0xff] }
 0x784   :  { %3404 = vmatpush.bf16.msrb.mxu1 %v8041_v3  ;;  %3417 = vmatpush.bf16.msrb.mxu2 %v8042_v13  ;;  %v3497_v3 = vld [vmem:[%s6889_s7 + $0xb8] sm:$0xff] }
 0x785   :  { %3430 = vmatpush.bf16.msrb.mxu3 %v8043_v23  ;;  %3443 = vmatpush.bf16.msra.mxu0 %v8044_v34 }
 0x788   :  { %3405 = vmatpush.bf16.msrb.mxu1 %v8045_v45  ;;  %3418 = vmatpush.bf16.msrb.mxu2 %v8046_v63  ;;  %v3480_v45 = vld [vmem:[%s6889_s7 + $0x30] sm:$0xff] }
 0x789   :  { %3431 = vmatpush.bf16.msrb.mxu3 %v8047_v51  ;;  %3444 = vmatpush.bf16.msra.mxu0 %v8048_v33  ;;  %v3496_v63 = vld [vmem:[%s6889_s7 + $0xb0] sm:$0xff] }
 0x78c   :  { %3406 = vmatpush.bf16.msrb.mxu1 %v8049_v59  ;;  %3419 = vmatpush.bf16.msrb.mxu2 %v8050_v61  ;;  %v3479_v59 = vld [vmem:[%s6889_s7 + $0x28] sm:$0xff] }
 0x78d   :  { %3432 = vmatpush.bf16.msrb.mxu3 %v8051_v21  ;;  %3445 = vmatpush.bf16.msra.mxu0 %v8052_v11  ;;  %v3495_v61 = vld [vmem:[%s6889_s7 + $0xa8] sm:$0xff]  ;;  %v8065_v21 = vld [vmem:[#allocation46_spill] sm:$0xff] }
 0x790   :  { %3407 = vmatpush.bf16.msrb.mxu1 %v8053_v26  ;;  %3420 = vmatpush.bf16.msrb.mxu2 %v8054_v47  ;;  %v8066_v26 = vld [vmem:[#allocation45_spill] sm:$0xff] }
 0x791   :  { %3433 = vmatpush.bf16.msrb.mxu3 %v8055_v36  ;;  %3446 = vmatpush.bf16.msra.mxu0 %v8056_v18  ;;  %v3478_v18 = vld [vmem:[%s6889_s7 + $0x20] sm:$0xff] }
 0x794   :  { %3408 = vmatpush.bf16.msrb.mxu1 %v8057_v46  ;;  %3421 = vmatpush.bf16.msrb.mxu2 %v8058_v0  ;;  %v3494_v46 = vld [vmem:[%s6889_s7 + $0xa0] sm:$0xff] }
 0x795   :  { %3434 = vmatpush.bf16.msrb.mxu3 %v8059_v31  ;;  %3447 = vmatpush.bf16.msra.mxu0 %v8060_v62  ;;  %v8067_v0 = vld [vmem:[#allocation47_spill] sm:$0xff] }
 0x798   :  { %3409 = vmatpush.bf16.msrb.mxu1 %v8061_v42  ;;  %3422 = vmatpush.bf16.msrb.mxu2 %v8062_v15  ;;  %v8068_v42 = vld [vmem:[#allocation48_spill] sm:$0xff] }
 0x799   :  { %3435 = vmatpush.bf16.msrb.mxu3 %v8063_v41  ;;  %3448 = vmatpush.bf16.msra.mxu0 %v8064_v8  ;;  %v3477_v41 = vld [vmem:[%s6889_s7 + $0x18] sm:$0xff] }
 0x79a   :  { %v3493_v8 = vld [vmem:[%s6889_s7 + $0x98] sm:$0xff] }
 0x79b   :  { %3410 = vmatmul.bf16.vlgmr.msrb.gmra.mxu1 %v6585_v1  ;;  %3423 = vmatmul.bf16.vlgmr.msrb.gmra.mxu2 %v6587_v6 }
 0x79c   :  { %3436 = vmatmul.bf16.vlgmr.msrb.gmra.mxu3 %v6585_v1  ;;  %3449 = vmatmul.bf16.vlgmr.msra.gmra.mxu0 %v6587_v6  ;;  %v3484_v6 = vld [vmem:[%s6889_s7 + $0x50] sm:$0xff] }
 0x79d   :  { %3536 = vmatpush.msra.mxu2 %v3489_v55  ;;  %3556 = vmatpush.msra.mxu3 %v3505_v24  ;;  %v3474_v55 = vld [vmem:[%s6889_s7] sm:$0xff] }
 0x79e   :  { %v3490_v24 = vld [vmem:[%s6889_s7 + $0x80] sm:$0xff] }
 0x79f   :  { %3537 = vmatpush.msra.mxu2 %v3488_v54  ;;  %3557 = vmatpush.msra.mxu3 %v3504_v12  ;;  %v3507_v54 = vld [vmem:[%s6890_s8 + $0x8] sm:$0xff] }
 0x7a0   :  { %v8069_v12 = vld [vmem:[#allocation77_spill] sm:$0xff] }
 0x7a1   :  { %3538 = vmatpush.msra.mxu2 %v3487_v52  ;;  %3558 = vmatpush.msra.mxu3 %v3503_v27  ;;  %v8070_v27 = vld [vmem:[#allocation78_spill] sm:$0xff] }
 0x7a3   :  { %3539 = vmatpush.msra.mxu2 %v3486_v57  ;;  %3559 = vmatpush.msra.mxu3 %v3502_v50 }
 0x7a5   :  { %3540 = vmatpush.msra.mxu2 %v3485_v39  ;;  %3560 = vmatpush.msra.mxu3 %v3501_v30 }
 0x7a7   :  { %3541 = vmatpush.msra.mxu2 %v3484_v6  ;;  %3561 = vmatpush.msra.mxu3 %v3500_v48  ;;  %v8071_v48 = vld [vmem:[#allocation81_spill] sm:$0xff] }
 0x7a9   :  { %3542 = vmatpush.msra.mxu2 %v3483_v32  ;;  %3562 = vmatpush.msra.mxu3 %v3499_v25 }
 0x7ab   :  { %3543 = vmatpush.msra.mxu2 %v3482_v56  ;;  %3563 = vmatpush.msra.mxu3 %v3498_v17 }
 0x7ad   :  { %3544 = vmatpush.msra.mxu2 %v3481_v10  ;;  %3564 = vmatpush.msra.mxu3 %v3497_v3 }
 0x7af   :  { %3545 = vmatpush.msra.mxu2 %v3480_v45  ;;  %3565 = vmatpush.msra.mxu3 %v3496_v63 }
 0x7b1   :  { %3546 = vmatpush.msra.mxu2 %v3479_v59  ;;  %3566 = vmatpush.msra.mxu3 %v3495_v61 }
 0x7b3   :  { %3547 = vmatpush.msra.mxu2 %v3478_v18  ;;  %3567 = vmatpush.msra.mxu3 %v3494_v46 }
 0x7b5   :  { %3548 = vmatpush.msra.mxu2 %v3477_v41  ;;  %3568 = vmatpush.msra.mxu3 %v3493_v8 }
 0x7d7   :  { %v3231_v58 = vpop.f32.mrf.mxu1 }
 0x7d8   :  { %v3270_v2 = vpop.f32.mrf.mxu0 }
 0x7dd   :  { %v3257_v60 = vpop.f32.mrf.mxu3 }
 0x7de   :  { %v3244_v5 = vpop.f32.mrf.mxu2  ;;  %v3271_v13 = vadd.f32 %v3270_v2, %v3257_v60  ;;  %v3511_v60 = vld [vmem:[%s6890_s8 + $0x28] sm:$0xff] }
 0x7df   :  { %v3233_v38 = vpop.f32.mrf.mxu1  ;;  %v3245_v34 = vadd.f32 %v3244_v5, %v3231_v58  ;;  %v3476_v5 = vld [vmem:[%s6889_s7 + $0x10] sm:$0xff]  ;;  %3526 = vmatpush.msra.mxu1 %v3511_v60 }
 0x7e0   :  { %v3272_v44 = vpop.f32.mrf.mxu0  ;;  %v3275_v11 = vadd.f32 %v3271_v13, %v8065_v21  ;;  %v3492_v38 = vld [vmem:[%s6889_s7 + $0x90] sm:$0xff]  ;;  %3549 = vmatpush.msra.mxu2 %v3476_v5 }
 0x7e1   :  { %v3274_v47 = vadd.f32 %v3245_v34, %v8066_v26  ;;  %3569 = vmatpush.msra.mxu3 %v3492_v38 }
 0x7e2   :  { %v3277_v58 = vmul.f32 0.5, %v3275_v11  ;;  %v8073_v11 = vld [vmem:[#allocation80_spill] sm:$0xff] }
 0x7e3   :  { %v3276_v2 = vmul.f32 0.5, %v3274_v47 }
 0x7e4   :  { %4655 = vtanh.f32 %v3277_v58 }
 0x7e5   :  { %v3259_v43 = vpop.f32.mrf.mxu3  ;;  %4657 = vtanh.f32 %v3276_v2 }
 0x7e6   :  { %v3246_v37 = vpop.f32.mrf.mxu2 }
 0x7e7   :  { %v3293_v29 = vpop.f32.mrf.mxu1  ;;  %v3510_v37 = vld [vmem:[%s6890_s8 + $0x20] sm:$0xff] }
 0x7e8   :  { %v3332_v49 = vpop.f32.mrf.mxu0  ;;  %3527 = vmatpush.msra.mxu1 %v3510_v37 }
 0x7ea   :  { %v4656_v57 = vpop.eup %4655 }
 0x7eb   :  { %v4658_v50 = vpop.eup %4657  ;;  %v3281_v25 = vmul.f32 0.5, %v4656_v57 }
 0x7ed   :  { %v3319_v22 = vpop.f32.mrf.mxu3 }
 0x7ee   :  { %v3306_v35 = vpop.f32.mrf.mxu2  ;;  %v3333_v33 = vadd.f32 %v3332_v49, %v3319_v22  ;;  %v3491_v49 = vld [vmem:[%s6889_s7 + $0x88] sm:$0xff] }
 0x7ef   :  { %v3295_v40 = vpop.f32.mrf.mxu1  ;;  %v3307_v51 = vadd.f32 %v3306_v35, %v3293_v29  ;;  %v3475_v29 = vld [vmem:[%s6889_s7 + $0x8] sm:$0xff]  ;;  %3570 = vmatpush.msra.mxu3 %v3491_v49 }
 0x7f0   :  { %v3334_v14 = vpop.f32.mrf.mxu0  ;;  %v3337_v15 = vadd.f32 %v3333_v33, %v8068_v42  ;;  %3550 = vmatpush.msra.mxu2 %v3475_v29  ;;  %v3509_v40 = vld [vmem:[%s6890_s8 + $0x18] sm:$0xff]  ;;  %v4510_v29 = vld [vmem:[%s6891_s9] ss:$0 sm:$0xff] }
 0x7f1   :  { %v3336_v31 = vadd.f32 %v3307_v51, %v8067_v0  ;;  %v3508_v14 = vld [vmem:[%s6890_s8 + $0x10] sm:$0xff]  ;;  %3528 = vmatpush.msra.mxu1 %v3509_v40  ;;  %3571 = vmatpush.msra.mxu3 %v3490_v24  ;;  %v8072_v33 = vld [vmem:[#allocation79_spill] sm:$0xff] }
 0x7f2   :  { %v3339_v43 = vmul.f32 0.5, %v3337_v15  ;;  %3551 = vmatpush.msra.mxu2 %v3474_v55  ;;  %v3636_v55 = vld [vmem:[%s6894_s12 + $0x78] sm:$0xf]  ;;  %v3635_v24 = vld [vmem:[%s6894_s12 + $0x70] sm:$0xff] }
 0x7f3   :  { %v3338_v44 = vmul.f32 0.5, %v3336_v31  ;;  %3529 = vmatpush.msra.mxu1 %v3508_v14  ;;  %v4765_v14 = vmov 124.0  }
 0x7f5   :  { %v3321_v9 = vpop.f32.mrf.mxu3  ;;  %4659 = vtanh.f32 %v3338_v44  ;;  %3530 = vmatpush.msra.mxu1 %v3507_v54 }
 0x7f6   :  { %v3308_v16 = vpop.f32.mrf.mxu2  ;;  %4661 = vtanh.f32 %v3339_v43 }
 0x7f7   :  { %v3506_v16 = vld [vmem:[%s6890_s8] sm:$0xff] }
 0x7f8   :  { %v6699_v1 = vpop.f32.mrf.mxu1  ;;  %3531 = vmatpush.msra.mxu1 %v3506_v16 }
 0x7f9   :  { %4349 = vmatmul.msk.f32.vlgmr.msra.gmra.mxu1 %vm3512_vm3, %v8071_v48  ;;  %v3633_v48 = vld [vmem:[%s6894_s12 + $0x60] sm:$0xff] }
 0x7fa   :  { %4350 = vmatpush.msk.msrb.mxu1 %vm560_vm1, %v3636_v55 }
 0x7fb   :  { %v6707_v20 = vpop.f32.mrf.mxu0  ;;  %v4660_v39 = vpop.eup %4659 }
 0x7fc   :  { %v3342_v32 = vmul.f32 0.5, %v4660_v39  ;;  %3648 = vmatpush.msrb.mxu1 %v3635_v24 }
 0x7fe   :  { %v3368_v28 = vpop.f32.mrf.mxu2  ;;  %v3344_v10 = vadd.f32 0.5, %v3342_v32  ;;  %v3631_v32 = vld [vmem:[%s6894_s12 + $0x50] sm:$0xff] }
 0x7ff   :  { %v3369_v22 = vadd.f32 %v3368_v28, %v6699_v1  ;;  %v4662_v1 = vpop.eup %4661 }
 0x800   :  { %v3357_v53 = vpop.f32.mrf.mxu1  ;;  %v3343_v28 = vmul.f32 0.5, %v4662_v1  ;;  %v3464_v47 = vmul.f32 %v3344_v10, %v6579_v4  ;;  %v3624_v10 = vld [vmem:[%s6894_s12 + $0x18] sm:$0xff] }
 0x801   :  { %v3381_v19 = vpop.f32.mrf.mxu3  ;;  %v3398_v52 = vadd.f32 %v3369_v22, %v8069_v12 }
 0x802   :  { %v3395_v35 = vadd.f32 %v6707_v20, %v3381_v19  ;;  %v3280_v20 = vmul.f32 0.5, %v4658_v50  ;;  %v3345_v34 = vadd.f32 0.5, %v3343_v28  ;;  %v3629_v28 = vld [vmem:[%s6894_s12 + $0x40] sm:$0xff] }
 0x803   :  { %v3396_v23 = vpop.f32.mrf.mxu0  ;;  %4663 = vtanh.f32 %v3398_v52 }
 0x804   :  { %v3399_v9 = vadd.f32 %v3395_v35, %v8070_v27  ;;  %v3282_v53 = vadd.f32 0.5, %v3280_v20  ;;  %v3283_v23 = vadd.f32 0.5, %v3281_v25  ;;  %v3465_v18 = vmul.f32 %v3345_v34, %v6581_v7  ;;  %v3632_v20 = vld [vmem:[%s6894_s12 + $0x58] sm:$0xff]  ;;  %v3630_v25 = vld [vmem:[%s6894_s12 + $0x48] sm:$0xff]  ;;  %v3672_v34 = vld [vmem:[%s6896_s14 + $0x20] sm:$0xff] }
 0x805   :  { %3692 = vmatpush.msrb.mxu2 %v3672_v34 }
 0x806   :  { %v3370_v36 = vpop.f32.mrf.mxu2  ;;  %4665 = vtanh.f32 %v3399_v9 }
 0x809   :  { %v3383_v62 = vpop.f32.mrf.mxu3  ;;  %v4664_v56 = vpop.eup %4663 }
 0x80a   :  { %v3466_v51 = vmul.f32 %v4664_v56, %v3282_v53  ;;  %v3628_v56 = vld [vmem:[%s6894_s12 + $0x38] sm:$0xff]  ;;  %v3625_v53 = vld [vmem:[%s6894_s12 + $0x20] sm:$0xff] }
 0x80c   :  { %v4666_v19 = vpop.eup %4665  ;;  %v3468_v0 = vadd.f32 %v3466_v51, %v3464_v47 }
 0x80d   :  { %v3467_v21 = vmul.f32 %v4666_v19, %v3283_v23  ;;  %v3626_v19 = vld [vmem:[%s6894_s12 + $0x28] sm:$0xff]  ;;  %v3621_v23 = vld [vmem:[%s6894_s12] sm:$0xff] }
 0x80f   :  { %v3469_v31 = vadd.f32 %v3467_v21, %v3465_v18 }
 0x818   :  { %v3411_v30 = vpop.f32.mrf.mxu1 }
 0x819   :  { %v3450_v6 = vpop.f32.mrf.mxu0 }
 0x81e   :  { %v3424_v17 = vpop.f32.mrf.mxu2 }
 0x81f   :  { %v3425_v3 = vadd.f32 %v3424_v17, %v3411_v30  ;;  %v3437_v13 = vpop.f32.mrf.mxu3  ;;  %v3627_v17 = vld [vmem:[%s6894_s12 + $0x30] sm:$0xff] }
 0x820   :  { %v3451_v45 = vadd.f32 %v3450_v6, %v3437_v13  ;;  %v3413_v63 = vpop.f32.mrf.mxu1  ;;  %v3634_v6 = vld [vmem:[%s6894_s12 + $0x68] sm:$0xff] }
 0x821   :  { %v3454_v59 = vadd.f32 %v3425_v3, %v8072_v33  ;;  %v3452_v61 = vpop.f32.mrf.mxu0  ;;  %3649 = vmatpush.msrb.mxu1 %v3634_v6  ;;  %v3623_v3 = vld [vmem:[%s6894_s12 + $0x10] sm:$0xff]  ;;  %v3622_v13 = vld [vmem:[%s6894_s12 + $0x8] sm:$0xff] }
 0x822   :  { %v3455_v26 = vadd.f32 %v3451_v45, %v8073_v11  ;;  %v3671_v45 = vld [vmem:[%s6896_s14 + $0x18] sm:$0xff] }
 0x823   :  { %v3456_v36 = vmul.f32 0.5, %v3454_v59  ;;  %3650 = vmatpush.msrb.mxu1 %v3633_v48  ;;  %3693 = vmatpush.msrb.mxu2 %v3671_v45 }
 0x824   :  { %v3457_v46 = vmul.f32 0.5, %v3455_v26 }
 0x825   :  { %4667 = vtanh.f32 %v3456_v36  ;;  %3651 = vmatpush.msrb.mxu1 %v3632_v20  ;;  %v4511_v36 = vld [vmem:[%s6892_s10] ss:$0 sm:$0xff] }
 0x826   :  { %4669 = vtanh.f32 %v3457_v46  ;;  %v3426_v62 = vpop.f32.mrf.mxu2  ;;  %v4512_v46 = vld [vmem:[%s6893_s11] ss:$0 sm:$0xff] }
 0x827   :  { %v3439_v42 = vpop.f32.mrf.mxu3  ;;  %4671 = vtanh.f32 %v3468_v0  ;;  %3652 = vmatpush.msrb.mxu1 %v3631_v32 }
 0x828   :  { %4673 = vtanh.f32 %v3469_v31  ;;  %v3670_v42 = vld [vmem:[%s6896_s14 + $0x10] sm:$0xff] }
 0x829   :  { %4675 = vrcp.f32 %v4765_v14  ;;  %3653 = vmatpush.msrb.mxu1 %v3630_v25  ;;  %3694 = vmatpush.msrb.mxu2 %v3670_v42 }
 0x82b   :  { %v4668_v15 = vpop.eup %4667  ;;  %3654 = vmatpush.msrb.mxu1 %v3629_v28 }
 0x82c   :  { %v4670_v41 = vpop.eup %4669  ;;  %v3460_v8 = vmul.f32 0.5, %v4668_v15  ;;  %v3669_v15 = vld [vmem:[%s6896_s14 + $0x8] sm:$0xff] }
 0x82d   :  { %v3461_v58 = vmul.f32 0.5, %v4670_v41  ;;  %v4672_v60 = vpop.eup %4671  ;;  %3655 = vmatpush.msrb.mxu1 %v3628_v56  ;;  %3695 = vmatpush.msrb.mxu2 %v3669_v15  ;;  %v3668_v41 = vld [vmem:[%s6896_s14] sm:$0xff] }
 0x82e   :  { %v3462_v2 = vadd.f32 0.5, %v3460_v8  ;;  %v4674_v4 = vpop.eup %4673  ;;  %v4513_v8 = vld [vmem:[%s6895_s13] ss:$0 sm:$0xff] }
 0x82f   :  { %v3463_v5 = vadd.f32 0.5, %v3461_v58  ;;  %v4676_v54 = vpop.eup %4675  ;;  %3656 = vmatpush.msrb.mxu1 %v3627_v17  ;;  %3696 = vmatpush.msrb.mxu2 %v3668_v41 }
 0x830   :  { %v3472_v38 = vmul.f32 %v4672_v60, %v3462_v2  ;;  %v3586_v12 = vmul.f32 124.0, %v4676_v54  ;;  %vm3590_vm5 = vweird.f32 %v4676_v54 }
 0x831   :  { %v3473_v44 = vmul.f32 %v4674_v4, %v3463_v5  ;;  %3657 = vmatpush.msrb.mxu1 %v3626_v19  ;;  %v4514_v5 = vld [vmem:[#allocation5] ss:$0 sm:$0xff] }
 0x832   :  { %3552 = vmatmul.f32.vlgmr.msra.gmra.mxu2 %v3472_v38  ;;  %v3587_v52 = vsub.f32 1.0, %v3586_v12 }
 0x833   :  { %3572 = vmatmul.f32.vlgmr.msra.gmra.mxu3 %v3473_v44  ;;  %3658 = vmatpush.msrb.mxu1 %v3625_v53 }
 0x834   :  { %v3588_v27 = vmul.f32 %v4676_v54, %v3587_v52 }
 0x835   :  { %3659 = vmatpush.msrb.mxu1 %v3624_v10 }
 0x836   :  { %v3589_v9 = vadd.f32 %v4676_v54, %v3588_v27 }
 0x837   :  { %3660 = vmatpush.msrb.mxu1 %v3623_v3 }
 0x838   :  { %v3591_v16 = vsel %vm3590_vm5, %v4676_v54, %v3589_v9 }
 0x839   :  { %3661 = vmatpush.msrb.mxu1 %v3622_v13 }
 0x83b   :  { %3662 = vmatpush.msrb.mxu1 %v3621_v23 }
 0x876   :  { %v3533_v7 = vpop.f32.mrf.mxu1 }
 0x8b5   :  { %v3553_v43 = vpop.f32.mrf.mxu2 }
 0x8b6   :  { %v3554_v37 = vadd.f32 %v3553_v43, %v3533_v7  ;;  %v3573_v49 = vpop.f32.mrf.mxu3 }
 0x8b8   :  { %v3574_v22 = vadd.f32 %v3573_v49, %v3554_v37 }
 0x8ba   :  { %v3580_v35 = vadd.f32 %v4510_v29, %v3574_v22 }
 0x8bc   :  { %v3582_v40 = vsel %vm3581_vm4, %v3580_v35, 0.0 }
 0x8bd   :  { %3583 = vadd.xlane.f32.xlu0 %v3582_v40 }
 0x930   :  { %v3584_v57 = vpop.xlane.xlu0 %3583 }
 0x931   :  { %v3592_v50 = vmul.f32 %v3591_v16, %v3584_v57 }
 0x933   :  { %v3593_v39 = vsub.f32 %v3580_v35, %v3592_v50 }
 0x935   :  { %v3594_v30 = vmul.f32 %v3593_v39, %v3593_v39 }
 0x937   :  { %v3595_v1 = vsel %vm3581_vm4, %v3594_v30, 0.0 }
 0x938   :  { %3596 = vadd.xlane.f32.xlu0 %v3595_v1 }
 0x9ab   :  { %v3597_v63 = vpop.xlane.xlu0 %3596 }
 0x9ac   :  { %v3598_v51 = vmul.f32 %v3597_v63, %v3591_v16 }
 0x9ae   :  { %v3599_v33 = vadd.f32 1e-05, %v3598_v51 }
 0x9b0   :  { %4677 = vrsqrt.f32 %v3599_v33  ;;  %vm3606_vm7 = vweird.f32 %v3599_v33 }
 0x9b6   :  { %v4678_v59 = vpop.eup %4677 }
 0x9b7   :  { %v3601_v61 = vmul.f32 %v4678_v59, %v3599_v33  ;;  %vm3607_vm6 = vweird.f32 %v4678_v59 }
 0x9b8   :  { %vm3608_vm8 = vmor %vm3606_vm7, %vm3607_vm6 }
 0x9b9   :  { %v3602_v21 = vmul.f32 %v4678_v59, %v3601_v61 }
 0x9bb   :  { %v3603_v11 = vmul.f32 0.5, %v3602_v21 }
 0x9bd   :  { %v3604_v26 = vsub.f32 1.5, %v3603_v11 }
 0x9bf   :  { %v3605_v47 = vmul.f32 %v4678_v59, %v3604_v26 }
 0x9c1   :  { %v3609_v18 = vsel %vm3608_vm8, %v4678_v59, %v3605_v47 }
 0x9c2   :  { %v3610_v0 = vmul.f32 %v3609_v18, %v3593_v39 }
 0x9c4   :  { %v3615_v31 = vmul.f32 %v4511_v36, %v3610_v0 }
 0x9c6   :  { %v3620_v62 = vadd.f32 %v4512_v46, %v3615_v31 }
 0x9c8   :  { %4351 = vmatmul.msk.f32.vlgmr.msrb.gmra.mxu1 %vm3581_vm4, %v3620_v62 }
 0xa45   :  { %v3664_v58 = vpop.f32.mrf.mxu1 }
 0xa46   :  { %v3665_v2 = vadd.f32 %v4513_v8, %v3664_v58 }
 0xa48   :  { %v3667_v60 = vmax.f32 %v3665_v2, 0.0 }
 0xa4a   :  { %4352 = vmatmul.msk.f32.vlgmr.msrb.gmra.mxu2 %vm3677_vm9, %v3667_v60 }
 0xacd   :  { %v3698_v4 = vpop.f32.mrf.mxu2 }
 0xace   :  { %v3699_v38 = vadd.f32 %v4514_v5, %v3698_v4 }
 0xad0   :  { %4679 = vtanh.f32 %v3699_v38 }
 0xad6   :  { %v4680_v44 = vpop.eup %4679 }
 0xad7   :  { %3703 = vst.msk [vmem:[%s6898_s16] sm:$0xff] %vm3702_vm10, %v4680_v44 }
 0xad8   :  { %3708 = vsyncpa [#allocation7], 1 }
 0xad9   :  { %3709 = vsyncpa [#allocation9], 1 }
 0xada   :  { %3710 = vsyncmov [#allocation4] }
 0xadd   :  { %s3711_s14 = vpop.sfrf %3710 }
 0xade   :  { %p4353_p0 = scmp.ne.s32.totalorder %s3711_s14, 0 }
 0xae0   :  { %3715 = shalt.err (%p4353_p0)  }

</bundles_post_ra>
